<compile_context>
chip_gen: v7x
topology: tpu7x:2x2x1
jax: 0.10.0
libtpu: 0.0.40
codegen_flags: <defaults>
</compile_context>

<pallas_src>
import functools

import jax
import jax.numpy as jnp
import numpy as np
from jax.experimental import pallas as pl
from jax.experimental.pallas import tpu as pltpu

RELU_COEF = 0.05
LANE = 128
TM_PREF = 512                      # dst-row tile (sublane axis of the aggregation)
TK_PREF = 2048                     # src / reduction tile
TN_PREF = 512                      # node-row tile for projection / gate kernels
RESIDENT_XS_BYTES = 4 * 1024 * 1024  # keep xs fully resident in VMEM below this size
VMEM_LIMIT = 32 * 1024 * 1024


def _leaky(v):
    return jnp.where(v >= 0, v, RELU_COEF * v)


def _round_up(x, m=LANE):
    return ((x + m - 1) // m) * m


def _pad_to(a, shape):
    return jnp.pad(a, [(0, s - d) for d, s in zip(a.shape, shape)])


def _pick_tile(n, pref, align=LANE):
    """Largest tile <= pref that divides n and is `align`-aligned (else the full n)."""
    if n <= pref:
        return n
    t = (pref // align) * align
    while t >= align:
        if n % t == 0:
            return t
        t -= align
    return n


def _full_spec(arr, grid_rank):
    """Whole-array block, constant index map (fetched once, stays VMEM-resident)."""
    zeros = (0,) * arr.ndim
    if grid_rank == 1:
        return pl.BlockSpec(arr.shape, lambda i: zeros)
    return pl.BlockSpec(arr.shape, lambda i, k: zeros)


# ---------------------------------------------------------------------------
# Kernel A: layer-1 per-node projections.
#   xs1 = x0 @ W_rel1         (bf16: streamed operand of the big matmul)
#   xd1 = x0 @ W_root1 + b1   (bf16: dst-side term, seeds the accumulator)
# ---------------------------------------------------------------------------
def _proj1_kernel(x_ref, wr_ref, wo_ref, b_ref, xs_ref, xd_ref):
    x = x_ref[...]
    xs_ref[...] = jnp.dot(x, wr_ref[...],
                          preferred_element_type=jnp.float32).astype(xs_ref.dtype)
    xd_ref[...] = (jnp.dot(x, wo_ref[...], preferred_element_type=jnp.float32)
                   + b_ref[...]).astype(xd_ref.dtype)


def _node_project(x, w_rel, w_root, b, tn):
    n = x.shape[0]
    h = w_rel.shape[1]
    return pl.pallas_call(
        _proj1_kernel,
        out_shape=(jax.ShapeDtypeStruct((n, h), jnp.bfloat16),
                   jax.ShapeDtypeStruct((n, h), jnp.bfloat16)),
        grid=(n // tn,),
        in_specs=[pl.BlockSpec((tn, x.shape[1]), lambda i: (i, 0)),
                  _full_spec(w_rel, 1), _full_spec(w_root, 1), _full_spec(b, 1)],
        out_specs=(pl.BlockSpec((tn, h), lambda i: (i, 0)),
                   pl.BlockSpec((tn, h), lambda i: (i, 0))),
        compiler_params=pltpu.CompilerParams(
            dimension_semantics=("parallel",),
            vmem_limit_bytes=VMEM_LIMIT),
    )(x, w_rel, w_root, b)


# ---------------------------------------------------------------------------
# Shared aggregation step: acc (+)= A_tile(bf16) @ xs, acc seeded with xd at k==0.
#   A tile is int8 in HBM/VMEM, upcast to bf16 for the MXU.
#   xs is either fully resident (sliced by k inside the kernel) or streamed per k.
# ---------------------------------------------------------------------------
def _accumulate_step(a_ref, xs_ref, xd_ref, acc_ref, xs_resident):
    k = pl.program_id(1)

    @pl.when(k == 0)
    def _():
        acc_ref[...] = xd_ref[...].astype(jnp.float32)

    tk = a_ref.shape[1]
    if xs_resident:
        start = k * tk
        if tk % LANE == 0:
            start = pl.multiple_of(start, LANE)
        xs = xs_ref[pl.ds(start, tk), :]
    else:
        xs = xs_ref[...]
    acc_ref[...] += jnp.dot(a_ref[...].astype(jnp.bfloat16), xs,
                            preferred_element_type=jnp.float32)


# ---------------------------------------------------------------------------
# Kernel B: layer-1 aggregation fused with the layer-2 node projections.
#   h1  = leaky(A @ xs1 + xd1)          (stays in VMEM only)
#   xs2 = h1 @ W_rel2                    (bf16 out)
#   xd2 = h1 @ W_root2 + b2              (bf16 out)
# grid = (dst-row tiles ["parallel"], src tiles [reduction, "arbitrary", last])
# ---------------------------------------------------------------------------
def _agg1_proj2_kernel(a_ref, xs_ref, xd_ref, wr2_ref, wo2_ref, b2_ref,
                       xs2_ref, xd2_ref, acc_ref, *, xs_resident):
    _accumulate_step(a_ref, xs_ref, xd_ref, acc_ref, xs_resident)

    @pl.when(pl.program_id(1) == pl.num_programs(1) - 1)
    def _():
        h1 = _leaky(acc_ref[...]).astype(jnp.bfloat16)
        xs2_ref[...] = jnp.dot(h1, wr2_ref[...],
                               preferred_element_type=jnp.float32).astype(xs2_ref.dtype)
        xd2_ref[...] = (jnp.dot(h1, wo2_ref[...], preferred_element_type=jnp.float32)
                        + b2_ref[...]).astype(xd2_ref.dtype)


def _agg_conv_proj(adj, xs, xd, w_rel2, w_root2, b2, tm, tk, xs_resident):
    n = adj.shape[0]
    h = xs.shape[1]
    xs_spec = (pl.BlockSpec((n, h), lambda i, k: (0, 0)) if xs_resident
               else pl.BlockSpec((tk, h), lambda i, k: (k, 0)))
    return pl.pallas_call(
        functools.partial(_agg1_proj2_kernel, xs_resident=xs_resident),
        out_shape=(jax.ShapeDtypeStruct((n, h), jnp.bfloat16),
                   jax.ShapeDtypeStruct((n, h), jnp.bfloat16)),
        grid=(n // tm, n // tk),
        in_specs=[pl.BlockSpec((tm, tk), lambda i, k: (i, k)),
                  xs_spec,
                  pl.BlockSpec((tm, h), lambda i, k: (i, 0)),
                  _full_spec(w_rel2, 2), _full_spec(w_root2, 2), _full_spec(b2, 2)],
        out_specs=(pl.BlockSpec((tm, h), lambda i, k: (i, 0)),
                   pl.BlockSpec((tm, h), lambda i, k: (i, 0))),
        scratch_shapes=[pltpu.VMEM((tm, h), jnp.float32)],
        compiler_params=pltpu.CompilerParams(
            dimension_semantics=("parallel", "arbitrary"),
            vmem_limit_bytes=VMEM_LIMIT),
    )(adj, xs, xd, w_rel2, w_root2, b2)


# ---------------------------------------------------------------------------
# Kernel C: layer-2 aggregation.  h2 = leaky(A @ xs2 + xd2)  (bf16 out)
# ---------------------------------------------------------------------------
def _agg_conv_kernel(a_ref, xs_ref, xd_ref, o_ref, acc_ref, *, xs_resident):
    _accumulate_step(a_ref, xs_ref, xd_ref, acc_ref, xs_resident)

    @pl.when(pl.program_id(1) == pl.num_programs(1) - 1)
    def _():
        o_ref[...] = _leaky(acc_ref[...]).astype(o_ref.dtype)


def _agg_conv(adj, xs, xd, tm, tk, xs_resident):
    n = adj.shape[0]
    h = xs.shape[1]
    xs_spec = (pl.BlockSpec((n, h), lambda i, k: (0, 0)) if xs_resident
               else pl.BlockSpec((tk, h), lambda i, k: (k, 0)))
    return pl.pallas_call(
        functools.partial(_agg_conv_kernel, xs_resident=xs_resident),
        out_shape=jax.ShapeDtypeStruct((n, h), jnp.bfloat16),
        grid=(n // tm, n // tk),
        in_specs=[pl.BlockSpec((tm, tk), lambda i, k: (i, k)),
                  xs_spec,
                  pl.BlockSpec((tm, h), lambda i, k: (i, 0))],
        out_specs=pl.BlockSpec((tm, h), lambda i, k: (i, 0)),
        scratch_shapes=[pltpu.VMEM((tm, h), jnp.float32)],
        compiler_params=pltpu.CompilerParams(
            dimension_semantics=("parallel", "arbitrary"),
            vmem_limit_bytes=VMEM_LIMIT),
    )(adj, xs, xd)


# ---------------------------------------------------------------------------
# Kernel D: fused gate (sig & tanh as one 2*Lp-lane dot) + global_add_pool + MLP
#           + final sigmoid.  Streams node tiles; pooled sum lives in VMEM scratch.
# ---------------------------------------------------------------------------
def _gate_pool_mlp_kernel(h_ref, x0_ref, p_ref,
                          wgh_ref, wgx_ref, bg_ref,
                          wf1_ref, bf1_ref, wf2_ref, bf2_ref,
                          wout_ref, bout_ref,
                          o_ref, pool_ref):
    i = pl.program_id(0)
    dot = functools.partial(jnp.dot, preferred_element_type=jnp.float32)

    @pl.when(i == 0)
    def _():
        pool_ref[...] = jnp.zeros_like(pool_ref)

    g = dot(h_ref[...], wgh_ref[...]) + dot(x0_ref[...], wgx_ref[...]) + bg_ref[...]
    half = g.shape[-1] // 2
    sx = jnp.clip(g[:, :half], -30.0, 30.0)
    tx = jnp.tanh(g[:, half:])
    # 1 / (1 + exp(sx)) * tanh(.)  (matches the PyTorch forward), EUP exp + reciprocal.
    xg = (pl.reciprocal(1.0 + jnp.exp(sx), approx=True) * tx).astype(jnp.bfloat16)
    pool_ref[...] += dot(p_ref[...], xg)

    @pl.when(i == pl.num_programs(0) - 1)
    def _():
        f = _leaky(dot(pool_ref[...], wf1_ref[...]) + bf1_ref[...])
        f = _leaky(dot(f, wf2_ref[...]) + bf2_ref[...])
        logits = dot(f, wout_ref[...]) + bout_ref[...]
        o_ref[...] = 1.0 / (1.0 + jnp.exp(-logits))   # exact sigmoid for the output


def _gate_pool_mlp(h2, x0, pool_mat, pp, num_graphs, outdim, tn):
    n = h2.shape[0]
    lp = pp["wf1"].shape[0]
    weights = [pp["wg_h"], pp["wg_x"], pp["bg"], pp["wf1"], pp["bf1"],
               pp["wf2"], pp["bf2"], pp["wout"], pp["bout"]]
    return pl.pallas_call(
        _gate_pool_mlp_kernel,
        out_shape=jax.ShapeDtypeStruct((num_graphs, outdim), jnp.float32),
        grid=(n // tn,),
        in_specs=[pl.BlockSpec((tn, h2.shape[1]), lambda i: (i, 0)),
                  pl.BlockSpec((tn, x0.shape[1]), lambda i: (i, 0)),
                  pl.BlockSpec((num_graphs, tn), lambda i: (0, i))]
                 + [_full_spec(w, 1) for w in weights],
        out_specs=pl.BlockSpec((num_graphs, outdim), lambda i: (0, 0)),
        scratch_shapes=[pltpu.VMEM((num_graphs, lp), jnp.float32)],
        compiler_params=pltpu.CompilerParams(
            dimension_semantics=("arbitrary",),   # pooled accumulator spans the grid
            vmem_limit_bytes=VMEM_LIMIT),
    )(h2, x0, pool_mat, *weights)


# ---------------------------------------------------------------------------
# Parameter padding / fusion, done ONCE at init (hoisted out of the jitted forward).
# Padding is exact: padded lanes of every intermediate stay 0.
# ---------------------------------------------------------------------------
def prepare_padded_params(p):
    in_dim, hidden = p["wrel1"].shape
    lin_hidden = p["wsig_h"].shape[1]
    f1, f2 = p["wf1"].shape[1], p["wf2"].shape[1]
    outdim = p["wout"].shape[1]
    hp, lp, f1p, f2p = (_round_up(d) for d in (hidden, lin_hidden, f1, f2))

    wg_h = jnp.concatenate([_pad_to(p["wsig_h"], (hp, lp)),
                            _pad_to(p["wtanh_h"], (hp, lp))], axis=1).astype(jnp.bfloat16)
    wg_x = jnp.concatenate([_pad_to(p["wsig_x"], (in_dim, lp)),
                            _pad_to(p["wtanh_x"], (in_dim, lp))], axis=1)
    bg = jnp.concatenate([_pad_to(p["bsig"], (1, lp)),
                          _pad_to(p["btanh"], (1, lp))], axis=1)
    return {
        "wrel1": _pad_to(p["wrel1"], (in_dim, hp)),
        "wroot1": _pad_to(p["wroot1"], (in_dim, hp)),
        "b1": _pad_to(p["brel1"], (1, hp)),
        "wrel2": _pad_to(p["wrel2"], (hp, hp)).astype(jnp.bfloat16),
        "wroot2": _pad_to(p["wroot2"], (hp, hp)).astype(jnp.bfloat16),
        "b2": _pad_to(p["brel2"], (1, hp)),
        "wg_h": wg_h, "wg_x": wg_x, "bg": bg,
        "wf1": _pad_to(p["wf1"], (lp, f1p)),
        "bf1": _pad_to(p["bf1"], (1, f1p)),
        "wf2": _pad_to(p["wf2"], (f1p, f2p)),
        "bf2": _pad_to(p["bf2"], (1, f2p)),
        "wout": _pad_to(p["wout"], (f2p, outdim)),
        "bout": p["bout"],
    }


# ---------------------------------------------------------------------------
# Forward pass (padded params prepared outside; num_graphs static).
# ---------------------------------------------------------------------------
@functools.partial(jax.jit, static_argnums=(4,))
def rg_discriminator(x0, edge_index, batch, pp, num_graphs):
    """x0: (N, in_dim) f32; edge_index: (2, E) int32 [src; dst]; batch: (N,) int32."""
    n = x0.shape[0]
    outdim = pp["wout"].shape[1]
    hp = pp["wrel1"].shape[1]

    # Dense aggregation operator A[dst, src] += 1 per edge (edge_attr=None -> weight 1),
    # stored as int8 (exact while per-pair edge multiplicity <= 127).
    adj = (jnp.zeros((n, n), jnp.float32)
           .at[edge_index[1], edge_index[0]].add(1.0)
           .astype(jnp.int8))
    # Pooling operator P[g, i] = [batch[i] == g], built directly in bf16.
    pool_mat = (batch[None, :] ==
                jnp.arange(num_graphs, dtype=batch.dtype)[:, None]).astype(jnp.bfloat16)

    tm = _pick_tile(n, TM_PREF)
    tk = _pick_tile(n, TK_PREF)
    tn = _pick_tile(n, TN_PREF)
    xs_resident = (n * hp * 2) <= RESIDENT_XS_BYTES   # bf16 xs held fully in VMEM

    # GraphConv 1 (reassociated: A @ (x0 @ W_rel) + x0 @ W_root + b) + LeakyReLU,
    # with the layer-2 projections fused into the aggregation epilogue.
    xs1, xd1 = _node_project(x0, pp["wrel1"], pp["wroot1"], pp["b1"], tn)
    xs2, xd2 = _agg_conv_proj(adj, xs1, xd1, pp["wrel2"], pp["wroot2"], pp["b2"],
                              tm, tk, xs_resident)
    # GraphConv 2 + LeakyReLU
    h2 = _agg_conv(adj, xs2, xd2, tm, tk, xs_resident)
    # gated linear (fused sig/tanh) + global_add_pool + final MLP + sigmoid
    return _gate_pool_mlp(h2, x0, pool_mat, pp, num_graphs, outdim, tn)


# ---------------------------------------------------------------------------
# Pure-JAX reference mirroring the PyTorch forward (f32, unpadded).
# ---------------------------------------------------------------------------
def ref_forward(x0, edge_index, batch, params, num_graphs):
    n = x0.shape[0]
    adj = jnp.zeros((n, n), jnp.float32).at[edge_index[1], edge_index[0]].add(1.0)
    pool_mat = jax.nn.one_hot(batch, num_graphs, dtype=jnp.float32).T

    def leaky(v):
        return jnp.where(v >= 0, v, RELU_COEF * v)

    h = leaky(adj @ x0 @ params["wrel1"] + params["brel1"] + x0 @ params["wroot1"])
    h = leaky(adj @ h @ params["wrel2"] + params["brel2"] + h @ params["wroot2"])
    xc = jnp.concatenate([h, x0], axis=1)
    wsig = jnp.concatenate([params["wsig_h"], params["wsig_x"]], axis=0)
    wtanh = jnp.concatenate([params["wtanh_h"], params["wtanh_x"]], axis=0)
    sx = jnp.clip(xc @ wsig + params["bsig"], -30.0, 30.0)
    xg = (1.0 / (1.0 + jnp.exp(sx))) * jnp.tanh(xc @ wtanh + params["btanh"])
    pooled = pool_mat @ xg
    f = leaky(pooled @ params["wf1"] + params["bf1"])
    f = leaky(f @ params["wf2"] + params["bf2"])
    logits = f @ params["wout"] + params["bout"]
    return 1.0 / (1.0 + jnp.exp(-logits))


def init_params(key, in_dim, hidden, lin_hidden, out_hidden, outdim):
    def lin(key, fan_in, fan_out):
        kw, kb = jax.random.split(key)
        bound = 1.0 / np.sqrt(fan_in)
        w = jax.random.uniform(kw, (fan_in, fan_out), jnp.float32, -bound, bound)
        b = jax.random.uniform(kb, (1, fan_out), jnp.float32, -bound, bound)
        return w, b

    ks = jax.random.split(key, 10)
    wrel1, brel1 = lin(ks[0], in_dim, hidden)
    wroot1, _ = lin(ks[1], in_dim, hidden)       # lin_root has no bias in PyG GraphConv
    wrel2, brel2 = lin(ks[2], hidden, hidden)
    wroot2, _ = lin(ks[3], hidden, hidden)
    cat_dim = hidden + in_dim
    wsig, bsig = lin(ks[4], cat_dim, lin_hidden)
    wtanh, btanh = lin(ks[5], cat_dim, lin_hidden)
    wf1, bf1 = lin(ks[6], lin_hidden, out_hidden[0])
    wf2, bf2 = lin(ks[7], out_hidden[0], out_hidden[1])
    wout, bout = lin(ks[8], out_hidden[1], outdim)
    return {
        "wrel1": wrel1, "brel1": brel1, "wroot1": wroot1,
        "wrel2": wrel2, "brel2": brel2, "wroot2": wroot2,
        # split the concat weights: rows [0:hidden] act on the conv output,
        # rows [hidden:hidden+in_dim] act on x0 (cat([x, x0]) ordering)
        "wsig_h": wsig[:hidden], "wsig_x": wsig[hidden:], "bsig": bsig,
        "wtanh_h": wtanh[:hidden], "wtanh_x": wtanh[hidden:], "btanh": btanh,
        "wf1": wf1, "bf1": bf1, "wf2": wf2, "bf2": bf2,
        "wout": wout, "bout": bout,
    }


if __name__ == "__main__":
    # 2 graphs x 512 nodes -> N = 1024: the aggregation grid has 2 row tiles (even,
    # so v7x's two TCs both get work) and a single 1024-wide reduction step.
    in_dim, hidden, lin_hidden = 4, 32, 32
    out_hidden = [128, 258]
    outdim = 1
    num_graphs = 2
    nodes_per_graph = 512
    n_nodes = num_graphs * nodes_per_graph

    key = jax.random.PRNGKey(0)
    k_x, k_p = jax.random.split(key)
    x0 = jax.random.normal(k_x, (n_nodes, in_dim), jnp.float32)

    # Bidirectional ring within each graph.
    src, dst = [], []
    for g in range(num_graphs):
        base = g * nodes_per_graph
        for i in range(nodes_per_graph):
            a, b = base + i, base + (i + 1) % nodes_per_graph
            src += [a, b]
            dst += [b, a]
    edge_index = jnp.asarray(np.stack([src, dst]), dtype=jnp.int32)   # (2, 2048)
    batch = jnp.asarray(np.repeat(np.arange(num_graphs), nodes_per_graph), jnp.int32)

    params = init_params(k_p, in_dim, hidden, lin_hidden, out_hidden, outdim)
    padded = prepare_padded_params(params)   # hoisted out of the jitted forward

    out = rg_discriminator(x0, edge_index, batch, padded, num_graphs)
    out = jax.block_until_ready(out)

    ref = ref_forward(x0, edge_index, batch, params, num_graphs)
    # bf16 activations/weights on the MXU paths + approx-reciprocal internal sigmoid:
    # compare against the exact f32 reference with a correspondingly loosened tolerance.
    np.testing.assert_allclose(np.asarray(out), np.asarray(ref), rtol=5e-2, atol=5e-2)
    assert out.shape == (num_graphs, outdim)
    print("KERNEL_OK")
</pallas_src>

<mosaic_0001>
module attributes {stable_mosaic.version = 11 : i64} {
  func.func private @main(%arg0: i32) attributes {dimension_semantics = [#tpu.dimension_semantics<core_parallel>], iteration_bounds = array<i64: 2>, tpu.core_type = #tpu.core_type<sc_scalar_subcore>, window_params = []} {
    return
  }
}

module attributes {stable_mosaic.version = 11 : i64} {
  func.func private @main(%arg0: i32) attributes {dimension_semantics = [#tpu.dimension_semantics<core_parallel>], iteration_bounds = array<i64: 2>, tpu.core_type = #tpu.core_type<sc_scalar_subcore>, window_params = []} {
    return
  }
}

module attributes {stable_mosaic.version = 11 : i64} {
  func.func @_proj1_kernel(%arg0: i32, %arg1: memref<512x4xf32, #tpu.memory_space<vmem>>, %arg2: memref<4x128xf32, #tpu.memory_space<vmem>>, %arg3: memref<4x128xf32, #tpu.memory_space<vmem>>, %arg4: memref<1x128xf32, #tpu.memory_space<vmem>>, %arg5: memref<512x128xbf16, #tpu.memory_space<vmem>>, %arg6: memref<512x128xbf16, #tpu.memory_space<vmem>>) attributes {dimension_semantics = [#tpu.dimension_semantics<parallel>], iteration_bounds = array<i64: 2>, scalar_prefetch = 0 : i64, scratch_operands = 0 : i64, tpu.core_type = #tpu.core_type<tc>, window_params = [{transform_indices = @transform_0, window_bounds = array<i64: 512, 4>}, {pipeline_mode = #tpu.pipeline_mode<synchronous>, transform_indices = @transform_1, window_bounds = array<i64: 4, 128>}, {pipeline_mode = #tpu.pipeline_mode<synchronous>, transform_indices = @transform_2, window_bounds = array<i64: 4, 128>}, {pipeline_mode = #tpu.pipeline_mode<synchronous>, transform_indices = @transform_3, window_bounds = array<i64: 1, 128>}, {transform_indices = @transform_4, window_bounds = array<i64: 512, 128>}, {transform_indices = @transform_5, window_bounds = array<i64: 512, 128>}]} {
    %c0 = arith.constant 0 : index
    %c0_0 = arith.constant 0 : index
    %0 = vector.load %arg1[%c0, %c0_0] : memref<512x4xf32, #tpu.memory_space<vmem>>, vector<512x4xf32>
    %c0_1 = arith.constant 0 : index
    %c0_2 = arith.constant 0 : index
    %1 = vector.load %arg2[%c0_1, %c0_2] : memref<4x128xf32, #tpu.memory_space<vmem>>, vector<4x128xf32>
    %cst = arith.constant dense<0.000000e+00> : vector<512x128xf32>
    %2 = tpu.matmul %0, %1, %cst {dimension_numbers = #tpu.dot_dimension_numbers<[1], [0], [0], [1], [0, 0, 1, 1], [], []>} : vector<512x4xf32>, vector<4x128xf32>, vector<512x128xf32> -> vector<512x128xf32>
    %3 = arith.truncf %2 : vector<512x128xf32> to vector<512x128xbf16>
    %c0_3 = arith.constant 0 : index
    %c0_4 = arith.constant 0 : index
    %4 = vector.load %arg5[%c0_3, %c0_4] : memref<512x128xbf16, #tpu.memory_space<vmem>>, vector<512x128xbf16>
    tpu.vector_store %arg5[%c0_3, %c0_4], %3 {strides = array<i32>} : memref<512x128xbf16, #tpu.memory_space<vmem>>, vector<512x128xbf16>,
    %c0_5 = arith.constant 0 : index
    %c0_6 = arith.constant 0 : index
    %5 = vector.load %arg3[%c0_5, %c0_6] : memref<4x128xf32, #tpu.memory_space<vmem>>, vector<4x128xf32>
    %cst_7 = arith.constant dense<0.000000e+00> : vector<512x128xf32>
    %6 = tpu.matmul %0, %5, %cst_7 {dimension_numbers = #tpu.dot_dimension_numbers<[1], [0], [0], [1], [0, 0, 1, 1], [], []>} : vector<512x4xf32>, vector<4x128xf32>, vector<512x128xf32> -> vector<512x128xf32>
    %c0_8 = arith.constant 0 : index
    %c0_9 = arith.constant 0 : index
    %7 = vector.load %arg4[%c0_8, %c0_9] : memref<1x128xf32, #tpu.memory_space<vmem>>, vector<1x128xf32>
    %8 = vector.broadcast %7 : vector<1x128xf32> to vector<512x128xf32>
    %9 = arith.addf %6, %8 : vector<512x128xf32>
    %10 = arith.truncf %9 : vector<512x128xf32> to vector<512x128xbf16>
    %c0_10 = arith.constant 0 : index
    %c0_11 = arith.constant 0 : index
    %11 = vector.load %arg6[%c0_10, %c0_11] : memref<512x128xbf16, #tpu.memory_space<vmem>>, vector<512x128xbf16>
    tpu.vector_store %arg6[%c0_10, %c0_11], %10 {strides = array<i32>} : memref<512x128xbf16, #tpu.memory_space<vmem>>, vector<512x128xbf16>,
    return
  }
  func.func @transform_0(%arg0: i32) -> (i32, i32) {
    %c0_i32 = arith.constant 0 : i32
    %c0_i32_0 = arith.constant 0 : i32
    return %arg0, %c0_i32 : i32, i32
  }
  func.func @transform_1(%arg0: i32) -> (i32, i32) {
    %c0_i32 = arith.constant 0 : i32
    %c0_i32_0 = arith.constant 0 : i32
    %c0_i32_1 = arith.constant 0 : i32
    return %c0_i32, %c0_i32_0 : i32, i32
  }
  func.func @transform_2(%arg0: i32) -> (i32, i32) {
    %c0_i32 = arith.constant 0 : i32
    %c0_i32_0 = arith.constant 0 : i32
    %c0_i32_1 = arith.constant 0 : i32
    return %c0_i32, %c0_i32_0 : i32, i32
  }
  func.func @transform_3(%arg0: i32) -> (i32, i32) {
    %c0_i32 = arith.constant 0 : i32
    %c0_i32_0 = arith.constant 0 : i32
    %c0_i32_1 = arith.constant 0 : i32
    return %c0_i32, %c0_i32_0 : i32, i32
  }
  func.func @transform_4(%arg0: i32) -> (i32, i32) {
    %c0_i32 = arith.constant 0 : i32
    %c0_i32_0 = arith.constant 0 : i32
    return %arg0, %c0_i32 : i32, i32
  }
  func.func @transform_5(%arg0: i32) -> (i32, i32) {
    %c0_i32 = arith.constant 0 : i32
    %c0_i32_0 = arith.constant 0 : i32
    return %arg0, %c0_i32 : i32, i32
  }
}

module attributes {stable_mosaic.version = 11 : i64} {
  func.func @_agg1_proj2_kernel(%arg0: i32, %arg1: i32, %arg2: memref<512x1024xi8, #tpu.memory_space<vmem>>, %arg3: memref<1024x128xbf16, #tpu.memory_space<vmem>>, %arg4: memref<512x128xbf16, #tpu.memory_space<vmem>>, %arg5: memref<128x128xbf16, #tpu.memory_space<vmem>>, %arg6: memref<128x128xbf16, #tpu.memory_space<vmem>>, %arg7: memref<1x128xf32, #tpu.memory_space<vmem>>, %arg8: memref<512x128xbf16, #tpu.memory_space<vmem>>, %arg9: memref<512x128xbf16, #tpu.memory_space<vmem>>, %arg10: memref<512x128xf32, #tpu.memory_space<vmem>>) attributes {dimension_semantics = [#tpu.dimension_semantics<parallel>, #tpu.dimension_semantics<arbitrary>], iteration_bounds = array<i64: 2, 1>, scalar_prefetch = 0 : i64, scratch_operands = 1 : i64, tpu.core_type = #tpu.core_type<tc>, window_params = [{transform_indices = @transform_0, window_bounds = array<i64: 512, 1024>}, {pipeline_mode = #tpu.pipeline_mode<synchronous>, transform_indices = @transform_1, window_bounds = array<i64: 1024, 128>}, {transform_indices = @transform_2, window_bounds = array<i64: 512, 128>}, {pipeline_mode = #tpu.pipeline_mode<synchronous>, transform_indices = @transform_3, window_bounds = array<i64: 128, 128>}, {pipeline_mode = #tpu.pipeline_mode<synchronous>, transform_indices = @transform_4, window_bounds = array<i64: 128, 128>}, {pipeline_mode = #tpu.pipeline_mode<synchronous>, transform_indices = @transform_5, window_bounds = array<i64: 1, 128>}, {transform_indices = @transform_6, window_bounds = array<i64: 512, 128>}, {transform_indices = @transform_7, window_bounds = array<i64: 512, 128>}]} {
    %c0_i32 = arith.constant 0 : i32
    %0 = arith.cmpi eq, %arg1, %c0_i32 : i32
    %1 = arith.extui %0 : i1 to i32
    %c0_i32_0 = arith.constant 0 : i32
    %2 = arith.cmpi ne, %1, %c0_i32_0 : i32
    scf.if %2 {
      %c0_9 = arith.constant 0 : index
      %c0_10 = arith.constant 0 : index
      %16 = vector.load %arg4[%c0_9, %c0_10] : memref<512x128xbf16, #tpu.memory_space<vmem>>, vector<512x128xbf16>
      %17 = arith.extf %16 : vector<512x128xbf16> to vector<512x128xf32>
      %c0_11 = arith.constant 0 : index
      %c0_12 = arith.constant 0 : index
      %18 = vector.load %arg10[%c0_11, %c0_12] : memref<512x128xf32, #tpu.memory_space<vmem>>, vector<512x128xf32>
      tpu.vector_store %arg10[%c0_11, %c0_12], %17 {strides = array<i32>} : memref<512x128xf32, #tpu.memory_space<vmem>>, vector<512x128xf32>,
    } else {
    }
    %c1024_i32 = arith.constant 1024 : i32
    %3 = arith.muli %arg1, %c1024_i32 : i32
    %4 = tpu.assume_multiple %3, 128 : i32
    %5 = arith.index_cast %4 : i32 to index
    %c0 = arith.constant 0 : index
    %6 = vector.load %arg3[%5, %c0] : memref<1024x128xbf16, #tpu.memory_space<vmem>>, vector<1024x128xbf16>
    %c0_1 = arith.constant 0 : index
    %c0_2 = arith.constant 0 : index
    %7 = vector.load %arg10[%c0_1, %c0_2] : memref<512x128xf32, #tpu.memory_space<vmem>>, vector<512x128xf32>
    %c0_3 = arith.constant 0 : index
    %c0_4 = arith.constant 0 : index
    %8 = vector.load %arg2[%c0_3, %c0_4] : memref<512x1024xi8, #tpu.memory_space<vmem>>, vector<512x1024xi8>
    %9 = arith.sitofp %8 : vector<512x1024xi8> to vector<512x1024xbf16>
    %cst = arith.constant dense<0.000000e+00> : vector<512x128xf32>
    %10 = tpu.matmul %9, %6, %cst {dimension_numbers = #tpu.dot_dimension_numbers<[1], [0], [0], [1], [0, 0, 1, 1], [], []>} : vector<512x1024xbf16>, vector<1024x128xbf16>, vector<512x128xf32> -> vector<512x128xf32>
    %11 = arith.addf %7, %10 : vector<512x128xf32>
    %c0_5 = arith.constant 0 : index
    %c0_6 = arith.constant 0 : index
    %12 = vector.load %arg10[%c0_5, %c0_6] : memref<512x128xf32, #tpu.memory_space<vmem>>, vector<512x128xf32>
    tpu.vector_store %arg10[%c0_5, %c0_6], %11 {strides = array<i32>} : memref<512x128xf32, #tpu.memory_space<vmem>>, vector<512x128xf32>,
    %c0_i32_7 = arith.constant 0 : i32
    %13 = arith.cmpi eq, %arg1, %c0_i32_7 : i32
    %14 = arith.extui %13 : i1 to i32
    %c0_i32_8 = arith.constant 0 : i32
    %15 = arith.cmpi ne, %14, %c0_i32_8 : i32
    scf.if %15 {
      %c0_9 = arith.constant 0 : index
      %c0_10 = arith.constant 0 : index
      %16 = vector.load %arg10[%c0_9, %c0_10] : memref<512x128xf32, #tpu.memory_space<vmem>>, vector<512x128xf32>
      %cst_11 = arith.constant 0.000000e+00 : f32
      %17 = vector.broadcast %cst_11 : f32 to vector<512x128xf32>
      %18 = arith.cmpf oge, %16, %17 : vector<512x128xf32>
      %cst_12 = arith.constant 5.000000e-02 : f32
      %19 = vector.broadcast %cst_12 : f32 to vector<512x128xf32>
      %20 = arith.mulf %19, %16 : vector<512x128xf32>
      %21 = arith.select %18, %16, %20 : vector<512x128xi1>, vector<512x128xf32>
      %22 = arith.truncf %21 : vector<512x128xf32> to vector<512x128xbf16>
      %c0_13 = arith.constant 0 : index
      %c0_14 = arith.constant 0 : index
      %23 = vector.load %arg5[%c0_13, %c0_14] : memref<128x128xbf16, #tpu.memory_space<vmem>>, vector<128x128xbf16>
      %cst_15 = arith.constant dense<0.000000e+00> : vector<512x128xf32>
      %24 = tpu.matmul %22, %23, %cst_15 {dimension_numbers = #tpu.dot_dimension_numbers<[1], [0], [0], [1], [0, 0, 1, 1], [], []>} : vector<512x128xbf16>, vector<128x128xbf16>, vector<512x128xf32> -> vector<512x128xf32>
      %25 = arith.truncf %24 : vector<512x128xf32> to vector<512x128xbf16>
      %c0_16 = arith.constant 0 : index
      %c0_17 = arith.constant 0 : index
      %26 = vector.load %arg8[%c0_16, %c0_17] : memref<512x128xbf16, #tpu.memory_space<vmem>>, vector<512x128xbf16>
      tpu.vector_store %arg8[%c0_16, %c0_17], %25 {strides = array<i32>} : memref<512x128xbf16, #tpu.memory_space<vmem>>, vector<512x128xbf16>,
      %c0_18 = arith.constant 0 : index
      %c0_19 = arith.constant 0 : index
      %27 = vector.load %arg6[%c0_18, %c0_19] : memref<128x128xbf16, #tpu.memory_space<vmem>>, vector<128x128xbf16>
      %cst_20 = arith.constant dense<0.000000e+00> : vector<512x128xf32>
      %28 = tpu.matmul %22, %27, %cst_20 {dimension_numbers = #tpu.dot_dimension_numbers<[1], [0], [0], [1], [0, 0, 1, 1], [], []>} : vector<512x128xbf16>, vector<128x128xbf16>, vector<512x128xf32> -> vector<512x128xf32>
      %c0_21 = arith.constant 0 : index
      %c0_22 = arith.constant 0 : index
      %29 = vector.load %arg7[%c0_21, %c0_22] : memref<1x128xf32, #tpu.memory_space<vmem>>, vector<1x128xf32>
      %30 = vector.broadcast %29 : vector<1x128xf32> to vector<512x128xf32>
      %31 = arith.addf %28, %30 : vector<512x128xf32>
      %32 = arith.truncf %31 : vector<512x128xf32> to vector<512x128xbf16>
      %c0_23 = arith.constant 0 : index
      %c0_24 = arith.constant 0 : index
      %33 = vector.load %arg9[%c0_23, %c0_24] : memref<512x128xbf16, #tpu.memory_space<vmem>>, vector<512x128xbf16>
      tpu.vector_store %arg9[%c0_23, %c0_24], %32 {strides = array<i32>} : memref<512x128xbf16, #tpu.memory_space<vmem>>, vector<512x128xbf16>,
    } else {
    }
    return
  }
  func.func @transform_0(%arg0: i32, %arg1: i32) -> (i32, i32) {
    %c0_i32 = arith.constant 0 : i32
    return %arg0, %arg1 : i32, i32
  }
  func.func @transform_1(%arg0: i32, %arg1: i32) -> (i32, i32) {
    %c0_i32 = arith.constant 0 : i32
    %c0_i32_0 = arith.constant 0 : i32
    %c0_i32_1 = arith.constant 0 : i32
    return %c0_i32, %c0_i32_0 : i32, i32
  }
  func.func @transform_2(%arg0: i32, %arg1: i32) -> (i32, i32) {
    %c0_i32 = arith.constant 0 : i32
    %c0_i32_0 = arith.constant 0 : i32
    return %arg0, %c0_i32 : i32, i32
  }
  func.func @transform_3(%arg0: i32, %arg1: i32) -> (i32, i32) {
    %c0_i32 = arith.constant 0 : i32
    %c0_i32_0 = arith.constant 0 : i32
    %c0_i32_1 = arith.constant 0 : i32
    return %c0_i32, %c0_i32_0 : i32, i32
  }
  func.func @transform_4(%arg0: i32, %arg1: i32) -> (i32, i32) {
    %c0_i32 = arith.constant 0 : i32
    %c0_i32_0 = arith.constant 0 : i32
    %c0_i32_1 = arith.constant 0 : i32
    return %c0_i32, %c0_i32_0 : i32, i32
  }
  func.func @transform_5(%arg0: i32, %arg1: i32) -> (i32, i32) {
    %c0_i32 = arith.constant 0 : i32
    %c0_i32_0 = arith.constant 0 : i32
    %c0_i32_1 = arith.constant 0 : i32
    return %c0_i32, %c0_i32_0 : i32, i32
  }
  func.func @transform_6(%arg0: i32, %arg1: i32) -> (i32, i32) {
    %c0_i32 = arith.constant 0 : i32
    %c0_i32_0 = arith.constant 0 : i32
    return %arg0, %c0_i32 : i32, i32
  }
  func.func @transform_7(%arg0: i32, %arg1: i32) -> (i32, i32) {
    %c0_i32 = arith.constant 0 : i32
    %c0_i32_0 = arith.constant 0 : i32
    return %arg0, %c0_i32 : i32, i32
  }
}

module attributes {stable_mosaic.version = 11 : i64} {
  func.func @_agg_conv_kernel(%arg0: i32, %arg1: i32, %arg2: memref<512x1024xi8, #tpu.memory_space<vmem>>, %arg3: memref<1024x128xbf16, #tpu.memory_space<vmem>>, %arg4: memref<512x128xbf16, #tpu.memory_space<vmem>>, %arg5: memref<512x128xbf16, #tpu.memory_space<vmem>>, %arg6: memref<512x128xf32, #tpu.memory_space<vmem>>) attributes {dimension_semantics = [#tpu.dimension_semantics<parallel>, #tpu.dimension_semantics<arbitrary>], iteration_bounds = array<i64: 2, 1>, scalar_prefetch = 0 : i64, scratch_operands = 1 : i64, tpu.core_type = #tpu.core_type<tc>, window_params = [{transform_indices = @transform_0, window_bounds = array<i64: 512, 1024>}, {pipeline_mode = #tpu.pipeline_mode<synchronous>, transform_indices = @transform_1, window_bounds = array<i64: 1024, 128>}, {transform_indices = @transform_2, window_bounds = array<i64: 512, 128>}, {transform_indices = @transform_3, window_bounds = array<i64: 512, 128>}]} {
    %c0_i32 = arith.constant 0 : i32
    %0 = arith.cmpi eq, %arg1, %c0_i32 : i32
    %1 = arith.extui %0 : i1 to i32
    %c0_i32_0 = arith.constant 0 : i32
    %2 = arith.cmpi ne, %1, %c0_i32_0 : i32
    scf.if %2 {
      %c0_9 = arith.constant 0 : index
      %c0_10 = arith.constant 0 : index
      %16 = vector.load %arg4[%c0_9, %c0_10] : memref<512x128xbf16, #tpu.memory_space<vmem>>, vector<512x128xbf16>
      %17 = arith.extf %16 : vector<512x128xbf16> to vector<512x128xf32>
      %c0_11 = arith.constant 0 : index
      %c0_12 = arith.constant 0 : index
      %18 = vector.load %arg6[%c0_11, %c0_12] : memref<512x128xf32, #tpu.memory_space<vmem>>, vector<512x128xf32>
      tpu.vector_store %arg6[%c0_11, %c0_12], %17 {strides = array<i32>} : memref<512x128xf32, #tpu.memory_space<vmem>>, vector<512x128xf32>,
    } else {
    }
    %c1024_i32 = arith.constant 1024 : i32
    %3 = arith.muli %arg1, %c1024_i32 : i32
    %4 = tpu.assume_multiple %3, 128 : i32
    %5 = arith.index_cast %4 : i32 to index
    %c0 = arith.constant 0 : index
    %6 = vector.load %arg3[%5, %c0] : memref<1024x128xbf16, #tpu.memory_space<vmem>>, vector<1024x128xbf16>
    %c0_1 = arith.constant 0 : index
    %c0_2 = arith.constant 0 : index
    %7 = vector.load %arg6[%c0_1, %c0_2] : memref<512x128xf32, #tpu.memory_space<vmem>>, vector<512x128xf32>
    %c0_3 = arith.constant 0 : index
    %c0_4 = arith.constant 0 : index
    %8 = vector.load %arg2[%c0_3, %c0_4] : memref<512x1024xi8, #tpu.memory_space<vmem>>, vector<512x1024xi8>
    %9 = arith.sitofp %8 : vector<512x1024xi8> to vector<512x1024xbf16>
    %cst = arith.constant dense<0.000000e+00> : vector<512x128xf32>
    %10 = tpu.matmul %9, %6, %cst {dimension_numbers = #tpu.dot_dimension_numbers<[1], [0], [0], [1], [0, 0, 1, 1], [], []>} : vector<512x1024xbf16>, vector<1024x128xbf16>, vector<512x128xf32> -> vector<512x128xf32>
    %11 = arith.addf %7, %10 : vector<512x128xf32>
    %c0_5 = arith.constant 0 : index
    %c0_6 = arith.constant 0 : index
    %12 = vector.load %arg6[%c0_5, %c0_6] : memref<512x128xf32, #tpu.memory_space<vmem>>, vector<512x128xf32>
    tpu.vector_store %arg6[%c0_5, %c0_6], %11 {strides = array<i32>} : memref<512x128xf32, #tpu.memory_space<vmem>>, vector<512x128xf32>,
    %c0_i32_7 = arith.constant 0 : i32
    %13 = arith.cmpi eq, %arg1, %c0_i32_7 : i32
    %14 = arith.extui %13 : i1 to i32
    %c0_i32_8 = arith.constant 0 : i32
    %15 = arith.cmpi ne, %14, %c0_i32_8 : i32
    scf.if %15 {
      %c0_9 = arith.constant 0 : index
      %c0_10 = arith.constant 0 : index
      %16 = vector.load %arg6[%c0_9, %c0_10] : memref<512x128xf32, #tpu.memory_space<vmem>>, vector<512x128xf32>
      %cst_11 = arith.constant 0.000000e+00 : f32
      %17 = vector.broadcast %cst_11 : f32 to vector<512x128xf32>
      %18 = arith.cmpf oge, %16, %17 : vector<512x128xf32>
      %cst_12 = arith.constant 5.000000e-02 : f32
      %19 = vector.broadcast %cst_12 : f32 to vector<512x128xf32>
      %20 = arith.mulf %19, %16 : vector<512x128xf32>
      %21 = arith.select %18, %16, %20 : vector<512x128xi1>, vector<512x128xf32>
      %22 = arith.truncf %21 : vector<512x128xf32> to vector<512x128xbf16>
      %c0_13 = arith.constant 0 : index
      %c0_14 = arith.constant 0 : index
      %23 = vector.load %arg5[%c0_13, %c0_14] : memref<512x128xbf16, #tpu.memory_space<vmem>>, vector<512x128xbf16>
      tpu.vector_store %arg5[%c0_13, %c0_14], %22 {strides = array<i32>} : memref<512x128xbf16, #tpu.memory_space<vmem>>, vector<512x128xbf16>,
    } else {
    }
    return
  }
  func.func @transform_0(%arg0: i32, %arg1: i32) -> (i32, i32) {
    %c0_i32 = arith.constant 0 : i32
    return %arg0, %arg1 : i32, i32
  }
  func.func @transform_1(%arg0: i32, %arg1: i32) -> (i32, i32) {
    %c0_i32 = arith.constant 0 : i32
    %c0_i32_0 = arith.constant 0 : i32
    %c0_i32_1 = arith.constant 0 : i32
    return %c0_i32, %c0_i32_0 : i32, i32
  }
  func.func @transform_2(%arg0: i32, %arg1: i32) -> (i32, i32) {
    %c0_i32 = arith.constant 0 : i32
    %c0_i32_0 = arith.constant 0 : i32
    return %arg0, %c0_i32 : i32, i32
  }
  func.func @transform_3(%arg0: i32, %arg1: i32) -> (i32, i32) {
    %c0_i32 = arith.constant 0 : i32
    %c0_i32_0 = arith.constant 0 : i32
    return %arg0, %c0_i32 : i32, i32
  }
}

module attributes {stable_mosaic.version = 11 : i64} {
  func.func @_gate_pool_mlp_kernel(%arg0: i32, %arg1: memref<512x128xbf16, #tpu.memory_space<vmem>>, %arg2: memref<512x4xf32, #tpu.memory_space<vmem>>, %arg3: memref<2x512xbf16, #tpu.memory_space<vmem>>, %arg4: memref<128x256xbf16, #tpu.memory_space<vmem>>, %arg5: memref<4x256xf32, #tpu.memory_space<vmem>>, %arg6: memref<1x256xf32, #tpu.memory_space<vmem>>, %arg7: memref<128x128xf32, #tpu.memory_space<vmem>>, %arg8: memref<1x128xf32, #tpu.memory_space<vmem>>, %arg9: memref<128x384xf32, #tpu.memory_space<vmem>>, %arg10: memref<1x384xf32, #tpu.memory_space<vmem>>, %arg11: memref<384x1xf32, #tpu.memory_space<vmem>>, %arg12: memref<1x1xf32, #tpu.memory_space<vmem>>, %arg13: memref<2x1xf32, #tpu.memory_space<vmem>>, %arg14: memref<2x128xf32, #tpu.memory_space<vmem>>) attributes {dimension_semantics = [#tpu.dimension_semantics<arbitrary>], iteration_bounds = array<i64: 2>, scalar_prefetch = 0 : i64, scratch_operands = 1 : i64, tpu.core_type = #tpu.core_type<tc>, window_params = [{transform_indices = @transform_0, window_bounds = array<i64: 512, 128>}, {transform_indices = @transform_1, window_bounds = array<i64: 512, 4>}, {transform_indices = @transform_2, window_bounds = array<i64: 2, 512>}, {pipeline_mode = #tpu.pipeline_mode<synchronous>, transform_indices = @transform_3, window_bounds = array<i64: 128, 256>}, {pipeline_mode = #tpu.pipeline_mode<synchronous>, transform_indices = @transform_4, window_bounds = array<i64: 4, 256>}, {pipeline_mode = #tpu.pipeline_mode<synchronous>, transform_indices = @transform_5, window_bounds = array<i64: 1, 256>}, {pipeline_mode = #tpu.pipeline_mode<synchronous>, transform_indices = @transform_6, window_bounds = array<i64: 128, 128>}, {pipeline_mode = #tpu.pipeline_mode<synchronous>, transform_indices = @transform_7, window_bounds = array<i64: 1, 128>}, {pipeline_mode = #tpu.pipeline_mode<synchronous>, transform_indices = @transform_8, window_bounds = array<i64: 128, 384>}, {pipeline_mode = #tpu.pipeline_mode<synchronous>, transform_indices = @transform_9, window_bounds = array<i64: 1, 384>}, {pipeline_mode = #tpu.pipeline_mode<synchronous>, transform_indices = @transform_10, window_bounds = array<i64: 384, 1>}, {pipeline_mode = #tpu.pipeline_mode<synchronous>, transform_indices = @transform_11, window_bounds = array<i64: 1, 1>}, {pipeline_mode = #tpu.pipeline_mode<synchronous>, transform_indices = @transform_12, window_bounds = array<i64: 2, 1>}]} {
    %c0_i32 = arith.constant 0 : i32
    %0 = arith.cmpi eq, %arg0, %c0_i32 : i32
    %1 = arith.extui %0 : i1 to i32
    %c0_i32_0 = arith.constant 0 : i32
    %2 = arith.cmpi ne, %1, %c0_i32_0 : i32
    scf.if %2 {
      %cst_22 = arith.constant 0.000000e+00 : f32
      %34 = vector.broadcast %cst_22 : f32 to vector<2x128xf32>
      %c0_23 = arith.constant 0 : index
      %c0_24 = arith.constant 0 : index
      %35 = vector.load %arg14[%c0_23, %c0_24] : memref<2x128xf32, #tpu.memory_space<vmem>>, vector<2x128xf32>
      tpu.vector_store %arg14[%c0_23, %c0_24], %34 {strides = array<i32>} : memref<2x128xf32, #tpu.memory_space<vmem>>, vector<2x128xf32>,
    } else {
    }
    %c0 = arith.constant 0 : index
    %c0_1 = arith.constant 0 : index
    %3 = vector.load %arg1[%c0, %c0_1] : memref<512x128xbf16, #tpu.memory_space<vmem>>, vector<512x128xbf16>
    %c0_2 = arith.constant 0 : index
    %c0_3 = arith.constant 0 : index
    %4 = vector.load %arg4[%c0_2, %c0_3] : memref<128x256xbf16, #tpu.memory_space<vmem>>, vector<128x256xbf16>
    %cst = arith.constant dense<0.000000e+00> : vector<512x256xf32>
    %5 = tpu.matmul %3, %4, %cst {dimension_numbers = #tpu.dot_dimension_numbers<[1], [0], [0], [1], [0, 0, 1, 1], [], []>} : vector<512x128xbf16>, vector<128x256xbf16>, vector<512x256xf32> -> vector<512x256xf32>
    %c0_4 = arith.constant 0 : index
    %c0_5 = arith.constant 0 : index
    %6 = vector.load %arg2[%c0_4, %c0_5] : memref<512x4xf32, #tpu.memory_space<vmem>>, vector<512x4xf32>
    %c0_6 = arith.constant 0 : index
    %c0_7 = arith.constant 0 : index
    %7 = vector.load %arg5[%c0_6, %c0_7] : memref<4x256xf32, #tpu.memory_space<vmem>>, vector<4x256xf32>
    %cst_8 = arith.constant dense<0.000000e+00> : vector<512x256xf32>
    %8 = tpu.matmul %6, %7, %cst_8 {dimension_numbers = #tpu.dot_dimension_numbers<[1], [0], [0], [1], [0, 0, 1, 1], [], []>} : vector<512x4xf32>, vector<4x256xf32>, vector<512x256xf32> -> vector<512x256xf32>
    %9 = arith.addf %5, %8 : vector<512x256xf32>
    %c0_9 = arith.constant 0 : index
    %c0_10 = arith.constant 0 : index
    %10 = vector.load %arg6[%c0_9, %c0_10] : memref<1x256xf32, #tpu.memory_space<vmem>>, vector<1x256xf32>
    %11 = vector.broadcast %10 : vector<1x256xf32> to vector<512x256xf32>
    %12 = arith.addf %9, %11 : vector<512x256xf32>
    %13 = vector.extract_strided_slice %12 {offsets = [0, 0], sizes = [512, 128], strides = [1, 1]} : vector<512x256xf32> to vector<512x128xf32>
    %cst_11 = arith.constant -3.000000e+01 : f32
    %cst_12 = arith.constant 3.000000e+01 : f32
    %14 = vector.broadcast %cst_11 : f32 to vector<512x128xf32>
    %15 = arith.maximumf %14, %13 : vector<512x128xf32>
    %16 = vector.broadcast %cst_12 : f32 to vector<512x128xf32>
    %17 = arith.minimumf %16, %15 : vector<512x128xf32>
    %18 = vector.extract_strided_slice %12 {offsets = [0, 128], sizes = [512, 128], strides = [1, 1]} : vector<512x256xf32> to vector<512x128xf32>
    %19 = math.tanh %18 : vector<512x128xf32>
    %20 = math.exp %17 : vector<512x128xf32>
    %cst_13 = arith.constant 1.000000e+00 : f32
    %21 = vector.broadcast %cst_13 : f32 to vector<512x128xf32>
    %22 = arith.addf %21, %20 : vector<512x128xf32>
    %23 = tpu.reciprocal %22 {approx = true} : vector<512x128xf32> -> vector<512x128xf32>
    %24 = arith.mulf %23, %19 : vector<512x128xf32>
    %25 = arith.truncf %24 : vector<512x128xf32> to vector<512x128xbf16>
    %c0_14 = arith.constant 0 : index
    %c0_15 = arith.constant 0 : index
    %26 = vector.load %arg14[%c0_14, %c0_15] : memref<2x128xf32, #tpu.memory_space<vmem>>, vector<2x128xf32>
    %c0_16 = arith.constant 0 : index
    %c0_17 = arith.constant 0 : index
    %27 = vector.load %arg3[%c0_16, %c0_17] : memref<2x512xbf16, #tpu.memory_space<vmem>>, vector<2x512xbf16>
    %cst_18 = arith.constant dense<0.000000e+00> : vector<2x128xf32>
    %28 = tpu.matmul %27, %25, %cst_18 {dimension_numbers = #tpu.dot_dimension_numbers<[1], [0], [0], [1], [0, 0, 1, 1], [], []>} : vector<2x512xbf16>, vector<512x128xbf16>, vector<2x128xf32> -> vector<2x128xf32>
    %29 = arith.addf %26, %28 : vector<2x128xf32>
    %c0_19 = arith.constant 0 : index
    %c0_20 = arith.constant 0 : index
    %30 = vector.load %arg14[%c0_19, %c0_20] : memref<2x128xf32, #tpu.memory_space<vmem>>, vector<2x128xf32>
    tpu.vector_store %arg14[%c0_19, %c0_20], %29 {strides = array<i32>} : memref<2x128xf32, #tpu.memory_space<vmem>>, vector<2x128xf32>,
    %c1_i32 = arith.constant 1 : i32
    %31 = arith.cmpi eq, %arg0, %c1_i32 : i32
    %32 = arith.extui %31 : i1 to i32
    %c0_i32_21 = arith.constant 0 : i32
    %33 = arith.cmpi ne, %32, %c0_i32_21 : i32
    scf.if %33 {
      %c0_22 = arith.constant 0 : index
      %c0_23 = arith.constant 0 : index
      %34 = vector.load %arg14[%c0_22, %c0_23] : memref<2x128xf32, #tpu.memory_space<vmem>>, vector<2x128xf32>
      %c0_24 = arith.constant 0 : index
      %c0_25 = arith.constant 0 : index
      %35 = vector.load %arg7[%c0_24, %c0_25] : memref<128x128xf32, #tpu.memory_space<vmem>>, vector<128x128xf32>
      %cst_26 = arith.constant dense<0.000000e+00> : vector<2x128xf32>
      %36 = tpu.matmul %34, %35, %cst_26 {dimension_numbers = #tpu.dot_dimension_numbers<[1], [0], [0], [1], [0, 0, 1, 1], [], []>} : vector<2x128xf32>, vector<128x128xf32>, vector<2x128xf32> -> vector<2x128xf32>
      %c0_27 = arith.constant 0 : index
      %c0_28 = arith.constant 0 : index
      %37 = vector.load %arg8[%c0_27, %c0_28] : memref<1x128xf32, #tpu.memory_space<vmem>>, vector<1x128xf32>
      %38 = vector.broadcast %37 : vector<1x128xf32> to vector<2x128xf32>
      %39 = arith.addf %36, %38 : vector<2x128xf32>
      %cst_29 = arith.constant 0.000000e+00 : f32
      %40 = vector.broadcast %cst_29 : f32 to vector<2x128xf32>
      %41 = arith.cmpf oge, %39, %40 : vector<2x128xf32>
      %cst_30 = arith.constant 5.000000e-02 : f32
      %42 = vector.broadcast %cst_30 : f32 to vector<2x128xf32>
      %43 = arith.mulf %42, %39 : vector<2x128xf32>
      %44 = arith.select %41, %39, %43 : vector<2x128xi1>, vector<2x128xf32>
      %c0_31 = arith.constant 0 : index
      %c0_32 = arith.constant 0 : index
      %45 = vector.load %arg9[%c0_31, %c0_32] : memref<128x384xf32, #tpu.memory_space<vmem>>, vector<128x384xf32>
      %cst_33 = arith.constant dense<0.000000e+00> : vector<2x384xf32>
      %46 = tpu.matmul %44, %45, %cst_33 {dimension_numbers = #tpu.dot_dimension_numbers<[1], [0], [0], [1], [0, 0, 1, 1], [], []>} : vector<2x128xf32>, vector<128x384xf32>, vector<2x384xf32> -> vector<2x384xf32>
      %c0_34 = arith.constant 0 : index
      %c0_35 = arith.constant 0 : index
      %47 = vector.load %arg10[%c0_34, %c0_35] : memref<1x384xf32, #tpu.memory_space<vmem>>, vector<1x384xf32>
      %48 = vector.broadcast %47 : vector<1x384xf32> to vector<2x384xf32>
      %49 = arith.addf %46, %48 : vector<2x384xf32>
      %cst_36 = arith.constant 0.000000e+00 : f32
      %50 = vector.broadcast %cst_36 : f32 to vector<2x384xf32>
      %51 = arith.cmpf oge, %49, %50 : vector<2x384xf32>
      %cst_37 = arith.constant 5.000000e-02 : f32
      %52 = vector.broadcast %cst_37 : f32 to vector<2x384xf32>
      %53 = arith.mulf %52, %49 : vector<2x384xf32>
      %54 = arith.select %51, %49, %53 : vector<2x384xi1>, vector<2x384xf32>
      %c0_38 = arith.constant 0 : index
      %c0_39 = arith.constant 0 : index
      %55 = vector.load %arg11[%c0_38, %c0_39] : memref<384x1xf32, #tpu.memory_space<vmem>>, vector<384x1xf32>
      %cst_40 = arith.constant dense<0.000000e+00> : vector<2x1xf32>
      %56 = tpu.matmul %54, %55, %cst_40 {dimension_numbers = #tpu.dot_dimension_numbers<[1], [0], [0], [1], [0, 0, 1, 1], [], []>} : vector<2x384xf32>, vector<384x1xf32>, vector<2x1xf32> -> vector<2x1xf32>
      %c0_41 = arith.constant 0 : index
      %c0_42 = arith.constant 0 : index
      %57 = vector.load %arg12[%c0_41, %c0_42] : memref<1x1xf32, #tpu.memory_space<vmem>>, vector<1x1xf32>
      %58 = vector.broadcast %57 : vector<1x1xf32> to vector<2x1xf32>
      %59 = arith.addf %56, %58 : vector<2x1xf32>
      %cst_43 = arith.constant 0.000000e+00 : f32
      %60 = vector.broadcast %cst_43 : f32 to vector<2x1xf32>
      %61 = arith.subf %60, %59 : vector<2x1xf32>
      %62 = math.exp %61 : vector<2x1xf32>
      %cst_44 = arith.constant 1.000000e+00 : f32
      %63 = vector.broadcast %cst_44 : f32 to vector<2x1xf32>
      %64 = arith.addf %63, %62 : vector<2x1xf32>
      %cst_45 = arith.constant 1.000000e+00 : f32
      %65 = vector.broadcast %cst_45 : f32 to vector<2x1xf32>
      %66 = arith.divf %65, %64 : vector<2x1xf32>
      %c0_46 = arith.constant 0 : index
      %c0_47 = arith.constant 0 : index
      %67 = vector.load %arg13[%c0_46, %c0_47] : memref<2x1xf32, #tpu.memory_space<vmem>>, vector<2x1xf32>
      tpu.vector_store %arg13[%c0_46, %c0_47], %66 {strides = array<i32>} : memref<2x1xf32, #tpu.memory_space<vmem>>, vector<2x1xf32>,
    } else {
    }
    return
  }
  func.func @transform_0(%arg0: i32) -> (i32, i32) {
    %c0_i32 = arith.constant 0 : i32
    %c0_i32_0 = arith.constant 0 : i32
    return %arg0, %c0_i32 : i32, i32
  }
  func.func @transform_1(%arg0: i32) -> (i32, i32) {
    %c0_i32 = arith.constant 0 : i32
    %c0_i32_0 = arith.constant 0 : i32
    return %arg0, %c0_i32 : i32, i32
  }
  func.func @transform_2(%arg0: i32) -> (i32, i32) {
    %c0_i32 = arith.constant 0 : i32
    %c0_i32_0 = arith.constant 0 : i32
    return %c0_i32, %arg0 : i32, i32
  }
  func.func @transform_3(%arg0: i32) -> (i32, i32) {
    %c0_i32 = arith.constant 0 : i32
    %c0_i32_0 = arith.constant 0 : i32
    %c0_i32_1 = arith.constant 0 : i32
    return %c0_i32, %c0_i32_0 : i32, i32
  }
  func.func @transform_4(%arg0: i32) -> (i32, i32) {
    %c0_i32 = arith.constant 0 : i32
    %c0_i32_0 = arith.constant 0 : i32
    %c0_i32_1 = arith.constant 0 : i32
    return %c0_i32, %c0_i32_0 : i32, i32
  }
  func.func @transform_5(%arg0: i32) -> (i32, i32) {
    %c0_i32 = arith.constant 0 : i32
    %c0_i32_0 = arith.constant 0 : i32
    %c0_i32_1 = arith.constant 0 : i32
    return %c0_i32, %c0_i32_0 : i32, i32
  }
  func.func @transform_6(%arg0: i32) -> (i32, i32) {
    %c0_i32 = arith.constant 0 : i32
    %c0_i32_0 = arith.constant 0 : i32
    %c0_i32_1 = arith.constant 0 : i32
    return %c0_i32, %c0_i32_0 : i32, i32
  }
  func.func @transform_7(%arg0: i32) -> (i32, i32) {
    %c0_i32 = arith.constant 0 : i32
    %c0_i32_0 = arith.constant 0 : i32
    %c0_i32_1 = arith.constant 0 : i32
    return %c0_i32, %c0_i32_0 : i32, i32
  }
  func.func @transform_8(%arg0: i32) -> (i32, i32) {
    %c0_i32 = arith.constant 0 : i32
    %c0_i32_0 = arith.constant 0 : i32
    %c0_i32_1 = arith.constant 0 : i32
    return %c0_i32, %c0_i32_0 : i32, i32
  }
  func.func @transform_9(%arg0: i32) -> (i32, i32) {
    %c0_i32 = arith.constant 0 : i32
    %c0_i32_0 = arith.constant 0 : i32
    %c0_i32_1 = arith.constant 0 : i32
    return %c0_i32, %c0_i32_0 : i32, i32
  }
  func.func @transform_10(%arg0: i32) -> (i32, i32) {
    %c0_i32 = arith.constant 0 : i32
    %c0_i32_0 = arith.constant 0 : i32
    %c0_i32_1 = arith.constant 0 : i32
    return %c0_i32, %c0_i32_0 : i32, i32
  }
  func.func @transform_11(%arg0: i32) -> (i32, i32) {
    %c0_i32 = arith.constant 0 : i32
    %c0_i32_0 = arith.constant 0 : i32
    %c0_i32_1 = arith.constant 0 : i32
    return %c0_i32, %c0_i32_0 : i32, i32
  }
  func.func @transform_12(%arg0: i32) -> (i32, i32) {
    %c0_i32 = arith.constant 0 : i32
    %c0_i32_0 = arith.constant 0 : i32
    %c0_i32_1 = arith.constant 0 : i32
    return %c0_i32, %c0_i32_0 : i32, i32
  }
}

</mosaic_0001>

<bundles_post_ra>
// kernel: rg_discriminator.4
= control target key start
LH: loop header
LB: loop body
LE: loop exit
PB: predicated region body
PF: predicated region fallthrough
CT: control target
= control target key end

     0   :  { %s3169_s18 = smov 0   ;;  %s3530_s0 = inlined_call_operand.vmem [shape: f32[1024,4], index: 0, kind: input, shape index: {}]   ;;  %s3531_s1 = inlined_call_operand.vmem [shape: f32[4,128], index: 1, kind: input, shape index: {}]   ;;  %s3532_s2 = inlined_call_operand.vmem [shape: f32[4,128], index: 2, kind: input, shape index: {}]   ;;  %s3533_s3 = inlined_call_operand.vmem [shape: f32[1,128], index: 3, kind: input, shape index: {}]   ;;  %s3534_s4 = inlined_call_operand.vmem [shape: bf16[1024,128], index: 4, kind: output, shape index: {0}]   ;;  %s3535_s5 = inlined_call_operand.vmem [shape: bf16[1024,128], index: 5, kind: output, shape index: {1}]  }
   0x1 LB: > { %s2015_s19 = sadd.s32 4294967295, %s3137_s18   ;;  %p2019_p0 = scmp.ge.s32.totalorder %s3137_s18, 1  ;;  %s3137_s18 = sphi %s3169_s18, %s16_s18  }
   0x2   : > { %p191_p1 = scmp.lt.s32.totalorder %s3137_s18, 3 }
   0x4   : > { %p192_p2 = pnand %p2019_p0, %p191_p1 }
   0x5   : > { %vm500_vm0 = vcmask (!%p192_p2), 1043456   ;;  %v1209_v0 = vld [vmem:[%s3532_s2] sm:$0xf] (!%p192_p2)  ;;  %s2020_s24 = sshll.u32 (!%p192_p2), %s2015_s19, 6  ;;  %vm307_vm1 = vcmask (!%p192_p2), 31744  }
   0x6   : > { %195 = sbr.rel (%p192_p2) target bundleno = 360 (0x168), region = 36  ;;  %v306_v1 = vld [vmem:[%s3531_s1] sm:$0xf] (!%p192_p2)  ;;  %3025 = vmatprep.subr.msk.mxu1 (!%p192_p2), %vm500_vm0, %v1209_v0  ;;  %p225_p3 = scmp.lt.s32.totalorder (!%p192_p2), %s2020_s24, 127 }
   0x7   : > { %2927 = vmatprep.subr.msk.mxu0 (!%p192_p2), %vm500_vm0, %v306_v1  ;;  %3026 = vmatpush3.msk.msra.mxu1 (!%p192_p2), %vm500_vm0, %v1209_v0 }
   0x8   : > { %2928 = vmatpush3.msk.msra.mxu0 (!%p192_p2), %vm500_vm0, %v306_v1 }
   0xd   : > { %s3537_s24 = smov (!%p225_p3, %s2020_s24), 127 }
   0xe   : > { %s2021_s25 = sshll.u32 %s3537_s24, 3  ;;  %s2023_s6 = sshll.u32 %s3537_s24, 2 }
   0xf   : > { %s3189_s28 = scalar_lea.vmem %s3530_s0, %s2021_s25  ;;  %s3393_s9 = scalar_lea.vmem %s3534_s4, %s2023_s6 }
  0x10   : > { %v242_v2 = vld [vmem:[%s3189_s28] sm:$0xff]  ;;  %v243_v3 = vld [vmem:[%s3189_s28 + $0x8] sm:$0xff]  ;;  %v244_v4 = vld [vmem:[%s3189_s28 + $0x10] sm:$0xff]  ;;  %s3399_s12 = scalar_lea.vmem %s3535_s5, %s2023_s6 }
  0x11   : > { %3027 = vmatprep.mubr.msk.f32.mxu1 %vm307_vm1, %v242_v2  ;;  %2929 = vmatprep.mubr.msk.f32.mxu0 %vm307_vm1, %v242_v2  ;;  %v245_v5 = vld [vmem:[%s3189_s28 + $0x18] sm:$0xff]  ;;  %v246_v6 = vld [vmem:[%s3189_s28 + $0x20] sm:$0xff]  ;;  %v247_v7 = vld [vmem:[%s3189_s28 + $0x28] sm:$0xff] }
  0x12   : > { %3028 = vmatmul.mubr.msk.f32.vlgmr.msra.gmra.mrb[0].mxu1 %vm307_vm1, %v243_v3  ;;  %2930 = vmatmul.mubr.msk.f32.vlgmr.msra.gmra.mrb[0].mxu0 %vm307_vm1, %v243_v3  ;;  %v248_v8 = vld [vmem:[%s3189_s28 + $0x30] sm:$0xff]  ;;  %v249_v9 = vld [vmem:[%s3189_s28 + $0x38] sm:$0xff]  ;;  %v250_v10 = vld [vmem:[%s3189_s28 + $0x40] sm:$0xff] }
  0x13   : > { %3030 = vmatprep.mubr.msk.f32.mxu1 %vm307_vm1, %v244_v4  ;;  %2932 = vmatprep.mubr.msk.f32.mxu0 %vm307_vm1, %v244_v4  ;;  %v251_v11 = vld [vmem:[%s3189_s28 + $0x48] sm:$0xff]  ;;  %v252_v12 = vld [vmem:[%s3189_s28 + $0x50] sm:$0xff]  ;;  %v253_v13 = vld [vmem:[%s3189_s28 + $0x58] sm:$0xff] }
  0x14   : > { %v254_v14 = vld [vmem:[%s3189_s28 + $0x60] sm:$0xff]  ;;  %v255_v15 = vld [vmem:[%s3189_s28 + $0x68] sm:$0xff]  ;;  %v256_v16 = vld [vmem:[%s3189_s28 + $0x70] sm:$0xff] }
  0x15   : > { %v257_v17 = vld [vmem:[%s3189_s28 + $0x78] sm:$0xff]  ;;  %v258_v18 = vld [vmem:[%s3189_s28 + $0x80] sm:$0xff]  ;;  %v259_v19 = vld [vmem:[%s3189_s28 + $0x88] sm:$0xff] }
  0x16   : > { %3031 = vmatmul.mubr.msk.f32.gmra.mrb[2].mxu1 %vm307_vm1, %v245_v5  ;;  %2933 = vmatmul.mubr.msk.f32.gmra.mrb[2].mxu0 %vm307_vm1, %v245_v5  ;;  %v260_v20 = vld [vmem:[%s3189_s28 + $0x90] sm:$0xff]  ;;  %v261_v21 = vld [vmem:[%s3189_s28 + $0x98] sm:$0xff]  ;;  %v262_v22 = vld [vmem:[%s3189_s28 + $0xa0] sm:$0xff] }
  0x17   : > { %3033 = vmatprep.mubr.msk.f32.mxu1 %vm307_vm1, %v246_v6  ;;  %2935 = vmatprep.mubr.msk.f32.mxu0 %vm307_vm1, %v246_v6  ;;  %v263_v23 = vld [vmem:[%s3189_s28 + $0xa8] sm:$0xff]  ;;  %v264_v24 = vld [vmem:[%s3189_s28 + $0xb0] sm:$0xff]  ;;  %v265_v25 = vld [vmem:[%s3189_s28 + $0xb8] sm:$0xff] }
  0x18   : > { %v266_v26 = vld [vmem:[%s3189_s28 + $0xc0] sm:$0xff]  ;;  %v267_v27 = vld [vmem:[%s3189_s28 + $0xc8] sm:$0xff]  ;;  %v268_v28 = vld [vmem:[%s3189_s28 + $0xd0] sm:$0xff] }
  0x19   : > { %v269_v29 = vld [vmem:[%s3189_s28 + $0xd8] sm:$0xff]  ;;  %v270_v30 = vld [vmem:[%s3189_s28 + $0xe0] sm:$0xff]  ;;  %v271_v31 = vld [vmem:[%s3189_s28 + $0xe8] sm:$0xff] }
  0x1a   : > { %3034 = vmatmul.mubr.msk.f32.gmra.mrb[4].mxu1 %vm307_vm1, %v247_v7  ;;  %2936 = vmatmul.mubr.msk.f32.gmra.mrb[4].mxu0 %vm307_vm1, %v247_v7  ;;  %v272_v32 = vld [vmem:[%s3189_s28 + $0xf0] sm:$0xff]  ;;  %v273_v33 = vld [vmem:[%s3189_s28 + $0xf8] sm:$0xff]  ;;  %v274_v34 = vld [vmem:[%s3189_s28 + $0x100] sm:$0xff] }
  0x1b   : > { %3036 = vmatprep.mubr.msk.f32.mxu1 %vm307_vm1, %v248_v8  ;;  %2938 = vmatprep.mubr.msk.f32.mxu0 %vm307_vm1, %v248_v8  ;;  %v275_v35 = vld [vmem:[%s3189_s28 + $0x108] sm:$0xff]  ;;  %v276_v36 = vld [vmem:[%s3189_s28 + $0x110] sm:$0xff]  ;;  %v277_v37 = vld [vmem:[%s3189_s28 + $0x118] sm:$0xff] }
  0x1c   : > { %v278_v38 = vld [vmem:[%s3189_s28 + $0x120] sm:$0xff]  ;;  %v279_v39 = vld [vmem:[%s3189_s28 + $0x128] sm:$0xff]  ;;  %v280_v40 = vld [vmem:[%s3189_s28 + $0x130] sm:$0xff] }
  0x1d   : > { %v281_v41 = vld [vmem:[%s3189_s28 + $0x138] sm:$0xff]  ;;  %v282_v42 = vld [vmem:[%s3189_s28 + $0x140] sm:$0xff]  ;;  %v283_v43 = vld [vmem:[%s3189_s28 + $0x148] sm:$0xff] }
  0x1e   : > { %3037 = vmatmul.mubr.msk.f32.gmra.mrb[6].mxu1 %vm307_vm1, %v249_v9  ;;  %2939 = vmatmul.mubr.msk.f32.gmra.mrb[6].mxu0 %vm307_vm1, %v249_v9  ;;  %v284_v44 = vld [vmem:[%s3189_s28 + $0x150] sm:$0xff]  ;;  %v285_v45 = vld [vmem:[%s3189_s28 + $0x158] sm:$0xff]  ;;  %v286_v46 = vld [vmem:[%s3189_s28 + $0x160] sm:$0xff] }
  0x1f   : > { %3039 = vmatprep.mubr.msk.f32.mxu1 %vm307_vm1, %v250_v10  ;;  %2941 = vmatprep.mubr.msk.f32.mxu0 %vm307_vm1, %v250_v10  ;;  %v287_v47 = vld [vmem:[%s3189_s28 + $0x168] sm:$0xff]  ;;  %v288_v48 = vld [vmem:[%s3189_s28 + $0x170] sm:$0xff]  ;;  %v289_v49 = vld [vmem:[%s3189_s28 + $0x178] sm:$0xff] }
  0x20   : > { %v290_v50 = vld [vmem:[%s3189_s28 + $0x180] sm:$0xff]  ;;  %v291_v51 = vld [vmem:[%s3189_s28 + $0x188] sm:$0xff]  ;;  %v292_v52 = vld [vmem:[%s3189_s28 + $0x190] sm:$0xff] }
  0x21   : > { %v293_v53 = vld [vmem:[%s3189_s28 + $0x198] sm:$0xff]  ;;  %v294_v54 = vld [vmem:[%s3189_s28 + $0x1a0] sm:$0xff]  ;;  %v295_v55 = vld [vmem:[%s3189_s28 + $0x1a8] sm:$0xff] }
  0x22   : > { %3040 = vmatmul.mubr.msk.f32.gmra.mrb[8].mxu1 %vm307_vm1, %v251_v11  ;;  %2942 = vmatmul.mubr.msk.f32.gmra.mrb[8].mxu0 %vm307_vm1, %v251_v11  ;;  %v296_v56 = vld [vmem:[%s3189_s28 + $0x1b0] sm:$0xff]  ;;  %v297_v57 = vld [vmem:[%s3189_s28 + $0x1b8] sm:$0xff]  ;;  %v298_v58 = vld [vmem:[%s3189_s28 + $0x1c0] sm:$0xff] }
  0x23   : > { %3042 = vmatprep.mubr.msk.f32.mxu1 %vm307_vm1, %v252_v12  ;;  %2944 = vmatprep.mubr.msk.f32.mxu0 %vm307_vm1, %v252_v12  ;;  %v299_v59 = vld [vmem:[%s3189_s28 + $0x1c8] sm:$0xff]  ;;  %v300_v60 = vld [vmem:[%s3189_s28 + $0x1d0] sm:$0xff]  ;;  %v301_v61 = vld [vmem:[%s3189_s28 + $0x1d8] sm:$0xff] }
  0x24   : > { %v302_v62 = vld [vmem:[%s3189_s28 + $0x1e0] sm:$0xff]  ;;  %v303_v63 = vld [vmem:[%s3189_s28 + $0x1e8] sm:$0xff]  ;;  %v304_v0 = vld [vmem:[%s3189_s28 + $0x1f0] sm:$0xff] }
  0x25   : > { %v305_v1 = vld [vmem:[%s3189_s28 + $0x1f8] sm:$0xff]  ;;  %v3386_v2 = vld [vmem:[%s3533_s3] ss:$0 sm:$0xff] }
  0x26   : > { %3043 = vmatmul.mubr.msk.f32.gmra.mrb[10].mxu1 %vm307_vm1, %v253_v13  ;;  %2945 = vmatmul.mubr.msk.f32.gmra.mrb[10].mxu0 %vm307_vm1, %v253_v13 }
  0x27   : > { %3045 = vmatprep.mubr.msk.f32.mxu1 %vm307_vm1, %v254_v14  ;;  %2947 = vmatprep.mubr.msk.f32.mxu0 %vm307_vm1, %v254_v14 }
  0x2a   : > { %3046 = vmatmul.mubr.msk.f32.gmra.mrb[12].mxu1 %vm307_vm1, %v255_v15  ;;  %2948 = vmatmul.mubr.msk.f32.gmra.mrb[12].mxu0 %vm307_vm1, %v255_v15 }
  0x2b   : > { %3048 = vmatprep.mubr.msk.f32.mxu1 %vm307_vm1, %v256_v16  ;;  %2950 = vmatprep.mubr.msk.f32.mxu0 %vm307_vm1, %v256_v16 }
  0x2e   : > { %3049 = vmatmul.mubr.msk.f32.gmra.mrb[14].mxu1 %vm307_vm1, %v257_v17  ;;  %2951 = vmatmul.mubr.msk.f32.gmra.mrb[14].mxu0 %vm307_vm1, %v257_v17 }
  0x2f   : > { %3051 = vmatprep.mubr.msk.f32.mxu1 %vm307_vm1, %v258_v18  ;;  %2953 = vmatprep.mubr.msk.f32.mxu0 %vm307_vm1, %v258_v18 }
  0x32   : > { %3052 = vmatmul.mubr.msk.f32.gmra.mrb[16].mxu1 %vm307_vm1, %v259_v19  ;;  %2954 = vmatmul.mubr.msk.f32.gmra.mrb[16].mxu0 %vm307_vm1, %v259_v19 }
  0x33   : > { %3054 = vmatprep.mubr.msk.f32.mxu1 %vm307_vm1, %v260_v20  ;;  %2956 = vmatprep.mubr.msk.f32.mxu0 %vm307_vm1, %v260_v20 }
  0x36   : > { %3055 = vmatmul.mubr.msk.f32.gmra.mrb[18].mxu1 %vm307_vm1, %v261_v21  ;;  %2957 = vmatmul.mubr.msk.f32.gmra.mrb[18].mxu0 %vm307_vm1, %v261_v21 }
  0x37   : > { %3057 = vmatprep.mubr.msk.f32.mxu1 %vm307_vm1, %v262_v22  ;;  %2959 = vmatprep.mubr.msk.f32.mxu0 %vm307_vm1, %v262_v22 }
  0x3a   : > { %3058 = vmatmul.mubr.msk.f32.gmra.mrb[20].mxu1 %vm307_vm1, %v263_v23  ;;  %2960 = vmatmul.mubr.msk.f32.gmra.mrb[20].mxu0 %vm307_vm1, %v263_v23 }
  0x3b   : > { %3060 = vmatprep.mubr.msk.f32.mxu1 %vm307_vm1, %v264_v24  ;;  %2962 = vmatprep.mubr.msk.f32.mxu0 %vm307_vm1, %v264_v24 }
  0x3e   : > { %3061 = vmatmul.mubr.msk.f32.gmra.mrb[22].mxu1 %vm307_vm1, %v265_v25  ;;  %2963 = vmatmul.mubr.msk.f32.gmra.mrb[22].mxu0 %vm307_vm1, %v265_v25 }
  0x3f   : > { %3063 = vmatprep.mubr.msk.f32.mxu1 %vm307_vm1, %v266_v26  ;;  %2965 = vmatprep.mubr.msk.f32.mxu0 %vm307_vm1, %v266_v26 }
  0x42   : > { %3064 = vmatmul.mubr.msk.f32.gmra.mrb[24].mxu1 %vm307_vm1, %v267_v27  ;;  %2966 = vmatmul.mubr.msk.f32.gmra.mrb[24].mxu0 %vm307_vm1, %v267_v27 }
  0x43   : > { %3066 = vmatprep.mubr.msk.f32.mxu1 %vm307_vm1, %v268_v28  ;;  %2968 = vmatprep.mubr.msk.f32.mxu0 %vm307_vm1, %v268_v28 }
  0x46   : > { %3067 = vmatmul.mubr.msk.f32.gmra.mrb[26].mxu1 %vm307_vm1, %v269_v29  ;;  %2969 = vmatmul.mubr.msk.f32.gmra.mrb[26].mxu0 %vm307_vm1, %v269_v29 }
  0x47   : > { %3069 = vmatprep.mubr.msk.f32.mxu1 %vm307_vm1, %v270_v30  ;;  %2971 = vmatprep.mubr.msk.f32.mxu0 %vm307_vm1, %v270_v30 }
  0x4a   : > { %3070 = vmatmul.mubr.msk.f32.gmra.mrb[28].mxu1 %vm307_vm1, %v271_v31  ;;  %2972 = vmatmul.mubr.msk.f32.gmra.mrb[28].mxu0 %vm307_vm1, %v271_v31 }
  0x4b   : > { %3072 = vmatprep.mubr.msk.f32.mxu1 %vm307_vm1, %v272_v32  ;;  %2974 = vmatprep.mubr.msk.f32.mxu0 %vm307_vm1, %v272_v32 }
  0x4e   : > { %3073 = vmatmul.mubr.msk.f32.gmra.mrb[30].mxu1 %vm307_vm1, %v273_v33  ;;  %2975 = vmatmul.mubr.msk.f32.gmra.mrb[30].mxu0 %vm307_vm1, %v273_v33 }
  0x4f   : > { %3075 = vmatprep.mubr.msk.f32.mxu1 %vm307_vm1, %v274_v34  ;;  %2977 = vmatprep.mubr.msk.f32.mxu0 %vm307_vm1, %v274_v34 }
  0x52   : > { %3076 = vmatmul.mubr.msk.f32.gmra.mrb[32].mxu1 %vm307_vm1, %v275_v35  ;;  %2978 = vmatmul.mubr.msk.f32.gmra.mrb[32].mxu0 %vm307_vm1, %v275_v35 }
  0x53   : > { %3078 = vmatprep.mubr.msk.f32.mxu1 %vm307_vm1, %v276_v36  ;;  %2980 = vmatprep.mubr.msk.f32.mxu0 %vm307_vm1, %v276_v36 }
  0x56   : > { %3079 = vmatmul.mubr.msk.f32.gmra.mrb[34].mxu1 %vm307_vm1, %v277_v37  ;;  %2981 = vmatmul.mubr.msk.f32.gmra.mrb[34].mxu0 %vm307_vm1, %v277_v37 }
  0x57   : > { %3081 = vmatprep.mubr.msk.f32.mxu1 %vm307_vm1, %v278_v38  ;;  %2983 = vmatprep.mubr.msk.f32.mxu0 %vm307_vm1, %v278_v38 }
  0x5a   : > { %3082 = vmatmul.mubr.msk.f32.gmra.mrb[36].mxu1 %vm307_vm1, %v279_v39  ;;  %2984 = vmatmul.mubr.msk.f32.gmra.mrb[36].mxu0 %vm307_vm1, %v279_v39 }
  0x5b   : > { %3084 = vmatprep.mubr.msk.f32.mxu1 %vm307_vm1, %v280_v40  ;;  %2986 = vmatprep.mubr.msk.f32.mxu0 %vm307_vm1, %v280_v40 }
  0x5e   : > { %3085 = vmatmul.mubr.msk.f32.gmra.mrb[38].mxu1 %vm307_vm1, %v281_v41  ;;  %2987 = vmatmul.mubr.msk.f32.gmra.mrb[38].mxu0 %vm307_vm1, %v281_v41 }
  0x5f   : > { %3087 = vmatprep.mubr.msk.f32.mxu1 %vm307_vm1, %v282_v42  ;;  %2989 = vmatprep.mubr.msk.f32.mxu0 %vm307_vm1, %v282_v42 }
  0x62   : > { %3088 = vmatmul.mubr.msk.f32.gmra.mrb[40].mxu1 %vm307_vm1, %v283_v43  ;;  %2990 = vmatmul.mubr.msk.f32.gmra.mrb[40].mxu0 %vm307_vm1, %v283_v43 }
  0x63   : > { %3090 = vmatprep.mubr.msk.f32.mxu1 %vm307_vm1, %v284_v44  ;;  %2992 = vmatprep.mubr.msk.f32.mxu0 %vm307_vm1, %v284_v44 }
  0x66   : > { %3091 = vmatmul.mubr.msk.f32.gmra.mrb[42].mxu1 %vm307_vm1, %v285_v45  ;;  %2993 = vmatmul.mubr.msk.f32.gmra.mrb[42].mxu0 %vm307_vm1, %v285_v45 }
  0x67   : > { %3093 = vmatprep.mubr.msk.f32.mxu1 %vm307_vm1, %v286_v46  ;;  %2995 = vmatprep.mubr.msk.f32.mxu0 %vm307_vm1, %v286_v46 }
  0x6a   : > { %3094 = vmatmul.mubr.msk.f32.gmra.mrb[44].mxu1 %vm307_vm1, %v287_v47  ;;  %2996 = vmatmul.mubr.msk.f32.gmra.mrb[44].mxu0 %vm307_vm1, %v287_v47 }
  0x6b   : > { %3096 = vmatprep.mubr.msk.f32.mxu1 %vm307_vm1, %v288_v48  ;;  %2998 = vmatprep.mubr.msk.f32.mxu0 %vm307_vm1, %v288_v48 }
  0x6e   : > { %3097 = vmatmul.mubr.msk.f32.gmra.mrb[46].mxu1 %vm307_vm1, %v289_v49  ;;  %2999 = vmatmul.mubr.msk.f32.gmra.mrb[46].mxu0 %vm307_vm1, %v289_v49 }
  0x6f   : > { %3099 = vmatprep.mubr.msk.f32.mxu1 %vm307_vm1, %v290_v50  ;;  %3001 = vmatprep.mubr.msk.f32.mxu0 %vm307_vm1, %v290_v50 }
  0x72   : > { %3100 = vmatmul.mubr.msk.f32.gmra.mrb[48].mxu1 %vm307_vm1, %v291_v51  ;;  %3002 = vmatmul.mubr.msk.f32.gmra.mrb[48].mxu0 %vm307_vm1, %v291_v51 }
  0x73   : > { %3102 = vmatprep.mubr.msk.f32.mxu1 %vm307_vm1, %v292_v52  ;;  %3004 = vmatprep.mubr.msk.f32.mxu0 %vm307_vm1, %v292_v52 }
  0x76   : > { %3103 = vmatmul.mubr.msk.f32.gmra.mrb[50].mxu1 %vm307_vm1, %v293_v53  ;;  %3005 = vmatmul.mubr.msk.f32.gmra.mrb[50].mxu0 %vm307_vm1, %v293_v53 }
  0x77   : > { %3105 = vmatprep.mubr.msk.f32.mxu1 %vm307_vm1, %v294_v54  ;;  %3007 = vmatprep.mubr.msk.f32.mxu0 %vm307_vm1, %v294_v54 }
  0x7a   : > { %3106 = vmatmul.mubr.msk.f32.gmra.mrb[52].mxu1 %vm307_vm1, %v295_v55  ;;  %3008 = vmatmul.mubr.msk.f32.gmra.mrb[52].mxu0 %vm307_vm1, %v295_v55 }
  0x7b   : > { %3108 = vmatprep.mubr.msk.f32.mxu1 %vm307_vm1, %v296_v56  ;;  %3010 = vmatprep.mubr.msk.f32.mxu0 %vm307_vm1, %v296_v56 }
  0x7e   : > { %3109 = vmatmul.mubr.msk.f32.gmra.mrb[54].mxu1 %vm307_vm1, %v297_v57  ;;  %3011 = vmatmul.mubr.msk.f32.gmra.mrb[54].mxu0 %vm307_vm1, %v297_v57 }
  0x7f   : > { %3111 = vmatprep.mubr.msk.f32.mxu1 %vm307_vm1, %v298_v58  ;;  %3013 = vmatprep.mubr.msk.f32.mxu0 %vm307_vm1, %v298_v58 }
  0x82   : > { %3112 = vmatmul.mubr.msk.f32.gmra.mrb[56].mxu1 %vm307_vm1, %v299_v59  ;;  %3014 = vmatmul.mubr.msk.f32.gmra.mrb[56].mxu0 %vm307_vm1, %v299_v59 }
  0x83   : > { %3114 = vmatprep.mubr.msk.f32.mxu1 %vm307_vm1, %v300_v60  ;;  %3016 = vmatprep.mubr.msk.f32.mxu0 %vm307_vm1, %v300_v60 }
  0x86   : > { %3115 = vmatmul.mubr.msk.f32.gmra.mrb[58].mxu1 %vm307_vm1, %v301_v61  ;;  %3017 = vmatmul.mubr.msk.f32.gmra.mrb[58].mxu0 %vm307_vm1, %v301_v61 }
  0x87   : > { %3117 = vmatprep.mubr.msk.f32.mxu1 %vm307_vm1, %v302_v62  ;;  %3019 = vmatprep.mubr.msk.f32.mxu0 %vm307_vm1, %v302_v62 }
  0x8a   : > { %3118 = vmatmul.mubr.msk.f32.gmra.mrb[60].mxu1 %vm307_vm1, %v303_v63  ;;  %3020 = vmatmul.mubr.msk.f32.gmra.mrb[60].mxu0 %vm307_vm1, %v303_v63 }
  0x8b   : > { %3120 = vmatprep.mubr.msk.f32.mxu1 %vm307_vm1, %v304_v0  ;;  %3022 = vmatprep.mubr.msk.f32.mxu0 %vm307_vm1, %v304_v0 }
  0x8e   : > { %3121 = vmatmul.mubr.msk.f32.gmra.mrb[62].mxu1 %vm307_vm1, %v305_v1  ;;  %3023 = vmatmul.mubr.msk.f32.gmra.mrb[62].mxu0 %vm307_vm1, %v305_v1 }
  0xe5   : > { %v3029_v3 = vpop.f32.mrb[0].mxu1  ;;  %v2931_v4 = vpop.f32.mrb[0].mxu0 }
  0xe6   : > { %v1292_v5 = vadd.f32 %v3029_v3, %v3386_v2  ;;  %v1286_v6 = vpop.f32.mrb[1].mxu1  ;;  %v570_v7 = vpop.f32.mrb[1].mxu0 }
  0xe7   : > { %v1287_v8 = vadd.f32 %v3386_v2, %v1286_v6  ;;  %v2418_v9 = vpack.c.bf16 %v2931_v4, %v570_v7 }
  0xe9   : > { %v2578_v10 = vpack.c.bf16 %v1292_v5, %v1287_v8  ;;  %2419 = vst [vmem:[%s3393_s9] sm:$0xff] %v2418_v9   ;;  %v3032_v11 = vpop.f32.mrb[2].mxu1  ;;  %v2934_v12 = vpop.f32.mrb[2].mxu0 }
  0xea   : > { %v1302_v13 = vadd.f32 %v3032_v11, %v3386_v2  ;;  %v1296_v14 = vpop.f32.mrb[3].mxu1  ;;  %v580_v15 = vpop.f32.mrb[3].mxu0 }
  0xeb   : > { %2579 = vst [vmem:[%s3399_s12] sm:$0xff] %v2578_v10   ;;  %v1297_v16 = vadd.f32 %v3386_v2, %v1296_v14  ;;  %v2423_v17 = vpack.c.bf16 %v2934_v12, %v580_v15 }
  0xed   : > { %v2583_v18 = vpack.c.bf16 %v1302_v13, %v1297_v16  ;;  %2735 = vst [vmem:[%s3393_s9 + $0x8] sm:$0xff] %v2423_v17   ;;  %v3035_v19 = vpop.f32.mrb[4].mxu1  ;;  %v2937_v20 = vpop.f32.mrb[4].mxu0 }
  0xee   : > { %v1312_v21 = vadd.f32 %v3035_v19, %v3386_v2  ;;  %v1306_v22 = vpop.f32.mrb[5].mxu1  ;;  %v590_v23 = vpop.f32.mrb[5].mxu0 }
  0xef   : > { %2766 = vst [vmem:[%s3399_s12 + $0x8] sm:$0xff] %v2583_v18   ;;  %v1307_v24 = vadd.f32 %v3386_v2, %v1306_v22  ;;  %v2428_v25 = vpack.c.bf16 %v2937_v20, %v590_v23 }
  0xf1   : > { %v2588_v26 = vpack.c.bf16 %v1312_v21, %v1307_v24  ;;  %2736 = vst [vmem:[%s3393_s9 + $0x10] sm:$0xff] %v2428_v25   ;;  %v3038_v27 = vpop.f32.mrb[6].mxu1  ;;  %v2940_v28 = vpop.f32.mrb[6].mxu0 }
  0xf2   : > { %v1322_v29 = vadd.f32 %v3038_v27, %v3386_v2  ;;  %v1316_v30 = vpop.f32.mrb[7].mxu1  ;;  %v600_v31 = vpop.f32.mrb[7].mxu0 }
  0xf3   : > { %2767 = vst [vmem:[%s3399_s12 + $0x10] sm:$0xff] %v2588_v26   ;;  %v1317_v32 = vadd.f32 %v3386_v2, %v1316_v30  ;;  %v2433_v33 = vpack.c.bf16 %v2940_v28, %v600_v31 }
  0xf5   : > { %v2593_v34 = vpack.c.bf16 %v1322_v29, %v1317_v32  ;;  %2737 = vst [vmem:[%s3393_s9 + $0x18] sm:$0xff] %v2433_v33   ;;  %v3041_v35 = vpop.f32.mrb[8].mxu1  ;;  %v2943_v36 = vpop.f32.mrb[8].mxu0 }
  0xf6   : > { %v1332_v37 = vadd.f32 %v3041_v35, %v3386_v2  ;;  %v1326_v38 = vpop.f32.mrb[9].mxu1  ;;  %v610_v39 = vpop.f32.mrb[9].mxu0 }
  0xf7   : > { %2768 = vst [vmem:[%s3399_s12 + $0x18] sm:$0xff] %v2593_v34   ;;  %v1327_v40 = vadd.f32 %v3386_v2, %v1326_v38  ;;  %v2438_v41 = vpack.c.bf16 %v2943_v36, %v610_v39 }
  0xf9   : > { %v2598_v42 = vpack.c.bf16 %v1332_v37, %v1327_v40  ;;  %2738 = vst [vmem:[%s3393_s9 + $0x20] sm:$0xff] %v2438_v41   ;;  %v3044_v43 = vpop.f32.mrb[10].mxu1  ;;  %v2946_v44 = vpop.f32.mrb[10].mxu0 }
  0xfa   : > { %v1342_v45 = vadd.f32 %v3044_v43, %v3386_v2  ;;  %v1336_v46 = vpop.f32.mrb[11].mxu1  ;;  %v620_v47 = vpop.f32.mrb[11].mxu0 }
  0xfb   : > { %2769 = vst [vmem:[%s3399_s12 + $0x20] sm:$0xff] %v2598_v42   ;;  %v1337_v48 = vadd.f32 %v3386_v2, %v1336_v46  ;;  %v2443_v49 = vpack.c.bf16 %v2946_v44, %v620_v47 }
  0xfd   : > { %v2603_v50 = vpack.c.bf16 %v1342_v45, %v1337_v48  ;;  %2739 = vst [vmem:[%s3393_s9 + $0x28] sm:$0xff] %v2443_v49   ;;  %v3047_v51 = vpop.f32.mrb[12].mxu1  ;;  %v2949_v52 = vpop.f32.mrb[12].mxu0 }
  0xfe   : > { %v1352_v53 = vadd.f32 %v3047_v51, %v3386_v2  ;;  %v1346_v54 = vpop.f32.mrb[13].mxu1  ;;  %v630_v55 = vpop.f32.mrb[13].mxu0 }
  0xff   : > { %2770 = vst [vmem:[%s3399_s12 + $0x28] sm:$0xff] %v2603_v50   ;;  %v1347_v56 = vadd.f32 %v3386_v2, %v1346_v54  ;;  %v2448_v57 = vpack.c.bf16 %v2949_v52, %v630_v55 }
 0x101   : > { %v2608_v58 = vpack.c.bf16 %v1352_v53, %v1347_v56  ;;  %2740 = vst [vmem:[%s3393_s9 + $0x30] sm:$0xff] %v2448_v57   ;;  %v3050_v59 = vpop.f32.mrb[14].mxu1  ;;  %v2952_v60 = vpop.f32.mrb[14].mxu0 }
 0x102   : > { %v1362_v61 = vadd.f32 %v3050_v59, %v3386_v2  ;;  %v1356_v62 = vpop.f32.mrb[15].mxu1  ;;  %v640_v63 = vpop.f32.mrb[15].mxu0 }
 0x103   : > { %2771 = vst [vmem:[%s3399_s12 + $0x30] sm:$0xff] %v2608_v58   ;;  %v1357_v0 = vadd.f32 %v3386_v2, %v1356_v62  ;;  %v2453_v1 = vpack.c.bf16 %v2952_v60, %v640_v63 }
 0x105   : > { %v2613_v3 = vpack.c.bf16 %v1362_v61, %v1357_v0  ;;  %2741 = vst [vmem:[%s3393_s9 + $0x38] sm:$0xff] %v2453_v1   ;;  %v3053_v4 = vpop.f32.mrb[16].mxu1  ;;  %v2955_v5 = vpop.f32.mrb[16].mxu0 }
 0x106   : > { %v1372_v6 = vadd.f32 %v3053_v4, %v3386_v2  ;;  %v1366_v7 = vpop.f32.mrb[17].mxu1  ;;  %v650_v8 = vpop.f32.mrb[17].mxu0 }
 0x107   : > { %2772 = vst [vmem:[%s3399_s12 + $0x38] sm:$0xff] %v2613_v3   ;;  %v1367_v9 = vadd.f32 %v3386_v2, %v1366_v7  ;;  %v2458_v10 = vpack.c.bf16 %v2955_v5, %v650_v8 }
 0x109   : > { %v2618_v11 = vpack.c.bf16 %v1372_v6, %v1367_v9  ;;  %2742 = vst [vmem:[%s3393_s9 + $0x40] sm:$0xff] %v2458_v10   ;;  %v3056_v12 = vpop.f32.mrb[18].mxu1  ;;  %v2958_v13 = vpop.f32.mrb[18].mxu0 }
 0x10a   : > { %v1382_v14 = vadd.f32 %v3056_v12, %v3386_v2  ;;  %v1376_v15 = vpop.f32.mrb[19].mxu1  ;;  %v660_v16 = vpop.f32.mrb[19].mxu0 }
 0x10b   : > { %2773 = vst [vmem:[%s3399_s12 + $0x40] sm:$0xff] %v2618_v11   ;;  %v1377_v17 = vadd.f32 %v3386_v2, %v1376_v15  ;;  %v2463_v18 = vpack.c.bf16 %v2958_v13, %v660_v16 }
 0x10d   : > { %v2623_v19 = vpack.c.bf16 %v1382_v14, %v1377_v17  ;;  %2743 = vst [vmem:[%s3393_s9 + $0x48] sm:$0xff] %v2463_v18   ;;  %v3059_v20 = vpop.f32.mrb[20].mxu1  ;;  %v2961_v21 = vpop.f32.mrb[20].mxu0 }
 0x10e   : > { %v1392_v22 = vadd.f32 %v3059_v20, %v3386_v2  ;;  %v1386_v23 = vpop.f32.mrb[21].mxu1  ;;  %v670_v24 = vpop.f32.mrb[21].mxu0 }
 0x10f   : > { %2774 = vst [vmem:[%s3399_s12 + $0x48] sm:$0xff] %v2623_v19   ;;  %v1387_v25 = vadd.f32 %v3386_v2, %v1386_v23  ;;  %v2468_v26 = vpack.c.bf16 %v2961_v21, %v670_v24 }
 0x111   : > { %v2628_v27 = vpack.c.bf16 %v1392_v22, %v1387_v25  ;;  %2744 = vst [vmem:[%s3393_s9 + $0x50] sm:$0xff] %v2468_v26   ;;  %v3062_v28 = vpop.f32.mrb[22].mxu1  ;;  %v2964_v29 = vpop.f32.mrb[22].mxu0 }
 0x112   : > { %v1402_v30 = vadd.f32 %v3062_v28, %v3386_v2  ;;  %v1396_v31 = vpop.f32.mrb[23].mxu1  ;;  %v680_v32 = vpop.f32.mrb[23].mxu0 }
 0x113   : > { %2775 = vst [vmem:[%s3399_s12 + $0x50] sm:$0xff] %v2628_v27   ;;  %v1397_v33 = vadd.f32 %v3386_v2, %v1396_v31  ;;  %v2473_v34 = vpack.c.bf16 %v2964_v29, %v680_v32 }
 0x115   : > { %v2633_v35 = vpack.c.bf16 %v1402_v30, %v1397_v33  ;;  %2745 = vst [vmem:[%s3393_s9 + $0x58] sm:$0xff] %v2473_v34   ;;  %v3065_v36 = vpop.f32.mrb[24].mxu1  ;;  %v2967_v37 = vpop.f32.mrb[24].mxu0 }
 0x116   : > { %v1412_v38 = vadd.f32 %v3065_v36, %v3386_v2  ;;  %v1406_v39 = vpop.f32.mrb[25].mxu1  ;;  %v690_v40 = vpop.f32.mrb[25].mxu0 }
 0x117   : > { %2776 = vst [vmem:[%s3399_s12 + $0x58] sm:$0xff] %v2633_v35   ;;  %v1407_v41 = vadd.f32 %v3386_v2, %v1406_v39  ;;  %v2478_v42 = vpack.c.bf16 %v2967_v37, %v690_v40 }
 0x119   : > { %v2638_v43 = vpack.c.bf16 %v1412_v38, %v1407_v41  ;;  %2746 = vst [vmem:[%s3393_s9 + $0x60] sm:$0xff] %v2478_v42   ;;  %v3068_v44 = vpop.f32.mrb[26].mxu1  ;;  %v2970_v45 = vpop.f32.mrb[26].mxu0 }
 0x11a   : > { %v1422_v46 = vadd.f32 %v3068_v44, %v3386_v2  ;;  %v1416_v47 = vpop.f32.mrb[27].mxu1  ;;  %v700_v48 = vpop.f32.mrb[27].mxu0 }
 0x11b   : > { %2777 = vst [vmem:[%s3399_s12 + $0x60] sm:$0xff] %v2638_v43   ;;  %v1417_v49 = vadd.f32 %v3386_v2, %v1416_v47  ;;  %v2483_v50 = vpack.c.bf16 %v2970_v45, %v700_v48 }
 0x11d   : > { %v2643_v51 = vpack.c.bf16 %v1422_v46, %v1417_v49  ;;  %2747 = vst [vmem:[%s3393_s9 + $0x68] sm:$0xff] %v2483_v50   ;;  %v3071_v52 = vpop.f32.mrb[28].mxu1  ;;  %v2973_v53 = vpop.f32.mrb[28].mxu0 }
 0x11e   : > { %v1432_v54 = vadd.f32 %v3071_v52, %v3386_v2  ;;  %v1426_v55 = vpop.f32.mrb[29].mxu1  ;;  %v710_v56 = vpop.f32.mrb[29].mxu0 }
 0x11f   : > { %2778 = vst [vmem:[%s3399_s12 + $0x68] sm:$0xff] %v2643_v51   ;;  %v1427_v57 = vadd.f32 %v3386_v2, %v1426_v55  ;;  %v2488_v58 = vpack.c.bf16 %v2973_v53, %v710_v56 }
 0x121   : > { %v2648_v59 = vpack.c.bf16 %v1432_v54, %v1427_v57  ;;  %2748 = vst [vmem:[%s3393_s9 + $0x70] sm:$0xff] %v2488_v58   ;;  %v3074_v60 = vpop.f32.mrb[30].mxu1  ;;  %v2976_v61 = vpop.f32.mrb[30].mxu0 }
 0x122   : > { %v1442_v62 = vadd.f32 %v3074_v60, %v3386_v2  ;;  %v1436_v63 = vpop.f32.mrb[31].mxu1  ;;  %v720_v0 = vpop.f32.mrb[31].mxu0 }
 0x123   : > { %2779 = vst [vmem:[%s3399_s12 + $0x70] sm:$0xff] %v2648_v59   ;;  %v1437_v1 = vadd.f32 %v3386_v2, %v1436_v63  ;;  %v2493_v3 = vpack.c.bf16 %v2976_v61, %v720_v0 }
 0x125   : > { %v2653_v4 = vpack.c.bf16 %v1442_v62, %v1437_v1  ;;  %2749 = vst [vmem:[%s3393_s9 + $0x78] sm:$0xff] %v2493_v3   ;;  %v3077_v5 = vpop.f32.mrb[32].mxu1  ;;  %v2979_v6 = vpop.f32.mrb[32].mxu0 }
 0x126   : > { %v1452_v7 = vadd.f32 %v3077_v5, %v3386_v2  ;;  %v1446_v8 = vpop.f32.mrb[33].mxu1  ;;  %v730_v9 = vpop.f32.mrb[33].mxu0 }
 0x127   : > { %2780 = vst [vmem:[%s3399_s12 + $0x78] sm:$0xff] %v2653_v4   ;;  %v1447_v10 = vadd.f32 %v3386_v2, %v1446_v8  ;;  %v2498_v11 = vpack.c.bf16 %v2979_v6, %v730_v9 }
 0x129   : > { %v2658_v12 = vpack.c.bf16 %v1452_v7, %v1447_v10  ;;  %2750 = vst [vmem:[%s3393_s9 + $0x80] sm:$0xff] %v2498_v11   ;;  %v3080_v13 = vpop.f32.mrb[34].mxu1  ;;  %v2982_v14 = vpop.f32.mrb[34].mxu0 }
 0x12a   : > { %v1462_v15 = vadd.f32 %v3080_v13, %v3386_v2  ;;  %v1456_v16 = vpop.f32.mrb[35].mxu1  ;;  %v740_v17 = vpop.f32.mrb[35].mxu0 }
 0x12b   : > { %2781 = vst [vmem:[%s3399_s12 + $0x80] sm:$0xff] %v2658_v12   ;;  %v1457_v18 = vadd.f32 %v3386_v2, %v1456_v16  ;;  %v2503_v19 = vpack.c.bf16 %v2982_v14, %v740_v17 }
 0x12d   : > { %v2663_v20 = vpack.c.bf16 %v1462_v15, %v1457_v18  ;;  %2751 = vst [vmem:[%s3393_s9 + $0x88] sm:$0xff] %v2503_v19   ;;  %v3083_v21 = vpop.f32.mrb[36].mxu1  ;;  %v2985_v22 = vpop.f32.mrb[36].mxu0 }
 0x12e   : > { %v1472_v23 = vadd.f32 %v3083_v21, %v3386_v2  ;;  %v1466_v24 = vpop.f32.mrb[37].mxu1  ;;  %v750_v25 = vpop.f32.mrb[37].mxu0 }
 0x12f   : > { %2782 = vst [vmem:[%s3399_s12 + $0x88] sm:$0xff] %v2663_v20   ;;  %v1467_v26 = vadd.f32 %v3386_v2, %v1466_v24  ;;  %v2508_v27 = vpack.c.bf16 %v2985_v22, %v750_v25 }
 0x131   : > { %v2668_v28 = vpack.c.bf16 %v1472_v23, %v1467_v26  ;;  %2752 = vst [vmem:[%s3393_s9 + $0x90] sm:$0xff] %v2508_v27   ;;  %v3086_v29 = vpop.f32.mrb[38].mxu1  ;;  %v2988_v30 = vpop.f32.mrb[38].mxu0 }
 0x132   : > { %v1482_v31 = vadd.f32 %v3086_v29, %v3386_v2  ;;  %v1476_v32 = vpop.f32.mrb[39].mxu1  ;;  %v760_v33 = vpop.f32.mrb[39].mxu0 }
 0x133   : > { %2783 = vst [vmem:[%s3399_s12 + $0x90] sm:$0xff] %v2668_v28   ;;  %v1477_v34 = vadd.f32 %v3386_v2, %v1476_v32  ;;  %v2513_v35 = vpack.c.bf16 %v2988_v30, %v760_v33 }
 0x135   : > { %v2673_v36 = vpack.c.bf16 %v1482_v31, %v1477_v34  ;;  %2753 = vst [vmem:[%s3393_s9 + $0x98] sm:$0xff] %v2513_v35   ;;  %v3089_v37 = vpop.f32.mrb[40].mxu1  ;;  %v2991_v38 = vpop.f32.mrb[40].mxu0 }
 0x136   : > { %v1492_v39 = vadd.f32 %v3089_v37, %v3386_v2  ;;  %v1486_v40 = vpop.f32.mrb[41].mxu1  ;;  %v770_v41 = vpop.f32.mrb[41].mxu0 }
 0x137   : > { %2784 = vst [vmem:[%s3399_s12 + $0x98] sm:$0xff] %v2673_v36   ;;  %v1487_v42 = vadd.f32 %v3386_v2, %v1486_v40  ;;  %v2518_v43 = vpack.c.bf16 %v2991_v38, %v770_v41 }
 0x139   : > { %v2678_v44 = vpack.c.bf16 %v1492_v39, %v1487_v42  ;;  %2754 = vst [vmem:[%s3393_s9 + $0xa0] sm:$0xff] %v2518_v43   ;;  %v3092_v45 = vpop.f32.mrb[42].mxu1  ;;  %v2994_v46 = vpop.f32.mrb[42].mxu0 }
 0x13a   : > { %v1502_v47 = vadd.f32 %v3092_v45, %v3386_v2  ;;  %v1496_v48 = vpop.f32.mrb[43].mxu1  ;;  %v780_v49 = vpop.f32.mrb[43].mxu0 }
 0x13b   : > { %2785 = vst [vmem:[%s3399_s12 + $0xa0] sm:$0xff] %v2678_v44   ;;  %v1497_v50 = vadd.f32 %v3386_v2, %v1496_v48  ;;  %v2523_v51 = vpack.c.bf16 %v2994_v46, %v780_v49 }
 0x13d   : > { %v2683_v52 = vpack.c.bf16 %v1502_v47, %v1497_v50  ;;  %2755 = vst [vmem:[%s3393_s9 + $0xa8] sm:$0xff] %v2523_v51   ;;  %v3095_v53 = vpop.f32.mrb[44].mxu1  ;;  %v2997_v54 = vpop.f32.mrb[44].mxu0 }
 0x13e   : > { %v1512_v55 = vadd.f32 %v3095_v53, %v3386_v2  ;;  %v1506_v56 = vpop.f32.mrb[45].mxu1  ;;  %v790_v57 = vpop.f32.mrb[45].mxu0 }
 0x13f   : > { %2786 = vst [vmem:[%s3399_s12 + $0xa8] sm:$0xff] %v2683_v52   ;;  %v1507_v58 = vadd.f32 %v3386_v2, %v1506_v56  ;;  %v2528_v59 = vpack.c.bf16 %v2997_v54, %v790_v57 }
 0x141   : > { %v2688_v60 = vpack.c.bf16 %v1512_v55, %v1507_v58  ;;  %2756 = vst [vmem:[%s3393_s9 + $0xb0] sm:$0xff] %v2528_v59   ;;  %v3098_v61 = vpop.f32.mrb[46].mxu1  ;;  %v3000_v62 = vpop.f32.mrb[46].mxu0 }
 0x142   : > { %v1522_v63 = vadd.f32 %v3098_v61, %v3386_v2  ;;  %v1516_v0 = vpop.f32.mrb[47].mxu1  ;;  %v800_v1 = vpop.f32.mrb[47].mxu0 }
 0x143   : > { %2787 = vst [vmem:[%s3399_s12 + $0xb0] sm:$0xff] %v2688_v60   ;;  %v1517_v3 = vadd.f32 %v3386_v2, %v1516_v0  ;;  %v2533_v4 = vpack.c.bf16 %v3000_v62, %v800_v1 }
 0x145   : > { %v2693_v5 = vpack.c.bf16 %v1522_v63, %v1517_v3  ;;  %2757 = vst [vmem:[%s3393_s9 + $0xb8] sm:$0xff] %v2533_v4   ;;  %v3101_v6 = vpop.f32.mrb[48].mxu1  ;;  %v3003_v7 = vpop.f32.mrb[48].mxu0 }
 0x146   : > { %v1532_v8 = vadd.f32 %v3101_v6, %v3386_v2  ;;  %v1526_v9 = vpop.f32.mrb[49].mxu1  ;;  %v810_v10 = vpop.f32.mrb[49].mxu0 }
 0x147   : > { %2788 = vst [vmem:[%s3399_s12 + $0xb8] sm:$0xff] %v2693_v5   ;;  %v1527_v11 = vadd.f32 %v3386_v2, %v1526_v9  ;;  %v2538_v12 = vpack.c.bf16 %v3003_v7, %v810_v10 }
 0x149   : > { %v2698_v13 = vpack.c.bf16 %v1532_v8, %v1527_v11  ;;  %2758 = vst [vmem:[%s3393_s9 + $0xc0] sm:$0xff] %v2538_v12   ;;  %v3104_v14 = vpop.f32.mrb[50].mxu1  ;;  %v3006_v15 = vpop.f32.mrb[50].mxu0 }
 0x14a   : > { %v1542_v16 = vadd.f32 %v3104_v14, %v3386_v2  ;;  %v1536_v17 = vpop.f32.mrb[51].mxu1  ;;  %v820_v18 = vpop.f32.mrb[51].mxu0 }
 0x14b   : > { %2789 = vst [vmem:[%s3399_s12 + $0xc0] sm:$0xff] %v2698_v13   ;;  %v1537_v19 = vadd.f32 %v3386_v2, %v1536_v17  ;;  %v2543_v20 = vpack.c.bf16 %v3006_v15, %v820_v18 }
 0x14d   : > { %v2703_v21 = vpack.c.bf16 %v1542_v16, %v1537_v19  ;;  %2759 = vst [vmem:[%s3393_s9 + $0xc8] sm:$0xff] %v2543_v20   ;;  %v3107_v22 = vpop.f32.mrb[52].mxu1  ;;  %v3009_v23 = vpop.f32.mrb[52].mxu0 }
 0x14e   : > { %v1552_v24 = vadd.f32 %v3107_v22, %v3386_v2  ;;  %v1546_v25 = vpop.f32.mrb[53].mxu1  ;;  %v830_v26 = vpop.f32.mrb[53].mxu0 }
 0x14f   : > { %2790 = vst [vmem:[%s3399_s12 + $0xc8] sm:$0xff] %v2703_v21   ;;  %v1547_v27 = vadd.f32 %v3386_v2, %v1546_v25  ;;  %v2548_v28 = vpack.c.bf16 %v3009_v23, %v830_v26 }
 0x151   : > { %v2708_v29 = vpack.c.bf16 %v1552_v24, %v1547_v27  ;;  %2760 = vst [vmem:[%s3393_s9 + $0xd0] sm:$0xff] %v2548_v28   ;;  %v3110_v30 = vpop.f32.mrb[54].mxu1  ;;  %v3012_v31 = vpop.f32.mrb[54].mxu0 }
 0x152   : > { %v1562_v32 = vadd.f32 %v3110_v30, %v3386_v2  ;;  %v1556_v33 = vpop.f32.mrb[55].mxu1  ;;  %v840_v34 = vpop.f32.mrb[55].mxu0 }
 0x153   : > { %2791 = vst [vmem:[%s3399_s12 + $0xd0] sm:$0xff] %v2708_v29   ;;  %v1557_v35 = vadd.f32 %v3386_v2, %v1556_v33  ;;  %v2553_v36 = vpack.c.bf16 %v3012_v31, %v840_v34 }
 0x155   : > { %v2713_v37 = vpack.c.bf16 %v1562_v32, %v1557_v35  ;;  %2761 = vst [vmem:[%s3393_s9 + $0xd8] sm:$0xff] %v2553_v36   ;;  %v3113_v38 = vpop.f32.mrb[56].mxu1  ;;  %v3015_v39 = vpop.f32.mrb[56].mxu0 }
 0x156   : > { %v1572_v40 = vadd.f32 %v3113_v38, %v3386_v2  ;;  %v1566_v41 = vpop.f32.mrb[57].mxu1  ;;  %v850_v42 = vpop.f32.mrb[57].mxu0 }
 0x157   : > { %2792 = vst [vmem:[%s3399_s12 + $0xd8] sm:$0xff] %v2713_v37   ;;  %v1567_v43 = vadd.f32 %v3386_v2, %v1566_v41  ;;  %v2558_v44 = vpack.c.bf16 %v3015_v39, %v850_v42 }
 0x159   : > { %v2718_v45 = vpack.c.bf16 %v1572_v40, %v1567_v43  ;;  %2762 = vst [vmem:[%s3393_s9 + $0xe0] sm:$0xff] %v2558_v44   ;;  %v3116_v46 = vpop.f32.mrb[58].mxu1  ;;  %v3018_v47 = vpop.f32.mrb[58].mxu0 }
 0x15a   : > { %v1582_v48 = vadd.f32 %v3116_v46, %v3386_v2  ;;  %v1576_v49 = vpop.f32.mrb[59].mxu1  ;;  %v860_v50 = vpop.f32.mrb[59].mxu0 }
 0x15b   : > { %2793 = vst [vmem:[%s3399_s12 + $0xe0] sm:$0xff] %v2718_v45   ;;  %v1577_v51 = vadd.f32 %v3386_v2, %v1576_v49  ;;  %v2563_v52 = vpack.c.bf16 %v3018_v47, %v860_v50 }
 0x15d   : > { %v2723_v53 = vpack.c.bf16 %v1582_v48, %v1577_v51  ;;  %2763 = vst [vmem:[%s3393_s9 + $0xe8] sm:$0xff] %v2563_v52   ;;  %v3119_v54 = vpop.f32.mrb[60].mxu1  ;;  %v3021_v55 = vpop.f32.mrb[60].mxu0 }
 0x15e   : > { %v1592_v56 = vadd.f32 %v3119_v54, %v3386_v2  ;;  %v1586_v57 = vpop.f32.mrb[61].mxu1  ;;  %v870_v58 = vpop.f32.mrb[61].mxu0 }
 0x15f   : > { %2794 = vst [vmem:[%s3399_s12 + $0xe8] sm:$0xff] %v2723_v53   ;;  %v1587_v59 = vadd.f32 %v3386_v2, %v1586_v57  ;;  %v2568_v60 = vpack.c.bf16 %v3021_v55, %v870_v58 }
 0x161   : > { %v2728_v61 = vpack.c.bf16 %v1592_v56, %v1587_v59  ;;  %2764 = vst [vmem:[%s3393_s9 + $0xf0] sm:$0xff] %v2568_v60   ;;  %v3122_v62 = vpop.f32.mrb[62].mxu1  ;;  %v3024_v63 = vpop.f32.mrb[62].mxu0 }
 0x162   : > { %v1602_v0 = vadd.f32 %v3122_v62, %v3386_v2  ;;  %v1596_v1 = vpop.f32.mrb[63].mxu1  ;;  %v880_v3 = vpop.f32.mrb[63].mxu0 }
 0x163   : > { %2795 = vst [vmem:[%s3399_s12 + $0xf0] sm:$0xff] %v2728_v61   ;;  %v1597_v4 = vadd.f32 %v3386_v2, %v1596_v1  ;;  %v2573_v5 = vpack.c.bf16 %v3024_v63, %v880_v3 }
 0x165   : > { %v2733_v6 = vpack.c.bf16 %v1602_v0, %v1597_v4  ;;  %2765 = vst [vmem:[%s3393_s9 + $0xf8] sm:$0xff] %v2573_v5  }
 0x167   : > { %2796 = vst [vmem:[%s3399_s12 + $0xf8] sm:$0xff] %v2733_v6  }
 0x168 PF: > { %s16_s18 = sadd.s32 1, %s3137_s18  }
 0x169   : > { %p13_p4 = scmp.ge.s32.totalorder %s16_s18, 4  }
 0x16b   :  { %15 = sbr.rel (!%p13_p4) target bundleno = 1 (0x1), region = 78 }

// kernel: rg_discriminator.6
= control target key start
LH: loop header
LB: loop body
LE: loop exit
PB: predicated region body
PF: predicated region fallthrough
CT: control target
= control target key end

     0   :  { %s4028_s12 = smov 0   ;;  %s4030_s13 = smov 0   ;;  %s4751_s0 = inlined_call_operand.vmem [shape: s8[1024,1024], index: 0, kind: input, shape index: {}]   ;;  %s4752_s1 = inlined_call_operand.vmem [shape: bf16[1024,128], index: 1, kind: input, shape index: {}]   ;;  %s4753_s2 = inlined_call_operand.vmem [shape: bf16[1024,128], index: 2, kind: input, shape index: {}]   ;;  %s4754_s3 = inlined_call_operand.vmem [shape: bf16[1024,128], index: 3, kind: output, shape index: {}]  }
   0x1   :  { %s4032_s14 = smov 0  }
   0x2 LB: > { %s25_s15 = sadd.s32 1, %s4001_s13  ;;  %p3341_p0 = scmp.ge.s32.totalorder %s4005_s14, 1  ;;  %s4005_s14 = sphi %s4032_s14, %s13_s14   ;;  %s4001_s13 = sphi %s4030_s13, %s4805_s13   ;;  %s3997_s12 = sphi %s4028_s12, %s4804_s12  }
   0x3   : > { %p27_p1 = scmp.ge.s32.totalorder %s25_s15, 2  ;;  %p169_p2 = scmp.lt.s32.totalorder %s4005_s14, 3 }
   0x5   : > { %s4807_s15 = smov (%p27_p1, %s25_s15), 0  ;;  %p170_p3 = pnand %p3341_p0, %p169_p2 }
   0x7   : > { %173 = sbr.rel (%p170_p3) target bundleno = 809 (0x329), region = 32 }
   0xe   : > { %v3919_v0 = vld [vmem:[%s4752_s1] sm:$0xff]   ;;  %v4007_v1 = vmov 0   ;;  %v3921_v3 = vld [vmem:[%s4752_s1 + $0x8] sm:$0xff]   ;;  %v3923_v5 = vld [vmem:[%s4752_s1 + $0x10] sm:$0xff]   ;;  %s3342_s9 = sshll.u32 %s3997_s12, 4  ;;  %s3345_s11 = sshll.u32 %s3997_s12, 6 }
   0xf   : > { %1389 = vmatprep.subr.bf16.mxu0 %v4007_v1  ;;  %1678 = vmatprep.subr.bf16.mxu1 %v4007_v1  ;;  %v3920_v2 = vld [vmem:[%s4752_s1 + $0x80] sm:$0xff]   ;;  %v3922_v4 = vld [vmem:[%s4752_s1 + $0x88] sm:$0xff]   ;;  %v3924_v6 = vld [vmem:[%s4752_s1 + $0x90] sm:$0xff]   ;;  %p205_p4 = scmp.lt.s32.totalorder %s3342_s9, 31  ;;  %p4557_p5 = scmp.lt.s32.totalorder %s3345_s11, 127 }
  0x10   : > { %1390 = vmatpush1.bf16.msra.mxu0 %v3919_v0  ;;  %1679 = vmatpush1.bf16.msra.mxu1 %v3920_v2  ;;  %v3925_v7 = vld [vmem:[%s4752_s1 + $0x18] sm:$0xff]   ;;  %v3927_v9 = vld [vmem:[%s4752_s1 + $0x20] sm:$0xff]   ;;  %v3929_v11 = vld [vmem:[%s4752_s1 + $0x28] sm:$0xff]  }
  0x11   : > { %1391 = vmatprep.subr.bf16.mxu0 %v4007_v1  ;;  %1680 = vmatprep.subr.bf16.mxu1 %v4007_v1  ;;  %v3926_v8 = vld [vmem:[%s4752_s1 + $0x98] sm:$0xff]   ;;  %v3928_v10 = vld [vmem:[%s4752_s1 + $0xa0] sm:$0xff]   ;;  %v3930_v12 = vld [vmem:[%s4752_s1 + $0xa8] sm:$0xff]   ;;  %s4809_s9 = smov (!%p205_p4, %s3342_s9), 31  ;;  %s4811_s11 = smov (!%p4557_p5, %s3345_s11), 127 }
  0x12   : > { %v3931_v13 = vld [vmem:[%s4752_s1 + $0x30] sm:$0xff]   ;;  %v3933_v15 = vld [vmem:[%s4752_s1 + $0x38] sm:$0xff]   ;;  %s3479_s24 = sshll.u32 %s4809_s9, 6  ;;  %v3935_v17 = vld [vmem:[%s4752_s1 + $0x40] sm:$0xff]   ;;  %s3346_s12 = sshll.u32 %s4811_s11, 2 }
  0x13   : > { %v3932_v14 = vld [vmem:[%s4752_s1 + $0xb0] sm:$0xff]   ;;  %v3934_v16 = vld [vmem:[%s4752_s1 + $0xb8] sm:$0xff]   ;;  %s4116_s29 = scalar_lea.vmem %s4751_s0, %s3479_s24  ;;  %v3936_v18 = vld [vmem:[%s4752_s1 + $0xc0] sm:$0xff]   ;;  %s4579_s19 = scalar_lea.vmem %s4753_s2, %s3346_s12 }
  0x14   : > { %1392 = vmatpush1.bf16.msra.mxu0 %v3921_v3  ;;  %1681 = vmatpush1.bf16.msra.mxu1 %v3922_v4  ;;  %v4127_v19 = vld [vmem:[%s4116_s29 + $0x8] sm:$0xff]  ;;  %v4130_v20 = vld [vmem:[%s4116_s29 + $0x18] sm:$0xff]  ;;  %v3939_v25 = vld [vmem:[%s4752_s1 + $0x50] sm:$0xff]   ;;  %s4603_s22 = scalar_lea.vmem %s4754_s3, %s3346_s12 }
  0x15   : > { %1393 = vmatprep.subr.bf16.mxu0 %v4007_v1  ;;  %1682 = vmatprep.subr.bf16.mxu1 %v4007_v1  ;;  %v750_v21 = vunpack.c.l.s8.bf16 %v4127_v19  ;;  %v752_v22 = vunpack.c.l.s8.bf16 %v4130_v20  ;;  %v3937_v23 = vld [vmem:[%s4752_s1 + $0x48] sm:$0xff]   ;;  %v3940_v26 = vld [vmem:[%s4752_s1 + $0xd0] sm:$0xff]   ;;  %v3941_v27 = vld [vmem:[%s4752_s1 + $0x58] sm:$0xff]   ;;  %v758_v42 = vunpack.c.h.s8.bf16 %v4127_v19  ;;  %v760_v44 = vunpack.c.h.s8.bf16 %v4130_v20 }
  0x16   : > { %v3938_v24 = vld [vmem:[%s4752_s1 + $0xc8] sm:$0xff]   ;;  %v3942_v28 = vld [vmem:[%s4752_s1 + $0xd8] sm:$0xff]   ;;  %v3943_v29 = vld [vmem:[%s4752_s1 + $0x60] sm:$0xff]  }
  0x17   : > { %1421 = vmatprep.mubr.bf16.mxu0 %v750_v21  ;;  %1710 = vmatprep.mubr.bf16.mxu1 %v752_v22  ;;  %v3944_v30 = vld [vmem:[%s4752_s1 + $0xe0] sm:$0xff]   ;;  %v3945_v31 = vld [vmem:[%s4752_s1 + $0x68] sm:$0xff]   ;;  %v3947_v33 = vld [vmem:[%s4752_s1 + $0x70] sm:$0xff]  }
  0x18   : > { %1394 = vmatpush1.bf16.msra.mxu0 %v3923_v5  ;;  %1683 = vmatpush1.bf16.msra.mxu1 %v3924_v6  ;;  %v3946_v32 = vld [vmem:[%s4752_s1 + $0xe8] sm:$0xff]   ;;  %v3948_v34 = vld [vmem:[%s4752_s1 + $0xf0] sm:$0xff]   ;;  %v3949_v35 = vld [vmem:[%s4752_s1 + $0x78] sm:$0xff]  }
  0x19   : > { %1395 = vmatprep.subr.bf16.mxu0 %v4007_v1  ;;  %1684 = vmatprep.subr.bf16.mxu1 %v4007_v1  ;;  %v621_v36 = vld [vmem:[%s4116_s29] sm:$0xff]  ;;  %v3950_v37 = vld [vmem:[%s4752_s1 + $0xf8] sm:$0xff]   ;;  %v623_v38 = vld [vmem:[%s4116_s29 + $0x10] sm:$0xff] }
  0x1a   : > { %v3951_v39 = vld [vmem:[%s4752_s1 + $0x100] sm:$0xff]   ;;  %v749_v40 = vunpack.c.l.s8.bf16 %v621_v36  ;;  %v751_v41 = vunpack.c.l.s8.bf16 %v623_v38  ;;  %v630_v45 = vld [vmem:[%s4116_s29 + $0x48] sm:$0xff]  ;;  %v632_v46 = vld [vmem:[%s4116_s29 + $0x58] sm:$0xff]  ;;  %v757_v49 = vunpack.c.h.s8.bf16 %v621_v36  ;;  %v759_v50 = vunpack.c.h.s8.bf16 %v623_v38 }
  0x1b   : > { %v3952_v43 = vld [vmem:[%s4752_s1 + $0x180] sm:$0xff]   ;;  %v3953_v47 = vld [vmem:[%s4752_s1 + $0x108] sm:$0xff]   ;;  %v766_v51 = vunpack.c.l.s8.bf16 %v630_v45  ;;  %v768_v52 = vunpack.c.l.s8.bf16 %v632_v46  ;;  %v3955_v53 = vld [vmem:[%s4752_s1 + $0x110] sm:$0xff]   ;;  %v774_v61 = vunpack.c.h.s8.bf16 %v630_v45  ;;  %v776_v62 = vunpack.c.h.s8.bf16 %v632_v46 }
  0x1c   : > { %1396 = vmatpush1.bf16.msra.mxu0 %v3925_v7  ;;  %1685 = vmatpush1.bf16.msra.mxu1 %v3926_v8  ;;  %v3954_v48 = vld [vmem:[%s4752_s1 + $0x188] sm:$0xff]   ;;  %v3956_v54 = vld [vmem:[%s4752_s1 + $0x190] sm:$0xff]   ;;  %v629_v55 = vld [vmem:[%s4116_s29 + $0x40] sm:$0xff] }
  0x1d   : > { %1397 = vmatprep.subr.bf16.mxu0 %v4007_v1  ;;  %1686 = vmatprep.subr.bf16.mxu1 %v4007_v1  ;;  %v631_v56 = vld [vmem:[%s4116_s29 + $0x50] sm:$0xff]  ;;  %v3957_v57 = vld [vmem:[%s4752_s1 + $0x118] sm:$0xff]   ;;  %v765_v59 = vunpack.c.l.s8.bf16 %v629_v55  ;;  %v3959_v63 = vld [vmem:[%s4752_s1 + $0x120] sm:$0xff]   ;;  %v773_v6 = vunpack.c.h.s8.bf16 %v629_v55 }
  0x1e   : > { %v3958_v58 = vld [vmem:[%s4752_s1 + $0x198] sm:$0xff]   ;;  %v767_v60 = vunpack.c.l.s8.bf16 %v631_v56  ;;  %v3960_v0 = vld [vmem:[%s4752_s1 + $0x1a0] sm:$0xff]   ;;  %v638_v2 = vld [vmem:[%s4116_s29 + $0x88] sm:$0xff]  ;;  %v775_v7 = vunpack.c.h.s8.bf16 %v631_v56 }
  0x1f   : > { %v3961_v3 = vld [vmem:[%s4752_s1 + $0x128] sm:$0xff]   ;;  %v640_v4 = vld [vmem:[%s4116_s29 + $0x98] sm:$0xff]  ;;  %v782_v8 = vunpack.c.l.s8.bf16 %v638_v2  ;;  %v3967_v20 = vld [vmem:[%s4752_s1 + $0x140] sm:$0xff]  }
  0x20   : > { %1398 = vmatpush1.bf16.msra.mxu0 %v3927_v9  ;;  %1687 = vmatpush1.bf16.msra.mxu1 %v3928_v10  ;;  %v3962_v5 = vld [vmem:[%s4752_s1 + $0x1a8] sm:$0xff]   ;;  %v784_v9 = vunpack.c.l.s8.bf16 %v640_v4  ;;  %v3963_v10 = vld [vmem:[%s4752_s1 + $0x130] sm:$0xff]   ;;  %v792_v19 = vunpack.c.h.s8.bf16 %v640_v4  ;;  %v3968_v21 = vld [vmem:[%s4752_s1 + $0x1c0] sm:$0xff]  }
  0x21   : > { %1399 = vmatprep.subr.bf16.mxu0 %v4007_v1  ;;  %1688 = vmatprep.subr.bf16.mxu1 %v4007_v1  ;;  %v646_v22 = vld [vmem:[%s4116_s29 + $0xc8] sm:$0xff]  ;;  %v3973_v38 = vld [vmem:[%s4752_s1 + $0x158] sm:$0xff]   ;;  %v653_v46 = vld [vmem:[%s4116_s29 + $0x100] sm:$0xff] }
  0x22   : > { %v806_v36 = vunpack.c.h.s8.bf16 %v646_v22  ;;  %v664_v55 = vld [vmem:[%s4116_s29 + $0x158] sm:$0xff]  ;;  %v821_v56 = vunpack.c.h.s8.bf16 %v653_v46  ;;  %v670_v4 = vld [vmem:[%s4116_s29 + $0x188] sm:$0xff] }
  0x24   : > { %1400 = vmatpush1.bf16.msra.mxu0 %v3929_v11  ;;  %1689 = vmatpush1.bf16.msra.mxu1 %v3930_v12  ;;  %v3964_v11 = vld [vmem:[%s4752_s1 + $0x1b0] sm:$0xff]   ;;  %v637_v12 = vld [vmem:[%s4116_s29 + $0x80] sm:$0xff] }
  0x25   : > { %1401 = vmatprep.subr.bf16.mxu0 %v4007_v1  ;;  %1690 = vmatprep.subr.bf16.mxu1 %v4007_v1 }
  0x28   : > { %1402 = vmatpush1.bf16.msra.mxu0 %v3931_v13  ;;  %1691 = vmatpush1.bf16.msra.mxu1 %v3932_v14  ;;  %v639_v13 = vld [vmem:[%s4116_s29 + $0x90] sm:$0xff]  ;;  %v3965_v14 = vld [vmem:[%s4752_s1 + $0x138] sm:$0xff]  }
  0x29   : > { %1403 = vmatprep.subr.bf16.mxu0 %v4007_v1  ;;  %1692 = vmatprep.subr.bf16.mxu1 %v4007_v1 }
  0x2c   : > { %1404 = vmatpush1.bf16.msra.mxu0 %v3933_v15  ;;  %1693 = vmatpush1.bf16.msra.mxu1 %v3934_v16  ;;  %v3966_v15 = vld [vmem:[%s4752_s1 + $0x1b8] sm:$0xff]   ;;  %v781_v16 = vunpack.c.l.s8.bf16 %v637_v12 }
  0x2d   : > { %1405 = vmatprep.subr.bf16.mxu0 %v4007_v1  ;;  %1694 = vmatprep.subr.bf16.mxu1 %v4007_v1 }
  0x30   : > { %1406 = vmatpush1.bf16.msra.mxu0 %v3935_v17  ;;  %1695 = vmatpush1.bf16.msra.mxu1 %v3936_v18  ;;  %v783_v17 = vunpack.c.l.s8.bf16 %v639_v13  ;;  %v790_v18 = vunpack.c.h.s8.bf16 %v638_v2  ;;  %v840_v2 = vunpack.c.h.s8.bf16 %v664_v55 }
  0x31   : > { %1407 = vmatprep.subr.bf16.mxu0 %v4007_v1  ;;  %1696 = vmatprep.subr.bf16.mxu1 %v4007_v1 }
  0x34   : > { %1408 = vmatpush1.bf16.msra.mxu0 %v3937_v23  ;;  %1697 = vmatpush1.bf16.msra.mxu1 %v3938_v24  ;;  %v3969_v23 = vld [vmem:[%s4752_s1 + $0x148] sm:$0xff]   ;;  %v648_v24 = vld [vmem:[%s4116_s29 + $0xd8] sm:$0xff] }
  0x35   : > { %1409 = vmatprep.subr.bf16.mxu0 %v4007_v1  ;;  %1698 = vmatprep.subr.bf16.mxu1 %v4007_v1 }
  0x38   : > { %1410 = vmatpush1.bf16.msra.mxu0 %v3939_v25  ;;  %1699 = vmatpush1.bf16.msra.mxu1 %v3940_v26  ;;  %v3970_v25 = vld [vmem:[%s4752_s1 + $0x1c8] sm:$0xff]   ;;  %v789_v26 = vunpack.c.h.s8.bf16 %v637_v12  ;;  %v671_v12 = vld [vmem:[%s4116_s29 + $0x190] sm:$0xff] }
  0x39   : > { %1411 = vmatprep.subr.bf16.mxu0 %v4007_v1  ;;  %1700 = vmatprep.subr.bf16.mxu1 %v4007_v1 }
  0x3c   : > { %1412 = vmatpush1.bf16.msra.mxu0 %v3941_v27  ;;  %1701 = vmatpush1.bf16.msra.mxu1 %v3942_v28  ;;  %v791_v27 = vunpack.c.h.s8.bf16 %v639_v13  ;;  %v798_v28 = vunpack.c.l.s8.bf16 %v646_v22 }
  0x3d   : > { %1413 = vmatprep.subr.bf16.mxu0 %v4007_v1  ;;  %1702 = vmatprep.subr.bf16.mxu1 %v4007_v1 }
  0x40   : > { %1414 = vmatpush1.bf16.msra.mxu0 %v3943_v29  ;;  %1703 = vmatpush1.bf16.msra.mxu1 %v3944_v30  ;;  %v800_v29 = vunpack.c.l.s8.bf16 %v648_v24  ;;  %v3971_v30 = vld [vmem:[%s4752_s1 + $0x150] sm:$0xff]  }
  0x41   : > { %1415 = vmatprep.subr.bf16.mxu0 %v4007_v1  ;;  %1704 = vmatprep.subr.bf16.mxu1 %v4007_v1 }
  0x44   : > { %1416 = vmatpush1.bf16.msra.mxu0 %v3945_v31  ;;  %1705 = vmatpush1.bf16.msra.mxu1 %v3946_v32  ;;  %v3972_v31 = vld [vmem:[%s4752_s1 + $0x1d0] sm:$0xff]   ;;  %v645_v32 = vld [vmem:[%s4116_s29 + $0xc0] sm:$0xff] }
  0x45   : > { %1417 = vmatprep.subr.bf16.mxu0 %v4007_v1  ;;  %1706 = vmatprep.subr.bf16.mxu1 %v4007_v1 }
  0x48   : > { %1418 = vmatpush1.bf16.msra.mxu0 %v3947_v33  ;;  %1707 = vmatpush1.bf16.msra.mxu1 %v3948_v34  ;;  %v647_v33 = vld [vmem:[%s4116_s29 + $0xd0] sm:$0xff]  ;;  %v797_v34 = vunpack.c.l.s8.bf16 %v645_v32 }
  0x49   : > { %1419 = vmatprep.subr.bf16.mxu0 %v4007_v1  ;;  %1708 = vmatprep.subr.bf16.mxu1 %v4007_v1 }
  0x4c   : > { %1420 = vmatpush1.bf16.msra.mxu0 %v3949_v35  ;;  %1709 = vmatpush1.bf16.msra.mxu1 %v3950_v37  ;;  %v799_v35 = vunpack.c.l.s8.bf16 %v647_v33  ;;  %v808_v37 = vunpack.c.h.s8.bf16 %v648_v24 }
  0x4d   : > { %1967 = vmatprep.subr.bf16.mxu0 %v4007_v1  ;;  %2256 = vmatprep.subr.bf16.mxu1 %v4007_v1 }
  0x4f   : > { %1422 = vmatmul.mubr.bf16.vlgmr.msra.gmra.mrb[0].mxu0 %v749_v40  ;;  %1711 = vmatmul.mubr.bf16.vlgmr.msra.gmra.mrb[0].mxu1 %v751_v41  ;;  %v654_v40 = vld [vmem:[%s4116_s29 + $0x108] sm:$0xff]  ;;  %v656_v41 = vld [vmem:[%s4116_s29 + $0x118] sm:$0xff] }
  0x50   : > { %1968 = vmatpush1.bf16.msra.mxu0 %v3951_v39  ;;  %2257 = vmatpush1.bf16.msra.mxu1 %v3952_v43  ;;  %v3974_v39 = vld [vmem:[%s4752_s1 + $0x1d8] sm:$0xff]   ;;  %v807_v43 = vunpack.c.h.s8.bf16 %v647_v33  ;;  %v816_v45 = vunpack.c.l.s8.bf16 %v656_v41 }
  0x51   : > { %1429 = vmatprep.mubr.bf16.mxu0 %v758_v42  ;;  %1718 = vmatprep.mubr.bf16.mxu1 %v760_v44  ;;  %v805_v42 = vunpack.c.h.s8.bf16 %v645_v32  ;;  %v814_v44 = vunpack.c.l.s8.bf16 %v654_v40  ;;  %v688_v32 = vld [vmem:[%s4116_s29 + $0x218] sm:$0xff] }
  0x52   : > { %1969 = vmatprep.subr.bf16.mxu0 %v4007_v1  ;;  %2258 = vmatprep.subr.bf16.mxu1 %v4007_v1 }
  0x54   : > { %1970 = vmatpush1.bf16.msra.mxu0 %v3953_v47  ;;  %2259 = vmatpush1.bf16.msra.mxu1 %v3954_v48  ;;  %v655_v47 = vld [vmem:[%s4116_s29 + $0x110] sm:$0xff]  ;;  %v813_v48 = vunpack.c.l.s8.bf16 %v653_v46 }
  0x55   : > { %1971 = vmatprep.subr.bf16.mxu0 %v4007_v1  ;;  %2260 = vmatprep.subr.bf16.mxu1 %v4007_v1 }
  0x57   : > { %1430 = vmatmul.mubr.bf16.gmra.mrb[4].mxu0 %v757_v49  ;;  %1719 = vmatmul.mubr.bf16.gmra.mrb[4].mxu1 %v759_v50  ;;  %v815_v49 = vunpack.c.l.s8.bf16 %v655_v47  ;;  %v822_v50 = vunpack.c.h.s8.bf16 %v654_v40 }
  0x58   : > { %1437 = vmatprep.mubr.bf16.mxu0 %v766_v51  ;;  %1726 = vmatprep.mubr.bf16.mxu1 %v768_v52  ;;  %v824_v51 = vunpack.c.h.s8.bf16 %v656_v41  ;;  %v3975_v52 = vld [vmem:[%s4752_s1 + $0x160] sm:$0xff]  }
  0x59   : > { %1972 = vmatpush1.bf16.msra.mxu0 %v3955_v53  ;;  %2261 = vmatpush1.bf16.msra.mxu1 %v3956_v54  ;;  %v3976_v53 = vld [vmem:[%s4752_s1 + $0x1e0] sm:$0xff]   ;;  %v662_v54 = vld [vmem:[%s4116_s29 + $0x148] sm:$0xff] }
  0x5a   : > { %1973 = vmatprep.subr.bf16.mxu0 %v4007_v1  ;;  %2262 = vmatprep.subr.bf16.mxu1 %v4007_v1 }
  0x5d   : > { %1974 = vmatpush1.bf16.msra.mxu0 %v3957_v57  ;;  %2263 = vmatpush1.bf16.msra.mxu1 %v3958_v58  ;;  %v823_v57 = vunpack.c.h.s8.bf16 %v655_v47  ;;  %v830_v58 = vunpack.c.l.s8.bf16 %v662_v54 }
  0x5e   : > { %1975 = vmatprep.subr.bf16.mxu0 %v4007_v1  ;;  %2264 = vmatprep.subr.bf16.mxu1 %v4007_v1 }
  0x5f   : > { %1438 = vmatmul.mubr.bf16.gmra.mrb[8].mxu0 %v765_v59  ;;  %1727 = vmatmul.mubr.bf16.gmra.mrb[8].mxu1 %v767_v60  ;;  %v832_v59 = vunpack.c.l.s8.bf16 %v664_v55  ;;  %v661_v60 = vld [vmem:[%s4116_s29 + $0x140] sm:$0xff] }
  0x60   : > { %1445 = vmatprep.mubr.bf16.mxu0 %v774_v61  ;;  %1734 = vmatprep.mubr.bf16.mxu1 %v776_v62  ;;  %v663_v61 = vld [vmem:[%s4116_s29 + $0x150] sm:$0xff]  ;;  %v829_v62 = vunpack.c.l.s8.bf16 %v661_v60 }
  0x61   : > { %1976 = vmatpush1.bf16.msra.mxu0 %v3959_v63  ;;  %2265 = vmatpush1.bf16.msra.mxu1 %v3960_v0  ;;  %v831_v63 = vunpack.c.l.s8.bf16 %v663_v61  ;;  %v838_v0 = vunpack.c.h.s8.bf16 %v662_v54 }
  0x62   : > { %1977 = vmatprep.subr.bf16.mxu0 %v4007_v1  ;;  %2266 = vmatprep.subr.bf16.mxu1 %v4007_v1 }
  0x65   : > { %1978 = vmatpush1.bf16.msra.mxu0 %v3961_v3  ;;  %2267 = vmatpush1.bf16.msra.mxu1 %v3962_v5  ;;  %v3977_v3 = vld [vmem:[%s4752_s1 + $0x168] sm:$0xff]   ;;  %v672_v5 = vld [vmem:[%s4116_s29 + $0x198] sm:$0xff] }
  0x66   : > { %1979 = vmatprep.subr.bf16.mxu0 %v4007_v1  ;;  %2268 = vmatprep.subr.bf16.mxu1 %v4007_v1 }
  0x67   : > { %1446 = vmatmul.mubr.bf16.gmra.mrb[12].mxu0 %v773_v6  ;;  %1735 = vmatmul.mubr.bf16.gmra.mrb[12].mxu1 %v775_v7  ;;  %v837_v6 = vunpack.c.h.s8.bf16 %v661_v60  ;;  %v839_v7 = vunpack.c.h.s8.bf16 %v663_v61 }
  0x68   : > { %1453 = vmatprep.mubr.bf16.mxu0 %v782_v8  ;;  %1742 = vmatprep.mubr.bf16.mxu1 %v784_v9  ;;  %v846_v8 = vunpack.c.l.s8.bf16 %v670_v4  ;;  %v3978_v9 = vld [vmem:[%s4752_s1 + $0x1e8] sm:$0xff]  }
  0x69   : > { %1980 = vmatpush1.bf16.msra.mxu0 %v3963_v10  ;;  %2269 = vmatpush1.bf16.msra.mxu1 %v3964_v11  ;;  %v848_v10 = vunpack.c.l.s8.bf16 %v672_v5  ;;  %v669_v11 = vld [vmem:[%s4116_s29 + $0x180] sm:$0xff] }
  0x6a   : > { %1981 = vmatprep.subr.bf16.mxu0 %v4007_v1  ;;  %2270 = vmatprep.subr.bf16.mxu1 %v4007_v1  ;;  %v845_v13 = vunpack.c.l.s8.bf16 %v669_v11 }
  0x6d   : > { %1982 = vmatpush1.bf16.msra.mxu0 %v3965_v14  ;;  %2271 = vmatpush1.bf16.msra.mxu1 %v3966_v15  ;;  %v847_v14 = vunpack.c.l.s8.bf16 %v671_v12  ;;  %v854_v15 = vunpack.c.h.s8.bf16 %v670_v4 }
  0x6e   : > { %1983 = vmatprep.subr.bf16.mxu0 %v4007_v1  ;;  %2272 = vmatprep.subr.bf16.mxu1 %v4007_v1 }
  0x6f   : > { %1454 = vmatmul.mubr.bf16.gmra.mrb[16].mxu0 %v781_v16  ;;  %1743 = vmatmul.mubr.bf16.gmra.mrb[16].mxu1 %v783_v17  ;;  %v856_v16 = vunpack.c.h.s8.bf16 %v672_v5  ;;  %v3979_v17 = vld [vmem:[%s4752_s1 + $0x170] sm:$0xff]   ;;  %v710_v5 = vld [vmem:[%s4116_s29 + $0x2c8] sm:$0xff] }
  0x70   : > { %1461 = vmatprep.mubr.bf16.mxu0 %v790_v18  ;;  %1750 = vmatprep.mubr.bf16.mxu1 %v792_v19  ;;  %v678_v18 = vld [vmem:[%s4116_s29 + $0x1c8] sm:$0xff]  ;;  %v680_v19 = vld [vmem:[%s4116_s29 + $0x1d8] sm:$0xff] }
  0x71   : > { %1984 = vmatpush1.bf16.msra.mxu0 %v3967_v20  ;;  %2273 = vmatpush1.bf16.msra.mxu1 %v3968_v21  ;;  %v853_v20 = vunpack.c.h.s8.bf16 %v669_v11  ;;  %v855_v21 = vunpack.c.h.s8.bf16 %v671_v12  ;;  %v862_v22 = vunpack.c.l.s8.bf16 %v678_v18  ;;  %v864_v24 = vunpack.c.l.s8.bf16 %v680_v19  ;;  %v709_v11 = vld [vmem:[%s4116_s29 + $0x2c0] sm:$0xff]  ;;  %v711_v12 = vld [vmem:[%s4116_s29 + $0x2d0] sm:$0xff] }
  0x72   : > { %1985 = vmatprep.subr.bf16.mxu0 %v4007_v1  ;;  %2274 = vmatprep.subr.bf16.mxu1 %v4007_v1 }
  0x75   : > { %1986 = vmatpush1.bf16.msra.mxu0 %v3969_v23  ;;  %2275 = vmatpush1.bf16.msra.mxu1 %v3970_v25  ;;  %v3980_v23 = vld [vmem:[%s4752_s1 + $0x1f0] sm:$0xff]   ;;  %v677_v25 = vld [vmem:[%s4116_s29 + $0x1c0] sm:$0xff] }
  0x76   : > { %1987 = vmatprep.subr.bf16.mxu0 %v4007_v1  ;;  %2276 = vmatprep.subr.bf16.mxu1 %v4007_v1  ;;  %v869_v33 = vunpack.c.h.s8.bf16 %v677_v25 }
  0x77   : > { %1462 = vmatmul.mubr.bf16.gmra.mrb[20].mxu0 %v789_v26  ;;  %1751 = vmatmul.mubr.bf16.gmra.mrb[20].mxu1 %v791_v27  ;;  %v679_v26 = vld [vmem:[%s4116_s29 + $0x1d0] sm:$0xff]  ;;  %v861_v27 = vunpack.c.l.s8.bf16 %v677_v25 }
  0x78   : > { %1469 = vmatprep.mubr.bf16.mxu0 %v798_v28  ;;  %1758 = vmatprep.mubr.bf16.mxu1 %v800_v29  ;;  %v863_v28 = vunpack.c.l.s8.bf16 %v679_v26  ;;  %v870_v29 = vunpack.c.h.s8.bf16 %v678_v18  ;;  %v720_v18 = vld [vmem:[%s4116_s29 + $0x318] sm:$0xff] }
  0x79   : > { %1988 = vmatpush1.bf16.msra.mxu0 %v3971_v30  ;;  %2277 = vmatpush1.bf16.msra.mxu1 %v3972_v31  ;;  %v872_v30 = vunpack.c.h.s8.bf16 %v680_v19  ;;  %v3981_v31 = vld [vmem:[%s4752_s1 + $0x178] sm:$0xff]   ;;  %v933_v19 = vunpack.c.h.s8.bf16 %v709_v11 }
  0x7a   : > { %1989 = vmatprep.subr.bf16.mxu0 %v4007_v1  ;;  %2278 = vmatprep.subr.bf16.mxu1 %v4007_v1 }
  0x7d   : > { %1990 = vmatpush1.bf16.msra.mxu0 %v3973_v38  ;;  %2279 = vmatpush1.bf16.msra.mxu1 %v3974_v39  ;;  %v685_v38 = vld [vmem:[%s4116_s29 + $0x200] sm:$0xff]  ;;  %v687_v39 = vld [vmem:[%s4116_s29 + $0x210] sm:$0xff] }
  0x7e   : > { %1991 = vmatprep.subr.bf16.mxu0 %v4007_v1  ;;  %2280 = vmatprep.subr.bf16.mxu1 %v4007_v1  ;;  %v877_v40 = vunpack.c.l.s8.bf16 %v685_v38  ;;  %v879_v41 = vunpack.c.l.s8.bf16 %v687_v39  ;;  %v885_v46 = vunpack.c.h.s8.bf16 %v685_v38  ;;  %v887_v47 = vunpack.c.h.s8.bf16 %v687_v39 }
  0x7f   : > { %1470 = vmatmul.mubr.bf16.gmra.mrb[24].mxu0 %v797_v34  ;;  %1759 = vmatmul.mubr.bf16.gmra.mrb[24].mxu1 %v799_v35  ;;  %v871_v34 = vunpack.c.h.s8.bf16 %v679_v26 }
  0x80   : > { %1477 = vmatprep.mubr.bf16.mxu0 %v806_v36  ;;  %1766 = vmatprep.mubr.bf16.mxu1 %v808_v37  ;;  %v3982_v36 = vld [vmem:[%s4752_s1 + $0x1f8] sm:$0xff]   ;;  %v880_v37 = vunpack.c.l.s8.bf16 %v688_v32 }
  0x81   : > { %1992 = vmatpush1.bf16.msra.mxu0 %v3975_v52  ;;  %2281 = vmatpush1.bf16.msra.mxu1 %v3976_v53 }
  0x82   : > { %1993 = vmatprep.subr.bf16.mxu0 %v4007_v1  ;;  %2282 = vmatprep.subr.bf16.mxu1 %v4007_v1 }
  0x85   : > { %1994 = vmatpush1.bf16.msra.mxu0 %v3977_v3  ;;  %2283 = vmatpush1.bf16.msra.mxu1 %v3978_v9  ;;  %v926_v9 = vunpack.c.l.s8.bf16 %v710_v5 }
  0x86   : > { %1995 = vmatprep.subr.bf16.mxu0 %v4007_v1  ;;  %2284 = vmatprep.subr.bf16.mxu1 %v4007_v1 }
  0x87   : > { %1478 = vmatmul.mubr.bf16.gmra.mrb[28].mxu0 %v805_v42  ;;  %1767 = vmatmul.mubr.bf16.gmra.mrb[28].mxu1 %v807_v43  ;;  %v888_v43 = vunpack.c.h.s8.bf16 %v688_v32 }
  0x88   : > { %1485 = vmatprep.mubr.bf16.mxu0 %v814_v44  ;;  %1774 = vmatprep.mubr.bf16.mxu1 %v816_v45  ;;  %v694_v44 = vld [vmem:[%s4116_s29 + $0x248] sm:$0xff]  ;;  %v696_v45 = vld [vmem:[%s4116_s29 + $0x258] sm:$0xff] }
  0x89   : > { %1996 = vmatpush1.bf16.msra.mxu0 %v3979_v17  ;;  %2285 = vmatpush1.bf16.msra.mxu1 %v3980_v23  ;;  %v902_v54 = vunpack.c.h.s8.bf16 %v694_v44  ;;  %v904_v55 = vunpack.c.h.s8.bf16 %v696_v45  ;;  %v718_v17 = vld [vmem:[%s4116_s29 + $0x308] sm:$0xff]  ;;  %v717_v23 = vld [vmem:[%s4116_s29 + $0x300] sm:$0xff] }
  0x8a   : > { %1997 = vmatprep.subr.bf16.mxu0 %v4007_v1  ;;  %2286 = vmatprep.subr.bf16.mxu1 %v4007_v1  ;;  %v686_v1 = vld [vmem:[%s4116_s29 + $0x208] sm:$0xff]  ;;  %v941_v25 = vunpack.c.l.s8.bf16 %v717_v23 }
  0x8b   : > { %v878_v35 = vunpack.c.l.s8.bf16 %v686_v1  ;;  %v886_v42 = vunpack.c.h.s8.bf16 %v686_v1 }
  0x8d   : > { %1998 = vmatpush1.bf16.msra.mxu0 %v3981_v31  ;;  %2287 = vmatpush1.bf16.msra.mxu1 %v3982_v36  ;;  %v949_v31 = vunpack.c.h.s8.bf16 %v717_v23 }
  0x8f   : > { %1486 = vmatmul.mubr.bf16.gmra.mrb[32].mxu0 %v813_v48  ;;  %1775 = vmatmul.mubr.bf16.gmra.mrb[32].mxu1 %v815_v49  ;;  %v894_v48 = vunpack.c.l.s8.bf16 %v694_v44  ;;  %v896_v49 = vunpack.c.l.s8.bf16 %v696_v45 }
  0x90   : > { %1493 = vmatprep.mubr.bf16.mxu0 %v822_v50  ;;  %1782 = vmatprep.mubr.bf16.mxu1 %v824_v51  ;;  %v693_v50 = vld [vmem:[%s4116_s29 + $0x240] sm:$0xff]  ;;  %v695_v51 = vld [vmem:[%s4116_s29 + $0x250] sm:$0xff] }
  0x91   : > { %v893_v52 = vunpack.c.l.s8.bf16 %v693_v50  ;;  %v895_v53 = vunpack.c.l.s8.bf16 %v695_v51 }
  0x97   : > { %1494 = vmatmul.mubr.bf16.gmra.mrb[36].mxu0 %v821_v56  ;;  %1783 = vmatmul.mubr.bf16.gmra.mrb[36].mxu1 %v823_v57  ;;  %v702_v56 = vld [vmem:[%s4116_s29 + $0x288] sm:$0xff]  ;;  %v704_v57 = vld [vmem:[%s4116_s29 + $0x298] sm:$0xff] }
  0x98   : > { %1501 = vmatprep.mubr.bf16.mxu0 %v830_v58  ;;  %1790 = vmatprep.mubr.bf16.mxu1 %v832_v59  ;;  %v901_v58 = vunpack.c.h.s8.bf16 %v693_v50  ;;  %v903_v59 = vunpack.c.h.s8.bf16 %v695_v51  ;;  %v910_v60 = vunpack.c.l.s8.bf16 %v702_v56  ;;  %v912_v61 = vunpack.c.l.s8.bf16 %v704_v57 }
  0x99   : > { %v918_v3 = vunpack.c.h.s8.bf16 %v702_v56  ;;  %v920_v4 = vunpack.c.h.s8.bf16 %v704_v57  ;;  %v733_v56 = vld [vmem:[%s4116_s29 + $0x380] sm:$0xff]  ;;  %v735_v57 = vld [vmem:[%s4116_s29 + $0x390] sm:$0xff] }
  0x9f   : > { %1502 = vmatmul.mubr.bf16.gmra.mrb[40].mxu0 %v829_v62  ;;  %1791 = vmatmul.mubr.bf16.gmra.mrb[40].mxu1 %v831_v63  ;;  %v701_v62 = vld [vmem:[%s4116_s29 + $0x280] sm:$0xff]  ;;  %v703_v63 = vld [vmem:[%s4116_s29 + $0x290] sm:$0xff] }
  0xa0   : > { %1509 = vmatprep.mubr.bf16.mxu0 %v838_v0  ;;  %1798 = vmatprep.mubr.bf16.mxu1 %v840_v2  ;;  %v909_v0 = vunpack.c.l.s8.bf16 %v701_v62  ;;  %v911_v2 = vunpack.c.l.s8.bf16 %v703_v63 }
  0xa7   : > { %1510 = vmatmul.mubr.bf16.gmra.mrb[44].mxu0 %v837_v6  ;;  %1799 = vmatmul.mubr.bf16.gmra.mrb[44].mxu1 %v839_v7  ;;  %v712_v6 = vld [vmem:[%s4116_s29 + $0x2d8] sm:$0xff]  ;;  %v917_v7 = vunpack.c.h.s8.bf16 %v701_v62 }
  0xa8   : > { %1517 = vmatprep.mubr.bf16.mxu0 %v846_v8  ;;  %1806 = vmatprep.mubr.bf16.mxu1 %v848_v10  ;;  %v919_v8 = vunpack.c.h.s8.bf16 %v703_v63  ;;  %v928_v10 = vunpack.c.l.s8.bf16 %v712_v6 }
  0xaf   : > { %1518 = vmatmul.mubr.bf16.gmra.mrb[48].mxu0 %v845_v13  ;;  %1807 = vmatmul.mubr.bf16.gmra.mrb[48].mxu1 %v847_v14  ;;  %v925_v13 = vunpack.c.l.s8.bf16 %v709_v11  ;;  %v927_v14 = vunpack.c.l.s8.bf16 %v711_v12  ;;  %v744_v11 = vld [vmem:[%s4116_s29 + $0x3d8] sm:$0xff] }
  0xb0   : > { %1525 = vmatprep.mubr.bf16.mxu0 %v854_v15  ;;  %1814 = vmatprep.mubr.bf16.mxu1 %v856_v16  ;;  %v934_v15 = vunpack.c.h.s8.bf16 %v710_v5  ;;  %v936_v16 = vunpack.c.h.s8.bf16 %v712_v6 }
  0xb7   : > { %1526 = vmatmul.mubr.bf16.gmra.mrb[52].mxu0 %v853_v20  ;;  %1815 = vmatmul.mubr.bf16.gmra.mrb[52].mxu1 %v855_v21  ;;  %v935_v20 = vunpack.c.h.s8.bf16 %v711_v12  ;;  %v942_v21 = vunpack.c.l.s8.bf16 %v718_v17 }
  0xb8   : > { %1533 = vmatprep.mubr.bf16.mxu0 %v862_v22  ;;  %1822 = vmatprep.mubr.bf16.mxu1 %v864_v24  ;;  %v944_v22 = vunpack.c.l.s8.bf16 %v720_v18  ;;  %v719_v24 = vld [vmem:[%s4116_s29 + $0x310] sm:$0xff] }
  0xb9   : > { %v943_v26 = vunpack.c.l.s8.bf16 %v719_v24  ;;  %v951_v1 = vunpack.c.h.s8.bf16 %v719_v24 }
  0xbf   : > { %1534 = vmatmul.mubr.bf16.gmra.mrb[56].mxu0 %v861_v27  ;;  %1823 = vmatmul.mubr.bf16.gmra.mrb[56].mxu1 %v863_v28  ;;  %v950_v27 = vunpack.c.h.s8.bf16 %v718_v17  ;;  %v952_v28 = vunpack.c.h.s8.bf16 %v720_v18  ;;  %v983_v18 = vunpack.c.h.s8.bf16 %v735_v57 }
  0xc0   : > { %1541 = vmatprep.mubr.bf16.mxu0 %v870_v29  ;;  %1830 = vmatprep.mubr.bf16.mxu1 %v872_v30  ;;  %v726_v29 = vld [vmem:[%s4116_s29 + $0x348] sm:$0xff]  ;;  %v728_v30 = vld [vmem:[%s4116_s29 + $0x358] sm:$0xff] }
  0xc1   : > { %v958_v32 = vunpack.c.l.s8.bf16 %v726_v29  ;;  %v966_v38 = vunpack.c.h.s8.bf16 %v726_v29  ;;  %v968_v39 = vunpack.c.h.s8.bf16 %v728_v30 }
  0xc7   : > { %1542 = vmatmul.mubr.bf16.gmra.mrb[60].mxu0 %v869_v33  ;;  %1831 = vmatmul.mubr.bf16.gmra.mrb[60].mxu1 %v871_v34  ;;  %v960_v33 = vunpack.c.l.s8.bf16 %v728_v30  ;;  %v725_v34 = vld [vmem:[%s4116_s29 + $0x340] sm:$0xff] }
  0xc8   : > { %1549 = vmatprep.mubr.bf16.mxu0 %v878_v35  ;;  %1838 = vmatprep.mubr.bf16.mxu1 %v880_v37  ;;  %v727_v35 = vld [vmem:[%s4116_s29 + $0x350] sm:$0xff]  ;;  %v957_v36 = vunpack.c.l.s8.bf16 %v725_v34  ;;  %v965_v45 = vunpack.c.h.s8.bf16 %v725_v34 }
  0xc9   : > { %v959_v37 = vunpack.c.l.s8.bf16 %v727_v35 }
  0xcf   : > { %1550 = vmatmul.mubr.bf16.gmra.mrb[64].mxu0 %v877_v40  ;;  %1839 = vmatmul.mubr.bf16.gmra.mrb[64].mxu1 %v879_v41  ;;  %v734_v40 = vld [vmem:[%s4116_s29 + $0x388] sm:$0xff] }
  0xd0   : > { %1557 = vmatprep.mubr.bf16.mxu0 %v886_v42  ;;  %1846 = vmatprep.mubr.bf16.mxu1 %v888_v43  ;;  %v736_v42 = vld [vmem:[%s4116_s29 + $0x398] sm:$0xff]  ;;  %v974_v50 = vunpack.c.l.s8.bf16 %v734_v40 }
  0xd1   : > { %v984_v6 = vunpack.c.h.s8.bf16 %v736_v42 }
  0xd7   : > { %1558 = vmatmul.mubr.bf16.gmra.mrb[68].mxu0 %v885_v46  ;;  %1847 = vmatmul.mubr.bf16.gmra.mrb[68].mxu1 %v887_v47 }
  0xd8   : > { %1565 = vmatprep.mubr.bf16.mxu0 %v894_v48  ;;  %1854 = vmatprep.mubr.bf16.mxu1 %v896_v49  ;;  %v967_v49 = vunpack.c.h.s8.bf16 %v727_v35 }
  0xdf   : > { %1566 = vmatmul.mubr.bf16.gmra.mrb[72].mxu0 %v893_v52  ;;  %1855 = vmatmul.mubr.bf16.gmra.mrb[72].mxu1 %v895_v53  ;;  %v976_v53 = vunpack.c.l.s8.bf16 %v736_v42  ;;  %v628_v42 = vld [vmem:[%s4116_s29 + $0x38] sm:$0xff] }
  0xe0   : > { %1573 = vmatprep.mubr.bf16.mxu0 %v902_v54  ;;  %1862 = vmatprep.mubr.bf16.mxu1 %v904_v55 }
  0xe7   : > { %1574 = vmatmul.mubr.bf16.gmra.mrb[76].mxu0 %v901_v58  ;;  %1863 = vmatmul.mubr.bf16.gmra.mrb[76].mxu1 %v903_v59 }
  0xe8   : > { %1581 = vmatprep.mubr.bf16.mxu0 %v910_v60  ;;  %1870 = vmatprep.mubr.bf16.mxu1 %v912_v61  ;;  %v973_v61 = vunpack.c.l.s8.bf16 %v733_v56 }
  0xef   : > { %1582 = vmatmul.mubr.bf16.gmra.mrb[80].mxu0 %v909_v0  ;;  %1871 = vmatmul.mubr.bf16.gmra.mrb[80].mxu1 %v911_v2  ;;  %v975_v2 = vunpack.c.l.s8.bf16 %v735_v57 }
  0xf0   : > { %1589 = vmatprep.mubr.bf16.mxu0 %v918_v3  ;;  %1878 = vmatprep.mubr.bf16.mxu1 %v920_v4  ;;  %v982_v3 = vunpack.c.h.s8.bf16 %v734_v40  ;;  %v626_v40 = vld [vmem:[%s4116_s29 + $0x28] sm:$0xff] }
  0xf7   : > { %1590 = vmatmul.mubr.bf16.gmra.mrb[84].mxu0 %v917_v7  ;;  %1879 = vmatmul.mubr.bf16.gmra.mrb[84].mxu1 %v919_v8 }
  0xf8   : > { %1597 = vmatprep.mubr.bf16.mxu0 %v926_v9  ;;  %1886 = vmatprep.mubr.bf16.mxu1 %v928_v10  ;;  %v742_v9 = vld [vmem:[%s4116_s29 + $0x3c8] sm:$0xff] }
  0xf9   : > { %v998_v34 = vunpack.c.h.s8.bf16 %v742_v9 }
  0xff   : > { %1598 = vmatmul.mubr.bf16.gmra.mrb[88].mxu0 %v925_v13  ;;  %1887 = vmatmul.mubr.bf16.gmra.mrb[88].mxu1 %v927_v14  ;;  %v981_v14 = vunpack.c.h.s8.bf16 %v733_v56 }
 0x100   : > { %1605 = vmatprep.mubr.bf16.mxu0 %v934_v15  ;;  %1894 = vmatprep.mubr.bf16.mxu1 %v936_v16 }
 0x107   : > { %1606 = vmatmul.mubr.bf16.gmra.mrb[92].mxu0 %v933_v19  ;;  %1895 = vmatmul.mubr.bf16.gmra.mrb[92].mxu1 %v935_v20  ;;  %v990_v19 = vunpack.c.l.s8.bf16 %v742_v9 }
 0x108   : > { %1613 = vmatprep.mubr.bf16.mxu0 %v942_v21  ;;  %1902 = vmatprep.mubr.bf16.mxu1 %v944_v22  ;;  %v992_v22 = vunpack.c.l.s8.bf16 %v744_v11 }
 0x10f   : > { %1614 = vmatmul.mubr.bf16.gmra.mrb[96].mxu0 %v941_v25  ;;  %1903 = vmatmul.mubr.bf16.gmra.mrb[96].mxu1 %v943_v26  ;;  %v741_v25 = vld [vmem:[%s4116_s29 + $0x3c0] sm:$0xff]  ;;  %v743_v26 = vld [vmem:[%s4116_s29 + $0x3d0] sm:$0xff] }
 0x110   : > { %1621 = vmatprep.mubr.bf16.mxu0 %v950_v27  ;;  %1910 = vmatprep.mubr.bf16.mxu1 %v952_v28  ;;  %v989_v30 = vunpack.c.l.s8.bf16 %v741_v25 }
 0x117   : > { %1622 = vmatmul.mubr.bf16.gmra.mrb[100].mxu0 %v949_v31  ;;  %1911 = vmatmul.mubr.bf16.gmra.mrb[100].mxu1 %v951_v1 }
 0x118   : > { %1629 = vmatprep.mubr.bf16.mxu0 %v958_v32  ;;  %1918 = vmatprep.mubr.bf16.mxu1 %v960_v33  ;;  %v991_v33 = vunpack.c.l.s8.bf16 %v743_v26 }
 0x11f   : > { %1630 = vmatmul.mubr.bf16.gmra.mrb[104].mxu0 %v957_v36  ;;  %1919 = vmatmul.mubr.bf16.gmra.mrb[104].mxu1 %v959_v37  ;;  %v1000_v37 = vunpack.c.h.s8.bf16 %v744_v11 }
 0x120   : > { %1637 = vmatprep.mubr.bf16.mxu0 %v966_v38  ;;  %1926 = vmatprep.mubr.bf16.mxu1 %v968_v39 }
 0x122   : > { %v1423_v41 = vpop.f32.mrb[0].mxu0  ;;  %v1712_v43 = vpop.f32.mrb[0].mxu1 }
 0x123   : > { %v1425_v44 = vpop.f32.mrb[1].mxu0  ;;  %v4376_v46 = vadd.f32 %v1712_v43, %v1423_v41  ;;  %v1714_v47 = vpop.f32.mrb[1].mxu1 }
 0x124   : > { %v1426_v48 = vpop.f32.mrb[2].mxu0  ;;  %v1715_v51 = vpop.f32.mrb[2].mxu1 }
 0x125   : > { %v1428_v52 = vpop.f32.mrb[3].mxu0  ;;  %v4378_v54 = vadd.f32 %v1715_v51, %v1426_v48  ;;  %v1717_v55 = vpop.f32.mrb[3].mxu1  ;;  %v754_v51 = vunpack.c.l.s8.bf16 %v626_v40 }
 0x126   : > { %v756_v55 = vunpack.c.l.s8.bf16 %v628_v42 }
 0x127   : > { %1638 = vmatmul.mubr.bf16.gmra.mrb[108].mxu0 %v965_v45  ;;  %1927 = vmatmul.mubr.bf16.gmra.mrb[108].mxu1 %v967_v49  ;;  %v997_v45 = vunpack.c.h.s8.bf16 %v741_v25 }
 0x128   : > { %1645 = vmatprep.mubr.bf16.mxu0 %v974_v50  ;;  %1934 = vmatprep.mubr.bf16.mxu1 %v976_v53  ;;  %v999_v50 = vunpack.c.h.s8.bf16 %v743_v26 }
 0x12a   : > { %v1431_v58 = vpop.f32.mrb[4].mxu0  ;;  %v1720_v59 = vpop.f32.mrb[4].mxu1 }
 0x12b   : > { %v1433_v60 = vpop.f32.mrb[5].mxu0  ;;  %v4382_v62 = vadd.f32 %v1720_v59, %v1431_v58  ;;  %v1722_v63 = vpop.f32.mrb[5].mxu1  ;;  %v625_v58 = vld [vmem:[%s4116_s29 + $0x20] sm:$0xff]  ;;  %v627_v59 = vld [vmem:[%s4116_s29 + $0x30] sm:$0xff] }
 0x12c   : > { %v1434_v0 = vpop.f32.mrb[6].mxu0  ;;  %v1723_v4 = vpop.f32.mrb[6].mxu1 }
 0x12d   : > { %v1436_v5 = vpop.f32.mrb[7].mxu0  ;;  %v4384_v7 = vadd.f32 %v1723_v4, %v1434_v0  ;;  %v1725_v8 = vpop.f32.mrb[7].mxu1  ;;  %v753_v0 = vunpack.c.l.s8.bf16 %v625_v58 }
 0x12e   : > { %v755_v5 = vunpack.c.l.s8.bf16 %v627_v59 }
 0x12f   : > { %1646 = vmatmul.mubr.bf16.gmra.mrb[112].mxu0 %v973_v61  ;;  %1935 = vmatmul.mubr.bf16.gmra.mrb[112].mxu1 %v975_v2 }
 0x130   : > { %1653 = vmatprep.mubr.bf16.mxu0 %v982_v3  ;;  %1942 = vmatprep.mubr.bf16.mxu1 %v984_v6  ;;  %v762_v6 = vunpack.c.h.s8.bf16 %v626_v40 }
 0x132   : > { %v1439_v10 = vpop.f32.mrb[8].mxu0  ;;  %v1728_v12 = vpop.f32.mrb[8].mxu1 }
 0x133   : > { %v1441_v13 = vpop.f32.mrb[9].mxu0  ;;  %v4388_v15 = vadd.f32 %v1728_v12, %v1439_v10  ;;  %v1730_v16 = vpop.f32.mrb[9].mxu1  ;;  %v764_v10 = vunpack.c.h.s8.bf16 %v628_v42 }
 0x134   : > { %v1442_v17 = vpop.f32.mrb[10].mxu0  ;;  %v1731_v20 = vpop.f32.mrb[10].mxu1  ;;  %v634_v13 = vld [vmem:[%s4116_s29 + $0x68] sm:$0xff]  ;;  %v636_v16 = vld [vmem:[%s4116_s29 + $0x78] sm:$0xff] }
 0x135   : > { %v1444_v21 = vpop.f32.mrb[11].mxu0  ;;  %v4390_v23 = vadd.f32 %v1731_v20, %v1442_v17  ;;  %v1733_v24 = vpop.f32.mrb[11].mxu1  ;;  %v770_v25 = vunpack.c.l.s8.bf16 %v634_v13  ;;  %v778_v42 = vunpack.c.h.s8.bf16 %v634_v13 }
 0x136   : > { %v763_v24 = vunpack.c.h.s8.bf16 %v627_v59 }
 0x137   : > { %1654 = vmatmul.mubr.bf16.gmra.mrb[116].mxu0 %v981_v14  ;;  %1943 = vmatmul.mubr.bf16.gmra.mrb[116].mxu1 %v983_v18 }
 0x138   : > { %1661 = vmatprep.mubr.bf16.mxu0 %v990_v19  ;;  %1950 = vmatprep.mubr.bf16.mxu1 %v992_v22  ;;  %v761_v19 = vunpack.c.h.s8.bf16 %v625_v58 }
 0x13a   : > { %v1447_v27 = vpop.f32.mrb[12].mxu0  ;;  %v1736_v28 = vpop.f32.mrb[12].mxu1 }
 0x13b   : > { %v1449_v29 = vpop.f32.mrb[13].mxu0  ;;  %v4394_v31 = vadd.f32 %v1736_v28, %v1447_v27  ;;  %v1738_v1 = vpop.f32.mrb[13].mxu1  ;;  %v772_v28 = vunpack.c.l.s8.bf16 %v636_v16 }
 0x13c   : > { %v1450_v32 = vpop.f32.mrb[14].mxu0  ;;  %v1739_v35 = vpop.f32.mrb[14].mxu1  ;;  %v633_v1 = vld [vmem:[%s4116_s29 + $0x60] sm:$0xff] }
 0x13d   : > { %v1452_v36 = vpop.f32.mrb[15].mxu0  ;;  %v4396_v38 = vadd.f32 %v1739_v35, %v1450_v32  ;;  %v1741_v39 = vpop.f32.mrb[15].mxu1  ;;  %v635_v32 = vld [vmem:[%s4116_s29 + $0x70] sm:$0xff] }
 0x13e   : > { %v769_v36 = vunpack.c.l.s8.bf16 %v633_v1 }
 0x13f   : > { %1662 = vmatmul.mubr.bf16.gmra.mrb[120].mxu0 %v989_v30  ;;  %1951 = vmatmul.mubr.bf16.gmra.mrb[120].mxu1 %v991_v33 }
 0x140   : > { %1669 = vmatprep.mubr.bf16.mxu0 %v998_v34  ;;  %1958 = vmatprep.mubr.bf16.mxu1 %v1000_v37 }
 0x142   : > { %v1455_v41 = vpop.f32.mrb[16].mxu0  ;;  %v1744_v43 = vpop.f32.mrb[16].mxu1 }
 0x143   : > { %v1457_v44 = vpop.f32.mrb[17].mxu0  ;;  %v4400_v47 = vadd.f32 %v1744_v43, %v1455_v41  ;;  %v1746_v48 = vpop.f32.mrb[17].mxu1  ;;  %v771_v41 = vunpack.c.l.s8.bf16 %v635_v32 }
 0x144   : > { %v1458_v49 = vpop.f32.mrb[18].mxu0  ;;  %v1747_v52 = vpop.f32.mrb[18].mxu1 }
 0x145   : > { %v1460_v53 = vpop.f32.mrb[19].mxu0  ;;  %v4402_v56 = vadd.f32 %v1747_v52, %v1458_v49  ;;  %v1749_v57 = vpop.f32.mrb[19].mxu1  ;;  %v644_v52 = vld [vmem:[%s4116_s29 + $0xb8] sm:$0xff] }
 0x146   : > { %v777_v57 = vunpack.c.h.s8.bf16 %v633_v1  ;;  %v652_v1 = vld [vmem:[%s4116_s29 + $0xf8] sm:$0xff] }
 0x147   : > { %1670 = vmatmul.mubr.bf16.gmra.mrb[124].mxu0 %v997_v45  ;;  %1959 = vmatmul.mubr.bf16.gmra.mrb[124].mxu1 %v999_v50  ;;  %v780_v45 = vunpack.c.h.s8.bf16 %v636_v16  ;;  %v642_v50 = vld [vmem:[%s4116_s29 + $0xa8] sm:$0xff] }
 0x148   : > { %1999 = vmatprep.mubr.bf16.mxu0 %v754_v51  ;;  %2288 = vmatprep.mubr.bf16.mxu1 %v756_v55 }
 0x14a   : > { %v1463_v60 = vpop.f32.mrb[20].mxu0  ;;  %v1752_v61 = vpop.f32.mrb[20].mxu1 }
 0x14b   : > { %v1465_v63 = vpop.f32.mrb[21].mxu0  ;;  %v4406_v2 = vadd.f32 %v1752_v61, %v1463_v60  ;;  %v1754_v3 = vpop.f32.mrb[21].mxu1  ;;  %v779_v61 = vunpack.c.h.s8.bf16 %v635_v32 }
 0x14c   : > { %v1466_v4 = vpop.f32.mrb[22].mxu0  ;;  %v1755_v8 = vpop.f32.mrb[22].mxu1  ;;  %v786_v63 = vunpack.c.l.s8.bf16 %v642_v50 }
 0x14d   : > { %v1468_v9 = vpop.f32.mrb[23].mxu0  ;;  %v4408_v11 = vadd.f32 %v1755_v8, %v1466_v4  ;;  %v1757_v12 = vpop.f32.mrb[23].mxu1  ;;  %v788_v4 = vunpack.c.l.s8.bf16 %v644_v52  ;;  %v641_v8 = vld [vmem:[%s4116_s29 + $0xa0] sm:$0xff] }
 0x14e   : > { %v643_v9 = vld [vmem:[%s4116_s29 + $0xb0] sm:$0xff] }
 0x14f   : > { %2000 = vmatmul.mubr.bf16.vlgmr.msra.gmra.mrb[128].mxu0 %v753_v0  ;;  %2289 = vmatmul.mubr.bf16.vlgmr.msra.gmra.mrb[128].mxu1 %v755_v5 }
 0x150   : > { %2007 = vmatprep.mubr.bf16.mxu0 %v762_v6  ;;  %2296 = vmatprep.mubr.bf16.mxu1 %v764_v10 }
 0x152   : > { %v1471_v14 = vpop.f32.mrb[24].mxu0  ;;  %v1760_v17 = vpop.f32.mrb[24].mxu1 }
 0x153   : > { %v1473_v18 = vpop.f32.mrb[25].mxu0  ;;  %v4412_v20 = vadd.f32 %v1760_v17, %v1471_v14  ;;  %v1762_v21 = vpop.f32.mrb[25].mxu1  ;;  %v785_v14 = vunpack.c.l.s8.bf16 %v641_v8 }
 0x154   : > { %v1474_v22 = vpop.f32.mrb[26].mxu0  ;;  %v1763_v26 = vpop.f32.mrb[26].mxu1  ;;  %v794_v21 = vunpack.c.h.s8.bf16 %v642_v50  ;;  %v649_v50 = vld [vmem:[%s4116_s29 + $0xe0] sm:$0xff] }
 0x155   : > { %v1476_v27 = vpop.f32.mrb[27].mxu0  ;;  %v4414_v29 = vadd.f32 %v1763_v26, %v1474_v22  ;;  %v1765_v30 = vpop.f32.mrb[27].mxu1 }
 0x157   : > { %2008 = vmatmul.mubr.bf16.gmra.mrb[132].mxu0 %v761_v19  ;;  %2297 = vmatmul.mubr.bf16.gmra.mrb[132].mxu1 %v763_v24  ;;  %v787_v19 = vunpack.c.l.s8.bf16 %v643_v9 }
 0x158   : > { %2015 = vmatprep.mubr.bf16.mxu0 %v770_v25  ;;  %2304 = vmatprep.mubr.bf16.mxu1 %v772_v28  ;;  %v796_v25 = vunpack.c.h.s8.bf16 %v644_v52  ;;  %v650_v28 = vld [vmem:[%s4116_s29 + $0xe8] sm:$0xff] }
 0x15a   : > { %v1479_v33 = vpop.f32.mrb[28].mxu0  ;;  %v1768_v34 = vpop.f32.mrb[28].mxu1 }
 0x15b   : > { %v1481_v35 = vpop.f32.mrb[29].mxu0  ;;  %v4418_v37 = vadd.f32 %v1768_v34, %v1479_v33  ;;  %v1770_v39 = vpop.f32.mrb[29].mxu1  ;;  %v793_v34 = vunpack.c.h.s8.bf16 %v641_v8 }
 0x15c   : > { %v1482_v40 = vpop.f32.mrb[30].mxu0  ;;  %v1771_v43 = vpop.f32.mrb[30].mxu1 }
 0x15d   : > { %v1484_v44 = vpop.f32.mrb[31].mxu0  ;;  %v4420_v48 = vadd.f32 %v1771_v43, %v1482_v40  ;;  %v1773_v49 = vpop.f32.mrb[31].mxu1  ;;  %v795_v40 = vunpack.c.h.s8.bf16 %v643_v9 }
 0x15e   : > { %v804_v44 = vunpack.c.l.s8.bf16 %v652_v1 }
 0x15f   : > { %2016 = vmatmul.mubr.bf16.gmra.mrb[136].mxu0 %v769_v36  ;;  %2305 = vmatmul.mubr.bf16.gmra.mrb[136].mxu1 %v771_v41  ;;  %v802_v41 = vunpack.c.l.s8.bf16 %v650_v28 }
 0x160   : > { %2023 = vmatprep.mubr.bf16.mxu0 %v778_v42  ;;  %2312 = vmatprep.mubr.bf16.mxu1 %v780_v45 }
 0x162   : > { %v1487_v51 = vpop.f32.mrb[32].mxu0  ;;  %v1776_v53 = vpop.f32.mrb[32].mxu1 }
 0x163   : > { %v1489_v55 = vpop.f32.mrb[33].mxu0  ;;  %v4424_v58 = vadd.f32 %v1776_v53, %v1487_v51  ;;  %v1778_v59 = vpop.f32.mrb[33].mxu1  ;;  %v651_v51 = vld [vmem:[%s4116_s29 + $0xf0] sm:$0xff] }
 0x164   : > { %v1490_v60 = vpop.f32.mrb[34].mxu0  ;;  %v1779_v0 = vpop.f32.mrb[34].mxu1 }
 0x165   : > { %v1492_v3 = vpop.f32.mrb[35].mxu0  ;;  %v4426_v5 = vadd.f32 %v1779_v0, %v1490_v60  ;;  %v1781_v6 = vpop.f32.mrb[35].mxu1  ;;  %v810_v0 = vunpack.c.h.s8.bf16 %v650_v28 }
 0x166   : > { %v812_v6 = vunpack.c.h.s8.bf16 %v652_v1 }
 0x167   : > { %2024 = vmatmul.mubr.bf16.gmra.mrb[140].mxu0 %v777_v57  ;;  %2313 = vmatmul.mubr.bf16.gmra.mrb[140].mxu1 %v779_v61  ;;  %v801_v57 = vunpack.c.l.s8.bf16 %v649_v50 }
 0x168   : > { %2031 = vmatprep.mubr.bf16.mxu0 %v786_v63  ;;  %2320 = vmatprep.mubr.bf16.mxu1 %v788_v4  ;;  %v803_v63 = vunpack.c.l.s8.bf16 %v651_v51 }
 0x16a   : > { %v1495_v10 = vpop.f32.mrb[36].mxu0  ;;  %v1784_v12 = vpop.f32.mrb[36].mxu1 }
 0x16b   : > { %v1497_v13 = vpop.f32.mrb[37].mxu0  ;;  %v4430_v16 = vadd.f32 %v1784_v12, %v1495_v10  ;;  %v1786_v17 = vpop.f32.mrb[37].mxu1  ;;  %v658_v10 = vld [vmem:[%s4116_s29 + $0x128] sm:$0xff] }
 0x16c   : > { %v1498_v18 = vpop.f32.mrb[38].mxu0  ;;  %v1787_v22 = vpop.f32.mrb[38].mxu1  ;;  %v660_v13 = vld [vmem:[%s4116_s29 + $0x138] sm:$0xff] }
 0x16d   : > { %v1500_v24 = vpop.f32.mrb[39].mxu0  ;;  %v4432_v26 = vadd.f32 %v1787_v22, %v1498_v18  ;;  %v1789_v27 = vpop.f32.mrb[39].mxu1  ;;  %v809_v18 = vunpack.c.h.s8.bf16 %v649_v50  ;;  %v826_v50 = vunpack.c.h.s8.bf16 %v658_v10 }
 0x16e   : > { %v811_v24 = vunpack.c.h.s8.bf16 %v651_v51 }
 0x16f   : > { %2032 = vmatmul.mubr.bf16.gmra.mrb[144].mxu0 %v785_v14  ;;  %2321 = vmatmul.mubr.bf16.gmra.mrb[144].mxu1 %v787_v19 }
 0x170   : > { %2039 = vmatprep.mubr.bf16.mxu0 %v794_v21  ;;  %2328 = vmatprep.mubr.bf16.mxu1 %v796_v25  ;;  %v818_v25 = vunpack.c.l.s8.bf16 %v658_v10 }
 0x172   : > { %v1503_v30 = vpop.f32.mrb[40].mxu0  ;;  %v1792_v32 = vpop.f32.mrb[40].mxu1 }
 0x173   : > { %v1505_v33 = vpop.f32.mrb[41].mxu0  ;;  %v4436_v35 = vadd.f32 %v1792_v32, %v1503_v30  ;;  %v1794_v36 = vpop.f32.mrb[41].mxu1  ;;  %v820_v30 = vunpack.c.l.s8.bf16 %v660_v13 }
 0x174   : > { %v1506_v39 = vpop.f32.mrb[42].mxu0  ;;  %v1795_v42 = vpop.f32.mrb[42].mxu1  ;;  %v657_v33 = vld [vmem:[%s4116_s29 + $0x120] sm:$0xff] }
 0x175   : > { %v1508_v43 = vpop.f32.mrb[43].mxu0  ;;  %v4438_v45 = vadd.f32 %v1795_v42, %v1506_v39  ;;  %v1797_v49 = vpop.f32.mrb[43].mxu1 }
 0x177   : > { %2040 = vmatmul.mubr.bf16.gmra.mrb[148].mxu0 %v793_v34  ;;  %2329 = vmatmul.mubr.bf16.gmra.mrb[148].mxu1 %v795_v40  ;;  %v659_v34 = vld [vmem:[%s4116_s29 + $0x130] sm:$0xff] }
 0x178   : > { %2047 = vmatprep.mubr.bf16.mxu0 %v802_v41  ;;  %2336 = vmatprep.mubr.bf16.mxu1 %v804_v44  ;;  %v817_v41 = vunpack.c.l.s8.bf16 %v657_v33  ;;  %v819_v49 = vunpack.c.l.s8.bf16 %v659_v34 }
 0x17a   : > { %v1511_v52 = vpop.f32.mrb[44].mxu0  ;;  %v1800_v53 = vpop.f32.mrb[44].mxu1 }
 0x17b   : > { %v1513_v55 = vpop.f32.mrb[45].mxu0  ;;  %v4442_v59 = vadd.f32 %v1800_v53, %v1511_v52  ;;  %v1802_v60 = vpop.f32.mrb[45].mxu1  ;;  %v828_v53 = vunpack.c.h.s8.bf16 %v660_v13 }
 0x17c   : > { %v1514_v61 = vpop.f32.mrb[46].mxu0  ;;  %v1803_v3 = vpop.f32.mrb[46].mxu1  ;;  %v666_v60 = vld [vmem:[%s4116_s29 + $0x168] sm:$0xff] }
 0x17d   : > { %v1516_v4 = vpop.f32.mrb[47].mxu0  ;;  %v4444_v8 = vadd.f32 %v1803_v3, %v1514_v61  ;;  %v1805_v9 = vpop.f32.mrb[47].mxu1  ;;  %v834_v13 = vunpack.c.l.s8.bf16 %v666_v60 }
 0x17e   : > { %v825_v4 = vunpack.c.h.s8.bf16 %v657_v33 }
 0x17f   : > { %2048 = vmatmul.mubr.bf16.gmra.mrb[152].mxu0 %v801_v57  ;;  %2337 = vmatmul.mubr.bf16.gmra.mrb[152].mxu1 %v803_v63  ;;  %v668_v63 = vld [vmem:[%s4116_s29 + $0x178] sm:$0xff] }
 0x180   : > { %2055 = vmatprep.mubr.bf16.mxu0 %v810_v0  ;;  %2344 = vmatprep.mubr.bf16.mxu1 %v812_v6 }
 0x182   : > { %v1519_v12 = vpop.f32.mrb[48].mxu0  ;;  %v1808_v14 = vpop.f32.mrb[48].mxu1 }
 0x183   : > { %v1521_v17 = vpop.f32.mrb[49].mxu0  ;;  %v4448_v19 = vadd.f32 %v1808_v14, %v1519_v12  ;;  %v1810_v21 = vpop.f32.mrb[49].mxu1  ;;  %v827_v12 = vunpack.c.h.s8.bf16 %v659_v34 }
 0x184   : > { %v1522_v22 = vpop.f32.mrb[50].mxu0  ;;  %v1811_v27 = vpop.f32.mrb[50].mxu1 }
 0x185   : > { %v1524_v28 = vpop.f32.mrb[51].mxu0  ;;  %v4450_v1 = vadd.f32 %v1811_v27, %v1522_v22  ;;  %v1813_v32 = vpop.f32.mrb[51].mxu1 }
 0x187   : > { %2056 = vmatmul.mubr.bf16.gmra.mrb[156].mxu0 %v809_v18  ;;  %2345 = vmatmul.mubr.bf16.gmra.mrb[156].mxu1 %v811_v24  ;;  %v836_v18 = vunpack.c.l.s8.bf16 %v668_v63  ;;  %v665_v24 = vld [vmem:[%s4116_s29 + $0x160] sm:$0xff] }
 0x188   : > { %2063 = vmatprep.mubr.bf16.mxu0 %v818_v25  ;;  %2352 = vmatprep.mubr.bf16.mxu1 %v820_v30  ;;  %v667_v25 = vld [vmem:[%s4116_s29 + $0x170] sm:$0xff]  ;;  %v833_v32 = vunpack.c.l.s8.bf16 %v665_v24 }
 0x18a   : > { %v1527_v36 = vpop.f32.mrb[52].mxu0  ;;  %v1816_v39 = vpop.f32.mrb[52].mxu1 }
 0x18b   : > { %v1529_v40 = vpop.f32.mrb[53].mxu0  ;;  %v4454_v42 = vadd.f32 %v1816_v39, %v1527_v36  ;;  %v1818_v43 = vpop.f32.mrb[53].mxu1  ;;  %v835_v39 = vunpack.c.l.s8.bf16 %v667_v25 }
 0x18c   : > { %v1530_v44 = vpop.f32.mrb[54].mxu0  ;;  %v1819_v51 = vpop.f32.mrb[54].mxu1  ;;  %v842_v40 = vunpack.c.h.s8.bf16 %v666_v60 }
 0x18d   : > { %v1532_v52 = vpop.f32.mrb[55].mxu0  ;;  %v4456_v55 = vadd.f32 %v1819_v51, %v1530_v44  ;;  %v1821_v57 = vpop.f32.mrb[55].mxu1  ;;  %v844_v44 = vunpack.c.h.s8.bf16 %v668_v63  ;;  %v674_v51 = vld [vmem:[%s4116_s29 + $0x1a8] sm:$0xff]  ;;  %v843_v63 = vunpack.c.h.s8.bf16 %v667_v25 }
 0x18f   : > { %2064 = vmatmul.mubr.bf16.gmra.mrb[160].mxu0 %v817_v41  ;;  %2353 = vmatmul.mubr.bf16.gmra.mrb[160].mxu1 %v819_v49 }
 0x190   : > { %2071 = vmatprep.mubr.bf16.mxu0 %v826_v50  ;;  %2360 = vmatprep.mubr.bf16.mxu1 %v828_v53  ;;  %v676_v53 = vld [vmem:[%s4116_s29 + $0x1b8] sm:$0xff] }
 0x192   : > { %v1535_v61 = vpop.f32.mrb[56].mxu0  ;;  %v1824_v0 = vpop.f32.mrb[56].mxu1 }
 0x193   : > { %v1537_v3 = vpop.f32.mrb[57].mxu0  ;;  %v4460_v6 = vadd.f32 %v1824_v0, %v1535_v61  ;;  %v1826_v9 = vpop.f32.mrb[57].mxu1  ;;  %v841_v0 = vunpack.c.h.s8.bf16 %v665_v24 }
 0x194   : > { %v1538_v10 = vpop.f32.mrb[58].mxu0  ;;  %v1827_v14 = vpop.f32.mrb[58].mxu1  ;;  %v850_v9 = vunpack.c.l.s8.bf16 %v674_v51 }
 0x195   : > { %v1540_v17 = vpop.f32.mrb[59].mxu0  ;;  %v4462_v21 = vadd.f32 %v1827_v14, %v1538_v10  ;;  %v1829_v22 = vpop.f32.mrb[59].mxu1 }
 0x196   : > { %v675_v22 = vld [vmem:[%s4116_s29 + $0x1b0] sm:$0xff] }
 0x197   : > { %2072 = vmatmul.mubr.bf16.gmra.mrb[164].mxu0 %v825_v4  ;;  %2361 = vmatmul.mubr.bf16.gmra.mrb[164].mxu1 %v827_v12 }
 0x198   : > { %2079 = vmatprep.mubr.bf16.mxu0 %v834_v13  ;;  %2368 = vmatprep.mubr.bf16.mxu1 %v836_v18  ;;  %v852_v13 = vunpack.c.l.s8.bf16 %v676_v53  ;;  %v673_v18 = vld [vmem:[%s4116_s29 + $0x1a0] sm:$0xff] }
 0x19a   : > { %v1543_v27 = vpop.f32.mrb[60].mxu0  ;;  %v1832_v28 = vpop.f32.mrb[60].mxu1 }
 0x19b   : > { %v1545_v30 = vpop.f32.mrb[61].mxu0  ;;  %v4466_v33 = vadd.f32 %v1832_v28, %v1543_v27  ;;  %v1834_v34 = vpop.f32.mrb[61].mxu1 }
 0x19c   : > { %v1546_v36 = vpop.f32.mrb[62].mxu0  ;;  %v1835_v41 = vpop.f32.mrb[62].mxu1  ;;  %v849_v30 = vunpack.c.l.s8.bf16 %v673_v18 }
 0x19d   : > { %v1548_v43 = vpop.f32.mrb[63].mxu0  ;;  %v4468_v49 = vadd.f32 %v1835_v41, %v1546_v36  ;;  %v1837_v50 = vpop.f32.mrb[63].mxu1  ;;  %v851_v36 = vunpack.c.l.s8.bf16 %v675_v22 }
 0x19e   : > { %v860_v43 = vunpack.c.h.s8.bf16 %v676_v53  ;;  %v859_v53 = vunpack.c.h.s8.bf16 %v675_v22 }
 0x19f   : > { %2080 = vmatmul.mubr.bf16.gmra.mrb[168].mxu0 %v833_v32  ;;  %2369 = vmatmul.mubr.bf16.gmra.mrb[168].mxu1 %v835_v39  ;;  %v858_v39 = vunpack.c.h.s8.bf16 %v674_v51 }
 0x1a0   : > { %2087 = vmatprep.mubr.bf16.mxu0 %v842_v40  ;;  %2376 = vmatprep.mubr.bf16.mxu1 %v844_v44 }
 0x1a2   : > { %v1551_v52 = vpop.f32.mrb[64].mxu0  ;;  %v1840_v57 = vpop.f32.mrb[64].mxu1 }
 0x1a3   : > { %v1553_v61 = vpop.f32.mrb[65].mxu0  ;;  %v4472_v3 = vadd.f32 %v1840_v57, %v1551_v52  ;;  %v1842_v60 = vpop.f32.mrb[65].mxu1  ;;  %v682_v52 = vld [vmem:[%s4116_s29 + $0x1e8] sm:$0xff] }
 0x1a4   : > { %v1554_v4 = vpop.f32.mrb[66].mxu0  ;;  %v1843_v10 = vpop.f32.mrb[66].mxu1  ;;  %v684_v61 = vld [vmem:[%s4116_s29 + $0x1f8] sm:$0xff] }
 0x1a5   : > { %v1556_v12 = vpop.f32.mrb[67].mxu0  ;;  %v4474_v14 = vadd.f32 %v1843_v10, %v1554_v4  ;;  %v1845_v17 = vpop.f32.mrb[67].mxu1  ;;  %v857_v4 = vunpack.c.h.s8.bf16 %v673_v18  ;;  %v866_v10 = vunpack.c.l.s8.bf16 %v682_v52 }
 0x1a6   : > { %v868_v17 = vunpack.c.l.s8.bf16 %v684_v61 }
 0x1a7   : > { %2088 = vmatmul.mubr.bf16.gmra.mrb[172].mxu0 %v841_v0  ;;  %2377 = vmatmul.mubr.bf16.gmra.mrb[172].mxu1 %v843_v63 }
 0x1a8   : > { %2095 = vmatprep.mubr.bf16.mxu0 %v850_v9  ;;  %2384 = vmatprep.mubr.bf16.mxu1 %v852_v13 }
 0x1aa   : > { %v1559_v24 = vpop.f32.mrb[68].mxu0  ;;  %v1848_v27 = vpop.f32.mrb[68].mxu1 }
 0x1ab   : > { %v1561_v28 = vpop.f32.mrb[69].mxu0  ;;  %v4478_v32 = vadd.f32 %v1848_v27, %v1559_v24  ;;  %v1850_v25 = vpop.f32.mrb[69].mxu1 }
 0x1ac   : > { %v1562_v34 = vpop.f32.mrb[70].mxu0  ;;  %v1851_v40 = vpop.f32.mrb[70].mxu1  ;;  %v681_v28 = vld [vmem:[%s4116_s29 + $0x1e0] sm:$0xff] }
 0x1ad   : > { %v1564_v41 = vpop.f32.mrb[71].mxu0  ;;  %v4480_v44 = vadd.f32 %v1851_v40, %v1562_v34  ;;  %v1853_v50 = vpop.f32.mrb[71].mxu1 }
 0x1af   : > { %2096 = vmatmul.mubr.bf16.gmra.mrb[176].mxu0 %v849_v30  ;;  %2385 = vmatmul.mubr.bf16.gmra.mrb[176].mxu1 %v851_v36  ;;  %v683_v30 = vld [vmem:[%s4116_s29 + $0x1f0] sm:$0xff]  ;;  %v865_v36 = vunpack.c.l.s8.bf16 %v681_v28 }
 0x1b0   : > { %2103 = vmatprep.mubr.bf16.mxu0 %v858_v39  ;;  %2392 = vmatprep.mubr.bf16.mxu1 %v860_v43  ;;  %v867_v41 = vunpack.c.l.s8.bf16 %v683_v30  ;;  %v874_v43 = vunpack.c.h.s8.bf16 %v682_v52 }
 0x1b2   : > { %v1567_v57 = vpop.f32.mrb[72].mxu0  ;;  %v1856_v0 = vpop.f32.mrb[72].mxu1 }
 0x1b3   : > { %v1569_v60 = vpop.f32.mrb[73].mxu0  ;;  %v4484_v63 = vadd.f32 %v1856_v0, %v1567_v57  ;;  %v1858_v51 = vpop.f32.mrb[73].mxu1  ;;  %v876_v0 = vunpack.c.h.s8.bf16 %v684_v61  ;;  %v875_v61 = vunpack.c.h.s8.bf16 %v683_v30 }
 0x1b4   : > { %v1570_v9 = vpop.f32.mrb[74].mxu0  ;;  %v1859_v12 = vpop.f32.mrb[74].mxu1  ;;  %v690_v51 = vld [vmem:[%s4116_s29 + $0x228] sm:$0xff] }
 0x1b5   : > { %v1572_v13 = vpop.f32.mrb[75].mxu0  ;;  %v4486_v24 = vadd.f32 %v1859_v12, %v1570_v9  ;;  %v1861_v27 = vpop.f32.mrb[75].mxu1 }
 0x1b6   : > { %v873_v13 = vunpack.c.h.s8.bf16 %v681_v28 }
 0x1b7   : > { %2104 = vmatmul.mubr.bf16.gmra.mrb[180].mxu0 %v857_v4  ;;  %2393 = vmatmul.mubr.bf16.gmra.mrb[180].mxu1 %v859_v53  ;;  %v692_v53 = vld [vmem:[%s4116_s29 + $0x238] sm:$0xff] }
 0x1b8   : > { %2111 = vmatprep.mubr.bf16.mxu0 %v866_v10  ;;  %2400 = vmatprep.mubr.bf16.mxu1 %v868_v17 }
 0x1ba   : > { %v1575_v18 = vpop.f32.mrb[76].mxu0  ;;  %v1864_v25 = vpop.f32.mrb[76].mxu1 }
 0x1bb   : > { %v1577_v34 = vpop.f32.mrb[77].mxu0  ;;  %v4490_v39 = vadd.f32 %v1864_v25, %v1575_v18  ;;  %v1866_v22 = vpop.f32.mrb[77].mxu1  ;;  %v882_v18 = vunpack.c.l.s8.bf16 %v690_v51 }
 0x1bc   : > { %v1578_v40 = vpop.f32.mrb[78].mxu0  ;;  %v1867_v50 = vpop.f32.mrb[78].mxu1 }
 0x1bd   : > { %v1580_v57 = vpop.f32.mrb[79].mxu0  ;;  %v4492_v60 = vadd.f32 %v1867_v50, %v1578_v40  ;;  %v1869_v4 = vpop.f32.mrb[79].mxu1 }
 0x1bf   : > { %2112 = vmatmul.mubr.bf16.gmra.mrb[184].mxu0 %v865_v36  ;;  %2401 = vmatmul.mubr.bf16.gmra.mrb[184].mxu1 %v867_v41  ;;  %v884_v36 = vunpack.c.l.s8.bf16 %v692_v53  ;;  %v689_v41 = vld [vmem:[%s4116_s29 + $0x220] sm:$0xff] }
 0x1c0   : > { %2119 = vmatprep.mubr.bf16.mxu0 %v874_v43  ;;  %2408 = vmatprep.mubr.bf16.mxu1 %v876_v0  ;;  %v691_v43 = vld [vmem:[%s4116_s29 + $0x230] sm:$0xff]  ;;  %v881_v0 = vunpack.c.l.s8.bf16 %v689_v41 }
 0x1c2   : > { %v1583_v9 = vpop.f32.mrb[80].mxu0  ;;  %v1872_v10 = vpop.f32.mrb[80].mxu1 }
 0x1c3   : > { %v1585_v12 = vpop.f32.mrb[81].mxu0  ;;  %v4496_v17 = vadd.f32 %v1872_v10, %v1583_v9  ;;  %v1874_v52 = vpop.f32.mrb[81].mxu1  ;;  %v883_v10 = vunpack.c.l.s8.bf16 %v691_v43 }
 0x1c4   : > { %v1586_v27 = vpop.f32.mrb[82].mxu0  ;;  %v1875_v25 = vpop.f32.mrb[82].mxu1  ;;  %v890_v12 = vunpack.c.h.s8.bf16 %v690_v51 }
 0x1c5   : > { %4755 = vst [vmem:[#allocation3_spill] sm:$0xff] %v4496_v17  ;;  %v1588_v34 = vpop.f32.mrb[83].mxu0  ;;  %v4498_v22 = vadd.f32 %v1875_v25, %v1586_v27  ;;  %v1877_v40 = vpop.f32.mrb[83].mxu1  ;;  %v698_v25 = vld [vmem:[%s4116_s29 + $0x268] sm:$0xff] }
 0x1c7   : > { %4756 = vst [vmem:[#allocation4_spill] sm:$0xff] %v4498_v22  ;;  %2120 = vmatmul.mubr.bf16.gmra.mrb[188].mxu0 %v873_v13  ;;  %2409 = vmatmul.mubr.bf16.gmra.mrb[188].mxu1 %v875_v61  ;;  %v892_v13 = vunpack.c.h.s8.bf16 %v692_v53  ;;  %v891_v53 = vunpack.c.h.s8.bf16 %v691_v43 }
 0x1c8   : > { %2127 = vmatprep.mubr.bf16.mxu0 %v882_v18  ;;  %2416 = vmatprep.mubr.bf16.mxu1 %v884_v36  ;;  %v700_v36 = vld [vmem:[%s4116_s29 + $0x278] sm:$0xff] }
 0x1ca   : > { %v1591_v28 = vpop.f32.mrb[84].mxu0  ;;  %v1880_v50 = vpop.f32.mrb[84].mxu1 }
 0x1cb   : > { %v1593_v57 = vpop.f32.mrb[85].mxu0  ;;  %v4502_v4 = vadd.f32 %v1880_v50, %v1591_v28  ;;  %v1882_v30 = vpop.f32.mrb[85].mxu1  ;;  %v889_v50 = vunpack.c.h.s8.bf16 %v689_v41 }
 0x1cc   : > { %v1594_v9 = vpop.f32.mrb[86].mxu0  ;;  %v1883_v52 = vpop.f32.mrb[86].mxu1 }
 0x1cd   : > { %4757 = vst [vmem:[#allocation5_spill] sm:$0xff] %v4502_v4  ;;  %v1596_v27 = vpop.f32.mrb[87].mxu0  ;;  %v4504_v61 = vadd.f32 %v1883_v52, %v1594_v9  ;;  %v1885_v18 = vpop.f32.mrb[87].mxu1  ;;  %v898_v9 = vunpack.c.l.s8.bf16 %v698_v25 }
 0x1ce   : > { %v699_v18 = vld [vmem:[%s4116_s29 + $0x270] sm:$0xff] }
 0x1cf   : > { %4758 = vst [vmem:[#allocation6_spill] sm:$0xff] %v4504_v61  ;;  %2128 = vmatmul.mubr.bf16.gmra.mrb[192].mxu0 %v881_v0  ;;  %2417 = vmatmul.mubr.bf16.gmra.mrb[192].mxu1 %v883_v10  ;;  %v900_v0 = vunpack.c.l.s8.bf16 %v700_v36 }
 0x1d0   : > { %2135 = vmatprep.mubr.bf16.mxu0 %v890_v12  ;;  %2424 = vmatprep.mubr.bf16.mxu1 %v892_v13  ;;  %v697_v13 = vld [vmem:[%s4116_s29 + $0x260] sm:$0xff] }
 0x1d2   : > { %v1599_v34 = vpop.f32.mrb[88].mxu0  ;;  %v1888_v40 = vpop.f32.mrb[88].mxu1 }
 0x1d3   : > { %v1601_v28 = vpop.f32.mrb[89].mxu0  ;;  %v4508_v57 = vadd.f32 %v1888_v40, %v1599_v34  ;;  %v1890_v51 = vpop.f32.mrb[89].mxu1  ;;  %v897_v40 = vunpack.c.l.s8.bf16 %v697_v13 }
 0x1d4   : > { %v1602_v30 = vpop.f32.mrb[90].mxu0  ;;  %v1891_v52 = vpop.f32.mrb[90].mxu1 }
 0x1d5   : > { %4759 = vst [vmem:[#allocation7_spill] sm:$0xff] %v4508_v57  ;;  %v1604_v27 = vpop.f32.mrb[91].mxu0  ;;  %v4510_v10 = vadd.f32 %v1891_v52, %v1602_v30  ;;  %v1893_v12 = vpop.f32.mrb[91].mxu1  ;;  %v899_v57 = vunpack.c.l.s8.bf16 %v699_v18  ;;  %v906_v30 = vunpack.c.h.s8.bf16 %v698_v25 }
 0x1d7   : > { %4760 = vst [vmem:[#allocation8_spill] sm:$0xff] %v4510_v10  ;;  %2136 = vmatmul.mubr.bf16.gmra.mrb[196].mxu0 %v889_v50  ;;  %2425 = vmatmul.mubr.bf16.gmra.mrb[196].mxu1 %v891_v53  ;;  %v908_v50 = vunpack.c.h.s8.bf16 %v700_v36  ;;  %v708_v10 = vld [vmem:[%s4116_s29 + $0x2b8] sm:$0xff]  ;;  %v907_v36 = vunpack.c.h.s8.bf16 %v699_v18 }
 0x1d8   : > { %2143 = vmatprep.mubr.bf16.mxu0 %v898_v9  ;;  %2432 = vmatprep.mubr.bf16.mxu1 %v900_v0  ;;  %v706_v0 = vld [vmem:[%s4116_s29 + $0x2a8] sm:$0xff] }
 0x1da   : > { %v1607_v41 = vpop.f32.mrb[92].mxu0  ;;  %v1896_v28 = vpop.f32.mrb[92].mxu1 }
 0x1db   : > { %v1609_v34 = vpop.f32.mrb[93].mxu0  ;;  %v4514_v51 = vadd.f32 %v1896_v28, %v1607_v41  ;;  %v1898_v43 = vpop.f32.mrb[93].mxu1 }
 0x1dc   : > { %v1610_v27 = vpop.f32.mrb[94].mxu0  ;;  %v1899_v52 = vpop.f32.mrb[94].mxu1  ;;  %v905_v43 = vunpack.c.h.s8.bf16 %v697_v13 }
 0x1dd   : > { %4761 = vst [vmem:[#allocation9_spill] sm:$0xff] %v4514_v51  ;;  %v1612_v12 = vpop.f32.mrb[95].mxu0  ;;  %v4516_v53 = vadd.f32 %v1899_v52, %v1610_v27  ;;  %v1901_v9 = vpop.f32.mrb[95].mxu1  ;;  %v914_v27 = vunpack.c.l.s8.bf16 %v706_v0 }
 0x1df   : > { %4762 = vst [vmem:[#allocation10_spill] sm:$0xff] %v4516_v53  ;;  %2144 = vmatmul.mubr.bf16.gmra.mrb[200].mxu0 %v897_v40  ;;  %2433 = vmatmul.mubr.bf16.gmra.mrb[200].mxu1 %v899_v57  ;;  %v916_v40 = vunpack.c.l.s8.bf16 %v708_v10 }
 0x1e0   : > { %2151 = vmatprep.mubr.bf16.mxu0 %v906_v30  ;;  %2440 = vmatprep.mubr.bf16.mxu1 %v908_v50  ;;  %v705_v50 = vld [vmem:[%s4116_s29 + $0x2a0] sm:$0xff] }
 0x1e2   : > { %v1615_v34 = vpop.f32.mrb[96].mxu0  ;;  %v1904_v41 = vpop.f32.mrb[96].mxu1 }
 0x1e3   : > { %v1617_v28 = vpop.f32.mrb[97].mxu0  ;;  %v4520_v51 = vadd.f32 %v1904_v41, %v1615_v34  ;;  %v1906_v25 = vpop.f32.mrb[97].mxu1  ;;  %v913_v41 = vunpack.c.l.s8.bf16 %v705_v50 }
 0x1e4   : > { %v1618_v12 = vpop.f32.mrb[98].mxu0  ;;  %v1907_v52 = vpop.f32.mrb[98].mxu1  ;;  %v707_v28 = vld [vmem:[%s4116_s29 + $0x2b0] sm:$0xff] }
 0x1e5   : > { %4763 = vst [vmem:[#allocation11_spill] sm:$0xff] %v4520_v51  ;;  %v1620_v9 = vpop.f32.mrb[99].mxu0  ;;  %v4522_v57 = vadd.f32 %v1907_v52, %v1618_v12  ;;  %v1909_v30 = vpop.f32.mrb[99].mxu1  ;;  %v915_v51 = vunpack.c.l.s8.bf16 %v707_v28  ;;  %v922_v12 = vunpack.c.h.s8.bf16 %v706_v0 }
 0x1e7   : > { %4764 = vst [vmem:[#allocation12_spill] sm:$0xff] %v4522_v57  ;;  %2152 = vmatmul.mubr.bf16.gmra.mrb[204].mxu0 %v905_v43  ;;  %2441 = vmatmul.mubr.bf16.gmra.mrb[204].mxu1 %v907_v36  ;;  %v924_v43 = vunpack.c.h.s8.bf16 %v708_v10  ;;  %v716_v57 = vld [vmem:[%s4116_s29 + $0x2f8] sm:$0xff]  ;;  %v923_v10 = vunpack.c.h.s8.bf16 %v707_v28 }
 0x1e8   : > { %2159 = vmatprep.mubr.bf16.mxu0 %v914_v27  ;;  %2448 = vmatprep.mubr.bf16.mxu1 %v916_v40  ;;  %v714_v40 = vld [vmem:[%s4116_s29 + $0x2e8] sm:$0xff] }
 0x1ea   : > { %v1623_v13 = vpop.f32.mrb[100].mxu0  ;;  %v1912_v53 = vpop.f32.mrb[100].mxu1 }
 0x1eb   : > { %v1625_v34 = vpop.f32.mrb[101].mxu0  ;;  %v4526_v25 = vadd.f32 %v1912_v53, %v1623_v13  ;;  %v1914_v18 = vpop.f32.mrb[101].mxu1 }
 0x1ec   : > { %v1626_v9 = vpop.f32.mrb[102].mxu0  ;;  %v1915_v52 = vpop.f32.mrb[102].mxu1  ;;  %v921_v18 = vunpack.c.h.s8.bf16 %v705_v50 }
 0x1ed   : > { %4765 = vst [vmem:[#allocation13_spill] sm:$0xff] %v4526_v25  ;;  %v1628_v30 = vpop.f32.mrb[103].mxu0  ;;  %v4528_v36 = vadd.f32 %v1915_v52, %v1626_v9  ;;  %v1917_v27 = vpop.f32.mrb[103].mxu1  ;;  %v930_v9 = vunpack.c.l.s8.bf16 %v714_v40 }
 0x1ef   : > { %4766 = vst [vmem:[#allocation14_spill] sm:$0xff] %v4528_v36  ;;  %2160 = vmatmul.mubr.bf16.gmra.mrb[208].mxu0 %v913_v41  ;;  %2449 = vmatmul.mubr.bf16.gmra.mrb[208].mxu1 %v915_v51  ;;  %v932_v41 = vunpack.c.l.s8.bf16 %v716_v57 }
 0x1f0   : > { %2167 = vmatprep.mubr.bf16.mxu0 %v922_v12  ;;  %2456 = vmatprep.mubr.bf16.mxu1 %v924_v43  ;;  %v713_v43 = vld [vmem:[%s4116_s29 + $0x2e0] sm:$0xff] }
 0x1f2   : > { %v1631_v34 = vpop.f32.mrb[104].mxu0  ;;  %v1920_v53 = vpop.f32.mrb[104].mxu1 }
 0x1f3   : > { %v1633_v13 = vpop.f32.mrb[105].mxu0  ;;  %v4532_v25 = vadd.f32 %v1920_v53, %v1631_v34  ;;  %v1922_v0 = vpop.f32.mrb[105].mxu1  ;;  %v929_v53 = vunpack.c.l.s8.bf16 %v713_v43 }
 0x1f4   : > { %v1634_v30 = vpop.f32.mrb[106].mxu0  ;;  %v1923_v52 = vpop.f32.mrb[106].mxu1  ;;  %v715_v13 = vld [vmem:[%s4116_s29 + $0x2f0] sm:$0xff] }
 0x1f5   : > { %4767 = vst [vmem:[#allocation15_spill] sm:$0xff] %v4532_v25  ;;  %v1636_v27 = vpop.f32.mrb[107].mxu0  ;;  %v4534_v51 = vadd.f32 %v1923_v52, %v1634_v30  ;;  %v1925_v12 = vpop.f32.mrb[107].mxu1  ;;  %v931_v25 = vunpack.c.l.s8.bf16 %v715_v13  ;;  %v938_v30 = vunpack.c.h.s8.bf16 %v714_v40 }
 0x1f7   : > { %4768 = vst [vmem:[#allocation16_spill] sm:$0xff] %v4534_v51  ;;  %2168 = vmatmul.mubr.bf16.gmra.mrb[212].mxu0 %v921_v18  ;;  %2457 = vmatmul.mubr.bf16.gmra.mrb[212].mxu1 %v923_v10  ;;  %v940_v18 = vunpack.c.h.s8.bf16 %v716_v57  ;;  %v724_v51 = vld [vmem:[%s4116_s29 + $0x338] sm:$0xff]  ;;  %v939_v57 = vunpack.c.h.s8.bf16 %v715_v13 }
 0x1f8   : > { %2175 = vmatprep.mubr.bf16.mxu0 %v930_v9  ;;  %2464 = vmatprep.mubr.bf16.mxu1 %v932_v41  ;;  %v722_v41 = vld [vmem:[%s4116_s29 + $0x328] sm:$0xff] }
 0x1fa   : > { %v1639_v50 = vpop.f32.mrb[108].mxu0  ;;  %v1928_v36 = vpop.f32.mrb[108].mxu1 }
 0x1fb   : > { %v1641_v34 = vpop.f32.mrb[109].mxu0  ;;  %v4538_v0 = vadd.f32 %v1928_v36, %v1639_v50  ;;  %v1930_v28 = vpop.f32.mrb[109].mxu1 }
 0x1fc   : > { %v1642_v27 = vpop.f32.mrb[110].mxu0  ;;  %v1931_v52 = vpop.f32.mrb[110].mxu1  ;;  %v937_v28 = vunpack.c.h.s8.bf16 %v713_v43 }
 0x1fd   : > { %4769 = vst [vmem:[#allocation17_spill] sm:$0xff] %v4538_v0  ;;  %v1644_v12 = vpop.f32.mrb[111].mxu0  ;;  %v4540_v10 = vadd.f32 %v1931_v52, %v1642_v27  ;;  %v1933_v9 = vpop.f32.mrb[111].mxu1  ;;  %v946_v27 = vunpack.c.l.s8.bf16 %v722_v41 }
 0x1ff   : > { %4770 = vst [vmem:[#allocation18_spill] sm:$0xff] %v4540_v10  ;;  %2176 = vmatmul.mubr.bf16.gmra.mrb[216].mxu0 %v929_v53  ;;  %2465 = vmatmul.mubr.bf16.gmra.mrb[216].mxu1 %v931_v25  ;;  %v948_v53 = vunpack.c.l.s8.bf16 %v724_v51 }
 0x200   : > { %2183 = vmatprep.mubr.bf16.mxu0 %v938_v30  ;;  %2472 = vmatprep.mubr.bf16.mxu1 %v940_v18  ;;  %v721_v18 = vld [vmem:[%s4116_s29 + $0x320] sm:$0xff] }
 0x202   : > { %v1647_v34 = vpop.f32.mrb[112].mxu0  ;;  %v1936_v36 = vpop.f32.mrb[112].mxu1 }
 0x203   : > { %v1649_v50 = vpop.f32.mrb[113].mxu0  ;;  %v4544_v0 = vadd.f32 %v1936_v36, %v1647_v34  ;;  %v1938_v40 = vpop.f32.mrb[113].mxu1 }
 0x204   : > { %v1650_v12 = vpop.f32.mrb[114].mxu0  ;;  %v1939_v52 = vpop.f32.mrb[114].mxu1  ;;  %v723_v50 = vld [vmem:[%s4116_s29 + $0x330] sm:$0xff]  ;;  %v945_v40 = vunpack.c.l.s8.bf16 %v721_v18 }
 0x205   : > { %4771 = vst [vmem:[#allocation19_spill] sm:$0xff] %v4544_v0  ;;  %v1652_v9 = vpop.f32.mrb[115].mxu0  ;;  %v4546_v25 = vadd.f32 %v1939_v52, %v1650_v12  ;;  %v1941_v30 = vpop.f32.mrb[115].mxu1  ;;  %v947_v12 = vunpack.c.l.s8.bf16 %v723_v50  ;;  %v954_v52 = vunpack.c.h.s8.bf16 %v722_v41 }
 0x207   : > { %4772 = vst [vmem:[#allocation20_spill] sm:$0xff] %v4546_v25  ;;  %2184 = vmatmul.mubr.bf16.gmra.mrb[220].mxu0 %v937_v28  ;;  %2473 = vmatmul.mubr.bf16.gmra.mrb[220].mxu1 %v939_v57  ;;  %v956_v57 = vunpack.c.h.s8.bf16 %v724_v51  ;;  %v953_v51 = vunpack.c.h.s8.bf16 %v721_v18  ;;  %v731_v18 = vld [vmem:[%s4116_s29 + $0x370] sm:$0xff] }
 0x208   : > { %2191 = vmatprep.mubr.bf16.mxu0 %v946_v27  ;;  %2480 = vmatprep.mubr.bf16.mxu1 %v948_v53 }
 0x20a   : > { %v1655_v43 = vpop.f32.mrb[116].mxu0  ;;  %v1944_v34 = vpop.f32.mrb[116].mxu1 }
 0x20b   : > { %v1657_v36 = vpop.f32.mrb[117].mxu0  ;;  %v4550_v13 = vadd.f32 %v1944_v34, %v1655_v43  ;;  %v1946_v0 = vpop.f32.mrb[117].mxu1  ;;  %v732_v43 = vld [vmem:[%s4116_s29 + $0x378] sm:$0xff] }
 0x20c   : > { %v1658_v9 = vpop.f32.mrb[118].mxu0  ;;  %v1947_v30 = vpop.f32.mrb[118].mxu1  ;;  %v730_v36 = vld [vmem:[%s4116_s29 + $0x368] sm:$0xff] }
 0x20d   : > { %4773 = vst [vmem:[#allocation21_spill] sm:$0xff] %v4550_v13  ;;  %v1660_v28 = vpop.f32.mrb[119].mxu0  ;;  %v4552_v27 = vadd.f32 %v1947_v30, %v1658_v9  ;;  %v1949_v53 = vpop.f32.mrb[119].mxu1 }
 0x20f   : > { %4774 = vst [vmem:[#allocation22_spill] sm:$0xff] %v4552_v27  ;;  %2192 = vmatmul.mubr.bf16.gmra.mrb[224].mxu0 %v945_v40  ;;  %2481 = vmatmul.mubr.bf16.gmra.mrb[224].mxu1 %v947_v12  ;;  %v955_v12 = vunpack.c.h.s8.bf16 %v723_v50 }
 0x210   : > { %2199 = vmatprep.mubr.bf16.mxu0 %v954_v52  ;;  %2488 = vmatprep.mubr.bf16.mxu1 %v956_v57  ;;  %v962_v52 = vunpack.c.l.s8.bf16 %v730_v36  ;;  %v964_v57 = vunpack.c.l.s8.bf16 %v732_v43 }
 0x212   : > { %v1663_v25 = vpop.f32.mrb[120].mxu0  ;;  %v1952_v0 = vpop.f32.mrb[120].mxu1 }
 0x213   : > { %v1665_v41 = vpop.f32.mrb[121].mxu0  ;;  %v4561_v34 = vadd.f32 %v1952_v0, %v1663_v25  ;;  %v1954_v40 = vpop.f32.mrb[121].mxu1  ;;  %v729_v25 = vld [vmem:[%s4116_s29 + $0x360] sm:$0xff] }
 0x214   : > { %v1666_v9 = vpop.f32.mrb[122].mxu0  ;;  %v1955_v30 = vpop.f32.mrb[122].mxu1  ;;  %v961_v40 = vunpack.c.l.s8.bf16 %v729_v25  ;;  %v969_v10 = vunpack.c.h.s8.bf16 %v729_v25 }
 0x215   : > { %4776 = vst [vmem:[#allocation23_spill] sm:$0xff] %v4561_v34  ;;  %v1668_v28 = vpop.f32.mrb[123].mxu0  ;;  %v4563_v53 = vadd.f32 %v1955_v30, %v1666_v9  ;;  %v1957_v27 = vpop.f32.mrb[123].mxu1  ;;  %v963_v30 = vunpack.c.l.s8.bf16 %v731_v18 }
 0x217   : > { %4777 = vst [vmem:[#allocation24_spill] sm:$0xff] %v4563_v53  ;;  %2200 = vmatmul.mubr.bf16.gmra.mrb[228].mxu0 %v953_v51  ;;  %2489 = vmatmul.mubr.bf16.gmra.mrb[228].mxu1 %v955_v12  ;;  %v970_v53 = vunpack.c.h.s8.bf16 %v730_v36 }
 0x218   : > { %2207 = vmatprep.mubr.bf16.mxu0 %v962_v52  ;;  %2496 = vmatprep.mubr.bf16.mxu1 %v964_v57  ;;  %v972_v52 = vunpack.c.h.s8.bf16 %v732_v43 }
 0x21a   : > { %v1671_v0 = vpop.f32.mrb[124].mxu0  ;;  %v1960_v50 = vpop.f32.mrb[124].mxu1 }
 0x21b   : > { %v1673_v41 = vpop.f32.mrb[125].mxu0  ;;  %v4572_v28 = vadd.f32 %v1960_v50, %v1671_v0  ;;  %v1962_v27 = vpop.f32.mrb[125].mxu1  ;;  %v3545_v50 = vld [vmem:[%s4579_s19] sm:$0xff]  }
 0x21c   : > { %v1674_v9 = vpop.f32.mrb[126].mxu0  ;;  %v1963_v51 = vpop.f32.mrb[126].mxu1  ;;  %v738_v41 = vld [vmem:[%s4116_s29 + $0x3a8] sm:$0xff]  ;;  %v740_v27 = vld [vmem:[%s4116_s29 + $0x3b8] sm:$0xff] }
 0x21d   : > { %4778 = vst [vmem:[#allocation25_spill] sm:$0xff] %v4572_v28  ;;  %v1676_v12 = vpop.f32.mrb[127].mxu0  ;;  %v4581_v57 = vadd.f32 %v1963_v51, %v1674_v9  ;;  %v1965_v0 = vpop.f32.mrb[127].mxu1  ;;  %v3546_v28 = vunpack.c.l.bf16 %v3545_v50  ;;  %v971_v9 = vunpack.c.h.s8.bf16 %v731_v18  ;;  %v978_v51 = vunpack.c.l.s8.bf16 %v738_v41 }
 0x21f   : > { %4779 = vst [vmem:[#allocation26_spill] sm:$0xff] %v4581_v57  ;;  %2208 = vmatmul.mubr.bf16.gmra.mrb[232].mxu0 %v961_v40  ;;  %2497 = vmatmul.mubr.bf16.gmra.mrb[232].mxu1 %v963_v30  ;;  %v980_v57 = vunpack.c.l.s8.bf16 %v740_v27 }
 0x220   : > { %2215 = vmatprep.mubr.bf16.mxu0 %v970_v53  ;;  %2504 = vmatprep.mubr.bf16.mxu1 %v972_v52  ;;  %v3547_v53 = vunpack.c.h.bf16 %v3545_v50 }
 0x222   : > { %v2001_v36 = vpop.f32.mrb[128].mxu0  ;;  %v2290_v34 = vpop.f32.mrb[128].mxu1 }
 0x223   : > { %v2002_v12 = vadd.f32 %v2001_v36, %v4376_v46  ;;  %v2003_v13 = vpop.f32.mrb[129].mxu0  ;;  %v2292_v61 = vpop.f32.mrb[129].mxu1 }
 0x224   : > { %v2004_v43 = vpop.f32.mrb[130].mxu0  ;;  %v2293_v52 = vpop.f32.mrb[130].mxu1  ;;  %v3832_v13 = vld [vmem:[%s4579_s19 + $0x8] sm:$0xff]   ;;  %v4590_v61 = vld [vmem:[%s4116_s29 + $0x3a0] sm:$0xff] }
 0x225   : > { %v2291_v40 = vadd.f32 %v2290_v34, %v2002_v12  ;;  %v2005_v30 = vadd.f32 %v2004_v43, %v4378_v54  ;;  %v2006_v0 = vpop.f32.mrb[131].mxu0  ;;  %v2295_v4 = vpop.f32.mrb[131].mxu1  ;;  %v4593_v34 = vld [vmem:[%s4116_s29 + $0x3b0] sm:$0xff]  ;;  %v3550_v50 = vunpack.c.l.bf16 %v3832_v13  ;;  %v977_v43 = vunpack.c.l.s8.bf16 %v4590_v61 }
 0x227   : > { %v2545_v46 = vadd.f32 %v3546_v28, %v2291_v40  ;;  %v2294_v36 = vadd.f32 %v2293_v52, %v2005_v30  ;;  %2216 = vmatmul.mubr.bf16.gmra.mrb[236].mxu0 %v969_v10  ;;  %2505 = vmatmul.mubr.bf16.gmra.mrb[236].mxu1 %v971_v9  ;;  %v3551_v40 = vunpack.c.h.bf16 %v3832_v13  ;;  %v986_v30 = vunpack.c.h.s8.bf16 %v738_v41 }
 0x228   : > { %2223 = vmatprep.mubr.bf16.mxu0 %v978_v51  ;;  %2512 = vmatprep.mubr.bf16.mxu1 %v980_v57  ;;  %v979_v57 = vunpack.c.l.s8.bf16 %v4593_v34 }
 0x229   : > { %v2804_v25 = vmul.f32 0.05, %v2545_v46  ;;  %v2546_v18 = vadd.f32 %v3547_v53, %v2294_v36  ;;  %vm2740_vm0 = vcmp.ge.f32.partialorder %v2545_v46, 0.0  ;;  %v988_v53 = vunpack.c.h.s8.bf16 %v740_v27 }
 0x22a   : > { %v2009_v54 = vpop.f32.mrb[132].mxu0  ;;  %v2298_v28 = vpop.f32.mrb[132].mxu1 }
 0x22b   : > { %vm2741_vm1 = vcmp.ge.f32.partialorder %v2546_v18, 0.0  ;;  %v2805_v12 = vmul.f32 0.05, %v2546_v18  ;;  %v2010_v4 = vadd.f32 %v2009_v54, %v4382_v62  ;;  %v2011_v10 = vpop.f32.mrb[133].mxu0  ;;  %v2300_v9 = vpop.f32.mrb[133].mxu1  ;;  %v2868_v52 = vsel %vm2740_vm0, %v2545_v46, %v2804_v25  ;;  %v3833_v46 = vld [vmem:[%s4579_s19 + $0x10] sm:$0xff]  }
 0x22c   : > { %v2012_v51 = vpop.f32.mrb[134].mxu0  ;;  %v2301_v13 = vpop.f32.mrb[134].mxu1 }
 0x22d   : > { %v2869_v62 = vsel %vm2741_vm1, %v2546_v18, %v2805_v12  ;;  %v2299_v0 = vadd.f32 %v2298_v28, %v2010_v4  ;;  %v2013_v36 = vadd.f32 %v2012_v51, %v4384_v7  ;;  %v2014_v54 = vpop.f32.mrb[135].mxu0  ;;  %v2303_v9 = vpop.f32.mrb[135].mxu1  ;;  %v4609_v18 = vld [vmem:[%s4116_s29 + $0x3e8] sm:$0xff]  ;;  %v4612_v12 = vld [vmem:[%s4116_s29 + $0x3f8] sm:$0xff]  ;;  %v3554_v4 = vunpack.c.l.bf16 %v3833_v46 }
 0x22e   : > { %v3675_v10 = vpack.c.bf16 %v2869_v62, %v2868_v52  ;;  %v985_v52 = vunpack.c.h.s8.bf16 %v4590_v61  ;;  %v994_v62 = vunpack.c.l.s8.bf16 %v4609_v18 }
 0x22f   : > { %v2547_v41 = vadd.f32 %v3550_v50, %v2299_v0  ;;  %v2302_v27 = vadd.f32 %v2301_v13, %v2013_v36  ;;  %2224 = vmatmul.mubr.bf16.gmra.mrb[240].mxu0 %v977_v43  ;;  %2513 = vmatmul.mubr.bf16.gmra.mrb[240].mxu1 %v979_v57  ;;  %v996_v0 = vunpack.c.l.s8.bf16 %v4612_v12 }
 0x230   : > { %3676 = vst [vmem:[%s4603_s22] sm:$0xff] %v3675_v10   ;;  %2231 = vmatprep.mubr.bf16.mxu0 %v986_v30  ;;  %2520 = vmatprep.mubr.bf16.mxu1 %v988_v53  ;;  %v987_v53 = vunpack.c.h.s8.bf16 %v4593_v34  ;;  %v745_v34 = vld [vmem:[%s4116_s29 + $0x3e0] sm:$0xff] }
 0x231   : > { %v2806_v25 = vmul.f32 0.05, %v2547_v41  ;;  %v2548_v22 = vadd.f32 %v3551_v40, %v2302_v27  ;;  %vm2742_vm2 = vcmp.ge.f32.partialorder %v2547_v41, 0.0  ;;  %v3555_v40 = vunpack.c.h.bf16 %v3833_v46 }
 0x232   : > { %v2017_v7 = vpop.f32.mrb[136].mxu0  ;;  %v2306_v51 = vpop.f32.mrb[136].mxu1 }
 0x233   : > { %vm2743_vm3 = vcmp.ge.f32.partialorder %v2548_v22, 0.0  ;;  %v2807_v28 = vmul.f32 0.05, %v2548_v22  ;;  %v2018_v50 = vadd.f32 %v2017_v7, %v4388_v15  ;;  %v2019_v43 = vpop.f32.mrb[137].mxu0  ;;  %v2308_v57 = vpop.f32.mrb[137].mxu1  ;;  %v2870_v36 = vsel %vm2742_vm2, %v2547_v41, %v2806_v25 }
 0x234   : > { %v2020_v30 = vpop.f32.mrb[138].mxu0  ;;  %v2309_v10 = vpop.f32.mrb[138].mxu1  ;;  %v3834_v43 = vld [vmem:[%s4579_s19 + $0x18] sm:$0xff]  }
 0x235   : > { %v2871_v13 = vsel %vm2743_vm3, %v2548_v22, %v2807_v28  ;;  %v2307_v54 = vadd.f32 %v2306_v51, %v2018_v50  ;;  %v2021_v15 = vadd.f32 %v2020_v30, %v4390_v23  ;;  %v2022_v61 = vpop.f32.mrb[139].mxu0  ;;  %v2311_v27 = vpop.f32.mrb[139].mxu1  ;;  %v747_v22 = vld [vmem:[%s4116_s29 + $0x3f0] sm:$0xff]  ;;  %v3558_v23 = vunpack.c.l.bf16 %v3834_v43 }
 0x236   : > { %v3680_v9 = vpack.c.bf16 %v2871_v13, %v2870_v36  ;;  %v993_v51 = vunpack.c.l.s8.bf16 %v745_v34 }
 0x237   : > { %v2549_v7 = vadd.f32 %v3554_v4, %v2307_v54  ;;  %v2310_v46 = vadd.f32 %v2309_v10, %v2021_v15  ;;  %2232 = vmatmul.mubr.bf16.gmra.mrb[244].mxu0 %v985_v52  ;;  %2521 = vmatmul.mubr.bf16.gmra.mrb[244].mxu1 %v987_v53  ;;  %v3559_v53 = vunpack.c.h.bf16 %v3834_v43 }
 0x238   : > { %3863 = vst [vmem:[%s4603_s22 + $0x8] sm:$0xff] %v3680_v9   ;;  %2239 = vmatprep.mubr.bf16.mxu0 %v994_v62  ;;  %2528 = vmatprep.mubr.bf16.mxu1 %v996_v0  ;;  %v995_v62 = vunpack.c.l.s8.bf16 %v747_v22  ;;  %v1004_v0 = vunpack.c.h.s8.bf16 %v4612_v12 }
 0x239   : > { %v2808_v57 = vmul.f32 0.05, %v2549_v7  ;;  %v2550_v17 = vadd.f32 %v3555_v40, %v2310_v46  ;;  %vm2744_vm4 = vcmp.ge.f32.partialorder %v2549_v7, 0.0  ;;  %v1002_v40 = vunpack.c.h.s8.bf16 %v4609_v18 }
 0x23a   : > { %v2025_v41 = vpop.f32.mrb[140].mxu0  ;;  %v2314_v50 = vpop.f32.mrb[140].mxu1 }
 0x23b   : > { %vm2745_vm5 = vcmp.ge.f32.partialorder %v2550_v17, 0.0  ;;  %v2809_v25 = vmul.f32 0.05, %v2550_v17  ;;  %v2026_v28 = vadd.f32 %v2025_v41, %v4394_v31  ;;  %v2027_v4 = vpop.f32.mrb[141].mxu0  ;;  %v2316_v52 = vpop.f32.mrb[141].mxu1  ;;  %v2872_v36 = vsel %vm2744_vm4, %v2549_v7, %v2808_v57  ;;  %v3835_v41 = vld [vmem:[%s4579_s19 + $0x20] sm:$0xff]  }
 0x23c   : > { %v2028_v30 = vpop.f32.mrb[142].mxu0  ;;  %v2317_v10 = vpop.f32.mrb[142].mxu1  ;;  %v3563_v4 = vunpack.c.h.bf16 %v3835_v41 }
 0x23d   : > { %v2873_v13 = vsel %vm2745_vm5, %v2550_v17, %v2809_v25  ;;  %v2315_v54 = vadd.f32 %v2314_v50, %v2026_v28  ;;  %v2029_v15 = vadd.f32 %v2028_v30, %v4396_v38  ;;  %v2030_v31 = vpop.f32.mrb[143].mxu0  ;;  %v2319_v9 = vpop.f32.mrb[143].mxu1  ;;  %v3562_v17 = vunpack.c.l.bf16 %v3835_v41 }
 0x23e   : > { %v3685_v61 = vpack.c.bf16 %v2873_v13, %v2872_v36  ;;  %v1001_v28 = vunpack.c.h.s8.bf16 %v745_v34  ;;  %v3836_v34 = vld [vmem:[%s4579_s19 + $0x28] sm:$0xff]  }
 0x23f   : > { %v2551_v27 = vadd.f32 %v3558_v23, %v2315_v54  ;;  %v2318_v46 = vadd.f32 %v2317_v10, %v2029_v15  ;;  %2240 = vmatmul.mubr.bf16.gmra.mrb[248].mxu0 %v993_v51  ;;  %2529 = vmatmul.mubr.bf16.gmra.mrb[248].mxu1 %v995_v62  ;;  %v1003_v51 = vunpack.c.h.s8.bf16 %v747_v22  ;;  %v3566_v9 = vunpack.c.l.bf16 %v3836_v34 }
 0x240   : > { %3864 = vst [vmem:[%s4603_s22 + $0x10] sm:$0xff] %v3685_v61   ;;  %2247 = vmatprep.mubr.bf16.mxu0 %v1002_v40  ;;  %2536 = vmatprep.mubr.bf16.mxu1 %v1004_v0 }
 0x241   : > { %v2810_v43 = vmul.f32 0.05, %v2551_v27  ;;  %v2552_v18 = vadd.f32 %v3559_v53, %v2318_v46  ;;  %vm2746_vm6 = vcmp.ge.f32.partialorder %v2551_v27, 0.0 }
 0x242   : > { %v2033_v12 = vpop.f32.mrb[144].mxu0  ;;  %v2322_v57 = vpop.f32.mrb[144].mxu1 }
 0x243   : > { %vm2747_vm7 = vcmp.ge.f32.partialorder %v2552_v18, 0.0  ;;  %v2811_v7 = vmul.f32 0.05, %v2552_v18  ;;  %v2034_v38 = vadd.f32 %v2033_v12, %v4400_v47  ;;  %v2035_v25 = vpop.f32.mrb[145].mxu0  ;;  %v2324_v23 = vpop.f32.mrb[145].mxu1  ;;  %v2874_v52 = vsel %vm2746_vm6, %v2551_v27, %v2810_v43 }
 0x244   : > { %v2036_v50 = vpop.f32.mrb[146].mxu0  ;;  %v2325_v40 = vpop.f32.mrb[146].mxu1  ;;  %v3567_v43 = vunpack.c.h.bf16 %v3836_v34 }
 0x245   : > { %v2875_v30 = vsel %vm2747_vm7, %v2552_v18, %v2811_v7  ;;  %v2323_v53 = vadd.f32 %v2322_v57, %v2034_v38  ;;  %v2037_v62 = vadd.f32 %v2036_v50, %v4402_v56  ;;  %v2038_v0 = vpop.f32.mrb[147].mxu0  ;;  %v2327_v13 = vpop.f32.mrb[147].mxu1 }
 0x246   : > { %v3690_v36 = vpack.c.bf16 %v2875_v30, %v2874_v52 }
 0x247   : > { %v2553_v54 = vadd.f32 %v3562_v17, %v2323_v53  ;;  %v2326_v47 = vadd.f32 %v2325_v40, %v2037_v62  ;;  %2248 = vmatmul.mubr.bf16.gmra.mrb[252].mxu0 %v1001_v28  ;;  %2537 = vmatmul.mubr.bf16.gmra.mrb[252].mxu1 %v1003_v51 }
 0x248   : > { %3865 = vst [vmem:[%s4603_s22 + $0x18] sm:$0xff] %v3690_v36  }
 0x249   : > { %v2812_v15 = vmul.f32 0.05, %v2553_v54  ;;  %v2554_v10 = vadd.f32 %v3563_v4, %v2326_v47  ;;  %vm2748_vm8 = vcmp.ge.f32.partialorder %v2553_v54, 0.0 }
 0x24a   : > { %v2041_v31 = vpop.f32.mrb[148].mxu0  ;;  %v2330_v56 = vpop.f32.mrb[148].mxu1 }
 0x24b   : > { %vm2749_vm9 = vcmp.ge.f32.partialorder %v2554_v10, 0.0  ;;  %v2813_v22 = vmul.f32 0.05, %v2554_v10  ;;  %v2042_v61 = vadd.f32 %v2041_v31, %v4406_v2  ;;  %v2043_v27 = vpop.f32.mrb[149].mxu0  ;;  %v2332_v46 = vpop.f32.mrb[149].mxu1  ;;  %v2876_v18 = vsel %vm2748_vm8, %v2553_v54, %v2812_v15  ;;  %v3837_v2 = vld [vmem:[%s4579_s19 + $0x30] sm:$0xff]  }
 0x24c   : > { %v2044_v41 = vpop.f32.mrb[150].mxu0  ;;  %v2333_v38 = vpop.f32.mrb[150].mxu1  ;;  %v3570_v62 = vunpack.c.l.bf16 %v3837_v2  ;;  %v3571_v13 = vunpack.c.h.bf16 %v3837_v2 }
 0x24d   : > { %v2877_v12 = vsel %vm2749_vm9, %v2554_v10, %v2813_v22  ;;  %v2331_v17 = vadd.f32 %v2330_v56, %v2042_v61  ;;  %v2045_v7 = vadd.f32 %v2044_v41, %v4408_v11  ;;  %v2046_v57 = vpop.f32.mrb[151].mxu0  ;;  %v2335_v28 = vpop.f32.mrb[151].mxu1 }
 0x24e   : > { %v3695_v25 = vpack.c.bf16 %v2877_v12, %v2876_v18 }
 0x24f   : > { %v2555_v23 = vadd.f32 %v3566_v9, %v2331_v17  ;;  %v2334_v50 = vadd.f32 %v2333_v38, %v2045_v7 }
 0x250   : > { %3866 = vst [vmem:[%s4603_s22 + $0x20] sm:$0xff] %v3695_v25  }
 0x251   : > { %v2814_v4 = vmul.f32 0.05, %v2555_v23  ;;  %v2556_v51 = vadd.f32 %v3567_v43, %v2334_v50  ;;  %vm2750_vm10 = vcmp.ge.f32.partialorder %v2555_v23, 0.0 }
 0x252   : > { %v2049_v52 = vpop.f32.mrb[152].mxu0  ;;  %v2338_v40 = vpop.f32.mrb[152].mxu1 }
 0x253   : > { %vm2751_vm11 = vcmp.ge.f32.partialorder %v2556_v51, 0.0  ;;  %v2815_v30 = vmul.f32 0.05, %v2556_v51  ;;  %v2050_v53 = vadd.f32 %v2049_v52, %v4412_v20  ;;  %v2051_v11 = vpop.f32.mrb[153].mxu0  ;;  %v2340_v0 = vpop.f32.mrb[153].mxu1  ;;  %v2878_v54 = vsel %vm2750_vm10, %v2555_v23, %v2814_v4  ;;  %v3838_v20 = vld [vmem:[%s4579_s19 + $0x38] sm:$0xff]  }
 0x254   : > { %v2052_v36 = vpop.f32.mrb[154].mxu0  ;;  %v2341_v10 = vpop.f32.mrb[154].mxu1  ;;  %v3574_v12 = vunpack.c.l.bf16 %v3838_v20  ;;  %v3575_v57 = vunpack.c.h.bf16 %v3838_v20 }
 0x255   : > { %v2879_v47 = vsel %vm2751_vm11, %v2556_v51, %v2815_v30  ;;  %v2339_v34 = vadd.f32 %v2338_v40, %v2050_v53  ;;  %v2053_v15 = vadd.f32 %v2052_v36, %v4414_v29  ;;  %v2054_v31 = vpop.f32.mrb[155].mxu0  ;;  %v2343_v61 = vpop.f32.mrb[155].mxu1 }
 0x256   : > { %v3700_v22 = vpack.c.bf16 %v2879_v47, %v2878_v54 }
 0x257   : > { %v2557_v9 = vadd.f32 %v3570_v62, %v2339_v34  ;;  %v2342_v56 = vadd.f32 %v2341_v10, %v2053_v15 }
 0x258   : > { %3867 = vst [vmem:[%s4603_s22 + $0x28] sm:$0xff] %v3700_v22  }
 0x259   : > { %v2816_v27 = vmul.f32 0.05, %v2557_v9  ;;  %v2558_v46 = vadd.f32 %v3571_v13, %v2342_v56  ;;  %vm2752_vm12 = vcmp.ge.f32.partialorder %v2557_v9, 0.0 }
 0x25a   : > { %v2057_v41 = vpop.f32.mrb[156].mxu0  ;;  %v2346_v17 = vpop.f32.mrb[156].mxu1 }
 0x25b   : > { %vm2753_vm13 = vcmp.ge.f32.partialorder %v2558_v46, 0.0  ;;  %v2817_v43 = vmul.f32 0.05, %v2558_v46  ;;  %v2058_v18 = vadd.f32 %v2057_v41, %v4418_v37  ;;  %v2059_v29 = vpop.f32.mrb[157].mxu0  ;;  %v2348_v7 = vpop.f32.mrb[157].mxu1  ;;  %v2880_v25 = vsel %vm2752_vm12, %v2557_v9, %v2816_v27  ;;  %v3839_v37 = vld [vmem:[%s4579_s19 + $0x40] sm:$0xff]  }
 0x25c   : > { %v2060_v38 = vpop.f32.mrb[158].mxu0  ;;  %v2349_v2 = vpop.f32.mrb[158].mxu1  ;;  %v3578_v13 = vunpack.c.l.bf16 %v3839_v37  ;;  %v3579_v15 = vunpack.c.h.bf16 %v3839_v37 }
 0x25d   : > { %v2881_v28 = vsel %vm2753_vm13, %v2558_v46, %v2817_v43  ;;  %v2347_v23 = vadd.f32 %v2346_v17, %v2058_v18  ;;  %v2061_v50 = vadd.f32 %v2060_v38, %v4420_v48  ;;  %v2062_v4 = vpop.f32.mrb[159].mxu0  ;;  %v2351_v52 = vpop.f32.mrb[159].mxu1 }
 0x25e   : > { %v3705_v51 = vpack.c.bf16 %v2881_v28, %v2880_v25 }
 0x25f   : > { %v2559_v30 = vadd.f32 %v3574_v12, %v2347_v23  ;;  %v2350_v53 = vadd.f32 %v2349_v2, %v2061_v50 }
 0x260   : > { %3868 = vst [vmem:[%s4603_s22 + $0x30] sm:$0xff] %v3705_v51  }
 0x261   : > { %v2818_v62 = vmul.f32 0.05, %v2559_v30  ;;  %v2560_v40 = vadd.f32 %v3575_v57, %v2350_v53  ;;  %vm2754_vm14 = vcmp.ge.f32.partialorder %v2559_v30, 0.0 }
 0x262   : > { %v2065_v11 = vpop.f32.mrb[160].mxu0  ;;  %v2354_v54 = vpop.f32.mrb[160].mxu1 }
 0x263   : > { %vm2755_vm15 = vcmp.ge.f32.partialorder %v2560_v40, 0.0  ;;  %v2819_v0 = vmul.f32 0.05, %v2560_v40  ;;  %v2066_v36 = vadd.f32 %v2065_v11, %v4424_v58  ;;  %v2067_v48 = vpop.f32.mrb[161].mxu0  ;;  %v2356_v47 = vpop.f32.mrb[161].mxu1  ;;  %v2882_v10 = vsel %vm2754_vm14, %v2559_v30, %v2818_v62  ;;  %v3840_v58 = vld [vmem:[%s4579_s19 + $0x48] sm:$0xff]  }
 0x264   : > { %v2068_v34 = vpop.f32.mrb[162].mxu0  ;;  %v2357_v9 = vpop.f32.mrb[162].mxu1  ;;  %v3582_v7 = vunpack.c.l.bf16 %v3840_v58  ;;  %v3583_v28 = vunpack.c.h.bf16 %v3840_v58 }
 0x265   : > { %v2883_v31 = vsel %vm2755_vm15, %v2560_v40, %v2819_v0  ;;  %v2355_v22 = vadd.f32 %v2354_v54, %v2066_v36  ;;  %v2069_v61 = vadd.f32 %v2068_v34, %v4426_v5  ;;  %v2070_v56 = vpop.f32.mrb[163].mxu0  ;;  %v2359_v27 = vpop.f32.mrb[163].mxu1 }
 0x266   : > { %v3710_v20 = vpack.c.bf16 %v2883_v31, %v2882_v10 }
 0x267   : > { %v2561_v46 = vadd.f32 %v3578_v13, %v2355_v22  ;;  %v2358_v41 = vadd.f32 %v2357_v9, %v2069_v61 }
 0x268   : > { %3869 = vst [vmem:[%s4603_s22 + $0x38] sm:$0xff] %v3710_v20  }
 0x269   : > { %v2820_v43 = vmul.f32 0.05, %v2561_v46  ;;  %v2562_v18 = vadd.f32 %v3579_v15, %v2358_v41  ;;  %vm2756_vm0 = vcmp.ge.f32.partialorder %v2561_v46, 0.0 }
 0x26a   : > { %v2073_v12 = vpop.f32.mrb[164].mxu0  ;;  %v2362_v38 = vpop.f32.mrb[164].mxu1 }
 0x26b   : > { %vm2757_vm1 = vcmp.ge.f32.partialorder %v2562_v18, 0.0  ;;  %v2821_v17 = vmul.f32 0.05, %v2562_v18  ;;  %v2074_v29 = vadd.f32 %v2073_v12, %v4430_v16  ;;  %v2075_v5 = vpop.f32.mrb[165].mxu0  ;;  %v2364_v57 = vpop.f32.mrb[165].mxu1  ;;  %v2884_v23 = vsel %vm2756_vm0, %v2561_v46, %v2820_v43  ;;  %v3841_v16 = vld [vmem:[%s4579_s19 + $0x50] sm:$0xff]  }
 0x26c   : > { %v2076_v25 = vpop.f32.mrb[166].mxu0  ;;  %v2365_v51 = vpop.f32.mrb[166].mxu1  ;;  %v3586_v54 = vunpack.c.l.bf16 %v3841_v16  ;;  %v3587_v15 = vunpack.c.h.bf16 %v3841_v16 }
 0x26d   : > { %v2885_v50 = vsel %vm2757_vm1, %v2562_v18, %v2821_v17  ;;  %v2363_v2 = vadd.f32 %v2362_v38, %v2074_v29  ;;  %v2077_v4 = vadd.f32 %v2076_v25, %v4432_v26  ;;  %v2078_v52 = vpop.f32.mrb[167].mxu0  ;;  %v2367_v53 = vpop.f32.mrb[167].mxu1 }
 0x26e   : > { %v3715_v30 = vpack.c.bf16 %v2885_v50, %v2884_v23 }
 0x26f   : > { %v2563_v37 = vadd.f32 %v3582_v7, %v2363_v2  ;;  %v2366_v62 = vadd.f32 %v2365_v51, %v2077_v4 }
 0x270   : > { %3870 = vst [vmem:[%s4603_s22 + $0x40] sm:$0xff] %v3715_v30  }
 0x271   : > { %v2822_v40 = vmul.f32 0.05, %v2563_v37  ;;  %v2564_v11 = vadd.f32 %v3583_v28, %v2366_v62  ;;  %vm2758_vm2 = vcmp.ge.f32.partialorder %v2563_v37, 0.0 }
 0x272   : > { %v2081_v0 = vpop.f32.mrb[168].mxu0  ;;  %v2370_v48 = vpop.f32.mrb[168].mxu1 }
 0x273   : > { %vm2759_vm3 = vcmp.ge.f32.partialorder %v2564_v11, 0.0  ;;  %v2823_v36 = vmul.f32 0.05, %v2564_v11  ;;  %v2082_v13 = vadd.f32 %v2081_v0, %v4436_v35  ;;  %v2083_v26 = vpop.f32.mrb[169].mxu0  ;;  %v2372_v47 = vpop.f32.mrb[169].mxu1  ;;  %v2886_v10 = vsel %vm2758_vm2, %v2563_v37, %v2822_v40  ;;  %v3842_v35 = vld [vmem:[%s4579_s19 + $0x58] sm:$0xff]  }
 0x274   : > { %v2084_v34 = vpop.f32.mrb[170].mxu0  ;;  %v2373_v9 = vpop.f32.mrb[170].mxu1  ;;  %v3590_v29 = vunpack.c.l.bf16 %v3842_v35  ;;  %v3591_v57 = vunpack.c.h.bf16 %v3842_v35 }
 0x275   : > { %v2887_v31 = vsel %vm2759_vm3, %v2564_v11, %v2823_v36  ;;  %v2371_v22 = vadd.f32 %v2370_v48, %v2082_v13  ;;  %v2085_v61 = vadd.f32 %v2084_v34, %v4438_v45  ;;  %v2086_v56 = vpop.f32.mrb[171].mxu0  ;;  %v2375_v27 = vpop.f32.mrb[171].mxu1 }
 0x276   : > { %v3720_v20 = vpack.c.bf16 %v2887_v31, %v2886_v10 }
 0x277   : > { %v2565_v46 = vadd.f32 %v3586_v54, %v2371_v22  ;;  %v2374_v41 = vadd.f32 %v2373_v9, %v2085_v61 }
 0x278   : > { %3871 = vst [vmem:[%s4603_s22 + $0x48] sm:$0xff] %v3720_v20  }
 0x279   : > { %v2824_v58 = vmul.f32 0.05, %v2565_v46  ;;  %v2566_v43 = vadd.f32 %v3587_v15, %v2374_v41  ;;  %vm2760_vm4 = vcmp.ge.f32.partialorder %v2565_v46, 0.0 }
 0x27a   : > { %v2089_v18 = vpop.f32.mrb[172].mxu0  ;;  %v2378_v7 = vpop.f32.mrb[172].mxu1 }
 0x27b   : > { %vm2761_vm5 = vcmp.ge.f32.partialorder %v2566_v43, 0.0  ;;  %v2825_v12 = vmul.f32 0.05, %v2566_v43  ;;  %v2090_v17 = vadd.f32 %v2089_v18, %v4442_v59  ;;  %v2091_v45 = vpop.f32.mrb[173].mxu0  ;;  %v2380_v38 = vpop.f32.mrb[173].mxu1  ;;  %v2888_v25 = vsel %vm2760_vm4, %v2565_v46, %v2824_v58  ;;  %v3843_v59 = vld [vmem:[%s4579_s19 + $0x60] sm:$0xff]  }
 0x27c   : > { %v2092_v5 = vpop.f32.mrb[174].mxu0  ;;  %v2381_v2 = vpop.f32.mrb[174].mxu1  ;;  %v3594_v0 = vunpack.c.l.bf16 %v3843_v59  ;;  %v3595_v48 = vunpack.c.h.bf16 %v3843_v59 }
 0x27d   : > { %v2889_v28 = vsel %vm2761_vm5, %v2566_v43, %v2825_v12  ;;  %v2379_v23 = vadd.f32 %v2378_v7, %v2090_v17  ;;  %v2093_v50 = vadd.f32 %v2092_v5, %v4444_v8  ;;  %v2094_v4 = vpop.f32.mrb[175].mxu0  ;;  %v2383_v52 = vpop.f32.mrb[175].mxu1 }
 0x27e   : > { %v3725_v51 = vpack.c.bf16 %v2889_v28, %v2888_v25 }
 0x27f   : > { %v2567_v30 = vadd.f32 %v3590_v29, %v2379_v23  ;;  %v2382_v53 = vadd.f32 %v2381_v2, %v2093_v50 }
 0x280   : > { %3872 = vst [vmem:[%s4603_s22 + $0x50] sm:$0xff] %v3725_v51  }
 0x281   : > { %v2826_v37 = vmul.f32 0.05, %v2567_v30  ;;  %v2568_v62 = vadd.f32 %v3591_v57, %v2382_v53  ;;  %vm2762_vm6 = vcmp.ge.f32.partialorder %v2567_v30, 0.0 }
 0x282   : > { %v2097_v16 = vpop.f32.mrb[176].mxu0  ;;  %v2386_v36 = vpop.f32.mrb[176].mxu1 }
 0x283   : > { %vm2763_vm7 = vcmp.ge.f32.partialorder %v2568_v62, 0.0  ;;  %v2827_v40 = vmul.f32 0.05, %v2568_v62  ;;  %v2098_v11 = vadd.f32 %v2097_v16, %v4448_v19  ;;  %v2099_v8 = vpop.f32.mrb[177].mxu0  ;;  %v2388_v13 = vpop.f32.mrb[177].mxu1  ;;  %v2890_v26 = vsel %vm2762_vm6, %v2567_v30, %v2826_v37  ;;  %v3844_v19 = vld [vmem:[%s4579_s19 + $0x68] sm:$0xff]  }
 0x284   : > { %v2100_v54 = vpop.f32.mrb[178].mxu0  ;;  %v2389_v10 = vpop.f32.mrb[178].mxu1  ;;  %v3598_v58 = vunpack.c.l.bf16 %v3844_v19  ;;  %v3599_v17 = vunpack.c.h.bf16 %v3844_v19 }
 0x285   : > { %v2891_v47 = vsel %vm2763_vm7, %v2568_v62, %v2827_v40  ;;  %v2387_v34 = vadd.f32 %v2386_v36, %v2098_v11  ;;  %v2101_v15 = vadd.f32 %v2100_v54, %v4450_v1  ;;  %v2102_v31 = vpop.f32.mrb[179].mxu0  ;;  %v2391_v61 = vpop.f32.mrb[179].mxu1 }
 0x286   : > { %v3730_v22 = vpack.c.bf16 %v2891_v47, %v2890_v26 }
 0x287   : > { %v2569_v9 = vadd.f32 %v3594_v0, %v2387_v34  ;;  %v2390_v56 = vadd.f32 %v2389_v10, %v2101_v15 }
 0x288   : > { %3873 = vst [vmem:[%s4603_s22 + $0x58] sm:$0xff] %v3730_v22  }
 0x289   : > { %v2828_v20 = vmul.f32 0.05, %v2569_v9  ;;  %v2570_v27 = vadd.f32 %v3595_v48, %v2390_v56  ;;  %vm2764_vm8 = vcmp.ge.f32.partialorder %v2569_v9, 0.0 }
 0x28a   : > { %v2105_v46 = vpop.f32.mrb[180].mxu0  ;;  %v2394_v43 = vpop.f32.mrb[180].mxu1 }
 0x28b   : > { %vm2765_vm9 = vcmp.ge.f32.partialorder %v2570_v27, 0.0  ;;  %v2829_v41 = vmul.f32 0.05, %v2570_v27  ;;  %v2106_v35 = vadd.f32 %v2105_v46, %v4454_v42  ;;  %v2107_v1 = vpop.f32.mrb[181].mxu0  ;;  %v2396_v18 = vpop.f32.mrb[181].mxu1  ;;  %v2892_v29 = vsel %vm2764_vm8, %v2569_v9, %v2828_v20  ;;  %v3845_v42 = vld [vmem:[%s4579_s19 + $0x70] sm:$0xff]  }
 0x28c   : > { %v2108_v12 = vpop.f32.mrb[182].mxu0  ;;  %v2397_v5 = vpop.f32.mrb[182].mxu1  ;;  %v3602_v53 = vunpack.c.l.bf16 %v3845_v42  ;;  %v3603_v16 = vunpack.c.h.bf16 %v3845_v42 }
 0x28d   : > { %v2893_v7 = vsel %vm2765_vm9, %v2570_v27, %v2829_v41  ;;  %v2395_v45 = vadd.f32 %v2394_v43, %v2106_v35  ;;  %v2109_v38 = vadd.f32 %v2108_v12, %v4456_v55  ;;  %v2110_v57 = vpop.f32.mrb[183].mxu0  ;;  %v2399_v28 = vpop.f32.mrb[183].mxu1 }
 0x28e   : > { %v3735_v25 = vpack.c.bf16 %v2893_v7, %v2892_v29 }
 0x28f   : > { %v2571_v23 = vadd.f32 %v3598_v58, %v2395_v45  ;;  %v2398_v50 = vadd.f32 %v2397_v5, %v2109_v38 }
 0x290   : > { %3874 = vst [vmem:[%s4603_s22 + $0x60] sm:$0xff] %v3735_v25  }
 0x291   : > { %v2830_v2 = vmul.f32 0.05, %v2571_v23  ;;  %v2572_v4 = vadd.f32 %v3599_v17, %v2398_v50  ;;  %vm2766_vm10 = vcmp.ge.f32.partialorder %v2571_v23, 0.0 }
 0x292   : > { %v2113_v51 = vpop.f32.mrb[184].mxu0  ;;  %v2402_v59 = vpop.f32.mrb[184].mxu1 }
 0x293   : > { %vm2767_vm11 = vcmp.ge.f32.partialorder %v2572_v4, 0.0  ;;  %v2831_v52 = vmul.f32 0.05, %v2572_v4  ;;  %v2114_v30 = vadd.f32 %v2113_v51, %v4460_v6  ;;  %v2115_v55 = vpop.f32.mrb[185].mxu0  ;;  %v2404_v37 = vpop.f32.mrb[185].mxu1  ;;  %v2894_v40 = vsel %vm2766_vm10, %v2571_v23, %v2830_v2  ;;  %v3846_v6 = vld [vmem:[%s4579_s19 + $0x78] sm:$0xff]  }
 0x294   : > { %v2116_v62 = vpop.f32.mrb[186].mxu0  ;;  %v2405_v8 = vpop.f32.mrb[186].mxu1  ;;  %v3606_v61 = vunpack.c.l.bf16 %v3846_v6  ;;  %v3607_v20 = vunpack.c.h.bf16 %v3846_v6 }
 0x295   : > { %v2895_v11 = vsel %vm2767_vm11, %v2572_v4, %v2831_v52  ;;  %v2403_v0 = vadd.f32 %v2402_v59, %v2114_v30  ;;  %v2117_v36 = vadd.f32 %v2116_v62, %v4462_v21  ;;  %v2118_v13 = vpop.f32.mrb[187].mxu0  ;;  %v2407_v48 = vpop.f32.mrb[187].mxu1 }
 0x296   : > { %v3740_v54 = vpack.c.bf16 %v2895_v11, %v2894_v40 }
 0x297   : > { %v2573_v26 = vadd.f32 %v3602_v53, %v2403_v0  ;;  %v2406_v47 = vadd.f32 %v2405_v8, %v2117_v36 }
 0x298   : > { %3875 = vst [vmem:[%s4603_s22 + $0x68] sm:$0xff] %v3740_v54  }
 0x299   : > { %v2832_v34 = vmul.f32 0.05, %v2573_v26  ;;  %v2574_v15 = vadd.f32 %v3603_v16, %v2406_v47  ;;  %vm2768_vm12 = vcmp.ge.f32.partialorder %v2573_v26, 0.0 }
 0x29a   : > { %v2121_v10 = vpop.f32.mrb[188].mxu0  ;;  %v2410_v9 = vpop.f32.mrb[188].mxu1 }
 0x29b   : > { %vm2769_vm13 = vcmp.ge.f32.partialorder %v2574_v15, 0.0  ;;  %v2833_v31 = vmul.f32 0.05, %v2574_v15  ;;  %v2122_v22 = vadd.f32 %v2121_v10, %v4466_v33  ;;  %v2123_v21 = vpop.f32.mrb[189].mxu0  ;;  %v2412_v56 = vpop.f32.mrb[189].mxu1  ;;  %v2896_v27 = vsel %vm2768_vm12, %v2573_v26, %v2832_v34  ;;  %v3847_v33 = vld [vmem:[%s4579_s19 + $0x80] sm:$0xff]  }
 0x29c   : > { %v2124_v19 = vpop.f32.mrb[190].mxu0  ;;  %v2413_v58 = vpop.f32.mrb[190].mxu1  ;;  %v3610_v57 = vunpack.c.l.bf16 %v3847_v33  ;;  %v3611_v50 = vunpack.c.h.bf16 %v3847_v33 }
 0x29d   : > { %v2897_v46 = vsel %vm2769_vm13, %v2574_v15, %v2833_v31  ;;  %v2411_v41 = vadd.f32 %v2410_v9, %v2122_v22  ;;  %v2125_v35 = vadd.f32 %v2124_v19, %v4468_v49  ;;  %v2126_v43 = vpop.f32.mrb[191].mxu0  ;;  %v2415_v18 = vpop.f32.mrb[191].mxu1 }
 0x29e   : > { %v3745_v1 = vpack.c.bf16 %v2897_v46, %v2896_v27 }
 0x29f   : > { %v2575_v12 = vadd.f32 %v3606_v61, %v2411_v41  ;;  %v2414_v17 = vadd.f32 %v2413_v58, %v2125_v35 }
 0x2a0   : > { %3876 = vst [vmem:[%s4603_s22 + $0x70] sm:$0xff] %v3745_v1  }
 0x2a1   : > { %v2834_v29 = vmul.f32 0.05, %v2575_v12  ;;  %v2576_v7 = vadd.f32 %v3607_v20, %v2414_v17  ;;  %vm2770_vm14 = vcmp.ge.f32.partialorder %v2575_v12, 0.0 }
 0x2a2   : > { %v2129_v45 = vpop.f32.mrb[192].mxu0  ;;  %v2418_v25 = vpop.f32.mrb[192].mxu1 }
 0x2a3   : > { %vm2771_vm15 = vcmp.ge.f32.partialorder %v2576_v7, 0.0  ;;  %v2835_v38 = vmul.f32 0.05, %v2576_v7  ;;  %v2130_v5 = vadd.f32 %v2129_v45, %v4472_v3  ;;  %v2131_v49 = vpop.f32.mrb[193].mxu0  ;;  %v2420_v28 = vpop.f32.mrb[193].mxu1  ;;  %v2898_v42 = vsel %vm2770_vm14, %v2575_v12, %v2834_v29  ;;  %v3848_v3 = vld [vmem:[%s4579_s19 + $0x88] sm:$0xff]  }
 0x2a4   : > { %v2132_v23 = vpop.f32.mrb[194].mxu0  ;;  %v2421_v52 = vpop.f32.mrb[194].mxu1  ;;  %v3614_v36 = vunpack.c.l.bf16 %v3848_v3  ;;  %v3615_v48 = vunpack.c.h.bf16 %v3848_v3 }
 0x2a5   : > { %v2899_v2 = vsel %vm2771_vm15, %v2576_v7, %v2835_v38  ;;  %v2419_v4 = vadd.f32 %v2418_v25, %v2130_v5  ;;  %v2133_v51 = vadd.f32 %v2132_v23, %v4474_v14  ;;  %v2134_v30 = vpop.f32.mrb[195].mxu0  ;;  %v2423_v59 = vpop.f32.mrb[195].mxu1 }
 0x2a6   : > { %v3750_v53 = vpack.c.bf16 %v2899_v2, %v2898_v42 }
 0x2a7   : > { %v2577_v55 = vadd.f32 %v3610_v57, %v2419_v4  ;;  %v2422_v37 = vadd.f32 %v2421_v52, %v2133_v51 }
 0x2a8   : > { %3877 = vst [vmem:[%s4603_s22 + $0x78] sm:$0xff] %v3750_v53  }
 0x2a9   : > { %v2836_v62 = vmul.f32 0.05, %v2577_v55  ;;  %v2578_v16 = vadd.f32 %v3611_v50, %v2422_v37  ;;  %vm2772_vm0 = vcmp.ge.f32.partialorder %v2577_v55, 0.0 }
 0x2aa   : > { %v2137_v40 = vpop.f32.mrb[196].mxu0  ;;  %v2426_v8 = vpop.f32.mrb[196].mxu1 }
 0x2ab   : > { %vm2773_vm1 = vcmp.ge.f32.partialorder %v2578_v16, 0.0  ;;  %v2837_v11 = vmul.f32 0.05, %v2578_v16  ;;  %v2138_v0 = vadd.f32 %v2137_v40, %v4478_v32  ;;  %v2139_v14 = vpop.f32.mrb[197].mxu0  ;;  %v2428_v13 = vpop.f32.mrb[197].mxu1  ;;  %v2900_v26 = vsel %vm2772_vm0, %v2577_v55, %v2836_v62  ;;  %v3849_v32 = vld [vmem:[%s4579_s19 + $0x90] sm:$0xff]  }
 0x2ac   : > { %v2140_v54 = vpop.f32.mrb[198].mxu0  ;;  %v2429_v15 = vpop.f32.mrb[198].mxu1  ;;  %v3618_v46 = vunpack.c.l.bf16 %v3849_v32  ;;  %v3619_v43 = vunpack.c.h.bf16 %v3849_v32  ;;  %v4780_v14 = vld [vmem:[#allocation3_spill] sm:$0xff] }
 0x2ad   : > { %v2901_v47 = vsel %vm2773_vm1, %v2578_v16, %v2837_v11  ;;  %v2427_v6 = vadd.f32 %v2426_v8, %v2138_v0  ;;  %v2141_v34 = vadd.f32 %v2140_v54, %v4480_v44  ;;  %v2142_v10 = vpop.f32.mrb[199].mxu0  ;;  %v2431_v22 = vpop.f32.mrb[199].mxu1 }
 0x2ae   : > { %v3755_v31 = vpack.c.bf16 %v2901_v47, %v2900_v26 }
 0x2af   : > { %v2579_v61 = vadd.f32 %v3614_v36, %v2427_v6  ;;  %v2430_v9 = vadd.f32 %v2429_v15, %v2141_v34 }
 0x2b0   : > { %3878 = vst [vmem:[%s4603_s22 + $0x80] sm:$0xff] %v3755_v31   ;;  %v4781_v31 = vld [vmem:[#allocation4_spill] sm:$0xff] }
 0x2b1   : > { %v2838_v21 = vmul.f32 0.05, %v2579_v61  ;;  %v2580_v56 = vadd.f32 %v3615_v48, %v2430_v9  ;;  %vm2774_vm2 = vcmp.ge.f32.partialorder %v2579_v61, 0.0 }
 0x2b2   : > { %v2145_v19 = vpop.f32.mrb[200].mxu0  ;;  %v2434_v41 = vpop.f32.mrb[200].mxu1 }
 0x2b3   : > { %vm2775_vm3 = vcmp.ge.f32.partialorder %v2580_v56, 0.0  ;;  %v2839_v20 = vmul.f32 0.05, %v2580_v56  ;;  %v2146_v27 = vadd.f32 %v2145_v19, %v4484_v63  ;;  %v2147_v44 = vpop.f32.mrb[201].mxu0  ;;  %v2436_v35 = vpop.f32.mrb[201].mxu1  ;;  %v2902_v1 = vsel %vm2774_vm2, %v2579_v61, %v2838_v21  ;;  %v3850_v63 = vld [vmem:[%s4579_s19 + $0x98] sm:$0xff]  }
 0x2b4   : > { %v2148_v58 = vpop.f32.mrb[202].mxu0  ;;  %v2437_v33 = vpop.f32.mrb[202].mxu1  ;;  %v3622_v50 = vunpack.c.l.bf16 %v3850_v63  ;;  %v3623_v51 = vunpack.c.h.bf16 %v3850_v63  ;;  %v4782_v35 = vld [vmem:[#allocation5_spill] sm:$0xff] }
 0x2b5   : > { %v2903_v18 = vsel %vm2775_vm3, %v2580_v56, %v2839_v20  ;;  %v2435_v12 = vadd.f32 %v2434_v41, %v2146_v27  ;;  %v2149_v17 = vadd.f32 %v2148_v58, %v4486_v24  ;;  %v2150_v29 = vpop.f32.mrb[203].mxu0  ;;  %v2439_v45 = vpop.f32.mrb[203].mxu1  ;;  %v3852_v20 = vld [vmem:[%s4579_s19 + $0xa8] sm:$0xff]  }
 0x2b6   : > { %v3760_v7 = vpack.c.bf16 %v2903_v18, %v2902_v1 }
 0x2b7   : > { %v2581_v38 = vadd.f32 %v3618_v46, %v2435_v12  ;;  %v2438_v5 = vadd.f32 %v2437_v33, %v2149_v17  ;;  %v3631_v33 = vunpack.c.h.bf16 %v3852_v20 }
 0x2b8   : > { %3879 = vst [vmem:[%s4603_s22 + $0x88] sm:$0xff] %v3760_v7  }
 0x2b9   : > { %v2840_v57 = vmul.f32 0.05, %v2581_v38  ;;  %v2582_v25 = vadd.f32 %v3619_v43, %v2438_v5  ;;  %vm2776_vm4 = vcmp.ge.f32.partialorder %v2581_v38, 0.0  ;;  %v3630_v43 = vunpack.c.l.bf16 %v3852_v20  ;;  %v4787_v20 = vld [vmem:[#allocation10_spill] sm:$0xff] }
 0x2ba   : > { %v2153_v49 = vpop.f32.mrb[204].mxu0  ;;  %v2442_v42 = vpop.f32.mrb[204].mxu1 }
 0x2bb   : > { %vm2777_vm5 = vcmp.ge.f32.partialorder %v2582_v25, 0.0  ;;  %v2841_v28 = vmul.f32 0.05, %v2582_v25  ;;  %v2154_v23 = vadd.f32 %v2153_v49, %v4490_v39  ;;  %v2155_v24 = vpop.f32.mrb[205].mxu0  ;;  %v2444_v2 = vpop.f32.mrb[205].mxu1  ;;  %v2904_v52 = vsel %vm2776_vm4, %v2581_v38, %v2840_v57  ;;  %v3851_v39 = vld [vmem:[%s4579_s19 + $0xa0] sm:$0xff]  }
 0x2bc   : > { %v2156_v4 = vpop.f32.mrb[206].mxu0  ;;  %v2445_v55 = vpop.f32.mrb[206].mxu1  ;;  %v3626_v54 = vunpack.c.l.bf16 %v3851_v39  ;;  %v3627_v6 = vunpack.c.h.bf16 %v3851_v39  ;;  %v4783_v38 = vld [vmem:[#allocation6_spill] sm:$0xff]  ;;  %v4785_v39 = vld [vmem:[#allocation8_spill] sm:$0xff] }
 0x2bd   : > { %v2905_v30 = vsel %vm2777_vm5, %v2582_v25, %v2841_v28  ;;  %v2443_v53 = vadd.f32 %v2442_v42, %v2154_v23  ;;  %v2157_v59 = vadd.f32 %v2156_v4, %v4492_v60  ;;  %v2158_v37 = vpop.f32.mrb[207].mxu0  ;;  %v2447_v62 = vpop.f32.mrb[207].mxu1 }
 0x2be   : > { %v3765_v3 = vpack.c.bf16 %v2905_v30, %v2904_v52 }
 0x2bf   : > { %v2583_v16 = vadd.f32 %v3622_v50, %v2443_v53  ;;  %v2446_v40 = vadd.f32 %v2445_v55, %v2157_v59  ;;  %v3853_v50 = vld [vmem:[%s4579_s19 + $0xb0] sm:$0xff]  }
 0x2c0   : > { %3880 = vst [vmem:[%s4603_s22 + $0x90] sm:$0xff] %v3765_v3   ;;  %v3634_v30 = vunpack.c.l.bf16 %v3853_v50  ;;  %v3635_v3 = vunpack.c.h.bf16 %v3853_v50  ;;  %v4789_v50 = vld [vmem:[#allocation12_spill] sm:$0xff] }
 0x2c1   : > { %v2842_v11 = vmul.f32 0.05, %v2583_v16  ;;  %v2584_v0 = vadd.f32 %v3623_v51, %v2446_v40  ;;  %vm2778_vm6 = vcmp.ge.f32.partialorder %v2583_v16, 0.0  ;;  %v4784_v51 = vld [vmem:[#allocation7_spill] sm:$0xff] }
 0x2c2   : > { %v2161_v36 = vpop.f32.mrb[208].mxu0  ;;  %v2450_v48 = vpop.f32.mrb[208].mxu1 }
 0x2c3   : > { %vm2779_vm7 = vcmp.ge.f32.partialorder %v2584_v0, 0.0  ;;  %v2843_v8 = vmul.f32 0.05, %v2584_v0  ;;  %v2162_v13 = vadd.f32 %v2161_v36, %v4780_v14  ;;  %v2163_v60 = vpop.f32.mrb[209].mxu0  ;;  %v2452_v26 = vpop.f32.mrb[209].mxu1  ;;  %v2906_v34 = vsel %vm2778_vm6, %v2583_v16, %v2842_v11 }
 0x2c4   : > { %v2164_v47 = vpop.f32.mrb[210].mxu0  ;;  %v2453_v61 = vpop.f32.mrb[210].mxu1 }
 0x2c5   : > { %v2907_v15 = vsel %vm2779_vm7, %v2584_v0, %v2843_v8  ;;  %v2451_v10 = vadd.f32 %v2450_v48, %v2162_v13  ;;  %v2165_v22 = vadd.f32 %v2164_v47, %v4781_v31  ;;  %v2166_v9 = vpop.f32.mrb[211].mxu0  ;;  %v2455_v21 = vpop.f32.mrb[211].mxu1  ;;  %v3854_v48 = vld [vmem:[%s4579_s19 + $0xb8] sm:$0xff]  }
 0x2c6   : > { %v3770_v32 = vpack.c.bf16 %v2907_v15, %v2906_v34  ;;  %v4786_v34 = vld [vmem:[#allocation9_spill] sm:$0xff] }
 0x2c7   : > { %v2585_v56 = vadd.f32 %v3626_v54, %v2451_v10  ;;  %v2454_v19 = vadd.f32 %v2453_v61, %v2165_v22  ;;  %v3638_v10 = vunpack.c.l.bf16 %v3854_v48 }
 0x2c8   : > { %3881 = vst [vmem:[%s4603_s22 + $0x98] sm:$0xff] %v3770_v32   ;;  %v3639_v32 = vunpack.c.h.bf16 %v3854_v48  ;;  %v4791_v48 = vld [vmem:[#allocation14_spill] sm:$0xff] }
 0x2c9   : > { %v2844_v27 = vmul.f32 0.05, %v2585_v56  ;;  %v2586_v46 = vadd.f32 %v3627_v6, %v2454_v19  ;;  %vm2780_vm8 = vcmp.ge.f32.partialorder %v2585_v56, 0.0 }
 0x2ca   : > { %v2169_v41 = vpop.f32.mrb[212].mxu0  ;;  %v2458_v1 = vpop.f32.mrb[212].mxu1 }
 0x2cb   : > { %vm2781_vm9 = vcmp.ge.f32.partialorder %v2586_v46, 0.0  ;;  %v2845_v44 = vmul.f32 0.05, %v2586_v46  ;;  %v2170_v58 = vadd.f32 %v2169_v41, %v4782_v35  ;;  %v2171_v18 = vpop.f32.mrb[213].mxu0  ;;  %v2460_v12 = vpop.f32.mrb[213].mxu1  ;;  %v2908_v29 = vsel %vm2780_vm8, %v2585_v56, %v2844_v27 }
 0x2cc   : > { %v2172_v17 = vpop.f32.mrb[214].mxu0  ;;  %v2461_v63 = vpop.f32.mrb[214].mxu1 }
 0x2cd   : > { %v2909_v7 = vsel %vm2781_vm9, %v2586_v46, %v2845_v44  ;;  %v2459_v45 = vadd.f32 %v2458_v1, %v2170_v58  ;;  %v2173_v5 = vadd.f32 %v2172_v17, %v4783_v38  ;;  %v2174_v57 = vpop.f32.mrb[215].mxu0  ;;  %v2463_v49 = vpop.f32.mrb[215].mxu1  ;;  %v3855_v1 = vld [vmem:[%s4579_s19 + $0xc0] sm:$0xff]  }
 0x2ce   : > { %v3775_v25 = vpack.c.bf16 %v2909_v7, %v2908_v29  ;;  %v4788_v29 = vld [vmem:[#allocation11_spill] sm:$0xff] }
 0x2cf   : > { %v2587_v28 = vadd.f32 %v3630_v43, %v2459_v45  ;;  %v2462_v23 = vadd.f32 %v2461_v63, %v2173_v5  ;;  %v3642_v45 = vunpack.c.l.bf16 %v3855_v1 }
 0x2d0   : > { %3882 = vst [vmem:[%s4603_s22 + $0xa0] sm:$0xff] %v3775_v25   ;;  %v3643_v25 = vunpack.c.h.bf16 %v3855_v1  ;;  %v4793_v1 = vld [vmem:[#allocation16_spill] sm:$0xff] }
 0x2d1   : > { %v2846_v42 = vmul.f32 0.05, %v2587_v28  ;;  %v2588_v24 = vadd.f32 %v3631_v33, %v2462_v23  ;;  %vm2782_vm10 = vcmp.ge.f32.partialorder %v2587_v28, 0.0 }
 0x2d2   : > { %v2177_v2 = vpop.f32.mrb[216].mxu0  ;;  %v2466_v53 = vpop.f32.mrb[216].mxu1 }
 0x2d3   : > { %vm2783_vm11 = vcmp.ge.f32.partialorder %v2588_v24, 0.0  ;;  %v2847_v4 = vmul.f32 0.05, %v2588_v24  ;;  %v2178_v52 = vadd.f32 %v2177_v2, %v4784_v51  ;;  %v2179_v59 = vpop.f32.mrb[217].mxu0  ;;  %v2468_v55 = vpop.f32.mrb[217].mxu1  ;;  %v2910_v62 = vsel %vm2782_vm10, %v2587_v28, %v2846_v42 }
 0x2d4   : > { %v2180_v37 = vpop.f32.mrb[218].mxu0  ;;  %v2469_v0 = vpop.f32.mrb[218].mxu1 }
 0x2d5   : > { %v2911_v16 = vsel %vm2783_vm11, %v2588_v24, %v2847_v4  ;;  %v2467_v40 = vadd.f32 %v2466_v53, %v2178_v52  ;;  %v2181_v11 = vadd.f32 %v2180_v37, %v4785_v39  ;;  %v2182_v36 = vpop.f32.mrb[219].mxu0  ;;  %v2471_v14 = vpop.f32.mrb[219].mxu1  ;;  %v3856_v53 = vld [vmem:[%s4579_s19 + $0xc8] sm:$0xff]  }
 0x2d6   : > { %v3780_v8 = vpack.c.bf16 %v2911_v16, %v2910_v62  ;;  %v4790_v62 = vld [vmem:[#allocation13_spill] sm:$0xff] }
 0x2d7   : > { %v2589_v13 = vadd.f32 %v3634_v30, %v2467_v40  ;;  %v2470_v54 = vadd.f32 %v2469_v0, %v2181_v11  ;;  %v3646_v40 = vunpack.c.l.bf16 %v3856_v53 }
 0x2d8   : > { %3883 = vst [vmem:[%s4603_s22 + $0xa8] sm:$0xff] %v3780_v8   ;;  %v3647_v8 = vunpack.c.h.bf16 %v3856_v53  ;;  %v4795_v53 = vld [vmem:[#allocation18_spill] sm:$0xff] }
 0x2d9   : > { %v2848_v60 = vmul.f32 0.05, %v2589_v13  ;;  %v2590_v26 = vadd.f32 %v3635_v3, %v2470_v54  ;;  %vm2784_vm12 = vcmp.ge.f32.partialorder %v2589_v13, 0.0 }
 0x2da   : > { %v2185_v47 = vpop.f32.mrb[220].mxu0  ;;  %v2474_v31 = vpop.f32.mrb[220].mxu1 }
 0x2db   : > { %vm2785_vm13 = vcmp.ge.f32.partialorder %v2590_v26, 0.0  ;;  %v2849_v6 = vmul.f32 0.05, %v2590_v26  ;;  %v2186_v15 = vadd.f32 %v2185_v47, %v4786_v34  ;;  %v2187_v22 = vpop.f32.mrb[221].mxu0  ;;  %v2476_v61 = vpop.f32.mrb[221].mxu1  ;;  %v2912_v21 = vsel %vm2784_vm12, %v2589_v13, %v2848_v60 }
 0x2dc   : > { %v2188_v9 = vpop.f32.mrb[222].mxu0  ;;  %v2477_v46 = vpop.f32.mrb[222].mxu1 }
 0x2dd   : > { %v2913_v56 = vsel %vm2785_vm13, %v2590_v26, %v2849_v6  ;;  %v2475_v19 = vadd.f32 %v2474_v31, %v2186_v15  ;;  %v2189_v27 = vadd.f32 %v2188_v9, %v4787_v20  ;;  %v2190_v41 = vpop.f32.mrb[223].mxu0  ;;  %v2479_v35 = vpop.f32.mrb[223].mxu1  ;;  %v3857_v31 = vld [vmem:[%s4579_s19 + $0xd0] sm:$0xff]  }
 0x2de   : > { %v3785_v44 = vpack.c.bf16 %v2913_v56, %v2912_v21  ;;  %v4792_v21 = vld [vmem:[#allocation15_spill] sm:$0xff] }
 0x2df   : > { %v2591_v58 = vadd.f32 %v3638_v10, %v2475_v19  ;;  %v2478_v43 = vadd.f32 %v2477_v46, %v2189_v27  ;;  %v3650_v19 = vunpack.c.l.bf16 %v3857_v31 }
 0x2e0   : > { %3884 = vst [vmem:[%s4603_s22 + $0xb0] sm:$0xff] %v3785_v44   ;;  %v3651_v44 = vunpack.c.h.bf16 %v3857_v31  ;;  %v4797_v31 = vld [vmem:[#allocation20_spill] sm:$0xff] }
 0x2e1   : > { %v2850_v18 = vmul.f32 0.05, %v2591_v58  ;;  %v2592_v12 = vadd.f32 %v3639_v32, %v2478_v43  ;;  %vm2786_vm14 = vcmp.ge.f32.partialorder %v2591_v58, 0.0 }
 0x2e2   : > { %v2193_v17 = vpop.f32.mrb[224].mxu0  ;;  %v2482_v38 = vpop.f32.mrb[224].mxu1 }
 0x2e3   : > { %vm2787_vm15 = vcmp.ge.f32.partialorder %v2592_v12, 0.0  ;;  %v2851_v33 = vmul.f32 0.05, %v2592_v12  ;;  %v2194_v7 = vadd.f32 %v2193_v17, %v4788_v29  ;;  %v2195_v5 = vpop.f32.mrb[225].mxu0  ;;  %v2484_v63 = vpop.f32.mrb[225].mxu1  ;;  %v2914_v49 = vsel %vm2786_vm14, %v2591_v58, %v2850_v18 }
 0x2e4   : > { %v2196_v57 = vpop.f32.mrb[226].mxu0  ;;  %v2485_v24 = vpop.f32.mrb[226].mxu1 }
 0x2e5   : > { %v2915_v28 = vsel %vm2787_vm15, %v2592_v12, %v2851_v33  ;;  %v2483_v23 = vadd.f32 %v2482_v38, %v2194_v7  ;;  %v2197_v42 = vadd.f32 %v2196_v57, %v4789_v50  ;;  %v2198_v2 = vpop.f32.mrb[227].mxu0  ;;  %v2487_v51 = vpop.f32.mrb[227].mxu1  ;;  %v3858_v38 = vld [vmem:[%s4579_s19 + $0xd8] sm:$0xff]  }
 0x2e6   : > { %v3790_v4 = vpack.c.bf16 %v2915_v28, %v2914_v49  ;;  %v4794_v49 = vld [vmem:[#allocation17_spill] sm:$0xff] }
 0x2e7   : > { %v2593_v52 = vadd.f32 %v3642_v45, %v2483_v23  ;;  %v2486_v30 = vadd.f32 %v2485_v24, %v2197_v42  ;;  %v3654_v23 = vunpack.c.l.bf16 %v3858_v38 }
 0x2e8   : > { %3885 = vst [vmem:[%s4603_s22 + $0xb8] sm:$0xff] %v3790_v4   ;;  %v3655_v4 = vunpack.c.h.bf16 %v3858_v38  ;;  %v4799_v38 = vld [vmem:[#allocation22_spill] sm:$0xff] }
 0x2e9   : > { %v2852_v59 = vmul.f32 0.05, %v2593_v52  ;;  %v2594_v55 = vadd.f32 %v3643_v25, %v2486_v30  ;;  %vm2788_vm0 = vcmp.ge.f32.partialorder %v2593_v52, 0.0 }
 0x2ea   : > { %v2201_v37 = vpop.f32.mrb[228].mxu0  ;;  %v2490_v39 = vpop.f32.mrb[228].mxu1 }
 0x2eb   : > { %vm2789_vm1 = vcmp.ge.f32.partialorder %v2594_v55, 0.0  ;;  %v2853_v3 = vmul.f32 0.05, %v2594_v55  ;;  %v2202_v16 = vadd.f32 %v2201_v37, %v4790_v62  ;;  %v2203_v11 = vpop.f32.mrb[229].mxu0  ;;  %v2492_v0 = vpop.f32.mrb[229].mxu1  ;;  %v2916_v14 = vsel %vm2788_vm0, %v2593_v52, %v2852_v59 }
 0x2ec   : > { %v2204_v36 = vpop.f32.mrb[230].mxu0  ;;  %v2493_v26 = vpop.f32.mrb[230].mxu1 }
 0x2ed   : > { %v2917_v13 = vsel %vm2789_vm1, %v2594_v55, %v2853_v3  ;;  %v2491_v54 = vadd.f32 %v2490_v39, %v2202_v16  ;;  %v2205_v60 = vadd.f32 %v2204_v36, %v4791_v48  ;;  %v2206_v47 = vpop.f32.mrb[231].mxu0  ;;  %v2495_v34 = vpop.f32.mrb[231].mxu1  ;;  %v3859_v39 = vld [vmem:[%s4579_s19 + $0xe0] sm:$0xff]  }
 0x2ee   : > { %v3795_v6 = vpack.c.bf16 %v2917_v13, %v2916_v14  ;;  %v4796_v14 = vld [vmem:[#allocation19_spill] sm:$0xff] }
 0x2ef   : > { %v2595_v15 = vadd.f32 %v3646_v40, %v2491_v54  ;;  %v2494_v10 = vadd.f32 %v2493_v26, %v2205_v60  ;;  %v3658_v54 = vunpack.c.l.bf16 %v3859_v39 }
 0x2f0   : > { %3886 = vst [vmem:[%s4603_s22 + $0xc0] sm:$0xff] %v3795_v6   ;;  %v3659_v6 = vunpack.c.h.bf16 %v3859_v39  ;;  %v4801_v39 = vld [vmem:[#allocation24_spill] sm:$0xff] }
 0x2f1   : > { %v2854_v22 = vmul.f32 0.05, %v2595_v15  ;;  %v2596_v61 = vadd.f32 %v3647_v8, %v2494_v10  ;;  %vm2790_vm2 = vcmp.ge.f32.partialorder %v2595_v15, 0.0 }
 0x2f2   : > { %v2209_v9 = vpop.f32.mrb[232].mxu0  ;;  %v2498_v20 = vpop.f32.mrb[232].mxu1 }
 0x2f3   : > { %vm2791_vm3 = vcmp.ge.f32.partialorder %v2596_v61, 0.0  ;;  %v2855_v32 = vmul.f32 0.05, %v2596_v61  ;;  %v2210_v56 = vadd.f32 %v2209_v9, %v4792_v21  ;;  %v2211_v27 = vpop.f32.mrb[233].mxu0  ;;  %v2500_v46 = vpop.f32.mrb[233].mxu1  ;;  %v2918_v35 = vsel %vm2790_vm2, %v2595_v15, %v2854_v22 }
 0x2f4   : > { %v2212_v41 = vpop.f32.mrb[234].mxu0  ;;  %v2501_v12 = vpop.f32.mrb[234].mxu1 }
 0x2f5   : > { %v2919_v58 = vsel %vm2791_vm3, %v2596_v61, %v2855_v32  ;;  %v2499_v43 = vadd.f32 %v2498_v20, %v2210_v56  ;;  %v2213_v18 = vadd.f32 %v2212_v41, %v4793_v1  ;;  %v2214_v17 = vpop.f32.mrb[235].mxu0  ;;  %v2503_v29 = vpop.f32.mrb[235].mxu1  ;;  %v3860_v20 = vld [vmem:[%s4579_s19 + $0xe8] sm:$0xff]  }
 0x2f6   : > { %v3800_v33 = vpack.c.bf16 %v2919_v58, %v2918_v35  ;;  %v4798_v35 = vld [vmem:[#allocation21_spill] sm:$0xff] }
 0x2f7   : > { %v2597_v7 = vadd.f32 %v3650_v19, %v2499_v43  ;;  %v2502_v45 = vadd.f32 %v2501_v12, %v2213_v18  ;;  %v3662_v43 = vunpack.c.l.bf16 %v3860_v20 }
 0x2f8   : > { %3887 = vst [vmem:[%s4603_s22 + $0xc8] sm:$0xff] %v3800_v33   ;;  %v3663_v33 = vunpack.c.h.bf16 %v3860_v20  ;;  %v4803_v20 = vld [vmem:[#allocation26_spill] sm:$0xff] }
 0x2f9   : > { %v2856_v5 = vmul.f32 0.05, %v2597_v7  ;;  %v2598_v63 = vadd.f32 %v3651_v44, %v2502_v45  ;;  %vm2792_vm4 = vcmp.ge.f32.partialorder %v2597_v7, 0.0 }
 0x2fa   : > { %v2217_v57 = vpop.f32.mrb[236].mxu0  ;;  %v2506_v50 = vpop.f32.mrb[236].mxu1 }
 0x2fb   : > { %vm2793_vm5 = vcmp.ge.f32.partialorder %v2598_v63, 0.0  ;;  %v2857_v25 = vmul.f32 0.05, %v2598_v63  ;;  %v2218_v28 = vadd.f32 %v2217_v57, %v4794_v49  ;;  %v2219_v42 = vpop.f32.mrb[237].mxu0  ;;  %v2508_v24 = vpop.f32.mrb[237].mxu1  ;;  %v2920_v51 = vsel %vm2792_vm4, %v2597_v7, %v2856_v5 }
 0x2fc   : > { %v2220_v2 = vpop.f32.mrb[238].mxu0  ;;  %v2509_v55 = vpop.f32.mrb[238].mxu1 }
 0x2fd   : > { %v2921_v52 = vsel %vm2793_vm5, %v2598_v63, %v2857_v25  ;;  %v2507_v30 = vadd.f32 %v2506_v50, %v2218_v28  ;;  %v2221_v59 = vadd.f32 %v2220_v2, %v4795_v53  ;;  %v2222_v37 = vpop.f32.mrb[239].mxu0  ;;  %v2511_v62 = vpop.f32.mrb[239].mxu1  ;;  %v3861_v50 = vld [vmem:[%s4579_s19 + $0xf0] sm:$0xff]  }
 0x2fe   : > { %v3805_v3 = vpack.c.bf16 %v2921_v52, %v2920_v51  ;;  %v4800_v51 = vld [vmem:[#allocation23_spill] sm:$0xff] }
 0x2ff   : > { %v2599_v16 = vadd.f32 %v3654_v23, %v2507_v30  ;;  %v2510_v40 = vadd.f32 %v2509_v55, %v2221_v59  ;;  %v3666_v30 = vunpack.c.l.bf16 %v3861_v50 }
 0x300   : > { %3888 = vst [vmem:[%s4603_s22 + $0xd0] sm:$0xff] %v3805_v3   ;;  %v3667_v3 = vunpack.c.h.bf16 %v3861_v50 }
 0x301   : > { %v2858_v11 = vmul.f32 0.05, %v2599_v16  ;;  %v2600_v0 = vadd.f32 %v3655_v4, %v2510_v40  ;;  %vm2794_vm6 = vcmp.ge.f32.partialorder %v2599_v16, 0.0 }
 0x302   : > { %v2225_v36 = vpop.f32.mrb[240].mxu0  ;;  %v2514_v48 = vpop.f32.mrb[240].mxu1 }
 0x303   : > { %vm2795_vm7 = vcmp.ge.f32.partialorder %v2600_v0, 0.0  ;;  %v2859_v8 = vmul.f32 0.05, %v2600_v0  ;;  %v2226_v13 = vadd.f32 %v2225_v36, %v4796_v14  ;;  %v2227_v60 = vpop.f32.mrb[241].mxu0  ;;  %v2516_v26 = vpop.f32.mrb[241].mxu1  ;;  %v2922_v34 = vsel %vm2794_vm6, %v2599_v16, %v2858_v11 }
 0x304   : > { %v2228_v47 = vpop.f32.mrb[242].mxu0  ;;  %v2517_v61 = vpop.f32.mrb[242].mxu1 }
 0x305   : > { %v2923_v15 = vsel %vm2795_vm7, %v2600_v0, %v2859_v8  ;;  %v2515_v10 = vadd.f32 %v2514_v48, %v2226_v13  ;;  %v2229_v22 = vadd.f32 %v2228_v47, %v4797_v31  ;;  %v2230_v9 = vpop.f32.mrb[243].mxu0  ;;  %v2519_v21 = vpop.f32.mrb[243].mxu1  ;;  %v3862_v48 = vld [vmem:[%s4579_s19 + $0xf8] sm:$0xff]  }
 0x306   : > { %v3810_v32 = vpack.c.bf16 %v2923_v15, %v2922_v34  ;;  %v4802_v34 = vld [vmem:[#allocation25_spill] sm:$0xff] }
 0x307   : > { %v2601_v56 = vadd.f32 %v3658_v54, %v2515_v10  ;;  %v2518_v19 = vadd.f32 %v2517_v61, %v2229_v22  ;;  %v3670_v10 = vunpack.c.l.bf16 %v3862_v48 }
 0x308   : > { %3889 = vst [vmem:[%s4603_s22 + $0xd8] sm:$0xff] %v3810_v32   ;;  %v3671_v32 = vunpack.c.h.bf16 %v3862_v48 }
 0x309   : > { %v2860_v27 = vmul.f32 0.05, %v2601_v56  ;;  %v2602_v46 = vadd.f32 %v3659_v6, %v2518_v19  ;;  %vm2796_vm8 = vcmp.ge.f32.partialorder %v2601_v56, 0.0 }
 0x30a   : > { %v2233_v41 = vpop.f32.mrb[244].mxu0  ;;  %v2522_v1 = vpop.f32.mrb[244].mxu1 }
 0x30b   : > { %vm2797_vm9 = vcmp.ge.f32.partialorder %v2602_v46, 0.0  ;;  %v2861_v44 = vmul.f32 0.05, %v2602_v46  ;;  %v2234_v58 = vadd.f32 %v2233_v41, %v4798_v35  ;;  %v2235_v18 = vpop.f32.mrb[245].mxu0  ;;  %v2524_v12 = vpop.f32.mrb[245].mxu1  ;;  %v2924_v29 = vsel %vm2796_vm8, %v2601_v56, %v2860_v27 }
 0x30c   : > { %v2236_v17 = vpop.f32.mrb[246].mxu0  ;;  %v2525_v63 = vpop.f32.mrb[246].mxu1 }
 0x30d   : > { %v2925_v7 = vsel %vm2797_vm9, %v2602_v46, %v2861_v44  ;;  %v2523_v45 = vadd.f32 %v2522_v1, %v2234_v58  ;;  %v2237_v5 = vadd.f32 %v2236_v17, %v4799_v38  ;;  %v2238_v57 = vpop.f32.mrb[247].mxu0  ;;  %v2527_v49 = vpop.f32.mrb[247].mxu1 }
 0x30e   : > { %v3815_v25 = vpack.c.bf16 %v2925_v7, %v2924_v29 }
 0x30f   : > { %v2603_v28 = vadd.f32 %v3662_v43, %v2523_v45  ;;  %v2526_v23 = vadd.f32 %v2525_v63, %v2237_v5 }
 0x310   : > { %3890 = vst [vmem:[%s4603_s22 + $0xe0] sm:$0xff] %v3815_v25  }
 0x311   : > { %v2862_v42 = vmul.f32 0.05, %v2603_v28  ;;  %v2604_v24 = vadd.f32 %v3663_v33, %v2526_v23  ;;  %vm2798_vm10 = vcmp.ge.f32.partialorder %v2603_v28, 0.0 }
 0x312   : > { %v2241_v2 = vpop.f32.mrb[248].mxu0  ;;  %v2530_v53 = vpop.f32.mrb[248].mxu1 }
 0x313   : > { %vm2799_vm11 = vcmp.ge.f32.partialorder %v2604_v24, 0.0  ;;  %v2863_v4 = vmul.f32 0.05, %v2604_v24  ;;  %v2242_v52 = vadd.f32 %v2241_v2, %v4800_v51  ;;  %v2243_v59 = vpop.f32.mrb[249].mxu0  ;;  %v2532_v55 = vpop.f32.mrb[249].mxu1  ;;  %v2926_v62 = vsel %vm2798_vm10, %v2603_v28, %v2862_v42 }
 0x314   : > { %v2244_v37 = vpop.f32.mrb[250].mxu0  ;;  %v2533_v0 = vpop.f32.mrb[250].mxu1 }
 0x315   : > { %v2927_v16 = vsel %vm2799_vm11, %v2604_v24, %v2863_v4  ;;  %v2531_v40 = vadd.f32 %v2530_v53, %v2242_v52  ;;  %v2245_v11 = vadd.f32 %v2244_v37, %v4801_v39  ;;  %v2246_v36 = vpop.f32.mrb[251].mxu0  ;;  %v2535_v14 = vpop.f32.mrb[251].mxu1 }
 0x316   : > { %v3820_v8 = vpack.c.bf16 %v2927_v16, %v2926_v62 }
 0x317   : > { %v2605_v13 = vadd.f32 %v3666_v30, %v2531_v40  ;;  %v2534_v54 = vadd.f32 %v2533_v0, %v2245_v11 }
 0x318   : > { %3891 = vst [vmem:[%s4603_s22 + $0xe8] sm:$0xff] %v3820_v8  }
 0x319   : > { %v2864_v60 = vmul.f32 0.05, %v2605_v13  ;;  %v2606_v26 = vadd.f32 %v3667_v3, %v2534_v54  ;;  %vm2800_vm12 = vcmp.ge.f32.partialorder %v2605_v13, 0.0 }
 0x31a   : > { %v2249_v47 = vpop.f32.mrb[252].mxu0  ;;  %v2538_v31 = vpop.f32.mrb[252].mxu1 }
 0x31b   : > { %vm2801_vm13 = vcmp.ge.f32.partialorder %v2606_v26, 0.0  ;;  %v2865_v6 = vmul.f32 0.05, %v2606_v26  ;;  %v2250_v15 = vadd.f32 %v2249_v47, %v4802_v34  ;;  %v2251_v22 = vpop.f32.mrb[253].mxu0  ;;  %v2540_v61 = vpop.f32.mrb[253].mxu1  ;;  %v2928_v21 = vsel %vm2800_vm12, %v2605_v13, %v2864_v60 }
 0x31c   : > { %v2252_v9 = vpop.f32.mrb[254].mxu0  ;;  %v2541_v46 = vpop.f32.mrb[254].mxu1 }
 0x31d   : > { %v2929_v56 = vsel %vm2801_vm13, %v2606_v26, %v2865_v6  ;;  %v2539_v19 = vadd.f32 %v2538_v31, %v2250_v15  ;;  %v2253_v27 = vadd.f32 %v2252_v9, %v4803_v20  ;;  %v2254_v41 = vpop.f32.mrb[255].mxu0  ;;  %v2543_v35 = vpop.f32.mrb[255].mxu1 }
 0x31e   : > { %v3825_v44 = vpack.c.bf16 %v2929_v56, %v2928_v21 }
 0x31f   : > { %v2607_v58 = vadd.f32 %v3670_v10, %v2539_v19  ;;  %v2542_v43 = vadd.f32 %v2541_v46, %v2253_v27 }
 0x320   : > { %3892 = vst [vmem:[%s4603_s22 + $0xf0] sm:$0xff] %v3825_v44  }
 0x321   : > { %v2866_v1 = vmul.f32 0.05, %v2607_v58  ;;  %v2608_v18 = vadd.f32 %v3671_v32, %v2542_v43  ;;  %vm2802_vm14 = vcmp.ge.f32.partialorder %v2607_v58, 0.0 }
 0x323   : > { %vm2803_vm15 = vcmp.ge.f32.partialorder %v2608_v18, 0.0  ;;  %v2867_v12 = vmul.f32 0.05, %v2608_v18  ;;  %v2930_v17 = vsel %vm2802_vm14, %v2607_v58, %v2866_v1 }
 0x325   : > { %v2931_v33 = vsel %vm2803_vm15, %v2608_v18, %v2867_v12 }
 0x326   : > { %v3830_v29 = vpack.c.bf16 %v2931_v33, %v2930_v17 }
 0x328   : > { %3893 = vst [vmem:[%s4603_s22 + $0xf8] sm:$0xff] %v3830_v29  }
 0x329 PF: > { %s13_s14 = sadd.s32 1, %s4005_s14   ;;  %s4804_s12 = smov %s4001_s13 }
 0x32a   : > { %p10_p6 = scmp.ge.s32.totalorder %s13_s14, 4   ;;  %s4805_s13 = smov %s4807_s15 }
 0x32c   :  { %12 = sbr.rel (!%p10_p6) target bundleno = 2 (0x2), region = 74 }

// kernel: rg_discriminator.5
= control target key start
LH: loop header
LB: loop body
LE: loop exit
PB: predicated region body
PF: predicated region fallthrough
CT: control target
= control target key end

     0   :  { %s5863_s24 = smov 0   ;;  %s5865_s25 = smov 0   ;;  %s6758_s0 = inlined_call_operand.vmem [shape: s8[1024,1024], index: 0, kind: input, shape index: {}]   ;;  %s6759_s1 = inlined_call_operand.vmem [shape: bf16[1024,128], index: 1, kind: input, shape index: {}]   ;;  %s6760_s2 = inlined_call_operand.vmem [shape: bf16[1024,128], index: 2, kind: input, shape index: {}]   ;;  %s6761_s3 = inlined_call_operand.vmem [shape: bf16[128,128], index: 3, kind: input, shape index: {}]   ;;  %s6762_s4 = inlined_call_operand.vmem [shape: bf16[128,128], index: 4, kind: input, shape index: {}]   ;;  %s6763_s5 = inlined_call_operand.vmem [shape: f32[1,128], index: 5, kind: input, shape index: {}]   ;;  %s6764_s6 = inlined_call_operand.vmem [shape: bf16[1024,128], index: 6, kind: output, shape index: {0}]   ;;  %s6765_s7 = inlined_call_operand.vmem [shape: bf16[1024,128], index: 7, kind: output, shape index: {1}]  }
   0x1   :  { %s5867_s26 = smov 0  }
   0x2 LB: > { %s30_s27 = sadd.s32 1, %s5816_s25  ;;  %p4562_p0 = scmp.ge.s32.totalorder %s5820_s26, 1  ;;  %s5820_s26 = sphi %s5867_s26, %s18_s26   ;;  %s5816_s25 = sphi %s5865_s25, %s6818_s25   ;;  %s5812_s24 = sphi %s5863_s24, %s6817_s24  }
   0x3   : > { %p32_p1 = scmp.ge.s32.totalorder %s30_s27, 2  ;;  %p272_p2 = scmp.lt.s32.totalorder %s5820_s26, 3 }
   0x5   : > { %s6820_s27 = smov (%p32_p1, %s30_s27), 0  ;;  %p273_p3 = pnand %p4562_p0, %p272_p2 }
   0x7   : > { %276 = sbr.rel (%p273_p3) target bundleno = 1028 (0x404), region = 44 }
   0xe   : > { %v5718_v0 = vld [vmem:[%s6759_s1] sm:$0xff]   ;;  %v5822_v1 = vmov 0   ;;  %v5720_v3 = vld [vmem:[%s6759_s1 + $0x8] sm:$0xff]   ;;  %v5722_v5 = vld [vmem:[%s6759_s1 + $0x10] sm:$0xff]   ;;  %s4563_s29 = sshll.u32 %s5812_s24, 4 }
   0xf   : > { %1511 = vmatprep.subr.bf16.mxu0 %v5822_v1  ;;  %1800 = vmatprep.subr.bf16.mxu1 %v5822_v1  ;;  %v5719_v2 = vld [vmem:[%s6759_s1 + $0x80] sm:$0xff]   ;;  %v5721_v4 = vld [vmem:[%s6759_s1 + $0x88] sm:$0xff]   ;;  %v5723_v6 = vld [vmem:[%s6759_s1 + $0x90] sm:$0xff]   ;;  %p321_p4 = scmp.lt.s32.totalorder %s4563_s29, 31 }
  0x10   : > { %1512 = vmatpush1.bf16.msra.mxu0 %v5718_v0  ;;  %1801 = vmatpush1.bf16.msra.mxu1 %v5719_v2  ;;  %v5724_v7 = vld [vmem:[%s6759_s1 + $0x18] sm:$0xff]   ;;  %v5726_v9 = vld [vmem:[%s6759_s1 + $0x20] sm:$0xff]   ;;  %v5728_v11 = vld [vmem:[%s6759_s1 + $0x28] sm:$0xff]  }
  0x11   : > { %1513 = vmatprep.subr.bf16.mxu0 %v5822_v1  ;;  %1802 = vmatprep.subr.bf16.mxu1 %v5822_v1  ;;  %v5725_v8 = vld [vmem:[%s6759_s1 + $0x98] sm:$0xff]   ;;  %v5727_v10 = vld [vmem:[%s6759_s1 + $0xa0] sm:$0xff]   ;;  %v5729_v12 = vld [vmem:[%s6759_s1 + $0xa8] sm:$0xff]   ;;  %s6822_s29 = smov (!%p321_p4, %s4563_s29), 31 }
  0x12   : > { %v5730_v13 = vld [vmem:[%s6759_s1 + $0x30] sm:$0xff]   ;;  %v5732_v15 = vld [vmem:[%s6759_s1 + $0x38] sm:$0xff]   ;;  %s4783_s17 = sshll.u32 %s6822_s29, 6  ;;  %v5734_v17 = vld [vmem:[%s6759_s1 + $0x40] sm:$0xff]   ;;  %s4566_s29 = sshll.u32 %s5812_s24, 6 }
  0x13   : > { %v5731_v14 = vld [vmem:[%s6759_s1 + $0xb0] sm:$0xff]   ;;  %v5733_v16 = vld [vmem:[%s6759_s1 + $0xb8] sm:$0xff]   ;;  %s5951_s22 = scalar_lea.vmem %s6758_s0, %s4783_s17  ;;  %v5735_v18 = vld [vmem:[%s6759_s1 + $0xc0] sm:$0xff]   ;;  %p6448_p5 = scmp.lt.s32.totalorder %s4566_s29, 127 }
  0x14   : > { %1514 = vmatpush1.bf16.msra.mxu0 %v5720_v3  ;;  %1803 = vmatpush1.bf16.msra.mxu1 %v5721_v4  ;;  %v5962_v19 = vld [vmem:[%s5951_s22 + $0x8] sm:$0xff]  ;;  %v5965_v20 = vld [vmem:[%s5951_s22 + $0x18] sm:$0xff]  ;;  %v5738_v25 = vld [vmem:[%s6759_s1 + $0x50] sm:$0xff]  }
  0x15   : > { %1515 = vmatprep.subr.bf16.mxu0 %v5822_v1  ;;  %1804 = vmatprep.subr.bf16.mxu1 %v5822_v1  ;;  %v872_v21 = vunpack.c.l.s8.bf16 %v5962_v19  ;;  %v874_v22 = vunpack.c.l.s8.bf16 %v5965_v20  ;;  %v5736_v23 = vld [vmem:[%s6759_s1 + $0x48] sm:$0xff]   ;;  %v5739_v26 = vld [vmem:[%s6759_s1 + $0xd0] sm:$0xff]   ;;  %v5740_v27 = vld [vmem:[%s6759_s1 + $0x58] sm:$0xff]   ;;  %v880_v42 = vunpack.c.h.s8.bf16 %v5962_v19  ;;  %v882_v44 = vunpack.c.h.s8.bf16 %v5965_v20  ;;  %s6824_s29 = smov (!%p6448_p5, %s4566_s29), 127 }
  0x16   : > { %v5737_v24 = vld [vmem:[%s6759_s1 + $0xc8] sm:$0xff]   ;;  %v5741_v28 = vld [vmem:[%s6759_s1 + $0xd8] sm:$0xff]   ;;  %v5742_v29 = vld [vmem:[%s6759_s1 + $0x60] sm:$0xff]   ;;  %s6460_s24 = sshll.u32 %s6824_s29, 2 }
  0x17   : > { %1543 = vmatprep.mubr.bf16.mxu0 %v872_v21  ;;  %1832 = vmatprep.mubr.bf16.mxu1 %v874_v22  ;;  %v5743_v30 = vld [vmem:[%s6759_s1 + $0xe0] sm:$0xff]   ;;  %v5744_v31 = vld [vmem:[%s6759_s1 + $0x68] sm:$0xff]   ;;  %v5746_v33 = vld [vmem:[%s6759_s1 + $0x70] sm:$0xff]   ;;  %s6468_s10 = scalar_lea.vmem %s6760_s2, %s6460_s24  ;;  %s6613_s14 = scalar_lea.vmem %s6764_s6, %s6460_s24 }
  0x18   : > { %1516 = vmatpush1.bf16.msra.mxu0 %v5722_v5  ;;  %1805 = vmatpush1.bf16.msra.mxu1 %v5723_v6  ;;  %v5745_v32 = vld [vmem:[%s6759_s1 + $0xe8] sm:$0xff]   ;;  %v5747_v34 = vld [vmem:[%s6759_s1 + $0xf0] sm:$0xff]   ;;  %v5748_v35 = vld [vmem:[%s6759_s1 + $0x78] sm:$0xff]   ;;  %s6623_s17 = scalar_lea.vmem %s6765_s7, %s6460_s24 }
  0x19   : > { %1517 = vmatprep.subr.bf16.mxu0 %v5822_v1  ;;  %1806 = vmatprep.subr.bf16.mxu1 %v5822_v1  ;;  %v743_v36 = vld [vmem:[%s5951_s22] sm:$0xff]  ;;  %v5749_v37 = vld [vmem:[%s6759_s1 + $0xf8] sm:$0xff]   ;;  %v745_v38 = vld [vmem:[%s5951_s22 + $0x10] sm:$0xff] }
  0x1a   : > { %v5750_v39 = vld [vmem:[%s6759_s1 + $0x100] sm:$0xff]   ;;  %v871_v40 = vunpack.c.l.s8.bf16 %v743_v36  ;;  %v873_v41 = vunpack.c.l.s8.bf16 %v745_v38  ;;  %v752_v45 = vld [vmem:[%s5951_s22 + $0x48] sm:$0xff]  ;;  %v754_v46 = vld [vmem:[%s5951_s22 + $0x58] sm:$0xff]  ;;  %v879_v49 = vunpack.c.h.s8.bf16 %v743_v36  ;;  %v881_v51 = vunpack.c.h.s8.bf16 %v745_v38 }
  0x1b   : > { %v5751_v43 = vld [vmem:[%s6759_s1 + $0x180] sm:$0xff]   ;;  %v5752_v47 = vld [vmem:[%s6759_s1 + $0x108] sm:$0xff]   ;;  %v5754_v50 = vld [vmem:[%s6759_s1 + $0x110] sm:$0xff]   ;;  %v888_v52 = vunpack.c.l.s8.bf16 %v752_v45  ;;  %v890_v54 = vunpack.c.l.s8.bf16 %v754_v46  ;;  %v896_v62 = vunpack.c.h.s8.bf16 %v752_v45  ;;  %v898_v63 = vunpack.c.h.s8.bf16 %v754_v46 }
  0x1c   : > { %1518 = vmatpush1.bf16.msra.mxu0 %v5724_v7  ;;  %1807 = vmatpush1.bf16.msra.mxu1 %v5725_v8  ;;  %v5753_v48 = vld [vmem:[%s6759_s1 + $0x188] sm:$0xff]   ;;  %v5755_v53 = vld [vmem:[%s6759_s1 + $0x190] sm:$0xff]   ;;  %v751_v55 = vld [vmem:[%s5951_s22 + $0x40] sm:$0xff] }
  0x1d   : > { %1519 = vmatprep.subr.bf16.mxu0 %v5822_v1  ;;  %1808 = vmatprep.subr.bf16.mxu1 %v5822_v1  ;;  %v753_v56 = vld [vmem:[%s5951_s22 + $0x50] sm:$0xff]  ;;  %v5756_v57 = vld [vmem:[%s6759_s1 + $0x118] sm:$0xff]   ;;  %v887_v59 = vunpack.c.l.s8.bf16 %v751_v55  ;;  %v5758_v60 = vld [vmem:[%s6759_s1 + $0x120] sm:$0xff]   ;;  %v895_v6 = vunpack.c.h.s8.bf16 %v751_v55 }
  0x1e   : > { %v5757_v58 = vld [vmem:[%s6759_s1 + $0x198] sm:$0xff]   ;;  %v889_v61 = vunpack.c.l.s8.bf16 %v753_v56  ;;  %v5759_v0 = vld [vmem:[%s6759_s1 + $0x1a0] sm:$0xff]   ;;  %v760_v2 = vld [vmem:[%s5951_s22 + $0x88] sm:$0xff]  ;;  %v897_v7 = vunpack.c.h.s8.bf16 %v753_v56 }
  0x1f   : > { %v5760_v3 = vld [vmem:[%s6759_s1 + $0x128] sm:$0xff]   ;;  %v762_v4 = vld [vmem:[%s5951_s22 + $0x98] sm:$0xff]  ;;  %v904_v8 = vunpack.c.l.s8.bf16 %v760_v2  ;;  %v5766_v20 = vld [vmem:[%s6759_s1 + $0x140] sm:$0xff]  }
  0x20   : > { %1520 = vmatpush1.bf16.msra.mxu0 %v5726_v9  ;;  %1809 = vmatpush1.bf16.msra.mxu1 %v5727_v10  ;;  %v5761_v5 = vld [vmem:[%s6759_s1 + $0x1a8] sm:$0xff]   ;;  %v906_v9 = vunpack.c.l.s8.bf16 %v762_v4  ;;  %v5762_v10 = vld [vmem:[%s6759_s1 + $0x130] sm:$0xff]   ;;  %v914_v19 = vunpack.c.h.s8.bf16 %v762_v4  ;;  %v5767_v21 = vld [vmem:[%s6759_s1 + $0x1c0] sm:$0xff]  }
  0x21   : > { %1521 = vmatprep.subr.bf16.mxu0 %v5822_v1  ;;  %1810 = vmatprep.subr.bf16.mxu1 %v5822_v1  ;;  %v768_v22 = vld [vmem:[%s5951_s22 + $0xc8] sm:$0xff]  ;;  %v5772_v38 = vld [vmem:[%s6759_s1 + $0x158] sm:$0xff]   ;;  %v775_v46 = vld [vmem:[%s5951_s22 + $0x100] sm:$0xff] }
  0x22   : > { %v928_v36 = vunpack.c.h.s8.bf16 %v768_v22  ;;  %v786_v55 = vld [vmem:[%s5951_s22 + $0x158] sm:$0xff]  ;;  %v943_v56 = vunpack.c.h.s8.bf16 %v775_v46  ;;  %v792_v4 = vld [vmem:[%s5951_s22 + $0x188] sm:$0xff] }
  0x24   : > { %1522 = vmatpush1.bf16.msra.mxu0 %v5728_v11  ;;  %1811 = vmatpush1.bf16.msra.mxu1 %v5729_v12  ;;  %v5763_v11 = vld [vmem:[%s6759_s1 + $0x1b0] sm:$0xff]   ;;  %v759_v12 = vld [vmem:[%s5951_s22 + $0x80] sm:$0xff] }
  0x25   : > { %1523 = vmatprep.subr.bf16.mxu0 %v5822_v1  ;;  %1812 = vmatprep.subr.bf16.mxu1 %v5822_v1 }
  0x28   : > { %1524 = vmatpush1.bf16.msra.mxu0 %v5730_v13  ;;  %1813 = vmatpush1.bf16.msra.mxu1 %v5731_v14  ;;  %v761_v13 = vld [vmem:[%s5951_s22 + $0x90] sm:$0xff]  ;;  %v5764_v14 = vld [vmem:[%s6759_s1 + $0x138] sm:$0xff]  }
  0x29   : > { %1525 = vmatprep.subr.bf16.mxu0 %v5822_v1  ;;  %1814 = vmatprep.subr.bf16.mxu1 %v5822_v1 }
  0x2c   : > { %1526 = vmatpush1.bf16.msra.mxu0 %v5732_v15  ;;  %1815 = vmatpush1.bf16.msra.mxu1 %v5733_v16  ;;  %v5765_v15 = vld [vmem:[%s6759_s1 + $0x1b8] sm:$0xff]   ;;  %v903_v16 = vunpack.c.l.s8.bf16 %v759_v12 }
  0x2d   : > { %1527 = vmatprep.subr.bf16.mxu0 %v5822_v1  ;;  %1816 = vmatprep.subr.bf16.mxu1 %v5822_v1 }
  0x30   : > { %1528 = vmatpush1.bf16.msra.mxu0 %v5734_v17  ;;  %1817 = vmatpush1.bf16.msra.mxu1 %v5735_v18  ;;  %v905_v17 = vunpack.c.l.s8.bf16 %v761_v13  ;;  %v912_v18 = vunpack.c.h.s8.bf16 %v760_v2  ;;  %v962_v2 = vunpack.c.h.s8.bf16 %v786_v55 }
  0x31   : > { %1529 = vmatprep.subr.bf16.mxu0 %v5822_v1  ;;  %1818 = vmatprep.subr.bf16.mxu1 %v5822_v1 }
  0x34   : > { %1530 = vmatpush1.bf16.msra.mxu0 %v5736_v23  ;;  %1819 = vmatpush1.bf16.msra.mxu1 %v5737_v24  ;;  %v5768_v23 = vld [vmem:[%s6759_s1 + $0x148] sm:$0xff]   ;;  %v770_v24 = vld [vmem:[%s5951_s22 + $0xd8] sm:$0xff] }
  0x35   : > { %1531 = vmatprep.subr.bf16.mxu0 %v5822_v1  ;;  %1820 = vmatprep.subr.bf16.mxu1 %v5822_v1 }
  0x38   : > { %1532 = vmatpush1.bf16.msra.mxu0 %v5738_v25  ;;  %1821 = vmatpush1.bf16.msra.mxu1 %v5739_v26  ;;  %v5769_v25 = vld [vmem:[%s6759_s1 + $0x1c8] sm:$0xff]   ;;  %v911_v26 = vunpack.c.h.s8.bf16 %v759_v12  ;;  %v793_v12 = vld [vmem:[%s5951_s22 + $0x190] sm:$0xff] }
  0x39   : > { %1533 = vmatprep.subr.bf16.mxu0 %v5822_v1  ;;  %1822 = vmatprep.subr.bf16.mxu1 %v5822_v1 }
  0x3c   : > { %1534 = vmatpush1.bf16.msra.mxu0 %v5740_v27  ;;  %1823 = vmatpush1.bf16.msra.mxu1 %v5741_v28  ;;  %v913_v27 = vunpack.c.h.s8.bf16 %v761_v13  ;;  %v920_v28 = vunpack.c.l.s8.bf16 %v768_v22  ;;  %v977_v22 = vunpack.c.h.s8.bf16 %v793_v12 }
  0x3d   : > { %1535 = vmatprep.subr.bf16.mxu0 %v5822_v1  ;;  %1824 = vmatprep.subr.bf16.mxu1 %v5822_v1 }
  0x40   : > { %1536 = vmatpush1.bf16.msra.mxu0 %v5742_v29  ;;  %1825 = vmatpush1.bf16.msra.mxu1 %v5743_v30  ;;  %v922_v29 = vunpack.c.l.s8.bf16 %v770_v24  ;;  %v5770_v30 = vld [vmem:[%s6759_s1 + $0x150] sm:$0xff]  }
  0x41   : > { %1537 = vmatprep.subr.bf16.mxu0 %v5822_v1  ;;  %1826 = vmatprep.subr.bf16.mxu1 %v5822_v1 }
  0x44   : > { %1538 = vmatpush1.bf16.msra.mxu0 %v5744_v31  ;;  %1827 = vmatpush1.bf16.msra.mxu1 %v5745_v32  ;;  %v5771_v31 = vld [vmem:[%s6759_s1 + $0x1d0] sm:$0xff]   ;;  %v767_v32 = vld [vmem:[%s5951_s22 + $0xc0] sm:$0xff] }
  0x45   : > { %1539 = vmatprep.subr.bf16.mxu0 %v5822_v1  ;;  %1828 = vmatprep.subr.bf16.mxu1 %v5822_v1 }
  0x48   : > { %1540 = vmatpush1.bf16.msra.mxu0 %v5746_v33  ;;  %1829 = vmatpush1.bf16.msra.mxu1 %v5747_v34  ;;  %v769_v33 = vld [vmem:[%s5951_s22 + $0xd0] sm:$0xff]  ;;  %v919_v34 = vunpack.c.l.s8.bf16 %v767_v32 }
  0x49   : > { %1541 = vmatprep.subr.bf16.mxu0 %v5822_v1  ;;  %1830 = vmatprep.subr.bf16.mxu1 %v5822_v1 }
  0x4c   : > { %1542 = vmatpush1.bf16.msra.mxu0 %v5748_v35  ;;  %1831 = vmatpush1.bf16.msra.mxu1 %v5749_v37  ;;  %v921_v35 = vunpack.c.l.s8.bf16 %v769_v33  ;;  %v930_v37 = vunpack.c.h.s8.bf16 %v770_v24 }
  0x4d   : > { %2089 = vmatprep.subr.bf16.mxu0 %v5822_v1  ;;  %2378 = vmatprep.subr.bf16.mxu1 %v5822_v1 }
  0x4f   : > { %1544 = vmatmul.mubr.bf16.vlgmr.msra.gmra.mrb[0].mxu0 %v871_v40  ;;  %1833 = vmatmul.mubr.bf16.vlgmr.msra.gmra.mrb[0].mxu1 %v873_v41  ;;  %v776_v40 = vld [vmem:[%s5951_s22 + $0x108] sm:$0xff]  ;;  %v778_v41 = vld [vmem:[%s5951_s22 + $0x118] sm:$0xff] }
  0x50   : > { %2090 = vmatpush1.bf16.msra.mxu0 %v5750_v39  ;;  %2379 = vmatpush1.bf16.msra.mxu1 %v5751_v43  ;;  %v5773_v39 = vld [vmem:[%s6759_s1 + $0x1d8] sm:$0xff]   ;;  %v929_v43 = vunpack.c.h.s8.bf16 %v769_v33  ;;  %v938_v45 = vunpack.c.l.s8.bf16 %v778_v41 }
  0x51   : > { %1551 = vmatprep.mubr.bf16.mxu0 %v880_v42  ;;  %1840 = vmatprep.mubr.bf16.mxu1 %v882_v44  ;;  %v927_v42 = vunpack.c.h.s8.bf16 %v767_v32  ;;  %v936_v44 = vunpack.c.l.s8.bf16 %v776_v40  ;;  %v810_v32 = vld [vmem:[%s5951_s22 + $0x218] sm:$0xff] }
  0x52   : > { %2091 = vmatprep.subr.bf16.mxu0 %v5822_v1  ;;  %2380 = vmatprep.subr.bf16.mxu1 %v5822_v1 }
  0x54   : > { %2092 = vmatpush1.bf16.msra.mxu0 %v5752_v47  ;;  %2381 = vmatpush1.bf16.msra.mxu1 %v5753_v48  ;;  %v777_v47 = vld [vmem:[%s5951_s22 + $0x110] sm:$0xff]  ;;  %v935_v48 = vunpack.c.l.s8.bf16 %v775_v46 }
  0x55   : > { %2093 = vmatprep.subr.bf16.mxu0 %v5822_v1  ;;  %2382 = vmatprep.subr.bf16.mxu1 %v5822_v1 }
  0x57   : > { %1552 = vmatmul.mubr.bf16.gmra.mrb[4].mxu0 %v879_v49  ;;  %1841 = vmatmul.mubr.bf16.gmra.mrb[4].mxu1 %v881_v51  ;;  %v937_v49 = vunpack.c.l.s8.bf16 %v777_v47  ;;  %v946_v51 = vunpack.c.h.s8.bf16 %v778_v41 }
  0x58   : > { %1559 = vmatprep.mubr.bf16.mxu0 %v888_v52  ;;  %1848 = vmatprep.mubr.bf16.mxu1 %v890_v54  ;;  %v5774_v52 = vld [vmem:[%s6759_s1 + $0x160] sm:$0xff]   ;;  %v784_v54 = vld [vmem:[%s5951_s22 + $0x148] sm:$0xff] }
  0x59   : > { %2094 = vmatpush1.bf16.msra.mxu0 %v5754_v50  ;;  %2383 = vmatpush1.bf16.msra.mxu1 %v5755_v53  ;;  %v944_v50 = vunpack.c.h.s8.bf16 %v776_v40  ;;  %v5775_v53 = vld [vmem:[%s6759_s1 + $0x1e0] sm:$0xff]  }
  0x5a   : > { %2095 = vmatprep.subr.bf16.mxu0 %v5822_v1  ;;  %2384 = vmatprep.subr.bf16.mxu1 %v5822_v1 }
  0x5d   : > { %2096 = vmatpush1.bf16.msra.mxu0 %v5756_v57  ;;  %2385 = vmatpush1.bf16.msra.mxu1 %v5757_v58  ;;  %v945_v57 = vunpack.c.h.s8.bf16 %v777_v47  ;;  %v952_v58 = vunpack.c.l.s8.bf16 %v784_v54 }
  0x5e   : > { %2097 = vmatprep.subr.bf16.mxu0 %v5822_v1  ;;  %2386 = vmatprep.subr.bf16.mxu1 %v5822_v1 }
  0x5f   : > { %1560 = vmatmul.mubr.bf16.gmra.mrb[8].mxu0 %v887_v59  ;;  %1849 = vmatmul.mubr.bf16.gmra.mrb[8].mxu1 %v889_v61  ;;  %v954_v59 = vunpack.c.l.s8.bf16 %v786_v55  ;;  %v785_v61 = vld [vmem:[%s5951_s22 + $0x150] sm:$0xff] }
  0x60   : > { %1567 = vmatprep.mubr.bf16.mxu0 %v896_v62  ;;  %1856 = vmatprep.mubr.bf16.mxu1 %v898_v63  ;;  %v953_v63 = vunpack.c.l.s8.bf16 %v785_v61 }
  0x61   : > { %2098 = vmatpush1.bf16.msra.mxu0 %v5758_v60  ;;  %2387 = vmatpush1.bf16.msra.mxu1 %v5759_v0  ;;  %v783_v60 = vld [vmem:[%s5951_s22 + $0x140] sm:$0xff]  ;;  %v960_v0 = vunpack.c.h.s8.bf16 %v784_v54 }
  0x62   : > { %2099 = vmatprep.subr.bf16.mxu0 %v5822_v1  ;;  %2388 = vmatprep.subr.bf16.mxu1 %v5822_v1  ;;  %v951_v62 = vunpack.c.l.s8.bf16 %v783_v60 }
  0x65   : > { %2100 = vmatpush1.bf16.msra.mxu0 %v5760_v3  ;;  %2389 = vmatpush1.bf16.msra.mxu1 %v5761_v5  ;;  %v5776_v3 = vld [vmem:[%s6759_s1 + $0x168] sm:$0xff]   ;;  %v794_v5 = vld [vmem:[%s5951_s22 + $0x198] sm:$0xff] }
  0x66   : > { %2101 = vmatprep.subr.bf16.mxu0 %v5822_v1  ;;  %2390 = vmatprep.subr.bf16.mxu1 %v5822_v1 }
  0x67   : > { %1568 = vmatmul.mubr.bf16.gmra.mrb[12].mxu0 %v895_v6  ;;  %1857 = vmatmul.mubr.bf16.gmra.mrb[12].mxu1 %v897_v7  ;;  %v959_v6 = vunpack.c.h.s8.bf16 %v783_v60  ;;  %v5777_v7 = vld [vmem:[%s6759_s1 + $0x1e8] sm:$0xff]  }
  0x68   : > { %1575 = vmatprep.mubr.bf16.mxu0 %v904_v8  ;;  %1864 = vmatprep.mubr.bf16.mxu1 %v906_v9  ;;  %v961_v8 = vunpack.c.h.s8.bf16 %v785_v61  ;;  %v968_v9 = vunpack.c.l.s8.bf16 %v792_v4 }
  0x69   : > { %2102 = vmatpush1.bf16.msra.mxu0 %v5762_v10  ;;  %2391 = vmatpush1.bf16.msra.mxu1 %v5763_v11  ;;  %v970_v10 = vunpack.c.l.s8.bf16 %v794_v5  ;;  %v791_v11 = vld [vmem:[%s5951_s22 + $0x180] sm:$0xff] }
  0x6a   : > { %2103 = vmatprep.subr.bf16.mxu0 %v5822_v1  ;;  %2392 = vmatprep.subr.bf16.mxu1 %v5822_v1  ;;  %v967_v13 = vunpack.c.l.s8.bf16 %v791_v11 }
  0x6d   : > { %2104 = vmatpush1.bf16.msra.mxu0 %v5764_v14  ;;  %2393 = vmatpush1.bf16.msra.mxu1 %v5765_v15  ;;  %v969_v14 = vunpack.c.l.s8.bf16 %v793_v12  ;;  %v976_v15 = vunpack.c.h.s8.bf16 %v792_v4  ;;  %v833_v12 = vld [vmem:[%s5951_s22 + $0x2d0] sm:$0xff] }
  0x6e   : > { %2105 = vmatprep.subr.bf16.mxu0 %v5822_v1  ;;  %2394 = vmatprep.subr.bf16.mxu1 %v5822_v1 }
  0x6f   : > { %1576 = vmatmul.mubr.bf16.gmra.mrb[16].mxu0 %v903_v16  ;;  %1865 = vmatmul.mubr.bf16.gmra.mrb[16].mxu1 %v905_v17  ;;  %v978_v16 = vunpack.c.h.s8.bf16 %v794_v5  ;;  %v5778_v17 = vld [vmem:[%s6759_s1 + $0x170] sm:$0xff]   ;;  %v832_v5 = vld [vmem:[%s5951_s22 + $0x2c8] sm:$0xff] }
  0x70   : > { %1583 = vmatprep.mubr.bf16.mxu0 %v912_v18  ;;  %1872 = vmatprep.mubr.bf16.mxu1 %v914_v19  ;;  %v800_v18 = vld [vmem:[%s5951_s22 + $0x1c8] sm:$0xff]  ;;  %v802_v19 = vld [vmem:[%s5951_s22 + $0x1d8] sm:$0xff] }
  0x71   : > { %2106 = vmatpush1.bf16.msra.mxu0 %v5766_v20  ;;  %2395 = vmatpush1.bf16.msra.mxu1 %v5767_v21  ;;  %v975_v20 = vunpack.c.h.s8.bf16 %v791_v11  ;;  %v5779_v21 = vld [vmem:[%s6759_s1 + $0x1f0] sm:$0xff]   ;;  %v986_v24 = vunpack.c.l.s8.bf16 %v802_v19  ;;  %v831_v11 = vld [vmem:[%s5951_s22 + $0x2c0] sm:$0xff] }
  0x72   : > { %2107 = vmatprep.subr.bf16.mxu0 %v5822_v1  ;;  %2396 = vmatprep.subr.bf16.mxu1 %v5822_v1 }
  0x75   : > { %2108 = vmatpush1.bf16.msra.mxu0 %v5768_v23  ;;  %2397 = vmatpush1.bf16.msra.mxu1 %v5769_v25  ;;  %v984_v23 = vunpack.c.l.s8.bf16 %v800_v18  ;;  %v799_v25 = vld [vmem:[%s5951_s22 + $0x1c0] sm:$0xff] }
  0x76   : > { %2109 = vmatprep.subr.bf16.mxu0 %v5822_v1  ;;  %2398 = vmatprep.subr.bf16.mxu1 %v5822_v1  ;;  %v991_v33 = vunpack.c.h.s8.bf16 %v799_v25 }
  0x77   : > { %1584 = vmatmul.mubr.bf16.gmra.mrb[20].mxu0 %v911_v26  ;;  %1873 = vmatmul.mubr.bf16.gmra.mrb[20].mxu1 %v913_v27  ;;  %v801_v26 = vld [vmem:[%s5951_s22 + $0x1d0] sm:$0xff]  ;;  %v983_v27 = vunpack.c.l.s8.bf16 %v799_v25 }
  0x78   : > { %1591 = vmatprep.mubr.bf16.mxu0 %v920_v28  ;;  %1880 = vmatprep.mubr.bf16.mxu1 %v922_v29  ;;  %v985_v28 = vunpack.c.l.s8.bf16 %v801_v26  ;;  %v992_v29 = vunpack.c.h.s8.bf16 %v800_v18  ;;  %v842_v18 = vld [vmem:[%s5951_s22 + $0x318] sm:$0xff] }
  0x79   : > { %2110 = vmatpush1.bf16.msra.mxu0 %v5770_v30  ;;  %2399 = vmatpush1.bf16.msra.mxu1 %v5771_v31  ;;  %v994_v30 = vunpack.c.h.s8.bf16 %v802_v19  ;;  %v808_v31 = vld [vmem:[%s5951_s22 + $0x208] sm:$0xff]  ;;  %v1055_v19 = vunpack.c.h.s8.bf16 %v831_v11 }
  0x7a   : > { %2111 = vmatprep.subr.bf16.mxu0 %v5822_v1  ;;  %2400 = vmatprep.subr.bf16.mxu1 %v5822_v1 }
  0x7d   : > { %2112 = vmatpush1.bf16.msra.mxu0 %v5772_v38  ;;  %2401 = vmatpush1.bf16.msra.mxu1 %v5773_v39  ;;  %v807_v38 = vld [vmem:[%s5951_s22 + $0x200] sm:$0xff]  ;;  %v809_v39 = vld [vmem:[%s5951_s22 + $0x210] sm:$0xff] }
  0x7e   : > { %2113 = vmatprep.subr.bf16.mxu0 %v5822_v1  ;;  %2402 = vmatprep.subr.bf16.mxu1 %v5822_v1  ;;  %v999_v40 = vunpack.c.l.s8.bf16 %v807_v38  ;;  %v1001_v41 = vunpack.c.l.s8.bf16 %v809_v39  ;;  %v1007_v46 = vunpack.c.h.s8.bf16 %v807_v38  ;;  %v1009_v47 = vunpack.c.h.s8.bf16 %v809_v39 }
  0x7f   : > { %1592 = vmatmul.mubr.bf16.gmra.mrb[24].mxu0 %v919_v34  ;;  %1881 = vmatmul.mubr.bf16.gmra.mrb[24].mxu1 %v921_v35  ;;  %v5781_v34 = vld [vmem:[%s6759_s1 + $0x1f8] sm:$0xff]   ;;  %v993_v35 = vunpack.c.h.s8.bf16 %v801_v26 }
  0x80   : > { %1599 = vmatprep.mubr.bf16.mxu0 %v928_v36  ;;  %1888 = vmatprep.mubr.bf16.mxu1 %v930_v37  ;;  %v1000_v36 = vunpack.c.l.s8.bf16 %v808_v31  ;;  %v1002_v37 = vunpack.c.l.s8.bf16 %v810_v32 }
  0x81   : > { %2114 = vmatpush1.bf16.msra.mxu0 %v5774_v52  ;;  %2403 = vmatpush1.bf16.msra.mxu1 %v5775_v53 }
  0x82   : > { %2115 = vmatprep.subr.bf16.mxu0 %v5822_v1  ;;  %2404 = vmatprep.subr.bf16.mxu1 %v5822_v1 }
  0x85   : > { %2116 = vmatpush1.bf16.msra.mxu0 %v5776_v3  ;;  %2405 = vmatpush1.bf16.msra.mxu1 %v5777_v7 }
  0x86   : > { %2117 = vmatprep.subr.bf16.mxu0 %v5822_v1  ;;  %2406 = vmatprep.subr.bf16.mxu1 %v5822_v1 }
  0x87   : > { %1600 = vmatmul.mubr.bf16.gmra.mrb[28].mxu0 %v927_v42  ;;  %1889 = vmatmul.mubr.bf16.gmra.mrb[28].mxu1 %v929_v43  ;;  %v1008_v42 = vunpack.c.h.s8.bf16 %v808_v31  ;;  %v1010_v43 = vunpack.c.h.s8.bf16 %v810_v32 }
  0x88   : > { %1607 = vmatprep.mubr.bf16.mxu0 %v936_v44  ;;  %1896 = vmatprep.mubr.bf16.mxu1 %v938_v45  ;;  %v816_v44 = vld [vmem:[%s5951_s22 + $0x248] sm:$0xff]  ;;  %v818_v45 = vld [vmem:[%s5951_s22 + $0x258] sm:$0xff] }
  0x89   : > { %2118 = vmatpush1.bf16.msra.mxu0 %v5778_v17  ;;  %2407 = vmatpush1.bf16.msra.mxu1 %v5779_v21  ;;  %v1024_v54 = vunpack.c.h.s8.bf16 %v816_v44  ;;  %v1026_v55 = vunpack.c.h.s8.bf16 %v818_v45  ;;  %v840_v17 = vld [vmem:[%s5951_s22 + $0x308] sm:$0xff] }
  0x8a   : > { %2119 = vmatprep.subr.bf16.mxu0 %v5822_v1  ;;  %2408 = vmatprep.subr.bf16.mxu1 %v5822_v1  ;;  %v5780_v1 = vld [vmem:[%s6759_s1 + $0x178] sm:$0xff]   ;;  %v1064_v21 = vunpack.c.l.s8.bf16 %v840_v17 }
  0x8d   : > { %2120 = vmatpush1.bf16.msra.mxu0 %v5780_v1  ;;  %2409 = vmatpush1.bf16.msra.mxu1 %v5781_v34  ;;  %v847_v34 = vld [vmem:[%s5951_s22 + $0x340] sm:$0xff] }
  0x8f   : > { %1608 = vmatmul.mubr.bf16.gmra.mrb[32].mxu0 %v935_v48  ;;  %1897 = vmatmul.mubr.bf16.gmra.mrb[32].mxu1 %v937_v49  ;;  %v1016_v48 = vunpack.c.l.s8.bf16 %v816_v44  ;;  %v1018_v49 = vunpack.c.l.s8.bf16 %v818_v45  ;;  %v1087_v45 = vunpack.c.h.s8.bf16 %v847_v34 }
  0x90   : > { %1615 = vmatprep.mubr.bf16.mxu0 %v944_v50  ;;  %1904 = vmatprep.mubr.bf16.mxu1 %v946_v51  ;;  %v815_v50 = vld [vmem:[%s5951_s22 + $0x240] sm:$0xff]  ;;  %v817_v51 = vld [vmem:[%s5951_s22 + $0x250] sm:$0xff] }
  0x91   : > { %v1015_v52 = vunpack.c.l.s8.bf16 %v815_v50  ;;  %v1017_v53 = vunpack.c.l.s8.bf16 %v817_v51 }
  0x97   : > { %1616 = vmatmul.mubr.bf16.gmra.mrb[36].mxu0 %v943_v56  ;;  %1905 = vmatmul.mubr.bf16.gmra.mrb[36].mxu1 %v945_v57  ;;  %v824_v56 = vld [vmem:[%s5951_s22 + $0x288] sm:$0xff]  ;;  %v826_v57 = vld [vmem:[%s5951_s22 + $0x298] sm:$0xff] }
  0x98   : > { %1623 = vmatprep.mubr.bf16.mxu0 %v952_v58  ;;  %1912 = vmatprep.mubr.bf16.mxu1 %v954_v59  ;;  %v1023_v58 = vunpack.c.h.s8.bf16 %v815_v50  ;;  %v1025_v59 = vunpack.c.h.s8.bf16 %v817_v51  ;;  %v1032_v60 = vunpack.c.l.s8.bf16 %v824_v56  ;;  %v1034_v61 = vunpack.c.l.s8.bf16 %v826_v57 }
  0x99   : > { %v1040_v3 = vunpack.c.h.s8.bf16 %v824_v56  ;;  %v1042_v4 = vunpack.c.h.s8.bf16 %v826_v57  ;;  %v855_v56 = vld [vmem:[%s5951_s22 + $0x380] sm:$0xff]  ;;  %v857_v57 = vld [vmem:[%s5951_s22 + $0x390] sm:$0xff] }
  0x9f   : > { %1624 = vmatmul.mubr.bf16.gmra.mrb[40].mxu0 %v951_v62  ;;  %1913 = vmatmul.mubr.bf16.gmra.mrb[40].mxu1 %v953_v63  ;;  %v823_v62 = vld [vmem:[%s5951_s22 + $0x280] sm:$0xff]  ;;  %v825_v63 = vld [vmem:[%s5951_s22 + $0x290] sm:$0xff] }
  0xa0   : > { %1631 = vmatprep.mubr.bf16.mxu0 %v960_v0  ;;  %1920 = vmatprep.mubr.bf16.mxu1 %v962_v2  ;;  %v1031_v0 = vunpack.c.l.s8.bf16 %v823_v62  ;;  %v1033_v2 = vunpack.c.l.s8.bf16 %v825_v63  ;;  %v1039_v7 = vunpack.c.h.s8.bf16 %v823_v62 }
  0xa7   : > { %1632 = vmatmul.mubr.bf16.gmra.mrb[44].mxu0 %v959_v6  ;;  %1921 = vmatmul.mubr.bf16.gmra.mrb[44].mxu1 %v961_v8  ;;  %v834_v6 = vld [vmem:[%s5951_s22 + $0x2d8] sm:$0xff]  ;;  %v1041_v8 = vunpack.c.h.s8.bf16 %v825_v63 }
  0xa8   : > { %1639 = vmatprep.mubr.bf16.mxu0 %v968_v9  ;;  %1928 = vmatprep.mubr.bf16.mxu1 %v970_v10  ;;  %v1048_v9 = vunpack.c.l.s8.bf16 %v832_v5  ;;  %v1050_v10 = vunpack.c.l.s8.bf16 %v834_v6 }
  0xaf   : > { %1640 = vmatmul.mubr.bf16.gmra.mrb[48].mxu0 %v967_v13  ;;  %1929 = vmatmul.mubr.bf16.gmra.mrb[48].mxu1 %v969_v14  ;;  %v1047_v13 = vunpack.c.l.s8.bf16 %v831_v11  ;;  %v1049_v14 = vunpack.c.l.s8.bf16 %v833_v12 }
  0xb0   : > { %1647 = vmatprep.mubr.bf16.mxu0 %v976_v15  ;;  %1936 = vmatprep.mubr.bf16.mxu1 %v978_v16  ;;  %v1056_v15 = vunpack.c.h.s8.bf16 %v832_v5  ;;  %v1058_v16 = vunpack.c.h.s8.bf16 %v834_v6 }
  0xb7   : > { %1648 = vmatmul.mubr.bf16.gmra.mrb[52].mxu0 %v975_v20  ;;  %1937 = vmatmul.mubr.bf16.gmra.mrb[52].mxu1 %v977_v22  ;;  %v1057_v20 = vunpack.c.h.s8.bf16 %v833_v12  ;;  %v1066_v22 = vunpack.c.l.s8.bf16 %v842_v18  ;;  %v866_v12 = vld [vmem:[%s5951_s22 + $0x3d8] sm:$0xff] }
  0xb8   : > { %1655 = vmatprep.mubr.bf16.mxu0 %v984_v23  ;;  %1944 = vmatprep.mubr.bf16.mxu1 %v986_v24  ;;  %v839_v23 = vld [vmem:[%s5951_s22 + $0x300] sm:$0xff]  ;;  %v841_v24 = vld [vmem:[%s5951_s22 + $0x310] sm:$0xff] }
  0xb9   : > { %v1063_v25 = vunpack.c.l.s8.bf16 %v839_v23  ;;  %v1065_v26 = vunpack.c.l.s8.bf16 %v841_v24  ;;  %v1071_v1 = vunpack.c.h.s8.bf16 %v839_v23  ;;  %v1073_v31 = vunpack.c.h.s8.bf16 %v841_v24 }
  0xba   : > { %v1114_v24 = vunpack.c.l.s8.bf16 %v866_v12 }
  0xbf   : > { %1656 = vmatmul.mubr.bf16.gmra.mrb[56].mxu0 %v983_v27  ;;  %1945 = vmatmul.mubr.bf16.gmra.mrb[56].mxu1 %v985_v28  ;;  %v1072_v27 = vunpack.c.h.s8.bf16 %v840_v17  ;;  %v1074_v28 = vunpack.c.h.s8.bf16 %v842_v18  ;;  %v1105_v18 = vunpack.c.h.s8.bf16 %v857_v57 }
  0xc0   : > { %1663 = vmatprep.mubr.bf16.mxu0 %v992_v29  ;;  %1952 = vmatprep.mubr.bf16.mxu1 %v994_v30  ;;  %v848_v29 = vld [vmem:[%s5951_s22 + $0x348] sm:$0xff]  ;;  %v850_v30 = vld [vmem:[%s5951_s22 + $0x358] sm:$0xff] }
  0xc1   : > { %v1080_v32 = vunpack.c.l.s8.bf16 %v848_v29  ;;  %v1088_v38 = vunpack.c.h.s8.bf16 %v848_v29  ;;  %v1090_v39 = vunpack.c.h.s8.bf16 %v850_v30 }
  0xc7   : > { %1664 = vmatmul.mubr.bf16.gmra.mrb[60].mxu0 %v991_v33  ;;  %1953 = vmatmul.mubr.bf16.gmra.mrb[60].mxu1 %v993_v35  ;;  %v1082_v33 = vunpack.c.l.s8.bf16 %v850_v30  ;;  %v849_v35 = vld [vmem:[%s5951_s22 + $0x350] sm:$0xff] }
  0xc8   : > { %1671 = vmatprep.mubr.bf16.mxu0 %v1000_v36  ;;  %1960 = vmatprep.mubr.bf16.mxu1 %v1002_v37  ;;  %v1079_v36 = vunpack.c.l.s8.bf16 %v847_v34  ;;  %v1081_v37 = vunpack.c.l.s8.bf16 %v849_v35 }
  0xcf   : > { %1672 = vmatmul.mubr.bf16.gmra.mrb[64].mxu0 %v999_v40  ;;  %1961 = vmatmul.mubr.bf16.gmra.mrb[64].mxu1 %v1001_v41  ;;  %v856_v40 = vld [vmem:[%s5951_s22 + $0x388] sm:$0xff] }
  0xd0   : > { %1679 = vmatprep.mubr.bf16.mxu0 %v1008_v42  ;;  %1968 = vmatprep.mubr.bf16.mxu1 %v1010_v43  ;;  %v858_v42 = vld [vmem:[%s5951_s22 + $0x398] sm:$0xff] }
  0xd1   : > { %v1106_v6 = vunpack.c.h.s8.bf16 %v858_v42 }
  0xd7   : > { %1680 = vmatmul.mubr.bf16.gmra.mrb[68].mxu0 %v1007_v46  ;;  %1969 = vmatmul.mubr.bf16.gmra.mrb[68].mxu1 %v1009_v47 }
  0xd8   : > { %1687 = vmatprep.mubr.bf16.mxu0 %v1016_v48  ;;  %1976 = vmatprep.mubr.bf16.mxu1 %v1018_v49  ;;  %v1089_v48 = vunpack.c.h.s8.bf16 %v849_v35  ;;  %v1096_v49 = vunpack.c.l.s8.bf16 %v856_v40 }
  0xdf   : > { %1688 = vmatmul.mubr.bf16.gmra.mrb[72].mxu0 %v1015_v52  ;;  %1977 = vmatmul.mubr.bf16.gmra.mrb[72].mxu1 %v1017_v53  ;;  %v1098_v53 = vunpack.c.l.s8.bf16 %v858_v42  ;;  %v748_v42 = vld [vmem:[%s5951_s22 + $0x28] sm:$0xff] }
  0xe0   : > { %1695 = vmatprep.mubr.bf16.mxu0 %v1024_v54  ;;  %1984 = vmatprep.mubr.bf16.mxu1 %v1026_v55 }
  0xe7   : > { %1696 = vmatmul.mubr.bf16.gmra.mrb[76].mxu0 %v1023_v58  ;;  %1985 = vmatmul.mubr.bf16.gmra.mrb[76].mxu1 %v1025_v59 }
  0xe8   : > { %1703 = vmatprep.mubr.bf16.mxu0 %v1032_v60  ;;  %1992 = vmatprep.mubr.bf16.mxu1 %v1034_v61  ;;  %v1095_v61 = vunpack.c.l.s8.bf16 %v855_v56 }
  0xef   : > { %1704 = vmatmul.mubr.bf16.gmra.mrb[80].mxu0 %v1031_v0  ;;  %1993 = vmatmul.mubr.bf16.gmra.mrb[80].mxu1 %v1033_v2  ;;  %v1097_v0 = vunpack.c.l.s8.bf16 %v857_v57  ;;  %v1104_v2 = vunpack.c.h.s8.bf16 %v856_v40 }
  0xf0   : > { %1711 = vmatprep.mubr.bf16.mxu0 %v1040_v3  ;;  %2000 = vmatprep.mubr.bf16.mxu1 %v1042_v4 }
  0xf7   : > { %1712 = vmatmul.mubr.bf16.gmra.mrb[84].mxu0 %v1039_v7  ;;  %2001 = vmatmul.mubr.bf16.gmra.mrb[84].mxu1 %v1041_v8 }
  0xf8   : > { %1719 = vmatprep.mubr.bf16.mxu0 %v1048_v9  ;;  %2008 = vmatprep.mubr.bf16.mxu1 %v1050_v10  ;;  %v6224_v9 = vld [vmem:[%s6762_s4] sm:$0xff]   ;;  %v864_v10 = vld [vmem:[%s5951_s22 + $0x3c8] sm:$0xff] }
  0xf9   : > { %5613 = vmatprep.subr.bf16.mxu1 %v6224_v9  ;;  %v1120_v35 = vunpack.c.h.s8.bf16 %v864_v10 }
  0xff   : > { %1720 = vmatmul.mubr.bf16.gmra.mrb[88].mxu0 %v1047_v13  ;;  %2009 = vmatmul.mubr.bf16.gmra.mrb[88].mxu1 %v1049_v14 }
 0x100   : > { %1727 = vmatprep.mubr.bf16.mxu0 %v1056_v15  ;;  %2016 = vmatprep.mubr.bf16.mxu1 %v1058_v16  ;;  %v1103_v15 = vunpack.c.h.s8.bf16 %v855_v56 }
 0x107   : > { %1728 = vmatmul.mubr.bf16.gmra.mrb[92].mxu0 %v1055_v19  ;;  %2017 = vmatmul.mubr.bf16.gmra.mrb[92].mxu1 %v1057_v20  ;;  %v1112_v19 = vunpack.c.l.s8.bf16 %v864_v10  ;;  %v6232_v20 = vld [vmem:[%s6761_s3] sm:$0xff]  }
 0x108   : > { %1735 = vmatprep.mubr.bf16.mxu0 %v1064_v21  ;;  %2024 = vmatprep.mubr.bf16.mxu1 %v1066_v22 }
 0x109   : > { %5533 = vmatprep.subr.bf16.mxu0 %v6232_v20 }
 0x10f   : > { %1736 = vmatmul.mubr.bf16.gmra.mrb[96].mxu0 %v1063_v25  ;;  %2025 = vmatmul.mubr.bf16.gmra.mrb[96].mxu1 %v1065_v26 }
 0x110   : > { %1743 = vmatprep.mubr.bf16.mxu0 %v1072_v27  ;;  %2032 = vmatprep.mubr.bf16.mxu1 %v1074_v28  ;;  %v863_v27 = vld [vmem:[%s5951_s22 + $0x3c0] sm:$0xff]  ;;  %v865_v28 = vld [vmem:[%s5951_s22 + $0x3d0] sm:$0xff] }
 0x111   : > { %v1113_v34 = vunpack.c.l.s8.bf16 %v865_v28 }
 0x117   : > { %1744 = vmatmul.mubr.bf16.gmra.mrb[100].mxu0 %v1071_v1  ;;  %2033 = vmatmul.mubr.bf16.gmra.mrb[100].mxu1 %v1073_v31  ;;  %v1111_v31 = vunpack.c.l.s8.bf16 %v863_v27 }
 0x118   : > { %1751 = vmatprep.mubr.bf16.mxu0 %v1080_v32  ;;  %2040 = vmatprep.mubr.bf16.mxu1 %v1082_v33 }
 0x11f   : > { %1752 = vmatmul.mubr.bf16.gmra.mrb[104].mxu0 %v1079_v36  ;;  %2041 = vmatmul.mubr.bf16.gmra.mrb[104].mxu1 %v1081_v37 }
 0x120   : > { %1759 = vmatprep.mubr.bf16.mxu0 %v1088_v38  ;;  %2048 = vmatprep.mubr.bf16.mxu1 %v1090_v39  ;;  %v1122_v39 = vunpack.c.h.s8.bf16 %v866_v12 }
 0x122   : > { %v1545_v41 = vpop.f32.mrb[0].mxu0  ;;  %v1834_v43 = vpop.f32.mrb[0].mxu1 }
 0x123   : > { %v1547_v44 = vpop.f32.mrb[1].mxu0  ;;  %v1836_v46 = vpop.f32.mrb[1].mxu1  ;;  %v6211_v50 = vadd.f32 %v1834_v43, %v1545_v41 }
 0x124   : > { %v1548_v47 = vpop.f32.mrb[2].mxu0  ;;  %v1837_v51 = vpop.f32.mrb[2].mxu1  ;;  %v750_v44 = vld [vmem:[%s5951_s22 + $0x38] sm:$0xff] }
 0x125   : > { %v1550_v52 = vpop.f32.mrb[3].mxu0  ;;  %v1839_v54 = vpop.f32.mrb[3].mxu1  ;;  %v6213_v55 = vadd.f32 %v1837_v51, %v1548_v47  ;;  %v1119_v47 = vunpack.c.h.s8.bf16 %v863_v27  ;;  %v1121_v51 = vunpack.c.h.s8.bf16 %v865_v28  ;;  %v878_v57 = vunpack.c.l.s8.bf16 %v750_v44 }
 0x126   : > { %v876_v52 = vunpack.c.l.s8.bf16 %v748_v42 }
 0x127   : > { %1760 = vmatmul.mubr.bf16.gmra.mrb[108].mxu0 %v1087_v45  ;;  %2049 = vmatmul.mubr.bf16.gmra.mrb[108].mxu1 %v1089_v48 }
 0x128   : > { %1767 = vmatprep.mubr.bf16.mxu0 %v1096_v49  ;;  %2056 = vmatprep.mubr.bf16.mxu1 %v1098_v53 }
 0x12a   : > { %v1553_v58 = vpop.f32.mrb[4].mxu0  ;;  %v1842_v59 = vpop.f32.mrb[4].mxu1 }
 0x12b   : > { %v1555_v60 = vpop.f32.mrb[5].mxu0  ;;  %v1844_v62 = vpop.f32.mrb[5].mxu1  ;;  %v6217_v3 = vadd.f32 %v1842_v59, %v1553_v58 }
 0x12c   : > { %v1556_v63 = vpop.f32.mrb[6].mxu0  ;;  %v1845_v4 = vpop.f32.mrb[6].mxu1  ;;  %v747_v60 = vld [vmem:[%s5951_s22 + $0x20] sm:$0xff] }
 0x12d   : > { %v1558_v5 = vpop.f32.mrb[7].mxu0  ;;  %v1847_v7 = vpop.f32.mrb[7].mxu1  ;;  %v6219_v8 = vadd.f32 %v1845_v4, %v1556_v63 }
 0x12e   : > { %v884_v7 = vunpack.c.h.s8.bf16 %v748_v42 }
 0x12f   : > { %1768 = vmatmul.mubr.bf16.gmra.mrb[112].mxu0 %v1095_v61  ;;  %2057 = vmatmul.mubr.bf16.gmra.mrb[112].mxu1 %v1097_v0  ;;  %v749_v61 = vld [vmem:[%s5951_s22 + $0x30] sm:$0xff] }
 0x130   : > { %1775 = vmatprep.mubr.bf16.mxu0 %v1104_v2  ;;  %2064 = vmatprep.mubr.bf16.mxu1 %v1106_v6  ;;  %v875_v2 = vunpack.c.l.s8.bf16 %v747_v60  ;;  %v877_v6 = vunpack.c.l.s8.bf16 %v749_v61  ;;  %v885_v28 = vunpack.c.h.s8.bf16 %v749_v61 }
 0x132   : > { %v1561_v11 = vpop.f32.mrb[8].mxu0  ;;  %v1850_v13 = vpop.f32.mrb[8].mxu1 }
 0x133   : > { %v1563_v14 = vpop.f32.mrb[9].mxu0  ;;  %v1852_v16 = vpop.f32.mrb[9].mxu1  ;;  %v6234_v21 = vadd.f32 %v1850_v13, %v1561_v11  ;;  %v886_v13 = vunpack.c.h.s8.bf16 %v750_v44 }
 0x134   : > { %v1564_v17 = vpop.f32.mrb[10].mxu0  ;;  %v1853_v22 = vpop.f32.mrb[10].mxu1  ;;  %v5784_v16 = vld [vmem:[%s6762_s4 + $0x8] sm:$0xff]  }
 0x135   : > { %v1566_v23 = vpop.f32.mrb[11].mxu0  ;;  %v1855_v25 = vpop.f32.mrb[11].mxu1  ;;  %v6237_v26 = vadd.f32 %v1853_v22, %v1564_v17  ;;  %v756_v17 = vld [vmem:[%s5951_s22 + $0x68] sm:$0xff] }
 0x137   : > { %1776 = vmatmul.mubr.bf16.gmra.mrb[116].mxu0 %v1103_v15  ;;  %2065 = vmatmul.mubr.bf16.gmra.mrb[116].mxu1 %v1105_v18 }
 0x138   : > { %1783 = vmatprep.mubr.bf16.mxu0 %v1112_v19  ;;  %2072 = vmatprep.mubr.bf16.mxu1 %v1114_v24  ;;  %v758_v19 = vld [vmem:[%s5951_s22 + $0x78] sm:$0xff]  ;;  %v883_v24 = vunpack.c.h.s8.bf16 %v747_v60 }
 0x13a   : > { %v1569_v29 = vpop.f32.mrb[12].mxu0  ;;  %v1858_v30 = vpop.f32.mrb[12].mxu1 }
 0x13b   : > { %v1571_v1 = vpop.f32.mrb[13].mxu0  ;;  %v1860_v32 = vpop.f32.mrb[13].mxu1  ;;  %v6241_v36 = vadd.f32 %v1858_v30, %v1569_v29  ;;  %v892_v29 = vunpack.c.l.s8.bf16 %v756_v17  ;;  %v5785_v30 = vld [vmem:[%s6761_s3 + $0x8] sm:$0xff]  }
 0x13c   : > { %v1572_v33 = vpop.f32.mrb[14].mxu0  ;;  %v1861_v37 = vpop.f32.mrb[14].mxu1  ;;  %v894_v32 = vunpack.c.l.s8.bf16 %v758_v19 }
 0x13d   : > { %v1574_v38 = vpop.f32.mrb[15].mxu0  ;;  %v1863_v40 = vpop.f32.mrb[15].mxu1  ;;  %v6243_v41 = vadd.f32 %v1861_v37, %v1572_v33 }
 0x13f   : > { %1784 = vmatmul.mubr.bf16.gmra.mrb[120].mxu0 %v1111_v31  ;;  %2073 = vmatmul.mubr.bf16.gmra.mrb[120].mxu1 %v1113_v34  ;;  %v755_v34 = vld [vmem:[%s5951_s22 + $0x60] sm:$0xff] }
 0x140   : > { %1791 = vmatprep.mubr.bf16.mxu0 %v1120_v35  ;;  %2080 = vmatprep.mubr.bf16.mxu1 %v1122_v39  ;;  %v757_v35 = vld [vmem:[%s5951_s22 + $0x70] sm:$0xff]  ;;  %v891_v40 = vunpack.c.l.s8.bf16 %v755_v34  ;;  %v899_v61 = vunpack.c.h.s8.bf16 %v755_v34 }
 0x141   : > { %v893_v44 = vunpack.c.l.s8.bf16 %v757_v35 }
 0x142   : > { %v1577_v43 = vpop.f32.mrb[16].mxu0  ;;  %v1866_v45 = vpop.f32.mrb[16].mxu1 }
 0x143   : > { %v1579_v46 = vpop.f32.mrb[17].mxu0  ;;  %v1868_v48 = vpop.f32.mrb[17].mxu1  ;;  %v6247_v53 = vadd.f32 %v1866_v45, %v1577_v43  ;;  %v900_v45 = vunpack.c.h.s8.bf16 %v756_v17 }
 0x144   : > { %v1580_v49 = vpop.f32.mrb[18].mxu0  ;;  %v1869_v54 = vpop.f32.mrb[18].mxu1 }
 0x145   : > { %v1582_v56 = vpop.f32.mrb[19].mxu0  ;;  %v1871_v58 = vpop.f32.mrb[19].mxu1  ;;  %v6249_v59 = vadd.f32 %v1869_v54, %v1580_v49  ;;  %v902_v49 = vunpack.c.h.s8.bf16 %v758_v19  ;;  %v764_v54 = vld [vmem:[%s5951_s22 + $0xa8] sm:$0xff] }
 0x147   : > { %1792 = vmatmul.mubr.bf16.gmra.mrb[124].mxu0 %v1119_v47  ;;  %2081 = vmatmul.mubr.bf16.gmra.mrb[124].mxu1 %v1121_v51 }
 0x148   : > { %2121 = vmatprep.mubr.bf16.mxu0 %v876_v52  ;;  %2410 = vmatprep.mubr.bf16.mxu1 %v878_v57  ;;  %v766_v57 = vld [vmem:[%s5951_s22 + $0xb8] sm:$0xff] }
 0x14a   : > { %v1585_v62 = vpop.f32.mrb[20].mxu0  ;;  %v1874_v63 = vpop.f32.mrb[20].mxu1 }
 0x14b   : > { %v1587_v0 = vpop.f32.mrb[21].mxu0  ;;  %v1876_v4 = vpop.f32.mrb[21].mxu1  ;;  %v6253_v10 = vadd.f32 %v1874_v63, %v1585_v62 }
 0x14c   : > { %v1588_v5 = vpop.f32.mrb[22].mxu0  ;;  %v1877_v11 = vpop.f32.mrb[22].mxu1  ;;  %v901_v0 = vunpack.c.h.s8.bf16 %v757_v35  ;;  %v774_v35 = vld [vmem:[%s5951_s22 + $0xf8] sm:$0xff] }
 0x14d   : > { %v1590_v12 = vpop.f32.mrb[23].mxu0  ;;  %v1879_v14 = vpop.f32.mrb[23].mxu1  ;;  %v6255_v15 = vadd.f32 %v1877_v11, %v1588_v5 }
 0x14e   : > { %v765_v14 = vld [vmem:[%s5951_s22 + $0xb0] sm:$0xff] }
 0x14f   : > { %2122 = vmatmul.mubr.bf16.vlgmr.msra.gmra.mrb[128].mxu0 %v875_v2  ;;  %2411 = vmatmul.mubr.bf16.vlgmr.msra.gmra.mrb[128].mxu1 %v877_v6  ;;  %v908_v2 = vunpack.c.l.s8.bf16 %v764_v54 }
 0x150   : > { %2129 = vmatprep.mubr.bf16.mxu0 %v884_v7  ;;  %2418 = vmatprep.mubr.bf16.mxu1 %v886_v13  ;;  %v910_v7 = vunpack.c.l.s8.bf16 %v766_v57  ;;  %v763_v13 = vld [vmem:[%s5951_s22 + $0xa0] sm:$0xff] }
 0x151   : > { %5614 = vmatpush3.bf16.msra.mxu1 %v6224_v9  ;;  %5534 = vmatpush3.bf16.msra.mxu0 %v6232_v20  ;;  %v907_v19 = vunpack.c.l.s8.bf16 %v763_v13 }
 0x152   : > { %v1593_v18 = vpop.f32.mrb[24].mxu0  ;;  %5615 = vmatprep.subr.bf16.mxu1 %v5784_v16  ;;  %v1882_v22 = vpop.f32.mrb[24].mxu1  ;;  %5535 = vmatprep.subr.bf16.mxu0 %v5785_v30 }
 0x153   : > { %v1595_v23 = vpop.f32.mrb[25].mxu0  ;;  %v1884_v25 = vpop.f32.mrb[25].mxu1  ;;  %v6267_v1 = vadd.f32 %v1882_v22, %v1593_v18 }
 0x154   : > { %v1596_v27 = vpop.f32.mrb[26].mxu0  ;;  %v1885_v9 = vpop.f32.mrb[26].mxu1  ;;  %v916_v25 = vunpack.c.h.s8.bf16 %v764_v54 }
 0x155   : > { %v1598_v31 = vpop.f32.mrb[27].mxu0  ;;  %5616 = vmatpush3.bf16.msra.mxu1 %v5784_v16  ;;  %v1887_v20 = vpop.f32.mrb[27].mxu1  ;;  %v6269_v33 = vadd.f32 %v1885_v9, %v1596_v27  ;;  %5536 = vmatpush3.bf16.msra.mxu0 %v5785_v30  ;;  %v918_v30 = vunpack.c.h.s8.bf16 %v766_v57  ;;  %v771_v57 = vld [vmem:[%s5951_s22 + $0xe0] sm:$0xff] }
 0x156   : > { %v772_v20 = vld [vmem:[%s5951_s22 + $0xe8] sm:$0xff] }
 0x157   : > { %2130 = vmatmul.mubr.bf16.gmra.mrb[132].mxu0 %v883_v24  ;;  %2419 = vmatmul.mubr.bf16.gmra.mrb[132].mxu1 %v885_v28  ;;  %v909_v24 = vunpack.c.l.s8.bf16 %v765_v14 }
 0x158   : > { %2137 = vmatprep.mubr.bf16.mxu0 %v892_v29  ;;  %2426 = vmatprep.mubr.bf16.mxu1 %v894_v32  ;;  %v5786_v32 = vld [vmem:[%s6762_s4 + $0x10] sm:$0xff]  }
 0x159   : > { %5617 = vmatprep.subr.bf16.mxu1 %v5786_v32 }
 0x15a   : > { %v1601_v37 = vpop.f32.mrb[28].mxu0  ;;  %v1890_v38 = vpop.f32.mrb[28].mxu1  ;;  %5618 = vmatpush3.bf16.msra.mxu1 %v5786_v32 }
 0x15b   : > { %v1603_v39 = vpop.f32.mrb[29].mxu0  ;;  %v1892_v42 = vpop.f32.mrb[29].mxu1  ;;  %v6273_v46 = vadd.f32 %v1890_v38, %v1601_v37 }
 0x15c   : > { %v1604_v43 = vpop.f32.mrb[30].mxu0  ;;  %v1893_v47 = vpop.f32.mrb[30].mxu1  ;;  %v915_v39 = vunpack.c.h.s8.bf16 %v763_v13 }
 0x15d   : > { %v1606_v48 = vpop.f32.mrb[31].mxu0  ;;  %v1895_v51 = vpop.f32.mrb[31].mxu1  ;;  %v6275_v52 = vadd.f32 %v1893_v47, %v1604_v43  ;;  %v917_v43 = vunpack.c.h.s8.bf16 %v765_v14  ;;  %v934_v14 = vunpack.c.h.s8.bf16 %v774_v35 }
 0x15e   : > { %v926_v51 = vunpack.c.l.s8.bf16 %v774_v35 }
 0x15f   : > { %2138 = vmatmul.mubr.bf16.gmra.mrb[136].mxu0 %v891_v40  ;;  %2427 = vmatmul.mubr.bf16.gmra.mrb[136].mxu1 %v893_v44  ;;  %v924_v44 = vunpack.c.l.s8.bf16 %v772_v20 }
 0x160   : > { %2145 = vmatprep.mubr.bf16.mxu0 %v900_v45  ;;  %2434 = vmatprep.mubr.bf16.mxu1 %v902_v49  ;;  %v5787_v45 = vld [vmem:[%s6761_s3 + $0x10] sm:$0xff]  }
 0x161   : > { %5537 = vmatprep.subr.bf16.mxu0 %v5787_v45 }
 0x162   : > { %v1609_v56 = vpop.f32.mrb[32].mxu0  ;;  %v1898_v58 = vpop.f32.mrb[32].mxu1  ;;  %5538 = vmatpush3.bf16.msra.mxu0 %v5787_v45 }
 0x163   : > { %v1611_v60 = vpop.f32.mrb[33].mxu0  ;;  %v1900_v62 = vpop.f32.mrb[33].mxu1  ;;  %v6279_v4 = vadd.f32 %v1898_v58, %v1609_v56  ;;  %v773_v58 = vld [vmem:[%s5951_s22 + $0xf0] sm:$0xff] }
 0x164   : > { %v1612_v63 = vpop.f32.mrb[34].mxu0  ;;  %v1901_v5 = vpop.f32.mrb[34].mxu1 }
 0x165   : > { %v1614_v6 = vpop.f32.mrb[35].mxu0  ;;  %v1903_v11 = vpop.f32.mrb[35].mxu1  ;;  %v6281_v12 = vadd.f32 %v1901_v5, %v1612_v63  ;;  %v923_v63 = vunpack.c.l.s8.bf16 %v771_v57  ;;  %v925_v5 = vunpack.c.l.s8.bf16 %v773_v58 }
 0x166   : > { %v932_v6 = vunpack.c.h.s8.bf16 %v772_v20 }
 0x167   : > { %2146 = vmatmul.mubr.bf16.gmra.mrb[140].mxu0 %v899_v61  ;;  %2435 = vmatmul.mubr.bf16.gmra.mrb[140].mxu1 %v901_v0 }
 0x168   : > { %2153 = vmatprep.mubr.bf16.mxu0 %v908_v2  ;;  %2442 = vmatprep.mubr.bf16.mxu1 %v910_v7 }
 0x16a   : > { %v1617_v16 = vpop.f32.mrb[36].mxu0  ;;  %v1906_v17 = vpop.f32.mrb[36].mxu1 }
 0x16b   : > { %v1619_v18 = vpop.f32.mrb[37].mxu0  ;;  %v1908_v22 = vpop.f32.mrb[37].mxu1  ;;  %v6285_v27 = vadd.f32 %v1906_v17, %v1617_v16 }
 0x16c   : > { %v1620_v23 = vpop.f32.mrb[38].mxu0  ;;  %v1909_v28 = vpop.f32.mrb[38].mxu1  ;;  %v780_v18 = vld [vmem:[%s5951_s22 + $0x128] sm:$0xff]  ;;  %v782_v22 = vld [vmem:[%s5951_s22 + $0x138] sm:$0xff] }
 0x16d   : > { %v1622_v29 = vpop.f32.mrb[39].mxu0  ;;  %v1911_v9 = vpop.f32.mrb[39].mxu1  ;;  %v6287_v31 = vadd.f32 %v1909_v28, %v1620_v23  ;;  %v942_v35 = vunpack.c.l.s8.bf16 %v782_v22 }
 0x16e   : > { %v940_v9 = vunpack.c.l.s8.bf16 %v780_v18 }
 0x16f   : > { %2154 = vmatmul.mubr.bf16.gmra.mrb[144].mxu0 %v907_v19  ;;  %2443 = vmatmul.mubr.bf16.gmra.mrb[144].mxu1 %v909_v24 }
 0x170   : > { %2161 = vmatprep.mubr.bf16.mxu0 %v916_v25  ;;  %2450 = vmatprep.mubr.bf16.mxu1 %v918_v30  ;;  %v931_v25 = vunpack.c.h.s8.bf16 %v771_v57  ;;  %v933_v30 = vunpack.c.h.s8.bf16 %v773_v58 }
 0x172   : > { %v1625_v34 = vpop.f32.mrb[40].mxu0  ;;  %v1914_v37 = vpop.f32.mrb[40].mxu1 }
 0x173   : > { %v1627_v38 = vpop.f32.mrb[41].mxu0  ;;  %v1916_v40 = vpop.f32.mrb[41].mxu1  ;;  %v6297_v47 = vadd.f32 %v1914_v37, %v1625_v34 }
 0x174   : > { %v1628_v42 = vpop.f32.mrb[42].mxu0  ;;  %v1917_v48 = vpop.f32.mrb[42].mxu1  ;;  %v781_v40 = vld [vmem:[%s5951_s22 + $0x130] sm:$0xff] }
 0x175   : > { %v1630_v49 = vpop.f32.mrb[43].mxu0  ;;  %v1919_v54 = vpop.f32.mrb[43].mxu1  ;;  %v6299_v56 = vadd.f32 %v1917_v48, %v1628_v42 }
 0x176   : > { %v948_v54 = vunpack.c.h.s8.bf16 %v780_v18 }
 0x177   : > { %2162 = vmatmul.mubr.bf16.gmra.mrb[148].mxu0 %v915_v39  ;;  %2451 = vmatmul.mubr.bf16.gmra.mrb[148].mxu1 %v917_v43  ;;  %v779_v39 = vld [vmem:[%s5951_s22 + $0x120] sm:$0xff] }
 0x178   : > { %2169 = vmatprep.mubr.bf16.mxu0 %v924_v44  ;;  %2458 = vmatprep.mubr.bf16.mxu1 %v926_v51  ;;  %v939_v45 = vunpack.c.l.s8.bf16 %v779_v39  ;;  %v941_v51 = vunpack.c.l.s8.bf16 %v781_v40 }
 0x17a   : > { %v1633_v60 = vpop.f32.mrb[44].mxu0  ;;  %v1922_v61 = vpop.f32.mrb[44].mxu1 }
 0x17b   : > { %v1635_v62 = vpop.f32.mrb[45].mxu0  ;;  %v1924_v0 = vpop.f32.mrb[45].mxu1  ;;  %v6303_v7 = vadd.f32 %v1922_v61, %v1633_v60  ;;  %v950_v61 = vunpack.c.h.s8.bf16 %v782_v22 }
 0x17c   : > { %v1636_v2 = vpop.f32.mrb[46].mxu0  ;;  %v1925_v11 = vpop.f32.mrb[46].mxu1  ;;  %v5788_v0 = vld [vmem:[%s6762_s4 + $0x18] sm:$0xff]  }
 0x17d   : > { %v1638_v13 = vpop.f32.mrb[47].mxu0  ;;  %v1927_v16 = vpop.f32.mrb[47].mxu1  ;;  %v6305_v17 = vadd.f32 %v1925_v11, %v1636_v2  ;;  %v788_v2 = vld [vmem:[%s5951_s22 + $0x168] sm:$0xff]  ;;  %5619 = vmatprep.subr.bf16.mxu1 %v5788_v0 }
 0x17e   : > { %5620 = vmatpush3.bf16.msra.mxu1 %v5788_v0  ;;  %v956_v22 = vunpack.c.l.s8.bf16 %v788_v2  ;;  %v798_v0 = vld [vmem:[%s5951_s22 + $0x1b8] sm:$0xff] }
 0x17f   : > { %2170 = vmatmul.mubr.bf16.gmra.mrb[152].mxu0 %v923_v63  ;;  %2459 = vmatmul.mubr.bf16.gmra.mrb[152].mxu1 %v925_v5 }
 0x180   : > { %2177 = vmatprep.mubr.bf16.mxu0 %v932_v6  ;;  %2466 = vmatprep.mubr.bf16.mxu1 %v934_v14  ;;  %v790_v6 = vld [vmem:[%s5951_s22 + $0x178] sm:$0xff]  ;;  %v947_v14 = vunpack.c.h.s8.bf16 %v779_v39 }
 0x182   : > { %v1641_v19 = vpop.f32.mrb[48].mxu0  ;;  %v1930_v23 = vpop.f32.mrb[48].mxu1 }
 0x183   : > { %v1643_v24 = vpop.f32.mrb[49].mxu0  ;;  %v1932_v28 = vpop.f32.mrb[49].mxu1  ;;  %v6309_v32 = vadd.f32 %v1930_v23, %v1641_v19  ;;  %v949_v19 = vunpack.c.h.s8.bf16 %v781_v40  ;;  %v5789_v23 = vld [vmem:[%s6761_s3 + $0x18] sm:$0xff]  }
 0x184   : > { %v1644_v29 = vpop.f32.mrb[50].mxu0  ;;  %v1933_v20 = vpop.f32.mrb[50].mxu1  ;;  %5539 = vmatprep.subr.bf16.mxu0 %v5789_v23 }
 0x185   : > { %v1646_v34 = vpop.f32.mrb[51].mxu0  ;;  %v1935_v37 = vpop.f32.mrb[51].mxu1  ;;  %v6311_v38 = vadd.f32 %v1933_v20, %v1644_v29  ;;  %v958_v29 = vunpack.c.l.s8.bf16 %v790_v6  ;;  %v787_v20 = vld [vmem:[%s5951_s22 + $0x160] sm:$0xff]  ;;  %5540 = vmatpush3.bf16.msra.mxu0 %v5789_v23  ;;  %v974_v23 = vunpack.c.l.s8.bf16 %v798_v0 }
 0x186   : > { %v789_v34 = vld [vmem:[%s5951_s22 + $0x170] sm:$0xff]  ;;  %v955_v40 = vunpack.c.l.s8.bf16 %v787_v20 }
 0x187   : > { %2178 = vmatmul.mubr.bf16.gmra.mrb[156].mxu0 %v931_v25  ;;  %2467 = vmatmul.mubr.bf16.gmra.mrb[156].mxu1 %v933_v30 }
 0x188   : > { %2185 = vmatprep.mubr.bf16.mxu0 %v940_v9  ;;  %2474 = vmatprep.mubr.bf16.mxu1 %v942_v35 }
 0x18a   : > { %v1649_v42 = vpop.f32.mrb[52].mxu0  ;;  %v1938_v43 = vpop.f32.mrb[52].mxu1 }
 0x18b   : > { %v1651_v44 = vpop.f32.mrb[53].mxu0  ;;  %v1940_v48 = vpop.f32.mrb[53].mxu1  ;;  %v6315_v57 = vadd.f32 %v1938_v43, %v1649_v42 }
 0x18c   : > { %v1652_v49 = vpop.f32.mrb[54].mxu0  ;;  %v1941_v58 = vpop.f32.mrb[54].mxu1  ;;  %v957_v44 = vunpack.c.l.s8.bf16 %v789_v34 }
 0x18d   : > { %v1654_v60 = vpop.f32.mrb[55].mxu0  ;;  %v1943_v62 = vpop.f32.mrb[55].mxu1  ;;  %v6317_v63 = vadd.f32 %v1941_v58, %v1652_v49 }
 0x18f   : > { %2186 = vmatmul.mubr.bf16.gmra.mrb[160].mxu0 %v939_v45  ;;  %2475 = vmatmul.mubr.bf16.gmra.mrb[160].mxu1 %v941_v51  ;;  %v964_v45 = vunpack.c.h.s8.bf16 %v788_v2 }
 0x190   : > { %2193 = vmatprep.mubr.bf16.mxu0 %v948_v54  ;;  %2482 = vmatprep.mubr.bf16.mxu1 %v950_v61  ;;  %v966_v54 = vunpack.c.h.s8.bf16 %v790_v6  ;;  %v796_v61 = vld [vmem:[%s5951_s22 + $0x1a8] sm:$0xff]  ;;  %v965_v6 = vunpack.c.h.s8.bf16 %v789_v34 }
 0x192   : > { %v1657_v5 = vpop.f32.mrb[56].mxu0  ;;  %v1946_v11 = vpop.f32.mrb[56].mxu1 }
 0x193   : > { %v1659_v13 = vpop.f32.mrb[57].mxu0  ;;  %v1948_v16 = vpop.f32.mrb[57].mxu1  ;;  %v6327_v24 = vadd.f32 %v1946_v11, %v1657_v5 }
 0x194   : > { %v1660_v18 = vpop.f32.mrb[58].mxu0  ;;  %v1949_v25 = vpop.f32.mrb[58].mxu1  ;;  %v963_v13 = vunpack.c.h.s8.bf16 %v787_v20 }
 0x195   : > { %v1662_v28 = vpop.f32.mrb[59].mxu0  ;;  %v1951_v30 = vpop.f32.mrb[59].mxu1  ;;  %v6329_v9 = vadd.f32 %v1949_v25, %v1660_v18  ;;  %v972_v18 = vunpack.c.l.s8.bf16 %v796_v61 }
 0x196   : > { %v797_v30 = vld [vmem:[%s5951_s22 + $0x1b0] sm:$0xff] }
 0x197   : > { %2194 = vmatmul.mubr.bf16.gmra.mrb[164].mxu0 %v947_v14  ;;  %2483 = vmatmul.mubr.bf16.gmra.mrb[164].mxu1 %v949_v19 }
 0x198   : > { %2201 = vmatprep.mubr.bf16.mxu0 %v956_v22  ;;  %2490 = vmatprep.mubr.bf16.mxu1 %v958_v29  ;;  %v795_v29 = vld [vmem:[%s5951_s22 + $0x1a0] sm:$0xff] }
 0x19a   : > { %v1665_v35 = vpop.f32.mrb[60].mxu0  ;;  %v1954_v37 = vpop.f32.mrb[60].mxu1 }
 0x19b   : > { %v1667_v39 = vpop.f32.mrb[61].mxu0  ;;  %v1956_v42 = vpop.f32.mrb[61].mxu1  ;;  %v6333_v48 = vadd.f32 %v1954_v37, %v1665_v35 }
 0x19c   : > { %v1668_v43 = vpop.f32.mrb[62].mxu0  ;;  %v1957_v49 = vpop.f32.mrb[62].mxu1  ;;  %v971_v39 = vunpack.c.l.s8.bf16 %v795_v29 }
 0x19d   : > { %v1670_v51 = vpop.f32.mrb[63].mxu0  ;;  %v1959_v58 = vpop.f32.mrb[63].mxu1  ;;  %v6335_v60 = vadd.f32 %v1957_v49, %v1668_v43  ;;  %v973_v43 = vunpack.c.l.s8.bf16 %v797_v30 }
 0x19e   : > { %v982_v51 = vunpack.c.h.s8.bf16 %v798_v0  ;;  %v981_v0 = vunpack.c.h.s8.bf16 %v797_v30  ;;  %v5791_v30 = vld [vmem:[%s6761_s3 + $0x20] sm:$0xff]  }
 0x19f   : > { %2202 = vmatmul.mubr.bf16.gmra.mrb[168].mxu0 %v955_v40  ;;  %2491 = vmatmul.mubr.bf16.gmra.mrb[168].mxu1 %v957_v44  ;;  %v980_v44 = vunpack.c.h.s8.bf16 %v796_v61 }
 0x1a0   : > { %2209 = vmatprep.mubr.bf16.mxu0 %v964_v45  ;;  %2498 = vmatprep.mubr.bf16.mxu1 %v966_v54 }
 0x1a1   : > { %5541 = vmatprep.subr.bf16.mxu0 %v5791_v30 }
 0x1a2   : > { %v1673_v62 = vpop.f32.mrb[64].mxu0  ;;  %v1962_v5 = vpop.f32.mrb[64].mxu1  ;;  %5542 = vmatpush3.bf16.msra.mxu0 %v5791_v30 }
 0x1a3   : > { %v1675_v11 = vpop.f32.mrb[65].mxu0  ;;  %v6339_v2 = vadd.f32 %v1962_v5, %v1673_v62  ;;  %v1964_v14 = vpop.f32.mrb[65].mxu1  ;;  %v804_v62 = vld [vmem:[%s5951_s22 + $0x1e8] sm:$0xff] }
 0x1a4   : > { %v1676_v16 = vpop.f32.mrb[66].mxu0  ;;  %v1965_v19 = vpop.f32.mrb[66].mxu1  ;;  %v806_v11 = vld [vmem:[%s5951_s22 + $0x1f8] sm:$0xff] }
 0x1a5   : > { %v1678_v22 = vpop.f32.mrb[67].mxu0  ;;  %v6341_v25 = vadd.f32 %v1965_v19, %v1676_v16  ;;  %v1967_v28 = vpop.f32.mrb[67].mxu1  ;;  %v979_v16 = vunpack.c.h.s8.bf16 %v795_v29  ;;  %v988_v19 = vunpack.c.l.s8.bf16 %v804_v62  ;;  %v803_v29 = vld [vmem:[%s5951_s22 + $0x1e0] sm:$0xff] }
 0x1a6   : > { %v990_v28 = vunpack.c.l.s8.bf16 %v806_v11 }
 0x1a7   : > { %2210 = vmatmul.mubr.bf16.gmra.mrb[172].mxu0 %v963_v13  ;;  %2499 = vmatmul.mubr.bf16.gmra.mrb[172].mxu1 %v965_v6 }
 0x1a8   : > { %2217 = vmatprep.mubr.bf16.mxu0 %v972_v18  ;;  %2506 = vmatprep.mubr.bf16.mxu1 %v974_v23 }
 0x1aa   : > { %v1681_v20 = vpop.f32.mrb[68].mxu0  ;;  %v1970_v35 = vpop.f32.mrb[68].mxu1 }
 0x1ab   : > { %v1683_v37 = vpop.f32.mrb[69].mxu0  ;;  %v6345_v40 = vadd.f32 %v1970_v35, %v1681_v20  ;;  %v1972_v34 = vpop.f32.mrb[69].mxu1 }
 0x1ac   : > { %v1684_v42 = vpop.f32.mrb[70].mxu0  ;;  %v1973_v45 = vpop.f32.mrb[70].mxu1  ;;  %v5790_v37 = vld [vmem:[%s6762_s4 + $0x20] sm:$0xff]  }
 0x1ad   : > { %v1686_v49 = vpop.f32.mrb[71].mxu0  ;;  %v6347_v54 = vadd.f32 %v1973_v45, %v1684_v42  ;;  %v1975_v58 = vpop.f32.mrb[71].mxu1  ;;  %5621 = vmatprep.subr.bf16.mxu1 %v5790_v37 }
 0x1ae   : > { %5622 = vmatpush3.bf16.msra.mxu1 %v5790_v37 }
 0x1af   : > { %2218 = vmatmul.mubr.bf16.gmra.mrb[176].mxu0 %v971_v39  ;;  %2507 = vmatmul.mubr.bf16.gmra.mrb[176].mxu1 %v973_v43  ;;  %v805_v39 = vld [vmem:[%s5951_s22 + $0x1f0] sm:$0xff] }
 0x1b0   : > { %2225 = vmatprep.mubr.bf16.mxu0 %v980_v44  ;;  %2514 = vmatprep.mubr.bf16.mxu1 %v982_v51  ;;  %v987_v44 = vunpack.c.l.s8.bf16 %v803_v29  ;;  %v989_v58 = vunpack.c.l.s8.bf16 %v805_v39 }
 0x1b2   : > { %v1689_v5 = vpop.f32.mrb[72].mxu0  ;;  %v1978_v13 = vpop.f32.mrb[72].mxu1 }
 0x1b3   : > { %v1691_v14 = vpop.f32.mrb[73].mxu0  ;;  %v6351_v6 = vadd.f32 %v1978_v13, %v1689_v5  ;;  %v1980_v61 = vpop.f32.mrb[73].mxu1  ;;  %v996_v5 = vunpack.c.h.s8.bf16 %v804_v62  ;;  %v5793_v62 = vld [vmem:[%s6762_s4 + $0x28] sm:$0xff]  }
 0x1b4   : > { %v1692_v18 = vpop.f32.mrb[74].mxu0  ;;  %v1981_v22 = vpop.f32.mrb[74].mxu1  ;;  %5623 = vmatprep.subr.bf16.mxu1 %v5793_v62 }
 0x1b5   : > { %v1694_v23 = vpop.f32.mrb[75].mxu0  ;;  %v6353_v20 = vadd.f32 %v1981_v22, %v1692_v18  ;;  %v1983_v35 = vpop.f32.mrb[75].mxu1  ;;  %v814_v22 = vld [vmem:[%s5951_s22 + $0x238] sm:$0xff]  ;;  %5624 = vmatpush3.bf16.msra.mxu1 %v5793_v62 }
 0x1b6   : > { %v5792_v23 = vld [vmem:[%s6761_s3 + $0x28] sm:$0xff]   ;;  %v995_v35 = vunpack.c.h.s8.bf16 %v803_v29  ;;  %v5794_v29 = vld [vmem:[%s6761_s3 + $0x30] sm:$0xff]  }
 0x1b7   : > { %2226 = vmatmul.mubr.bf16.gmra.mrb[180].mxu0 %v979_v16  ;;  %2515 = vmatmul.mubr.bf16.gmra.mrb[180].mxu1 %v981_v0  ;;  %v998_v16 = vunpack.c.h.s8.bf16 %v806_v11  ;;  %v812_v0 = vld [vmem:[%s5951_s22 + $0x228] sm:$0xff] }
 0x1b8   : > { %2233 = vmatprep.mubr.bf16.mxu0 %v988_v19  ;;  %2522 = vmatprep.mubr.bf16.mxu1 %v990_v28 }
 0x1b9   : > { %5543 = vmatprep.subr.bf16.mxu0 %v5792_v23 }
 0x1ba   : > { %v1697_v34 = vpop.f32.mrb[76].mxu0  ;;  %v1986_v42 = vpop.f32.mrb[76].mxu1  ;;  %5544 = vmatpush3.bf16.msra.mxu0 %v5792_v23 }
 0x1bb   : > { %v1699_v43 = vpop.f32.mrb[77].mxu0  ;;  %v6363_v45 = vadd.f32 %v1986_v42, %v1697_v34  ;;  %v1988_v49 = vpop.f32.mrb[77].mxu1  ;;  %v997_v42 = vunpack.c.h.s8.bf16 %v805_v39  ;;  %v5795_v39 = vld [vmem:[%s6762_s4 + $0x30] sm:$0xff]   ;;  %5545 = vmatprep.subr.bf16.mxu0 %v5794_v29 }
 0x1bc   : > { %v1700_v51 = vpop.f32.mrb[78].mxu0  ;;  %v1989_v13 = vpop.f32.mrb[78].mxu1  ;;  %v1004_v43 = vunpack.c.l.s8.bf16 %v812_v0  ;;  %5625 = vmatprep.subr.bf16.mxu1 %v5795_v39 }
 0x1bd   : > { %v1702_v14 = vpop.f32.mrb[79].mxu0  ;;  %v6365_v61 = vadd.f32 %v1989_v13, %v1700_v51  ;;  %v1991_v18 = vpop.f32.mrb[79].mxu1  ;;  %v1006_v51 = vunpack.c.l.s8.bf16 %v814_v22  ;;  %v811_v13 = vld [vmem:[%s5951_s22 + $0x220] sm:$0xff]  ;;  %5626 = vmatpush3.bf16.msra.mxu1 %v5795_v39 }
 0x1be   : > { %v813_v14 = vld [vmem:[%s5951_s22 + $0x230] sm:$0xff]  ;;  %5546 = vmatpush3.bf16.msra.mxu0 %v5794_v29  ;;  %v5796_v18 = vld [vmem:[%s6761_s3 + $0x38] sm:$0xff]   ;;  %v820_v29 = vld [vmem:[%s5951_s22 + $0x268] sm:$0xff] }
 0x1bf   : > { %6766 = vst [vmem:[#allocation3_spill] sm:$0xff] %v6365_v61  ;;  %2234 = vmatmul.mubr.bf16.gmra.mrb[184].mxu0 %v987_v44  ;;  %2523 = vmatmul.mubr.bf16.gmra.mrb[184].mxu1 %v989_v58 }
 0x1c0   : > { %2241 = vmatprep.mubr.bf16.mxu0 %v996_v5  ;;  %2530 = vmatprep.mubr.bf16.mxu1 %v998_v16 }
 0x1c1   : > { %5547 = vmatprep.subr.bf16.mxu0 %v5796_v18 }
 0x1c2   : > { %v1705_v19 = vpop.f32.mrb[80].mxu0  ;;  %v1994_v28 = vpop.f32.mrb[80].mxu1  ;;  %5548 = vmatpush3.bf16.msra.mxu0 %v5796_v18 }
 0x1c3   : > { %v1707_v11 = vpop.f32.mrb[81].mxu0  ;;  %v6375_v37 = vadd.f32 %v1994_v28, %v1705_v19  ;;  %v1996_v30 = vpop.f32.mrb[81].mxu1  ;;  %v5797_v19 = vld [vmem:[%s6762_s4 + $0x38] sm:$0xff]   ;;  %v1003_v28 = vunpack.c.l.s8.bf16 %v811_v13 }
 0x1c4   : > { %v1708_v34 = vpop.f32.mrb[82].mxu0  ;;  %v1997_v44 = vpop.f32.mrb[82].mxu1  ;;  %5627 = vmatprep.subr.bf16.mxu1 %v5797_v19 }
 0x1c5   : > { %6767 = vst [vmem:[#allocation4_spill] sm:$0xff] %v6375_v37  ;;  %v1710_v49 = vpop.f32.mrb[83].mxu0  ;;  %v6377_v58 = vadd.f32 %v1997_v44, %v1708_v34  ;;  %v1999_v5 = vpop.f32.mrb[83].mxu1  ;;  %v1005_v34 = vunpack.c.l.s8.bf16 %v813_v14  ;;  %5628 = vmatpush3.bf16.msra.mxu1 %v5797_v19 }
 0x1c6   : > { %v1014_v49 = vunpack.c.h.s8.bf16 %v814_v22 }
 0x1c7   : > { %6768 = vst [vmem:[#allocation5_spill] sm:$0xff] %v6377_v58  ;;  %2242 = vmatmul.mubr.bf16.gmra.mrb[188].mxu0 %v995_v35  ;;  %2531 = vmatmul.mubr.bf16.gmra.mrb[188].mxu1 %v997_v42  ;;  %v1012_v42 = vunpack.c.h.s8.bf16 %v812_v0 }
 0x1c8   : > { %2249 = vmatprep.mubr.bf16.mxu0 %v1004_v43  ;;  %2538 = vmatprep.mubr.bf16.mxu1 %v1006_v51 }
 0x1ca   : > { %v1713_v16 = vpop.f32.mrb[84].mxu0  ;;  %v2002_v23 = vpop.f32.mrb[84].mxu1 }
 0x1cb   : > { %v1715_v62 = vpop.f32.mrb[85].mxu0  ;;  %v6393_v11 = vadd.f32 %v2002_v23, %v1713_v16  ;;  %v2004_v35 = vpop.f32.mrb[85].mxu1  ;;  %v822_v16 = vld [vmem:[%s5951_s22 + $0x278] sm:$0xff] }
 0x1cc   : > { %v1716_v30 = vpop.f32.mrb[86].mxu0  ;;  %v2005_v43 = vpop.f32.mrb[86].mxu1  ;;  %v1011_v62 = vunpack.c.h.s8.bf16 %v811_v13  ;;  %v1022_v19 = vunpack.c.l.s8.bf16 %v822_v16 }
 0x1cd   : > { %6769 = vst [vmem:[#allocation6_spill] sm:$0xff] %v6393_v11  ;;  %v1718_v44 = vpop.f32.mrb[87].mxu0  ;;  %v6395_v51 = vadd.f32 %v2005_v43, %v1716_v30  ;;  %v2007_v5 = vpop.f32.mrb[87].mxu1  ;;  %v1013_v43 = vunpack.c.h.s8.bf16 %v813_v14 }
 0x1ce   : > { %v1020_v44 = vunpack.c.l.s8.bf16 %v820_v29  ;;  %v821_v5 = vld [vmem:[%s5951_s22 + $0x270] sm:$0xff] }
 0x1cf   : > { %6770 = vst [vmem:[#allocation7_spill] sm:$0xff] %v6395_v51  ;;  %2250 = vmatmul.mubr.bf16.gmra.mrb[192].mxu0 %v1003_v28  ;;  %2539 = vmatmul.mubr.bf16.gmra.mrb[192].mxu1 %v1005_v34 }
 0x1d0   : > { %2257 = vmatprep.mubr.bf16.mxu0 %v1012_v42  ;;  %2546 = vmatprep.mubr.bf16.mxu1 %v1014_v49  ;;  %v819_v49 = vld [vmem:[%s5951_s22 + $0x260] sm:$0xff] }
 0x1d2   : > { %v1721_v39 = vpop.f32.mrb[88].mxu0  ;;  %v2010_v23 = vpop.f32.mrb[88].mxu1 }
 0x1d3   : > { %v1723_v0 = vpop.f32.mrb[89].mxu0  ;;  %v6399_v35 = vadd.f32 %v2010_v23, %v1721_v39  ;;  %v2012_v22 = vpop.f32.mrb[89].mxu1  ;;  %v1019_v23 = vunpack.c.l.s8.bf16 %v819_v49 }
 0x1d4   : > { %v1724_v30 = vpop.f32.mrb[90].mxu0  ;;  %v2013_v18 = vpop.f32.mrb[90].mxu1 }
 0x1d5   : > { %6771 = vst [vmem:[#allocation8_spill] sm:$0xff] %v6399_v35  ;;  %v1726_v28 = vpop.f32.mrb[91].mxu0  ;;  %v6401_v34 = vadd.f32 %v2013_v18, %v1724_v30  ;;  %v2015_v42 = vpop.f32.mrb[91].mxu1  ;;  %v1021_v35 = vunpack.c.l.s8.bf16 %v821_v5  ;;  %v1028_v30 = vunpack.c.h.s8.bf16 %v820_v29 }
 0x1d7   : > { %6772 = vst [vmem:[#allocation9_spill] sm:$0xff] %v6401_v34  ;;  %2258 = vmatmul.mubr.bf16.gmra.mrb[196].mxu0 %v1011_v62  ;;  %2547 = vmatmul.mubr.bf16.gmra.mrb[196].mxu1 %v1013_v43  ;;  %v1030_v62 = vunpack.c.h.s8.bf16 %v822_v16  ;;  %v830_v34 = vld [vmem:[%s5951_s22 + $0x2b8] sm:$0xff]  ;;  %v1029_v16 = vunpack.c.h.s8.bf16 %v821_v5 }
 0x1d8   : > { %2265 = vmatprep.mubr.bf16.mxu0 %v1020_v44  ;;  %2554 = vmatprep.mubr.bf16.mxu1 %v1022_v19  ;;  %v828_v19 = vld [vmem:[%s5951_s22 + $0x2a8] sm:$0xff] }
 0x1da   : > { %v1729_v13 = vpop.f32.mrb[92].mxu0  ;;  %v2018_v0 = vpop.f32.mrb[92].mxu1 }
 0x1db   : > { %v1731_v39 = vpop.f32.mrb[93].mxu0  ;;  %v6405_v22 = vadd.f32 %v2018_v0, %v1729_v13  ;;  %v2020_v14 = vpop.f32.mrb[93].mxu1 }
 0x1dc   : > { %v1732_v28 = vpop.f32.mrb[94].mxu0  ;;  %v2021_v18 = vpop.f32.mrb[94].mxu1  ;;  %v1027_v14 = vunpack.c.h.s8.bf16 %v819_v49 }
 0x1dd   : > { %6773 = vst [vmem:[#allocation10_spill] sm:$0xff] %v6405_v22  ;;  %v1734_v42 = vpop.f32.mrb[95].mxu0  ;;  %v6407_v43 = vadd.f32 %v2021_v18, %v1732_v28  ;;  %v2023_v44 = vpop.f32.mrb[95].mxu1  ;;  %v1036_v28 = vunpack.c.l.s8.bf16 %v828_v19 }
 0x1df   : > { %6774 = vst [vmem:[#allocation11_spill] sm:$0xff] %v6407_v43  ;;  %2266 = vmatmul.mubr.bf16.gmra.mrb[200].mxu0 %v1019_v23  ;;  %2555 = vmatmul.mubr.bf16.gmra.mrb[200].mxu1 %v1021_v35  ;;  %v1038_v23 = vunpack.c.l.s8.bf16 %v830_v34 }
 0x1e0   : > { %2273 = vmatprep.mubr.bf16.mxu0 %v1028_v30  ;;  %2562 = vmatprep.mubr.bf16.mxu1 %v1030_v62  ;;  %v827_v62 = vld [vmem:[%s5951_s22 + $0x2a0] sm:$0xff] }
 0x1e2   : > { %v1737_v39 = vpop.f32.mrb[96].mxu0  ;;  %v2026_v13 = vpop.f32.mrb[96].mxu1 }
 0x1e3   : > { %v1739_v0 = vpop.f32.mrb[97].mxu0  ;;  %v6411_v22 = vadd.f32 %v2026_v13, %v1737_v39  ;;  %v2028_v29 = vpop.f32.mrb[97].mxu1  ;;  %v1035_v13 = vunpack.c.l.s8.bf16 %v827_v62 }
 0x1e4   : > { %v1740_v42 = vpop.f32.mrb[98].mxu0  ;;  %v2029_v18 = vpop.f32.mrb[98].mxu1  ;;  %v829_v0 = vld [vmem:[%s5951_s22 + $0x2b0] sm:$0xff] }
 0x1e5   : > { %6775 = vst [vmem:[#allocation12_spill] sm:$0xff] %v6411_v22  ;;  %v1742_v44 = vpop.f32.mrb[99].mxu0  ;;  %v6413_v35 = vadd.f32 %v2029_v18, %v1740_v42  ;;  %v2031_v30 = vpop.f32.mrb[99].mxu1  ;;  %v1037_v22 = vunpack.c.l.s8.bf16 %v829_v0  ;;  %v1044_v42 = vunpack.c.h.s8.bf16 %v828_v19 }
 0x1e7   : > { %6776 = vst [vmem:[#allocation13_spill] sm:$0xff] %v6413_v35  ;;  %2274 = vmatmul.mubr.bf16.gmra.mrb[204].mxu0 %v1027_v14  ;;  %2563 = vmatmul.mubr.bf16.gmra.mrb[204].mxu1 %v1029_v16  ;;  %v1046_v14 = vunpack.c.h.s8.bf16 %v830_v34  ;;  %v838_v35 = vld [vmem:[%s5951_s22 + $0x2f8] sm:$0xff]  ;;  %v1045_v34 = vunpack.c.h.s8.bf16 %v829_v0 }
 0x1e8   : > { %2281 = vmatprep.mubr.bf16.mxu0 %v1036_v28  ;;  %2570 = vmatprep.mubr.bf16.mxu1 %v1038_v23  ;;  %v836_v23 = vld [vmem:[%s5951_s22 + $0x2e8] sm:$0xff] }
 0x1ea   : > { %v1745_v49 = vpop.f32.mrb[100].mxu0  ;;  %v2034_v43 = vpop.f32.mrb[100].mxu1 }
 0x1eb   : > { %v1747_v39 = vpop.f32.mrb[101].mxu0  ;;  %v6417_v29 = vadd.f32 %v2034_v43, %v1745_v49  ;;  %v2036_v5 = vpop.f32.mrb[101].mxu1 }
 0x1ec   : > { %v1748_v44 = vpop.f32.mrb[102].mxu0  ;;  %v2037_v18 = vpop.f32.mrb[102].mxu1  ;;  %v1043_v5 = vunpack.c.h.s8.bf16 %v827_v62 }
 0x1ed   : > { %6777 = vst [vmem:[#allocation14_spill] sm:$0xff] %v6417_v29  ;;  %v1750_v30 = vpop.f32.mrb[103].mxu0  ;;  %v6419_v16 = vadd.f32 %v2037_v18, %v1748_v44  ;;  %v2039_v28 = vpop.f32.mrb[103].mxu1  ;;  %v1052_v44 = vunpack.c.l.s8.bf16 %v836_v23 }
 0x1ef   : > { %6778 = vst [vmem:[#allocation15_spill] sm:$0xff] %v6419_v16  ;;  %2282 = vmatmul.mubr.bf16.gmra.mrb[208].mxu0 %v1035_v13  ;;  %2571 = vmatmul.mubr.bf16.gmra.mrb[208].mxu1 %v1037_v22  ;;  %v1054_v13 = vunpack.c.l.s8.bf16 %v838_v35 }
 0x1f0   : > { %2289 = vmatprep.mubr.bf16.mxu0 %v1044_v42  ;;  %2578 = vmatprep.mubr.bf16.mxu1 %v1046_v14  ;;  %v835_v14 = vld [vmem:[%s5951_s22 + $0x2e0] sm:$0xff] }
 0x1f2   : > { %v1753_v39 = vpop.f32.mrb[104].mxu0  ;;  %v2042_v43 = vpop.f32.mrb[104].mxu1 }
 0x1f3   : > { %v1755_v49 = vpop.f32.mrb[105].mxu0  ;;  %v6423_v29 = vadd.f32 %v2042_v43, %v1753_v39  ;;  %v2044_v19 = vpop.f32.mrb[105].mxu1  ;;  %v1051_v43 = vunpack.c.l.s8.bf16 %v835_v14 }
 0x1f4   : > { %v1756_v30 = vpop.f32.mrb[106].mxu0  ;;  %v2045_v18 = vpop.f32.mrb[106].mxu1  ;;  %v837_v49 = vld [vmem:[%s5951_s22 + $0x2f0] sm:$0xff] }
 0x1f5   : > { %6779 = vst [vmem:[#allocation16_spill] sm:$0xff] %v6423_v29  ;;  %v1758_v28 = vpop.f32.mrb[107].mxu0  ;;  %v6425_v22 = vadd.f32 %v2045_v18, %v1756_v30  ;;  %v2047_v42 = vpop.f32.mrb[107].mxu1  ;;  %v1053_v29 = vunpack.c.l.s8.bf16 %v837_v49  ;;  %v1060_v30 = vunpack.c.h.s8.bf16 %v836_v23 }
 0x1f7   : > { %6780 = vst [vmem:[#allocation17_spill] sm:$0xff] %v6425_v22  ;;  %2290 = vmatmul.mubr.bf16.gmra.mrb[212].mxu0 %v1043_v5  ;;  %2579 = vmatmul.mubr.bf16.gmra.mrb[212].mxu1 %v1045_v34  ;;  %v1062_v5 = vunpack.c.h.s8.bf16 %v838_v35  ;;  %v846_v22 = vld [vmem:[%s5951_s22 + $0x338] sm:$0xff]  ;;  %v1061_v35 = vunpack.c.h.s8.bf16 %v837_v49 }
 0x1f8   : > { %2297 = vmatprep.mubr.bf16.mxu0 %v1052_v44  ;;  %2586 = vmatprep.mubr.bf16.mxu1 %v1054_v13  ;;  %v844_v13 = vld [vmem:[%s5951_s22 + $0x328] sm:$0xff] }
 0x1fa   : > { %v1761_v62 = vpop.f32.mrb[108].mxu0  ;;  %v2050_v16 = vpop.f32.mrb[108].mxu1 }
 0x1fb   : > { %v1763_v39 = vpop.f32.mrb[109].mxu0  ;;  %v6429_v19 = vadd.f32 %v2050_v16, %v1761_v62  ;;  %v2052_v0 = vpop.f32.mrb[109].mxu1 }
 0x1fc   : > { %v1764_v28 = vpop.f32.mrb[110].mxu0  ;;  %v2053_v18 = vpop.f32.mrb[110].mxu1  ;;  %v1059_v0 = vunpack.c.h.s8.bf16 %v835_v14 }
 0x1fd   : > { %6781 = vst [vmem:[#allocation18_spill] sm:$0xff] %v6429_v19  ;;  %v1766_v42 = vpop.f32.mrb[111].mxu0  ;;  %v6431_v34 = vadd.f32 %v2053_v18, %v1764_v28  ;;  %v2055_v44 = vpop.f32.mrb[111].mxu1  ;;  %v1068_v28 = vunpack.c.l.s8.bf16 %v844_v13 }
 0x1ff   : > { %6782 = vst [vmem:[#allocation19_spill] sm:$0xff] %v6431_v34  ;;  %2298 = vmatmul.mubr.bf16.gmra.mrb[216].mxu0 %v1051_v43  ;;  %2587 = vmatmul.mubr.bf16.gmra.mrb[216].mxu1 %v1053_v29  ;;  %v1070_v43 = vunpack.c.l.s8.bf16 %v846_v22 }
 0x200   : > { %2305 = vmatprep.mubr.bf16.mxu0 %v1060_v30  ;;  %2594 = vmatprep.mubr.bf16.mxu1 %v1062_v5  ;;  %v843_v5 = vld [vmem:[%s5951_s22 + $0x320] sm:$0xff] }
 0x202   : > { %v1769_v39 = vpop.f32.mrb[112].mxu0  ;;  %v2058_v16 = vpop.f32.mrb[112].mxu1 }
 0x203   : > { %v1771_v62 = vpop.f32.mrb[113].mxu0  ;;  %v6435_v19 = vadd.f32 %v2058_v16, %v1769_v39  ;;  %v2060_v23 = vpop.f32.mrb[113].mxu1 }
 0x204   : > { %v1772_v42 = vpop.f32.mrb[114].mxu0  ;;  %v2061_v18 = vpop.f32.mrb[114].mxu1  ;;  %v845_v62 = vld [vmem:[%s5951_s22 + $0x330] sm:$0xff]  ;;  %v1067_v23 = vunpack.c.l.s8.bf16 %v843_v5 }
 0x205   : > { %6783 = vst [vmem:[#allocation20_spill] sm:$0xff] %v6435_v19  ;;  %v1774_v44 = vpop.f32.mrb[115].mxu0  ;;  %v6437_v29 = vadd.f32 %v2061_v18, %v1772_v42  ;;  %v2063_v30 = vpop.f32.mrb[115].mxu1  ;;  %v1069_v42 = vunpack.c.l.s8.bf16 %v845_v62  ;;  %v1076_v18 = vunpack.c.h.s8.bf16 %v844_v13 }
 0x207   : > { %6784 = vst [vmem:[#allocation21_spill] sm:$0xff] %v6437_v29  ;;  %2306 = vmatmul.mubr.bf16.gmra.mrb[220].mxu0 %v1059_v0  ;;  %2595 = vmatmul.mubr.bf16.gmra.mrb[220].mxu1 %v1061_v35  ;;  %v1078_v35 = vunpack.c.h.s8.bf16 %v846_v22  ;;  %v1075_v22 = vunpack.c.h.s8.bf16 %v843_v5 }
 0x208   : > { %2313 = vmatprep.mubr.bf16.mxu0 %v1068_v28  ;;  %2602 = vmatprep.mubr.bf16.mxu1 %v1070_v43 }
 0x20a   : > { %v1777_v14 = vpop.f32.mrb[116].mxu0  ;;  %v2066_v39 = vpop.f32.mrb[116].mxu1 }
 0x20b   : > { %v1779_v16 = vpop.f32.mrb[117].mxu0  ;;  %v6441_v49 = vadd.f32 %v2066_v39, %v1777_v14  ;;  %v2068_v19 = vpop.f32.mrb[117].mxu1  ;;  %v854_v14 = vld [vmem:[%s5951_s22 + $0x378] sm:$0xff] }
 0x20c   : > { %v1780_v44 = vpop.f32.mrb[118].mxu0  ;;  %v2069_v30 = vpop.f32.mrb[118].mxu1  ;;  %v852_v16 = vld [vmem:[%s5951_s22 + $0x368] sm:$0xff] }
 0x20d   : > { %6785 = vst [vmem:[#allocation22_spill] sm:$0xff] %v6441_v49  ;;  %v1782_v0 = vpop.f32.mrb[119].mxu0  ;;  %v6443_v28 = vadd.f32 %v2069_v30, %v1780_v44  ;;  %v2071_v43 = vpop.f32.mrb[119].mxu1 }
 0x20f   : > { %6786 = vst [vmem:[#allocation23_spill] sm:$0xff] %v6443_v28  ;;  %2314 = vmatmul.mubr.bf16.gmra.mrb[224].mxu0 %v1067_v23  ;;  %2603 = vmatmul.mubr.bf16.gmra.mrb[224].mxu1 %v1069_v42  ;;  %v1077_v42 = vunpack.c.h.s8.bf16 %v845_v62 }
 0x210   : > { %2321 = vmatprep.mubr.bf16.mxu0 %v1076_v18  ;;  %2610 = vmatprep.mubr.bf16.mxu1 %v1078_v35  ;;  %v1084_v18 = vunpack.c.l.s8.bf16 %v852_v16  ;;  %v1086_v35 = vunpack.c.l.s8.bf16 %v854_v14 }
 0x212   : > { %v1785_v29 = vpop.f32.mrb[120].mxu0  ;;  %v2074_v19 = vpop.f32.mrb[120].mxu1 }
 0x213   : > { %v1787_v13 = vpop.f32.mrb[121].mxu0  ;;  %v6452_v39 = vadd.f32 %v2074_v19, %v1785_v29  ;;  %v2076_v23 = vpop.f32.mrb[121].mxu1  ;;  %v853_v29 = vld [vmem:[%s5951_s22 + $0x370] sm:$0xff] }
 0x214   : > { %v1788_v44 = vpop.f32.mrb[122].mxu0  ;;  %v2077_v30 = vpop.f32.mrb[122].mxu1  ;;  %v851_v13 = vld [vmem:[%s5951_s22 + $0x360] sm:$0xff] }
 0x215   : > { %6788 = vst [vmem:[#allocation24_spill] sm:$0xff] %v6452_v39  ;;  %v1790_v0 = vpop.f32.mrb[123].mxu0  ;;  %v6454_v43 = vadd.f32 %v2077_v30, %v1788_v44  ;;  %v2079_v28 = vpop.f32.mrb[123].mxu1  ;;  %v1083_v23 = vunpack.c.l.s8.bf16 %v851_v13  ;;  %v1085_v30 = vunpack.c.l.s8.bf16 %v853_v29  ;;  %v1091_v34 = vunpack.c.h.s8.bf16 %v851_v13 }
 0x217   : > { %6789 = vst [vmem:[#allocation25_spill] sm:$0xff] %v6454_v43  ;;  %2322 = vmatmul.mubr.bf16.gmra.mrb[228].mxu0 %v1075_v22  ;;  %2611 = vmatmul.mubr.bf16.gmra.mrb[228].mxu1 %v1077_v42  ;;  %v1092_v22 = vunpack.c.h.s8.bf16 %v852_v16  ;;  %v862_v16 = vld [vmem:[%s5951_s22 + $0x3b8] sm:$0xff] }
 0x218   : > { %2329 = vmatprep.mubr.bf16.mxu0 %v1084_v18  ;;  %2618 = vmatprep.mubr.bf16.mxu1 %v1086_v35  ;;  %v1094_v35 = vunpack.c.h.s8.bf16 %v854_v14 }
 0x21a   : > { %v1793_v5 = vpop.f32.mrb[124].mxu0  ;;  %v2082_v62 = vpop.f32.mrb[124].mxu1 }
 0x21b   : > { %v1795_v19 = vpop.f32.mrb[125].mxu0  ;;  %v6462_v0 = vadd.f32 %v2082_v62, %v1793_v5  ;;  %v2084_v44 = vpop.f32.mrb[125].mxu1  ;;  %v4913_v5 = vld [vmem:[%s6468_s10] sm:$0xff]   ;;  %v860_v62 = vld [vmem:[%s5951_s22 + $0x3a8] sm:$0xff] }
 0x21c   : > { %v1796_v28 = vpop.f32.mrb[126].mxu0  ;;  %v2085_v42 = vpop.f32.mrb[126].mxu1 }
 0x21d   : > { %6790 = vst [vmem:[#allocation26_spill] sm:$0xff] %v6462_v0  ;;  %v1798_v18 = vpop.f32.mrb[127].mxu0  ;;  %v6470_v43 = vadd.f32 %v2085_v42, %v1796_v28  ;;  %v2087_v19 = vpop.f32.mrb[127].mxu1  ;;  %v4914_v0 = vunpack.c.l.bf16 %v4913_v5  ;;  %v1093_v28 = vunpack.c.h.s8.bf16 %v853_v29  ;;  %v1100_v42 = vunpack.c.l.s8.bf16 %v860_v62 }
 0x21f   : > { %6791 = vst [vmem:[#allocation27_spill] sm:$0xff] %v6470_v43  ;;  %2330 = vmatmul.mubr.bf16.gmra.mrb[232].mxu0 %v1083_v23  ;;  %2619 = vmatmul.mubr.bf16.gmra.mrb[232].mxu1 %v1085_v30  ;;  %v1102_v43 = vunpack.c.l.s8.bf16 %v862_v16 }
 0x220   : > { %2337 = vmatprep.mubr.bf16.mxu0 %v1092_v22  ;;  %2626 = vmatprep.mubr.bf16.mxu1 %v1094_v35  ;;  %v4915_v22 = vunpack.c.h.bf16 %v4913_v5 }
 0x222   : > { %v2123_v44 = vpop.f32.mrb[128].mxu0  ;;  %v2412_v39 = vpop.f32.mrb[128].mxu1 }
 0x223   : > { %v2124_v18 = vadd.f32 %v2123_v44, %v6211_v50  ;;  %v2125_v49 = vpop.f32.mrb[129].mxu0  ;;  %v2414_v51 = vpop.f32.mrb[129].mxu1 }
 0x224   : > { %v2126_v14 = vpop.f32.mrb[130].mxu0  ;;  %v2415_v35 = vpop.f32.mrb[130].mxu1  ;;  %v5360_v49 = vld [vmem:[%s6468_s10 + $0x8] sm:$0xff]   ;;  %v6479_v51 = vld [vmem:[%s5951_s22 + $0x3a0] sm:$0xff] }
 0x225   : > { %v2413_v23 = vadd.f32 %v2412_v39, %v2124_v18  ;;  %v2127_v30 = vadd.f32 %v2126_v14, %v6213_v55  ;;  %v2128_v19 = vpop.f32.mrb[131].mxu0  ;;  %v2417_v11 = vpop.f32.mrb[131].mxu1  ;;  %v861_v39 = vld [vmem:[%s5951_s22 + $0x3b0] sm:$0xff]  ;;  %v4918_v18 = vunpack.c.l.bf16 %v5360_v49 }
 0x227   : > { %v2667_v50 = vadd.f32 %v4914_v0, %v2413_v23  ;;  %v2416_v44 = vadd.f32 %v2415_v35, %v2127_v30  ;;  %2338 = vmatmul.mubr.bf16.gmra.mrb[236].mxu0 %v1091_v34  ;;  %2627 = vmatmul.mubr.bf16.gmra.mrb[236].mxu1 %v1093_v28  ;;  %v1099_v34 = vunpack.c.l.s8.bf16 %v6479_v51  ;;  %v1101_v30 = vunpack.c.l.s8.bf16 %v861_v39 }
 0x228   : > { %2345 = vmatprep.mubr.bf16.mxu0 %v1100_v42  ;;  %2634 = vmatprep.mubr.bf16.mxu1 %v1102_v43  ;;  %v4919_v42 = vunpack.c.h.bf16 %v5360_v49  ;;  %v1108_v35 = vunpack.c.h.s8.bf16 %v860_v62  ;;  %v5361_v49 = vld [vmem:[%s6468_s10 + $0x10] sm:$0xff]  }
 0x229   : > { %v2926_v13 = vmul.f32 0.05, %v2667_v50  ;;  %v2668_v29 = vadd.f32 %v4915_v22, %v2416_v44  ;;  %vm2862_vm0 = vcmp.ge.f32.partialorder %v2667_v50, 0.0  ;;  %v1110_v22 = vunpack.c.h.s8.bf16 %v862_v16 }
 0x22a   : > { %v2131_v55 = vpop.f32.mrb[132].mxu0  ;;  %v2420_v11 = vpop.f32.mrb[132].mxu1 }
 0x22b   : > { %vm2863_vm1 = vcmp.ge.f32.partialorder %v2668_v29, 0.0  ;;  %v2927_v5 = vmul.f32 0.05, %v2668_v29  ;;  %v2132_v14 = vadd.f32 %v2131_v55, %v6217_v3  ;;  %v2133_v0 = vpop.f32.mrb[133].mxu0  ;;  %v2422_v23 = vpop.f32.mrb[133].mxu1  ;;  %v2990_v3 = vsel %vm2862_vm0, %v2667_v50, %v2926_v13 }
 0x22c   : > { %v2134_v28 = vpop.f32.mrb[134].mxu0  ;;  %v2423_v44 = vpop.f32.mrb[134].mxu1  ;;  %v4922_v50 = vunpack.c.l.bf16 %v5361_v49 }
 0x22d   : > { %v2421_v43 = vadd.f32 %v2420_v11, %v2132_v14  ;;  %v2135_v19 = vadd.f32 %v2134_v28, %v6219_v8  ;;  %v2136_v58 = vpop.f32.mrb[135].mxu0  ;;  %v2991_v55 = vsel %vm2863_vm1, %v2668_v29, %v2927_v5  ;;  %v2425_v0 = vpop.f32.mrb[135].mxu1  ;;  %v6491_v8 = vld [vmem:[%s5951_s22 + $0x3e8] sm:$0xff]  ;;  %v6494_v14 = vld [vmem:[%s5951_s22 + $0x3f8] sm:$0xff]  ;;  %v1107_v11 = vunpack.c.h.s8.bf16 %v6479_v51 }
 0x22e   : > { %v6487_v37 = vpack.c.bf16 %v2991_v55, %v2990_v3 }
 0x22f   : > { %v2669_v23 = vadd.f32 %v4918_v18, %v2421_v43  ;;  %v2424_v61 = vadd.f32 %v2423_v44, %v2135_v19  ;;  %2346 = vmatmul.mubr.bf16.gmra.mrb[240].mxu0 %v1099_v34  ;;  %2635 = vmatmul.mubr.bf16.gmra.mrb[240].mxu1 %v1101_v30  ;;  %v1116_v30 = vunpack.c.l.s8.bf16 %v6491_v8 }
 0x230   : > { %2353 = vmatprep.mubr.bf16.mxu0 %v1108_v35  ;;  %2642 = vmatprep.mubr.bf16.mxu1 %v1110_v22  ;;  %v1118_v35 = vunpack.c.l.s8.bf16 %v6494_v14 }
 0x231   : > { %v2928_v62 = vmul.f32 0.05, %v2669_v23  ;;  %v2670_v16 = vadd.f32 %v4919_v42, %v2424_v61  ;;  %vm2864_vm2 = vcmp.ge.f32.partialorder %v2669_v23, 0.0  ;;  %v4923_v61 = vunpack.c.h.bf16 %v5361_v49  ;;  %v867_v49 = vld [vmem:[%s5951_s22 + $0x3e0] sm:$0xff] }
 0x232   : > { %v2139_v58 = vpop.f32.mrb[136].mxu0  ;;  %v2428_v18 = vpop.f32.mrb[136].mxu1  ;;  %v1109_v42 = vunpack.c.h.s8.bf16 %v861_v39  ;;  %v5362_v39 = vld [vmem:[%s6468_s10 + $0x18] sm:$0xff]  }
 0x233   : > { %vm2865_vm3 = vcmp.ge.f32.partialorder %v2670_v16, 0.0  ;;  %v2929_v13 = vmul.f32 0.05, %v2670_v16  ;;  %v2140_v29 = vadd.f32 %v2139_v58, %v6234_v21  ;;  %v2141_v5 = vpop.f32.mrb[137].mxu0  ;;  %v2430_v34 = vpop.f32.mrb[137].mxu1  ;;  %v2992_v22 = vsel %vm2864_vm2, %v2669_v23, %v2928_v62  ;;  %v869_v23 = vld [vmem:[%s5951_s22 + $0x3f0] sm:$0xff] }
 0x234   : > { %v2142_v28 = vpop.f32.mrb[138].mxu0  ;;  %v2431_v44 = vpop.f32.mrb[138].mxu1 }
 0x235   : > { %v2993_v43 = vsel %vm2865_vm3, %v2670_v16, %v2929_v13  ;;  %v2429_v19 = vadd.f32 %v2428_v18, %v2140_v29  ;;  %v2143_v21 = vadd.f32 %v2142_v28, %v6237_v26  ;;  %v2144_v3 = vpop.f32.mrb[139].mxu0  ;;  %v2433_v51 = vpop.f32.mrb[139].mxu1  ;;  %v4926_v16 = vunpack.c.l.bf16 %v5362_v39 }
 0x236   : > { %v6501_v55 = vpack.c.bf16 %v2993_v43, %v2992_v22  ;;  %v1124_v22 = vunpack.c.h.s8.bf16 %v6491_v8 }
 0x237   : > { %v2671_v0 = vadd.f32 %v4922_v50, %v2429_v19  ;;  %v2432_v58 = vadd.f32 %v2431_v44, %v2143_v21  ;;  %2354 = vmatmul.mubr.bf16.gmra.mrb[244].mxu0 %v1107_v11  ;;  %2643 = vmatmul.mubr.bf16.gmra.mrb[244].mxu1 %v1109_v42  ;;  %v1115_v50 = vunpack.c.l.s8.bf16 %v867_v49  ;;  %v4927_v42 = vunpack.c.h.bf16 %v5362_v39  ;;  %v5363_v39 = vld [vmem:[%s6468_s10 + $0x20] sm:$0xff]  }
 0x238   : > { %2361 = vmatprep.mubr.bf16.mxu0 %v1116_v30  ;;  %2650 = vmatprep.mubr.bf16.mxu1 %v1118_v35  ;;  %v1117_v30 = vunpack.c.l.s8.bf16 %v869_v23 }
 0x239   : > { %v2930_v5 = vmul.f32 0.05, %v2671_v0  ;;  %v2672_v34 = vadd.f32 %v4923_v61, %v2432_v58  ;;  %vm2866_vm4 = vcmp.ge.f32.partialorder %v2671_v0, 0.0  ;;  %v1126_v61 = vunpack.c.h.s8.bf16 %v6494_v14 }
 0x23a   : > { %v2147_v62 = vpop.f32.mrb[140].mxu0  ;;  %v2436_v29 = vpop.f32.mrb[140].mxu1 }
 0x23b   : > { %vm2867_vm5 = vcmp.ge.f32.partialorder %v2672_v34, 0.0  ;;  %v2931_v26 = vmul.f32 0.05, %v2672_v34  ;;  %v2148_v13 = vadd.f32 %v2147_v62, %v6241_v36  ;;  %v2149_v18 = vpop.f32.mrb[141].mxu0  ;;  %v2438_v28 = vpop.f32.mrb[141].mxu1  ;;  %v2994_v44 = vsel %vm2866_vm4, %v2671_v0, %v2930_v5 }
 0x23c   : > { %v2150_v11 = vpop.f32.mrb[142].mxu0  ;;  %v2439_v19 = vpop.f32.mrb[142].mxu1  ;;  %v1125_v28 = vunpack.c.h.s8.bf16 %v869_v23 }
 0x23d   : > { %v2437_v35 = vadd.f32 %v2436_v29, %v2148_v13  ;;  %v2151_v43 = vadd.f32 %v2150_v11, %v6243_v41  ;;  %v2152_v21 = vpop.f32.mrb[143].mxu0  ;;  %v2995_v36 = vsel %vm2867_vm5, %v2672_v34, %v2931_v26  ;;  %v2441_v3 = vpop.f32.mrb[143].mxu1  ;;  %v4930_v13 = vunpack.c.l.bf16 %v5363_v39 }
 0x23e   : > { %v6512_v51 = vpack.c.bf16 %v2995_v36, %v2994_v44  ;;  %v1123_v26 = vunpack.c.h.s8.bf16 %v867_v49 }
 0x23f   : > { %v2673_v58 = vadd.f32 %v4926_v16, %v2437_v35  ;;  %v2440_v62 = vadd.f32 %v2439_v19, %v2151_v43  ;;  %2362 = vmatmul.mubr.bf16.gmra.mrb[248].mxu0 %v1115_v50  ;;  %2651 = vmatmul.mubr.bf16.gmra.mrb[248].mxu1 %v1117_v30  ;;  %v4931_v50 = vunpack.c.h.bf16 %v5363_v39 }
 0x240   : > { %2369 = vmatprep.mubr.bf16.mxu0 %v1124_v22  ;;  %2658 = vmatprep.mubr.bf16.mxu1 %v1126_v61 }
 0x241   : > { %v2932_v8 = vmul.f32 0.05, %v2673_v58  ;;  %v2674_v14 = vadd.f32 %v4927_v42, %v2440_v62  ;;  %vm2868_vm6 = vcmp.ge.f32.partialorder %v2673_v58, 0.0 }
 0x242   : > { %v2155_v41 = vpop.f32.mrb[144].mxu0  ;;  %v2444_v5 = vpop.f32.mrb[144].mxu1 }
 0x243   : > { %vm2869_vm7 = vcmp.ge.f32.partialorder %v2674_v14, 0.0  ;;  %v2933_v29 = vmul.f32 0.05, %v2674_v14  ;;  %v2156_v0 = vadd.f32 %v2155_v41, %v6247_v53  ;;  %v2157_v34 = vpop.f32.mrb[145].mxu0  ;;  %v2446_v18 = vpop.f32.mrb[145].mxu1  ;;  %v2996_v11 = vsel %vm2868_vm6, %v2673_v58, %v2932_v8  ;;  %v5364_v53 = vld [vmem:[%s6468_s10 + $0x28] sm:$0xff]  }
 0x244   : > { %v2158_v16 = vpop.f32.mrb[146].mxu0  ;;  %v2447_v61 = vpop.f32.mrb[146].mxu1  ;;  %v4934_v58 = vunpack.c.l.bf16 %v5364_v53  ;;  %v4935_v41 = vunpack.c.h.bf16 %v5364_v53 }
 0x245   : > { %v2997_v30 = vsel %vm2869_vm7, %v2674_v14, %v2933_v29  ;;  %v2445_v22 = vadd.f32 %v2444_v5, %v2156_v0  ;;  %v2159_v42 = vadd.f32 %v2158_v16, %v6249_v59  ;;  %v2160_v35 = vpop.f32.mrb[147].mxu0  ;;  %v2449_v19 = vpop.f32.mrb[147].mxu1 }
 0x246   : > { %v3057_v43 = vpack.c.bf16 %v2997_v30, %v2996_v11 }
 0x247   : > { %v2675_v21 = vadd.f32 %v4930_v13, %v2445_v22  ;;  %v2448_v44 = vadd.f32 %v2447_v61, %v2159_v42  ;;  %2370 = vmatmul.mubr.bf16.gmra.mrb[252].mxu0 %v1123_v26  ;;  %2659 = vmatmul.mubr.bf16.gmra.mrb[252].mxu1 %v1125_v28 }
 0x248   : > { %5549 = vmatprep.mubr.bf16.mxu0 %v6487_v37  ;;  %5629 = vmatprep.mubr.bf16.mxu1 %v6487_v37 }
 0x249   : > { %v2934_v49 = vmul.f32 0.05, %v2675_v21  ;;  %v2676_v36 = vadd.f32 %v4931_v50, %v2448_v44  ;;  %vm2870_vm8 = vcmp.ge.f32.partialorder %v2675_v21, 0.0 }
 0x24a   : > { %v2163_v23 = vpop.f32.mrb[148].mxu0  ;;  %v2452_v62 = vpop.f32.mrb[148].mxu1 }
 0x24b   : > { %vm2871_vm9 = vcmp.ge.f32.partialorder %v2676_v36, 0.0  ;;  %v2935_v3 = vmul.f32 0.05, %v2676_v36  ;;  %v2164_v59 = vadd.f32 %v2163_v23, %v6253_v10  ;;  %v2165_v39 = vpop.f32.mrb[149].mxu0  ;;  %v2454_v8 = vpop.f32.mrb[149].mxu1  ;;  %v2998_v34 = vsel %vm2870_vm8, %v2675_v21, %v2934_v49  ;;  %v5365_v10 = vld [vmem:[%s6468_s10 + $0x30] sm:$0xff]  }
 0x24c   : > { %v2166_v14 = vpop.f32.mrb[150].mxu0  ;;  %v2455_v0 = vpop.f32.mrb[150].mxu1  ;;  %v4938_v42 = vunpack.c.l.bf16 %v5365_v10 }
 0x24d   : > { %v2453_v13 = vadd.f32 %v2452_v62, %v2164_v59  ;;  %v2167_v29 = vadd.f32 %v2166_v14, %v6255_v15  ;;  %v2168_v5 = vpop.f32.mrb[151].mxu0  ;;  %v2999_v37 = vsel %vm2871_vm9, %v2676_v36, %v2935_v3  ;;  %v2457_v26 = vpop.f32.mrb[151].mxu1 }
 0x24e   : > { %v3058_v18 = vpack.c.bf16 %v2999_v37, %v2998_v34 }
 0x24f   : > { %v2677_v16 = vadd.f32 %v4934_v58, %v2453_v13  ;;  %v2456_v50 = vadd.f32 %v2455_v0, %v2167_v29  ;;  %5550 = vmatmul.mubr.bf16.vlgmr.msra.gmra.mrb[0].mxu0 %v6501_v55  ;;  %5630 = vmatmul.mubr.bf16.vlgmr.msra.gmra.mrb[0].mxu1 %v6501_v55  ;;  %v4939_v55 = vunpack.c.h.bf16 %v5365_v10 }
 0x250   : > { %5553 = vmatprep.mubr.bf16.mxu0 %v6512_v51  ;;  %5633 = vmatprep.mubr.bf16.mxu1 %v6512_v51 }
 0x251   : > { %v2936_v28 = vmul.f32 0.05, %v2677_v16  ;;  %v2678_v11 = vadd.f32 %v4935_v41, %v2456_v50  ;;  %vm2872_vm10 = vcmp.ge.f32.partialorder %v2677_v16, 0.0 }
 0x252   : > { %v2171_v15 = vpop.f32.mrb[152].mxu0  ;;  %v2460_v61 = vpop.f32.mrb[152].mxu1 }
 0x253   : > { %vm2873_vm11 = vcmp.ge.f32.partialorder %v2678_v11, 0.0  ;;  %v2937_v30 = vmul.f32 0.05, %v2678_v11  ;;  %v2172_v22 = vadd.f32 %v2171_v15, %v6267_v1  ;;  %v2173_v35 = vpop.f32.mrb[153].mxu0  ;;  %v2462_v19 = vpop.f32.mrb[153].mxu1  ;;  %v3000_v44 = vsel %vm2872_vm10, %v2677_v16, %v2936_v28  ;;  %v5366_v1 = vld [vmem:[%s6468_s10 + $0x38] sm:$0xff]  }
 0x254   : > { %v2174_v21 = vpop.f32.mrb[154].mxu0  ;;  %v2463_v23 = vpop.f32.mrb[154].mxu1  ;;  %v4943_v37 = vunpack.c.h.bf16 %v5366_v1 }
 0x255   : > { %v3001_v53 = vsel %vm2873_vm11, %v2678_v11, %v2937_v30  ;;  %v2461_v49 = vadd.f32 %v2460_v61, %v2172_v22  ;;  %v2175_v36 = vadd.f32 %v2174_v21, %v6269_v33  ;;  %v2176_v51 = vpop.f32.mrb[155].mxu0  ;;  %v2465_v59 = vpop.f32.mrb[155].mxu1  ;;  %v4942_v33 = vunpack.c.l.bf16 %v5366_v1 }
 0x256   : > { %v3059_v3 = vpack.c.bf16 %v3001_v53, %v3000_v44 }
 0x257   : > { %v2679_v58 = vadd.f32 %v4938_v42, %v2461_v49  ;;  %v2464_v62 = vadd.f32 %v2463_v23, %v2175_v36  ;;  %5554 = vmatmul.mubr.bf16.gmra.mrb[4].mxu0 %v3057_v43  ;;  %5634 = vmatmul.mubr.bf16.gmra.mrb[4].mxu1 %v3057_v43 }
 0x258   : > { %5557 = vmatprep.mubr.bf16.mxu0 %v3058_v18  ;;  %5637 = vmatprep.mubr.bf16.mxu1 %v3058_v18 }
 0x259   : > { %v2938_v39 = vmul.f32 0.05, %v2679_v58  ;;  %v2680_v8 = vadd.f32 %v4939_v55, %v2464_v62  ;;  %vm2874_vm12 = vcmp.ge.f32.partialorder %v2679_v58, 0.0 }
 0x25a   : > { %v2179_v14 = vpop.f32.mrb[156].mxu0  ;;  %v2468_v29 = vpop.f32.mrb[156].mxu1 }
 0x25b   : > { %vm2875_vm13 = vcmp.ge.f32.partialorder %v2680_v8, 0.0  ;;  %v2939_v41 = vmul.f32 0.05, %v2680_v8  ;;  %v2180_v13 = vadd.f32 %v2179_v14, %v6273_v46  ;;  %v2181_v0 = vpop.f32.mrb[157].mxu0  ;;  %v2470_v5 = vpop.f32.mrb[157].mxu1  ;;  %v3002_v10 = vsel %vm2874_vm12, %v2679_v58, %v2938_v39  ;;  %v5367_v46 = vld [vmem:[%s6468_s10 + $0x40] sm:$0xff]  }
 0x25c   : > { %v2182_v34 = vpop.f32.mrb[158].mxu0  ;;  %v2471_v16 = vpop.f32.mrb[158].mxu1  ;;  %v4946_v19 = vunpack.c.l.bf16 %v5367_v46  ;;  %v4947_v49 = vunpack.c.h.bf16 %v5367_v46 }
 0x25d   : > { %v2469_v26 = vadd.f32 %v2468_v29, %v2180_v13  ;;  %v2183_v43 = vadd.f32 %v2182_v34, %v6275_v52  ;;  %v2184_v50 = vpop.f32.mrb[159].mxu0  ;;  %v3003_v18 = vsel %vm2875_vm13, %v2680_v8, %v2939_v41  ;;  %v2473_v28 = vpop.f32.mrb[159].mxu1 }
 0x25e   : > { %v3060_v11 = vpack.c.bf16 %v3003_v18, %v3002_v10 }
 0x25f   : > { %v2681_v15 = vadd.f32 %v4942_v33, %v2469_v26  ;;  %v2472_v30 = vadd.f32 %v2471_v16, %v2183_v43  ;;  %5558 = vmatmul.mubr.bf16.gmra.mrb[8].mxu0 %v3059_v3  ;;  %5638 = vmatmul.mubr.bf16.gmra.mrb[8].mxu1 %v3059_v3 }
 0x260   : > { %5561 = vmatprep.mubr.bf16.mxu0 %v3060_v11  ;;  %5641 = vmatprep.mubr.bf16.mxu1 %v3060_v11 }
 0x261   : > { %v2940_v22 = vmul.f32 0.05, %v2681_v15  ;;  %v2682_v42 = vadd.f32 %v4943_v37, %v2472_v30  ;;  %vm2876_vm14 = vcmp.ge.f32.partialorder %v2681_v15, 0.0 }
 0x262   : > { %v2187_v61 = vpop.f32.mrb[160].mxu0  ;;  %v2476_v21 = vpop.f32.mrb[160].mxu1 }
 0x263   : > { %vm2877_vm15 = vcmp.ge.f32.partialorder %v2682_v42, 0.0  ;;  %v2941_v35 = vmul.f32 0.05, %v2682_v42  ;;  %v2188_v52 = vadd.f32 %v2187_v61, %v6279_v4  ;;  %v2189_v55 = vpop.f32.mrb[161].mxu0  ;;  %v2478_v44 = vpop.f32.mrb[161].mxu1  ;;  %v3004_v36 = vsel %vm2876_vm14, %v2681_v15, %v2940_v22  ;;  %v5368_v4 = vld [vmem:[%s6468_s10 + $0x48] sm:$0xff]  }
 0x264   : > { %v2190_v53 = vpop.f32.mrb[162].mxu0  ;;  %v2479_v59 = vpop.f32.mrb[162].mxu1  ;;  %v4950_v0 = vunpack.c.l.bf16 %v5368_v4  ;;  %v4951_v26 = vunpack.c.h.bf16 %v5368_v4 }
 0x265   : > { %v3005_v23 = vsel %vm2877_vm15, %v2682_v42, %v2941_v35  ;;  %v2477_v51 = vadd.f32 %v2476_v21, %v2188_v52  ;;  %v2191_v3 = vadd.f32 %v2190_v53, %v6281_v12  ;;  %v2192_v58 = vpop.f32.mrb[163].mxu0  ;;  %v2481_v1 = vpop.f32.mrb[163].mxu1 }
 0x266   : > { %v3061_v62 = vpack.c.bf16 %v3005_v23, %v3004_v36 }
 0x267   : > { %v2683_v39 = vadd.f32 %v4946_v19, %v2477_v51  ;;  %v2480_v8 = vadd.f32 %v2479_v59, %v2191_v3 }
 0x268   : > { %5562 = vmatmul.mubr.bf16.gmra.mrb[12].mxu0 %v3061_v62  ;;  %5642 = vmatmul.mubr.bf16.gmra.mrb[12].mxu1 %v3061_v62 }
 0x269   : > { %v2942_v14 = vmul.f32 0.05, %v2683_v39  ;;  %v2684_v41 = vadd.f32 %v4947_v49, %v2480_v8  ;;  %vm2878_vm0 = vcmp.ge.f32.partialorder %v2683_v39, 0.0 }
 0x26a   : > { %v2195_v13 = vpop.f32.mrb[164].mxu0  ;;  %v2484_v5 = vpop.f32.mrb[164].mxu1 }
 0x26b   : > { %vm2879_vm1 = vcmp.ge.f32.partialorder %v2684_v41, 0.0  ;;  %v2943_v33 = vmul.f32 0.05, %v2684_v41  ;;  %v2196_v29 = vadd.f32 %v2195_v13, %v6285_v27  ;;  %v2197_v12 = vpop.f32.mrb[165].mxu0  ;;  %v2486_v34 = vpop.f32.mrb[165].mxu1  ;;  %v3006_v18 = vsel %vm2878_vm0, %v2683_v39, %v2942_v14  ;;  %v5369_v27 = vld [vmem:[%s6468_s10 + $0x50] sm:$0xff]  }
 0x26c   : > { %v2198_v37 = vpop.f32.mrb[166].mxu0  ;;  %v2487_v50 = vpop.f32.mrb[166].mxu1  ;;  %v4955_v53 = vunpack.c.h.bf16 %v5369_v27 }
 0x26d   : > { %v2485_v43 = vadd.f32 %v2484_v5, %v2196_v29  ;;  %v2199_v16 = vadd.f32 %v2198_v37, %v6287_v31  ;;  %v2200_v10 = vpop.f32.mrb[167].mxu0  ;;  %v3007_v28 = vsel %vm2879_vm1, %v2684_v41, %v2943_v33  ;;  %v2489_v11 = vpop.f32.mrb[167].mxu1  ;;  %v4954_v31 = vunpack.c.l.bf16 %v5369_v27 }
 0x26e   : > { %v3062_v15 = vpack.c.bf16 %v3007_v28, %v3006_v18 }
 0x26f   : > { %v2685_v30 = vadd.f32 %v4950_v0, %v2485_v43  ;;  %v2488_v46 = vadd.f32 %v2487_v50, %v2199_v16 }
 0x270   : > { %5565 = vmatprep.mubr.bf16.mxu0 %v3062_v15  ;;  %5645 = vmatprep.mubr.bf16.mxu1 %v3062_v15 }
 0x271   : > { %v2944_v22 = vmul.f32 0.05, %v2685_v30  ;;  %v2686_v42 = vadd.f32 %v4951_v26, %v2488_v46  ;;  %vm2880_vm2 = vcmp.ge.f32.partialorder %v2685_v30, 0.0 }
 0x272   : > { %v2203_v61 = vpop.f32.mrb[168].mxu0  ;;  %v2492_v19 = vpop.f32.mrb[168].mxu1 }
 0x273   : > { %vm2881_vm3 = vcmp.ge.f32.partialorder %v2686_v42, 0.0  ;;  %v2945_v35 = vmul.f32 0.05, %v2686_v42  ;;  %v2204_v52 = vadd.f32 %v2203_v61, %v6297_v47  ;;  %v2205_v21 = vpop.f32.mrb[169].mxu0  ;;  %v2494_v55 = vpop.f32.mrb[169].mxu1  ;;  %v3008_v49 = vsel %vm2880_vm2, %v2685_v30, %v2944_v22  ;;  %v5370_v47 = vld [vmem:[%s6468_s10 + $0x58] sm:$0xff]  }
 0x274   : > { %v2206_v44 = vpop.f32.mrb[170].mxu0  ;;  %v2495_v3 = vpop.f32.mrb[170].mxu1  ;;  %v4958_v33 = vunpack.c.l.bf16 %v5370_v47  ;;  %v4959_v12 = vunpack.c.h.bf16 %v5370_v47 }
 0x275   : > { %v3009_v36 = vsel %vm2881_vm3, %v2686_v42, %v2945_v35  ;;  %v2493_v23 = vadd.f32 %v2492_v19, %v2204_v52  ;;  %v2207_v51 = vadd.f32 %v2206_v44, %v6299_v56  ;;  %v2208_v59 = vpop.f32.mrb[171].mxu0  ;;  %v2497_v62 = vpop.f32.mrb[171].mxu1 }
 0x276   : > { %v3063_v58 = vpack.c.bf16 %v3009_v36, %v3008_v49 }
 0x277   : > { %v2687_v1 = vadd.f32 %v4954_v31, %v2493_v23  ;;  %v2496_v39 = vadd.f32 %v2495_v3, %v2207_v51 }
 0x278   : > { %5566 = vmatmul.mubr.bf16.gmra.mrb[16].mxu0 %v3063_v58  ;;  %5646 = vmatmul.mubr.bf16.gmra.mrb[16].mxu1 %v3063_v58 }
 0x279   : > { %v2946_v8 = vmul.f32 0.05, %v2687_v1  ;;  %v2688_v4 = vadd.f32 %v4955_v53, %v2496_v39  ;;  %vm2882_vm4 = vcmp.ge.f32.partialorder %v2687_v1, 0.0 }
 0x27a   : > { %v2211_v14 = vpop.f32.mrb[172].mxu0  ;;  %v2500_v29 = vpop.f32.mrb[172].mxu1 }
 0x27b   : > { %vm2883_vm5 = vcmp.ge.f32.partialorder %v2688_v4, 0.0  ;;  %v2947_v41 = vmul.f32 0.05, %v2688_v4  ;;  %v2212_v13 = vadd.f32 %v2211_v14, %v6303_v7  ;;  %v2213_v56 = vpop.f32.mrb[173].mxu0  ;;  %v2502_v0 = vpop.f32.mrb[173].mxu1  ;;  %v3010_v16 = vsel %vm2882_vm4, %v2687_v1, %v2946_v8  ;;  %v5371_v7 = vld [vmem:[%s6468_s10 + $0x60] sm:$0xff]  }
 0x27c   : > { %v2214_v5 = vpop.f32.mrb[174].mxu0  ;;  %v2503_v26 = vpop.f32.mrb[174].mxu1  ;;  %v4963_v31 = vunpack.c.h.bf16 %v5371_v7 }
 0x27d   : > { %v2501_v34 = vadd.f32 %v2500_v29, %v2212_v13  ;;  %v2215_v37 = vadd.f32 %v2214_v5, %v6305_v17  ;;  %v2216_v43 = vpop.f32.mrb[175].mxu0  ;;  %v3011_v50 = vsel %vm2883_vm5, %v2688_v4, %v2947_v41  ;;  %v2505_v10 = vpop.f32.mrb[175].mxu1  ;;  %v4962_v17 = vunpack.c.l.bf16 %v5371_v7 }
 0x27e   : > { %v3064_v18 = vpack.c.bf16 %v3011_v50, %v3010_v16 }
 0x27f   : > { %v2689_v28 = vadd.f32 %v4958_v33, %v2501_v34  ;;  %v2504_v11 = vadd.f32 %v2503_v26, %v2215_v37 }
 0x280   : > { %5569 = vmatprep.mubr.bf16.mxu0 %v3064_v18  ;;  %5649 = vmatprep.mubr.bf16.mxu1 %v3064_v18 }
 0x281   : > { %v2948_v15 = vmul.f32 0.05, %v2689_v28  ;;  %v2690_v30 = vadd.f32 %v4959_v12, %v2504_v11  ;;  %vm2884_vm6 = vcmp.ge.f32.partialorder %v2689_v28, 0.0 }
 0x282   : > { %v2219_v46 = vpop.f32.mrb[176].mxu0  ;;  %v2508_v42 = vpop.f32.mrb[176].mxu1 }
 0x283   : > { %vm2885_vm7 = vcmp.ge.f32.partialorder %v2690_v30, 0.0  ;;  %v2949_v27 = vmul.f32 0.05, %v2690_v30  ;;  %v2220_v22 = vadd.f32 %v2219_v46, %v6309_v32  ;;  %v2221_v61 = vpop.f32.mrb[177].mxu0  ;;  %v2510_v35 = vpop.f32.mrb[177].mxu1  ;;  %v3012_v19 = vsel %vm2884_vm6, %v2689_v28, %v2948_v15  ;;  %v5372_v32 = vld [vmem:[%s6468_s10 + $0x68] sm:$0xff]  }
 0x284   : > { %v2222_v52 = vpop.f32.mrb[178].mxu0  ;;  %v2511_v53 = vpop.f32.mrb[178].mxu1  ;;  %v4966_v47 = vunpack.c.l.bf16 %v5372_v32  ;;  %v4967_v41 = vunpack.c.h.bf16 %v5372_v32 }
 0x285   : > { %v3013_v21 = vsel %vm2885_vm7, %v2690_v30, %v2949_v27  ;;  %v2509_v55 = vadd.f32 %v2508_v42, %v2220_v22  ;;  %v2223_v44 = vadd.f32 %v2222_v52, %v6311_v38  ;;  %v2224_v49 = vpop.f32.mrb[179].mxu0  ;;  %v2513_v23 = vpop.f32.mrb[179].mxu1 }
 0x286   : > { %v3065_v36 = vpack.c.bf16 %v3013_v21, %v3012_v19 }
 0x287   : > { %v2691_v51 = vadd.f32 %v4962_v17, %v2509_v55  ;;  %v2512_v3 = vadd.f32 %v2511_v53, %v2223_v44 }
 0x288   : > { %5570 = vmatmul.mubr.bf16.gmra.mrb[20].mxu0 %v3065_v36  ;;  %5650 = vmatmul.mubr.bf16.gmra.mrb[20].mxu1 %v3065_v36 }
 0x289   : > { %v2950_v59 = vmul.f32 0.05, %v2691_v51  ;;  %v2692_v58 = vadd.f32 %v4963_v31, %v2512_v3  ;;  %vm2886_vm8 = vcmp.ge.f32.partialorder %v2691_v51, 0.0 }
 0x28a   : > { %v2227_v62 = vpop.f32.mrb[180].mxu0  ;;  %v2516_v8 = vpop.f32.mrb[180].mxu1 }
 0x28b   : > { %vm2887_vm9 = vcmp.ge.f32.partialorder %v2692_v58, 0.0  ;;  %v2951_v1 = vmul.f32 0.05, %v2692_v58  ;;  %v2228_v39 = vadd.f32 %v2227_v62, %v6315_v57  ;;  %v2229_v38 = vpop.f32.mrb[181].mxu0  ;;  %v2518_v4 = vpop.f32.mrb[181].mxu1  ;;  %v3014_v0 = vsel %vm2886_vm8, %v2691_v51, %v2950_v59  ;;  %v5373_v57 = vld [vmem:[%s6468_s10 + $0x70] sm:$0xff]  }
 0x28c   : > { %v2230_v14 = vpop.f32.mrb[182].mxu0  ;;  %v2519_v29 = vpop.f32.mrb[182].mxu1  ;;  %v4971_v30 = vunpack.c.h.bf16 %v5373_v57 }
 0x28d   : > { %v2517_v13 = vadd.f32 %v2516_v8, %v2228_v39  ;;  %v2231_v33 = vadd.f32 %v2230_v14, %v6317_v63  ;;  %v2232_v56 = vpop.f32.mrb[183].mxu0  ;;  %v3015_v5 = vsel %vm2887_vm9, %v2692_v58, %v2951_v1  ;;  %v2521_v12 = vpop.f32.mrb[183].mxu1  ;;  %v4970_v63 = vunpack.c.l.bf16 %v5373_v57 }
 0x28e   : > { %v3066_v34 = vpack.c.bf16 %v3015_v5, %v3014_v0 }
 0x28f   : > { %v2693_v37 = vadd.f32 %v4966_v47, %v2517_v13  ;;  %v2520_v26 = vadd.f32 %v2519_v29, %v2231_v33 }
 0x290   : > { %5573 = vmatprep.mubr.bf16.mxu0 %v3066_v34  ;;  %5653 = vmatprep.mubr.bf16.mxu1 %v3066_v34 }
 0x291   : > { %v2952_v43 = vmul.f32 0.05, %v2693_v37  ;;  %v2694_v16 = vadd.f32 %v4967_v41, %v2520_v26  ;;  %vm2888_vm10 = vcmp.ge.f32.partialorder %v2693_v37, 0.0 }
 0x292   : > { %v2235_v50 = vpop.f32.mrb[184].mxu0  ;;  %v2524_v28 = vpop.f32.mrb[184].mxu1 }
 0x293   : > { %vm2889_vm11 = vcmp.ge.f32.partialorder %v2694_v16, 0.0  ;;  %v2953_v10 = vmul.f32 0.05, %v2694_v16  ;;  %v2236_v18 = vadd.f32 %v2235_v50, %v6327_v24  ;;  %v2237_v11 = vpop.f32.mrb[185].mxu0  ;;  %v2526_v7 = vpop.f32.mrb[185].mxu1  ;;  %v3016_v46 = vsel %vm2888_vm10, %v2693_v37, %v2952_v43  ;;  %v5374_v24 = vld [vmem:[%s6468_s10 + $0x78] sm:$0xff]  }
 0x294   : > { %v2238_v15 = vpop.f32.mrb[186].mxu0  ;;  %v2527_v42 = vpop.f32.mrb[186].mxu1  ;;  %v4974_v36 = vunpack.c.l.bf16 %v5374_v24  ;;  %v4975_v32 = vunpack.c.h.bf16 %v5374_v24 }
 0x295   : > { %v3017_v27 = vsel %vm2889_vm11, %v2694_v16, %v2953_v10  ;;  %v2525_v22 = vadd.f32 %v2524_v28, %v2236_v18  ;;  %v2239_v17 = vadd.f32 %v2238_v15, %v6329_v9  ;;  %v2240_v61 = vpop.f32.mrb[187].mxu0  ;;  %v2529_v52 = vpop.f32.mrb[187].mxu1 }
 0x296   : > { %v3067_v35 = vpack.c.bf16 %v3017_v27, %v3016_v46 }
 0x297   : > { %v2695_v31 = vadd.f32 %v4970_v63, %v2525_v22  ;;  %v2528_v19 = vadd.f32 %v2527_v42, %v2239_v17 }
 0x298   : > { %5574 = vmatmul.mubr.bf16.gmra.mrb[24].mxu0 %v3067_v35  ;;  %5654 = vmatmul.mubr.bf16.gmra.mrb[24].mxu1 %v3067_v35 }
 0x299   : > { %v2954_v21 = vmul.f32 0.05, %v2695_v31  ;;  %v2696_v55 = vadd.f32 %v4971_v30, %v2528_v19  ;;  %vm2890_vm12 = vcmp.ge.f32.partialorder %v2695_v31, 0.0 }
 0x29a   : > { %v2243_v44 = vpop.f32.mrb[188].mxu0  ;;  %v2532_v23 = vpop.f32.mrb[188].mxu1 }
 0x29b   : > { %vm2891_vm13 = vcmp.ge.f32.partialorder %v2696_v55, 0.0  ;;  %v2955_v53 = vmul.f32 0.05, %v2696_v55  ;;  %v2244_v49 = vadd.f32 %v2243_v44, %v6333_v48  ;;  %v2245_v9 = vpop.f32.mrb[189].mxu0  ;;  %v2534_v51 = vpop.f32.mrb[189].mxu1  ;;  %v3018_v39 = vsel %vm2890_vm12, %v2695_v31, %v2954_v21  ;;  %v5375_v48 = vld [vmem:[%s6468_s10 + $0x80] sm:$0xff]  }
 0x29c   : > { %v2246_v3 = vpop.f32.mrb[190].mxu0  ;;  %v2535_v62 = vpop.f32.mrb[190].mxu1  ;;  %v4979_v37 = vunpack.c.h.bf16 %v5375_v48 }
 0x29d   : > { %v2533_v59 = vadd.f32 %v2532_v23, %v2244_v49  ;;  %v2247_v58 = vadd.f32 %v2246_v3, %v6335_v60  ;;  %v2248_v1 = vpop.f32.mrb[191].mxu0  ;;  %v3019_v47 = vsel %vm2891_vm13, %v2696_v55, %v2955_v53  ;;  %v2537_v8 = vpop.f32.mrb[191].mxu1  ;;  %v4978_v60 = vunpack.c.l.bf16 %v5375_v48 }
 0x29e   : > { %v3068_v38 = vpack.c.bf16 %v3019_v47, %v3018_v39 }
 0x29f   : > { %v2697_v4 = vadd.f32 %v4974_v36, %v2533_v59  ;;  %v2536_v14 = vadd.f32 %v2535_v62, %v2247_v58 }
 0x2a0   : > { %5577 = vmatprep.mubr.bf16.mxu0 %v3068_v38  ;;  %5657 = vmatprep.mubr.bf16.mxu1 %v3068_v38 }
 0x2a1   : > { %v2956_v41 = vmul.f32 0.05, %v2697_v4  ;;  %v2698_v13 = vadd.f32 %v4975_v32, %v2536_v14  ;;  %vm2892_vm14 = vcmp.ge.f32.partialorder %v2697_v4, 0.0 }
 0x2a2   : > { %v2251_v33 = vpop.f32.mrb[192].mxu0  ;;  %v2540_v0 = vpop.f32.mrb[192].mxu1 }
 0x2a3   : > { %vm2893_vm15 = vcmp.ge.f32.partialorder %v2698_v13, 0.0  ;;  %v2957_v29 = vmul.f32 0.05, %v2698_v13  ;;  %v2252_v56 = vadd.f32 %v2251_v33, %v6339_v2  ;;  %v2253_v5 = vpop.f32.mrb[193].mxu0  ;;  %v2542_v12 = vpop.f32.mrb[193].mxu1  ;;  %v3020_v26 = vsel %vm2892_vm14, %v2697_v4, %v2956_v41  ;;  %v5376_v2 = vld [vmem:[%s6468_s10 + $0x88] sm:$0xff]  }
 0x2a4   : > { %v2254_v34 = vpop.f32.mrb[194].mxu0  ;;  %v2543_v50 = vpop.f32.mrb[194].mxu1  ;;  %v4982_v22 = vunpack.c.l.bf16 %v5376_v2  ;;  %v4983_v35 = vunpack.c.h.bf16 %v5376_v2 }
 0x2a5   : > { %v3021_v57 = vsel %vm2893_vm15, %v2698_v13, %v2957_v29  ;;  %v2541_v43 = vadd.f32 %v2540_v0, %v2252_v56  ;;  %v2255_v16 = vadd.f32 %v2254_v34, %v6341_v25  ;;  %v2256_v10 = vpop.f32.mrb[195].mxu0  ;;  %v2545_v63 = vpop.f32.mrb[195].mxu1 }
 0x2a6   : > { %v3069_v18 = vpack.c.bf16 %v3021_v57, %v3020_v26 }
 0x2a7   : > { %v2699_v28 = vadd.f32 %v4978_v60, %v2541_v43  ;;  %v2544_v11 = vadd.f32 %v2543_v50, %v2255_v16  ;;  %v6792_v50 = vld [vmem:[#allocation3_spill] sm:$0xff] }
 0x2a8   : > { %5578 = vmatmul.mubr.bf16.gmra.mrb[28].mxu0 %v3069_v18  ;;  %5658 = vmatmul.mubr.bf16.gmra.mrb[28].mxu1 %v3069_v18 }
 0x2a9   : > { %v2958_v7 = vmul.f32 0.05, %v2699_v28  ;;  %v2700_v15 = vadd.f32 %v4979_v37, %v2544_v11  ;;  %vm2894_vm0 = vcmp.ge.f32.partialorder %v2699_v28, 0.0 }
 0x2aa   : > { %v2259_v30 = vpop.f32.mrb[196].mxu0  ;;  %v2548_v17 = vpop.f32.mrb[196].mxu1 }
 0x2ab   : > { %vm2895_vm1 = vcmp.ge.f32.partialorder %v2700_v15, 0.0  ;;  %v2959_v46 = vmul.f32 0.05, %v2700_v15  ;;  %v2260_v27 = vadd.f32 %v2259_v30, %v6345_v40  ;;  %v2261_v25 = vpop.f32.mrb[197].mxu0  ;;  %v2550_v42 = vpop.f32.mrb[197].mxu1  ;;  %v3022_v21 = vsel %vm2894_vm0, %v2699_v28, %v2958_v7  ;;  %v5377_v40 = vld [vmem:[%s6468_s10 + $0x90] sm:$0xff]  }
 0x2ac   : > { %v2262_v61 = vpop.f32.mrb[198].mxu0  ;;  %v2551_v19 = vpop.f32.mrb[198].mxu1  ;;  %v4987_v39 = vunpack.c.h.bf16 %v5377_v40  ;;  %v6793_v25 = vld [vmem:[#allocation4_spill] sm:$0xff] }
 0x2ad   : > { %v2549_v52 = vadd.f32 %v2548_v17, %v2260_v27  ;;  %v2263_v31 = vadd.f32 %v2262_v61, %v6347_v54  ;;  %v2264_v24 = vpop.f32.mrb[199].mxu0  ;;  %v3023_v55 = vsel %vm2895_vm1, %v2700_v15, %v2959_v46  ;;  %v2553_v44 = vpop.f32.mrb[199].mxu1  ;;  %v4986_v54 = vunpack.c.l.bf16 %v5377_v40 }
 0x2ae   : > { %v3070_v53 = vpack.c.bf16 %v3023_v55, %v3022_v21 }
 0x2af   : > { %v2701_v49 = vadd.f32 %v4982_v22, %v2549_v52  ;;  %v2552_v36 = vadd.f32 %v2551_v19, %v2263_v31 }
 0x2b0   : > { %5581 = vmatprep.mubr.bf16.mxu0 %v3070_v53  ;;  %5661 = vmatprep.mubr.bf16.mxu1 %v3070_v53  ;;  %v6794_v53 = vld [vmem:[#allocation5_spill] sm:$0xff] }
 0x2b1   : > { %v2960_v23 = vmul.f32 0.05, %v2701_v49  ;;  %v2702_v9 = vadd.f32 %v4983_v35, %v2552_v36  ;;  %vm2896_vm2 = vcmp.ge.f32.partialorder %v2701_v49, 0.0 }
 0x2b2   : > { %v2267_v51 = vpop.f32.mrb[200].mxu0  ;;  %v2556_v59 = vpop.f32.mrb[200].mxu1 }
 0x2b3   : > { %vm2897_vm3 = vcmp.ge.f32.partialorder %v2702_v9, 0.0  ;;  %v2961_v3 = vmul.f32 0.05, %v2702_v9  ;;  %v2268_v32 = vadd.f32 %v2267_v51, %v6351_v6  ;;  %v2269_v58 = vpop.f32.mrb[201].mxu0  ;;  %v2558_v62 = vpop.f32.mrb[201].mxu1  ;;  %v3024_v47 = vsel %vm2896_vm2, %v2701_v49, %v2960_v23  ;;  %v5378_v6 = vld [vmem:[%s6468_s10 + $0x98] sm:$0xff]  }
 0x2b4   : > { %v2270_v1 = vpop.f32.mrb[202].mxu0  ;;  %v2559_v14 = vpop.f32.mrb[202].mxu1  ;;  %v4990_v34 = vunpack.c.l.bf16 %v5378_v6  ;;  %v4991_v43 = vunpack.c.h.bf16 %v5378_v6 }
 0x2b5   : > { %v3025_v8 = vsel %vm2897_vm3, %v2702_v9, %v2961_v3  ;;  %v2557_v38 = vadd.f32 %v2556_v59, %v2268_v32  ;;  %v2271_v4 = vadd.f32 %v2270_v1, %v6353_v20  ;;  %v2272_v48 = vpop.f32.mrb[203].mxu0  ;;  %v2561_v13 = vpop.f32.mrb[203].mxu1  ;;  %v5380_v32 = vld [vmem:[%s6468_s10 + $0xa8] sm:$0xff]   ;;  %v6795_v1 = vld [vmem:[#allocation6_spill] sm:$0xff] }
 0x2b6   : > { %v3071_v41 = vpack.c.bf16 %v3025_v8, %v3024_v47  ;;  %v4998_v47 = vunpack.c.l.bf16 %v5380_v32  ;;  %v4999_v48 = vunpack.c.h.bf16 %v5380_v32  ;;  %v6796_v13 = vld [vmem:[#allocation7_spill] sm:$0xff] }
 0x2b7   : > { %v2703_v33 = vadd.f32 %v4986_v54, %v2557_v38  ;;  %v2560_v29 = vadd.f32 %v2559_v14, %v2271_v4 }
 0x2b8   : > { %5582 = vmatmul.mubr.bf16.gmra.mrb[32].mxu0 %v3071_v41  ;;  %5662 = vmatmul.mubr.bf16.gmra.mrb[32].mxu1 %v3071_v41 }
 0x2b9   : > { %v2962_v56 = vmul.f32 0.05, %v2703_v33  ;;  %v2704_v60 = vadd.f32 %v4987_v39, %v2560_v29  ;;  %vm2898_vm4 = vcmp.ge.f32.partialorder %v2703_v33, 0.0 }
 0x2ba   : > { %v2275_v0 = vpop.f32.mrb[204].mxu0  ;;  %v2564_v37 = vpop.f32.mrb[204].mxu1 }
 0x2bb   : > { %vm2899_vm5 = vcmp.ge.f32.partialorder %v2704_v60, 0.0  ;;  %v2963_v5 = vmul.f32 0.05, %v2704_v60  ;;  %v2276_v12 = vadd.f32 %v2275_v0, %v6363_v45  ;;  %v2277_v20 = vpop.f32.mrb[205].mxu0  ;;  %v2566_v26 = vpop.f32.mrb[205].mxu1  ;;  %v3026_v28 = vsel %vm2898_vm4, %v2703_v33, %v2962_v56  ;;  %v5379_v45 = vld [vmem:[%s6468_s10 + $0xa0] sm:$0xff]  }
 0x2bc   : > { %v2278_v57 = vpop.f32.mrb[206].mxu0  ;;  %v2567_v18 = vpop.f32.mrb[206].mxu1  ;;  %v4994_v61 = vunpack.c.l.bf16 %v5379_v45  ;;  %v4995_v24 = vunpack.c.h.bf16 %v5379_v45  ;;  %v6798_v45 = vld [vmem:[#allocation9_spill] sm:$0xff] }
 0x2bd   : > { %v2565_v16 = vadd.f32 %v2564_v37, %v2276_v12  ;;  %v2279_v10 = vadd.f32 %v2278_v57, %v6792_v50  ;;  %v2280_v63 = vpop.f32.mrb[207].mxu0  ;;  %v3027_v11 = vsel %vm2899_vm5, %v2704_v60, %v2963_v5  ;;  %v2569_v2 = vpop.f32.mrb[207].mxu1  ;;  %v5381_v37 = vld [vmem:[%s6468_s10 + $0xb0] sm:$0xff]  }
 0x2be   : > { %v3072_v7 = vpack.c.bf16 %v3027_v11, %v3026_v28  ;;  %v5003_v2 = vunpack.c.h.bf16 %v5381_v37 }
 0x2bf   : > { %v2705_v15 = vadd.f32 %v4990_v34, %v2565_v16  ;;  %v2568_v30 = vadd.f32 %v2567_v18, %v2279_v10  ;;  %v6797_v16 = vld [vmem:[#allocation8_spill] sm:$0xff]  ;;  %v5002_v10 = vunpack.c.l.bf16 %v5381_v37  ;;  %v6802_v37 = vld [vmem:[#allocation13_spill] sm:$0xff] }
 0x2c0   : > { %5585 = vmatprep.mubr.bf16.mxu0 %v3072_v7  ;;  %5665 = vmatprep.mubr.bf16.mxu1 %v3072_v7 }
 0x2c1   : > { %v2964_v46 = vmul.f32 0.05, %v2705_v15  ;;  %v2706_v27 = vadd.f32 %v4991_v43, %v2568_v30  ;;  %vm2900_vm6 = vcmp.ge.f32.partialorder %v2705_v15, 0.0 }
 0x2c2   : > { %v2283_v22 = vpop.f32.mrb[208].mxu0  ;;  %v2572_v35 = vpop.f32.mrb[208].mxu1 }
 0x2c3   : > { %vm2901_vm7 = vcmp.ge.f32.partialorder %v2706_v27, 0.0  ;;  %v2965_v17 = vmul.f32 0.05, %v2706_v27  ;;  %v2284_v42 = vadd.f32 %v2283_v22, %v6793_v25  ;;  %v2285_v52 = vpop.f32.mrb[209].mxu0  ;;  %v2574_v31 = vpop.f32.mrb[209].mxu1  ;;  %v3028_v21 = vsel %vm2900_vm6, %v2705_v15, %v2964_v46 }
 0x2c4   : > { %v2286_v19 = vpop.f32.mrb[210].mxu0  ;;  %v2575_v36 = vpop.f32.mrb[210].mxu1 }
 0x2c5   : > { %v3029_v55 = vsel %vm2901_vm7, %v2706_v27, %v2965_v17  ;;  %v2573_v44 = vadd.f32 %v2572_v35, %v2284_v42  ;;  %v2287_v49 = vadd.f32 %v2286_v19, %v6794_v53  ;;  %v2288_v40 = vpop.f32.mrb[211].mxu0  ;;  %v2577_v9 = vpop.f32.mrb[211].mxu1  ;;  %v5382_v35 = vld [vmem:[%s6468_s10 + $0xb8] sm:$0xff]  }
 0x2c6   : > { %v3073_v23 = vpack.c.bf16 %v3029_v55, %v3028_v21  ;;  %v6799_v21 = vld [vmem:[#allocation10_spill] sm:$0xff] }
 0x2c7   : > { %v2707_v51 = vadd.f32 %v4994_v61, %v2573_v44  ;;  %v2576_v3 = vadd.f32 %v2575_v36, %v2287_v49  ;;  %v5006_v44 = vunpack.c.l.bf16 %v5382_v35 }
 0x2c8   : > { %5586 = vmatmul.mubr.bf16.gmra.mrb[36].mxu0 %v3073_v23  ;;  %5666 = vmatmul.mubr.bf16.gmra.mrb[36].mxu1 %v3073_v23  ;;  %v5007_v23 = vunpack.c.h.bf16 %v5382_v35 }
 0x2c9   : > { %v2966_v54 = vmul.f32 0.05, %v2707_v51  ;;  %v2708_v59 = vadd.f32 %v4995_v24, %v2576_v3  ;;  %vm2902_vm8 = vcmp.ge.f32.partialorder %v2707_v51, 0.0 }
 0x2ca   : > { %v2291_v58 = vpop.f32.mrb[212].mxu0  ;;  %v2580_v8 = vpop.f32.mrb[212].mxu1 }
 0x2cb   : > { %vm2903_vm9 = vcmp.ge.f32.partialorder %v2708_v59, 0.0  ;;  %v2967_v62 = vmul.f32 0.05, %v2708_v59  ;;  %v2292_v39 = vadd.f32 %v2291_v58, %v6795_v1  ;;  %v2293_v38 = vpop.f32.mrb[213].mxu0  ;;  %v2582_v4 = vpop.f32.mrb[213].mxu1  ;;  %v3030_v56 = vsel %vm2902_vm8, %v2707_v51, %v2966_v54  ;;  %v6800_v51 = vld [vmem:[#allocation11_spill] sm:$0xff] }
 0x2cc   : > { %v2294_v14 = vpop.f32.mrb[214].mxu0  ;;  %v2583_v29 = vpop.f32.mrb[214].mxu1 }
 0x2cd   : > { %v2581_v41 = vadd.f32 %v2580_v8, %v2292_v39  ;;  %v2295_v33 = vadd.f32 %v2294_v14, %v6796_v13  ;;  %v2296_v6 = vpop.f32.mrb[215].mxu0  ;;  %v3031_v60 = vsel %vm2903_vm9, %v2708_v59, %v2967_v62  ;;  %v2585_v0 = vpop.f32.mrb[215].mxu1  ;;  %v5383_v8 = vld [vmem:[%s6468_s10 + $0xc0] sm:$0xff]  }
 0x2ce   : > { %v3074_v5 = vpack.c.bf16 %v3031_v60, %v3030_v56  ;;  %v5011_v0 = vunpack.c.h.bf16 %v5383_v8 }
 0x2cf   : > { %v2709_v12 = vadd.f32 %v4998_v47, %v2581_v41  ;;  %v2584_v34 = vadd.f32 %v2583_v29, %v2295_v33  ;;  %v6801_v41 = vld [vmem:[#allocation12_spill] sm:$0xff]  ;;  %v5010_v33 = vunpack.c.l.bf16 %v5383_v8  ;;  %v6806_v8 = vld [vmem:[#allocation17_spill] sm:$0xff] }
 0x2d0   : > { %5589 = vmatprep.mubr.bf16.mxu0 %v3074_v5  ;;  %5669 = vmatprep.mubr.bf16.mxu1 %v3074_v5 }
 0x2d1   : > { %v2968_v20 = vmul.f32 0.05, %v2709_v12  ;;  %v2710_v26 = vadd.f32 %v4999_v48, %v2584_v34  ;;  %vm2904_vm10 = vcmp.ge.f32.partialorder %v2709_v12, 0.0 }
 0x2d2   : > { %v2299_v57 = vpop.f32.mrb[216].mxu0  ;;  %v2588_v18 = vpop.f32.mrb[216].mxu1 }
 0x2d3   : > { %vm2905_vm11 = vcmp.ge.f32.partialorder %v2710_v26, 0.0  ;;  %v2969_v43 = vmul.f32 0.05, %v2710_v26  ;;  %v2300_v50 = vadd.f32 %v2299_v57, %v6797_v16  ;;  %v2301_v63 = vpop.f32.mrb[217].mxu0  ;;  %v2590_v28 = vpop.f32.mrb[217].mxu1  ;;  %v3032_v7 = vsel %vm2904_vm10, %v2709_v12, %v2968_v20 }
 0x2d4   : > { %v2302_v11 = vpop.f32.mrb[218].mxu0  ;;  %v2591_v27 = vpop.f32.mrb[218].mxu1 }
 0x2d5   : > { %v3033_v15 = vsel %vm2905_vm11, %v2710_v26, %v2969_v43  ;;  %v2589_v30 = vadd.f32 %v2588_v18, %v2300_v50  ;;  %v2303_v46 = vadd.f32 %v2302_v11, %v6798_v45  ;;  %v2304_v22 = vpop.f32.mrb[219].mxu0  ;;  %v2593_v25 = vpop.f32.mrb[219].mxu1  ;;  %v5384_v18 = vld [vmem:[%s6468_s10 + $0xc8] sm:$0xff]  }
 0x2d6   : > { %v3075_v17 = vpack.c.bf16 %v3033_v15, %v3032_v7  ;;  %v6803_v7 = vld [vmem:[#allocation14_spill] sm:$0xff] }
 0x2d7   : > { %v2711_v42 = vadd.f32 %v5002_v10, %v2589_v30  ;;  %v2592_v61 = vadd.f32 %v2591_v27, %v2303_v46  ;;  %v5014_v30 = vunpack.c.l.bf16 %v5384_v18 }
 0x2d8   : > { %5590 = vmatmul.mubr.bf16.gmra.mrb[40].mxu0 %v3075_v17  ;;  %5670 = vmatmul.mubr.bf16.gmra.mrb[40].mxu1 %v3075_v17  ;;  %v5015_v17 = vunpack.c.h.bf16 %v5384_v18 }
 0x2d9   : > { %v2970_v52 = vmul.f32 0.05, %v2711_v42  ;;  %v2712_v31 = vadd.f32 %v5003_v2, %v2592_v61  ;;  %vm2906_vm12 = vcmp.ge.f32.partialorder %v2711_v42, 0.0 }
 0x2da   : > { %v2307_v19 = vpop.f32.mrb[220].mxu0  ;;  %v2596_v53 = vpop.f32.mrb[220].mxu1 }
 0x2db   : > { %vm2907_vm13 = vcmp.ge.f32.partialorder %v2712_v31, 0.0  ;;  %v2971_v24 = vmul.f32 0.05, %v2712_v31  ;;  %v2308_v55 = vadd.f32 %v2307_v19, %v6799_v21  ;;  %v2309_v49 = vpop.f32.mrb[221].mxu0  ;;  %v2598_v36 = vpop.f32.mrb[221].mxu1  ;;  %v3034_v59 = vsel %vm2906_vm12, %v2711_v42, %v2970_v52  ;;  %v6804_v42 = vld [vmem:[#allocation15_spill] sm:$0xff] }
 0x2dc   : > { %v2310_v40 = vpop.f32.mrb[222].mxu0  ;;  %v2599_v32 = vpop.f32.mrb[222].mxu1 }
 0x2dd   : > { %v2597_v9 = vadd.f32 %v2596_v53, %v2308_v55  ;;  %v2311_v3 = vadd.f32 %v2310_v40, %v6800_v51  ;;  %v2312_v54 = vpop.f32.mrb[223].mxu0  ;;  %v3035_v58 = vsel %vm2907_vm13, %v2712_v31, %v2971_v24  ;;  %v2601_v62 = vpop.f32.mrb[223].mxu1  ;;  %v5385_v53 = vld [vmem:[%s6468_s10 + $0xd0] sm:$0xff]  }
 0x2de   : > { %v3076_v1 = vpack.c.bf16 %v3035_v58, %v3034_v59  ;;  %v5019_v62 = vunpack.c.h.bf16 %v5385_v53 }
 0x2df   : > { %v2713_v39 = vadd.f32 %v5006_v44, %v2597_v9  ;;  %v2600_v47 = vadd.f32 %v2599_v32, %v2311_v3  ;;  %v6805_v9 = vld [vmem:[#allocation16_spill] sm:$0xff]  ;;  %v5018_v3 = vunpack.c.l.bf16 %v5385_v53  ;;  %v6810_v53 = vld [vmem:[#allocation21_spill] sm:$0xff] }
 0x2e0   : > { %5593 = vmatprep.mubr.bf16.mxu0 %v3076_v1  ;;  %5673 = vmatprep.mubr.bf16.mxu1 %v3076_v1 }
 0x2e1   : > { %v2972_v38 = vmul.f32 0.05, %v2713_v39  ;;  %v2714_v4 = vadd.f32 %v5007_v23, %v2600_v47  ;;  %vm2908_vm14 = vcmp.ge.f32.partialorder %v2713_v39, 0.0 }
 0x2e2   : > { %v2315_v14 = vpop.f32.mrb[224].mxu0  ;;  %v2604_v29 = vpop.f32.mrb[224].mxu1 }
 0x2e3   : > { %vm2909_vm15 = vcmp.ge.f32.partialorder %v2714_v4, 0.0  ;;  %v2973_v48 = vmul.f32 0.05, %v2714_v4  ;;  %v2316_v13 = vadd.f32 %v2315_v14, %v6801_v41  ;;  %v2317_v6 = vpop.f32.mrb[225].mxu0  ;;  %v2606_v56 = vpop.f32.mrb[225].mxu1  ;;  %v3036_v5 = vsel %vm2908_vm14, %v2713_v39, %v2972_v38 }
 0x2e4   : > { %v2318_v60 = vpop.f32.mrb[226].mxu0  ;;  %v2607_v26 = vpop.f32.mrb[226].mxu1 }
 0x2e5   : > { %v3037_v12 = vsel %vm2909_vm15, %v2714_v4, %v2973_v48  ;;  %v2605_v34 = vadd.f32 %v2604_v29, %v2316_v13  ;;  %v2319_v20 = vadd.f32 %v2318_v60, %v6802_v37  ;;  %v2320_v57 = vpop.f32.mrb[227].mxu0  ;;  %v2609_v16 = vpop.f32.mrb[227].mxu1  ;;  %v5386_v29 = vld [vmem:[%s6468_s10 + $0xd8] sm:$0xff]  }
 0x2e6   : > { %v3077_v43 = vpack.c.bf16 %v3037_v12, %v3036_v5  ;;  %v6807_v5 = vld [vmem:[#allocation18_spill] sm:$0xff] }
 0x2e7   : > { %v2715_v50 = vadd.f32 %v5010_v33, %v2605_v34  ;;  %v2608_v10 = vadd.f32 %v2607_v26, %v2319_v20  ;;  %v5022_v34 = vunpack.c.l.bf16 %v5386_v29 }
 0x2e8   : > { %5594 = vmatmul.mubr.bf16.gmra.mrb[44].mxu0 %v3077_v43  ;;  %5674 = vmatmul.mubr.bf16.gmra.mrb[44].mxu1 %v3077_v43  ;;  %v5023_v43 = vunpack.c.h.bf16 %v5386_v29 }
 0x2e9   : > { %v2974_v63 = vmul.f32 0.05, %v2715_v50  ;;  %v2716_v28 = vadd.f32 %v5011_v0, %v2608_v10  ;;  %vm2910_vm0 = vcmp.ge.f32.partialorder %v2715_v50, 0.0 }
 0x2ea   : > { %v2323_v11 = vpop.f32.mrb[228].mxu0  ;;  %v2612_v45 = vpop.f32.mrb[228].mxu1 }
 0x2eb   : > { %vm2911_vm1 = vcmp.ge.f32.partialorder %v2716_v28, 0.0  ;;  %v2975_v2 = vmul.f32 0.05, %v2716_v28  ;;  %v2324_v15 = vadd.f32 %v2323_v11, %v6803_v7  ;;  %v2325_v46 = vpop.f32.mrb[229].mxu0  ;;  %v2614_v27 = vpop.f32.mrb[229].mxu1  ;;  %v3038_v31 = vsel %vm2910_vm0, %v2715_v50, %v2974_v63  ;;  %v6808_v50 = vld [vmem:[#allocation19_spill] sm:$0xff] }
 0x2ec   : > { %v2326_v22 = vpop.f32.mrb[230].mxu0  ;;  %v2615_v35 = vpop.f32.mrb[230].mxu1 }
 0x2ed   : > { %v2613_v25 = vadd.f32 %v2612_v45, %v2324_v15  ;;  %v2327_v61 = vadd.f32 %v2326_v22, %v6804_v42  ;;  %v2328_v52 = vpop.f32.mrb[231].mxu0  ;;  %v3039_v19 = vsel %vm2911_vm1, %v2716_v28, %v2975_v2  ;;  %v2617_v24 = vpop.f32.mrb[231].mxu1  ;;  %v5387_v45 = vld [vmem:[%s6468_s10 + $0xe0] sm:$0xff]  }
 0x2ee   : > { %v3078_v21 = vpack.c.bf16 %v3039_v19, %v3038_v31  ;;  %v5027_v24 = vunpack.c.h.bf16 %v5387_v45 }
 0x2ef   : > { %v2717_v55 = vadd.f32 %v5014_v30, %v2613_v25  ;;  %v2616_v44 = vadd.f32 %v2615_v35, %v2327_v61  ;;  %v6809_v25 = vld [vmem:[#allocation20_spill] sm:$0xff]  ;;  %v5026_v61 = vunpack.c.l.bf16 %v5387_v45  ;;  %v6814_v45 = vld [vmem:[#allocation25_spill] sm:$0xff] }
 0x2f0   : > { %5597 = vmatprep.mubr.bf16.mxu0 %v3078_v21  ;;  %5677 = vmatprep.mubr.bf16.mxu1 %v3078_v21 }
 0x2f1   : > { %v2976_v49 = vmul.f32 0.05, %v2717_v55  ;;  %v2718_v36 = vadd.f32 %v5015_v17, %v2616_v44  ;;  %vm2912_vm2 = vcmp.ge.f32.partialorder %v2717_v55, 0.0 }
 0x2f2   : > { %v2331_v40 = vpop.f32.mrb[232].mxu0  ;;  %v2620_v32 = vpop.f32.mrb[232].mxu1 }
 0x2f3   : > { %vm2913_vm3 = vcmp.ge.f32.partialorder %v2718_v36, 0.0  ;;  %v2977_v23 = vmul.f32 0.05, %v2718_v36  ;;  %v2332_v51 = vadd.f32 %v2331_v40, %v6805_v9  ;;  %v2333_v54 = vpop.f32.mrb[233].mxu0  ;;  %v2622_v59 = vpop.f32.mrb[233].mxu1  ;;  %v3040_v1 = vsel %vm2912_vm2, %v2717_v55, %v2976_v49 }
 0x2f4   : > { %v2334_v58 = vpop.f32.mrb[234].mxu0  ;;  %v2623_v4 = vpop.f32.mrb[234].mxu1 }
 0x2f5   : > { %v3041_v39 = vsel %vm2913_vm3, %v2718_v36, %v2977_v23  ;;  %v2621_v47 = vadd.f32 %v2620_v32, %v2332_v51  ;;  %v2335_v38 = vadd.f32 %v2334_v58, %v6806_v8  ;;  %v2336_v14 = vpop.f32.mrb[235].mxu0  ;;  %v2625_v41 = vpop.f32.mrb[235].mxu1  ;;  %v5388_v32 = vld [vmem:[%s6468_s10 + $0xe8] sm:$0xff]  }
 0x2f6   : > { %v3079_v48 = vpack.c.bf16 %v3041_v39, %v3040_v1  ;;  %v6811_v1 = vld [vmem:[#allocation22_spill] sm:$0xff] }
 0x2f7   : > { %v2719_v13 = vadd.f32 %v5018_v3, %v2621_v47  ;;  %v2624_v33 = vadd.f32 %v2623_v4, %v2335_v38  ;;  %v5030_v47 = vunpack.c.l.bf16 %v5388_v32 }
 0x2f8   : > { %5598 = vmatmul.mubr.bf16.gmra.mrb[48].mxu0 %v3079_v48  ;;  %5678 = vmatmul.mubr.bf16.gmra.mrb[48].mxu1 %v3079_v48  ;;  %v5031_v48 = vunpack.c.h.bf16 %v5388_v32 }
 0x2f9   : > { %v2978_v6 = vmul.f32 0.05, %v2719_v13  ;;  %v2720_v56 = vadd.f32 %v5019_v62, %v2624_v33  ;;  %vm2914_vm4 = vcmp.ge.f32.partialorder %v2719_v13, 0.0 }
 0x2fa   : > { %v2339_v60 = vpop.f32.mrb[236].mxu0  ;;  %v2628_v37 = vpop.f32.mrb[236].mxu1 }
 0x2fb   : > { %vm2915_vm5 = vcmp.ge.f32.partialorder %v2720_v56, 0.0  ;;  %v2979_v0 = vmul.f32 0.05, %v2720_v56  ;;  %v2340_v12 = vadd.f32 %v2339_v60, %v6807_v5  ;;  %v2341_v20 = vpop.f32.mrb[237].mxu0  ;;  %v2630_v26 = vpop.f32.mrb[237].mxu1  ;;  %v3042_v28 = vsel %vm2914_vm4, %v2719_v13, %v2978_v6  ;;  %v6812_v13 = vld [vmem:[#allocation23_spill] sm:$0xff] }
 0x2fc   : > { %v2342_v57 = vpop.f32.mrb[238].mxu0  ;;  %v2631_v18 = vpop.f32.mrb[238].mxu1 }
 0x2fd   : > { %v2629_v16 = vadd.f32 %v2628_v37, %v2340_v12  ;;  %v2343_v10 = vadd.f32 %v2342_v57, %v6808_v50  ;;  %v2344_v63 = vpop.f32.mrb[239].mxu0  ;;  %v3043_v11 = vsel %vm2915_vm5, %v2720_v56, %v2979_v0  ;;  %v2633_v2 = vpop.f32.mrb[239].mxu1  ;;  %v5389_v37 = vld [vmem:[%s6468_s10 + $0xf0] sm:$0xff]  }
 0x2fe   : > { %v3080_v7 = vpack.c.bf16 %v3043_v11, %v3042_v28  ;;  %v5035_v2 = vunpack.c.h.bf16 %v5389_v37 }
 0x2ff   : > { %v2721_v15 = vadd.f32 %v5022_v34, %v2629_v16  ;;  %v2632_v30 = vadd.f32 %v2631_v18, %v2343_v10  ;;  %v6813_v16 = vld [vmem:[#allocation24_spill] sm:$0xff]  ;;  %v5034_v10 = vunpack.c.l.bf16 %v5389_v37 }
 0x300   : > { %5601 = vmatprep.mubr.bf16.mxu0 %v3080_v7  ;;  %5681 = vmatprep.mubr.bf16.mxu1 %v3080_v7 }
 0x301   : > { %v2980_v46 = vmul.f32 0.05, %v2721_v15  ;;  %v2722_v27 = vadd.f32 %v5023_v43, %v2632_v30  ;;  %vm2916_vm6 = vcmp.ge.f32.partialorder %v2721_v15, 0.0 }
 0x302   : > { %v2347_v22 = vpop.f32.mrb[240].mxu0  ;;  %v2636_v35 = vpop.f32.mrb[240].mxu1 }
 0x303   : > { %vm2917_vm7 = vcmp.ge.f32.partialorder %v2722_v27, 0.0  ;;  %v2981_v17 = vmul.f32 0.05, %v2722_v27  ;;  %v2348_v42 = vadd.f32 %v2347_v22, %v6809_v25  ;;  %v2349_v52 = vpop.f32.mrb[241].mxu0  ;;  %v2638_v31 = vpop.f32.mrb[241].mxu1  ;;  %v3044_v21 = vsel %vm2916_vm6, %v2721_v15, %v2980_v46 }
 0x304   : > { %v2350_v19 = vpop.f32.mrb[242].mxu0  ;;  %v2639_v36 = vpop.f32.mrb[242].mxu1 }
 0x305   : > { %v3045_v55 = vsel %vm2917_vm7, %v2722_v27, %v2981_v17  ;;  %v2637_v44 = vadd.f32 %v2636_v35, %v2348_v42  ;;  %v2351_v49 = vadd.f32 %v2350_v19, %v6810_v53  ;;  %v2352_v40 = vpop.f32.mrb[243].mxu0  ;;  %v2641_v9 = vpop.f32.mrb[243].mxu1  ;;  %v5390_v35 = vld [vmem:[%s6468_s10 + $0xf8] sm:$0xff]  }
 0x306   : > { %v3081_v23 = vpack.c.bf16 %v3045_v55, %v3044_v21  ;;  %v6815_v21 = vld [vmem:[#allocation26_spill] sm:$0xff] }
 0x307   : > { %v2723_v51 = vadd.f32 %v5026_v61, %v2637_v44  ;;  %v2640_v3 = vadd.f32 %v2639_v36, %v2351_v49  ;;  %v5038_v44 = vunpack.c.l.bf16 %v5390_v35 }
 0x308   : > { %5602 = vmatmul.mubr.bf16.gmra.mrb[52].mxu0 %v3081_v23  ;;  %5682 = vmatmul.mubr.bf16.gmra.mrb[52].mxu1 %v3081_v23  ;;  %v5039_v23 = vunpack.c.h.bf16 %v5390_v35 }
 0x309   : > { %v2982_v54 = vmul.f32 0.05, %v2723_v51  ;;  %v2724_v59 = vadd.f32 %v5027_v24, %v2640_v3  ;;  %vm2918_vm8 = vcmp.ge.f32.partialorder %v2723_v51, 0.0 }
 0x30a   : > { %v2355_v58 = vpop.f32.mrb[244].mxu0  ;;  %v2644_v8 = vpop.f32.mrb[244].mxu1 }
 0x30b   : > { %vm2919_vm9 = vcmp.ge.f32.partialorder %v2724_v59, 0.0  ;;  %v2983_v62 = vmul.f32 0.05, %v2724_v59  ;;  %v2356_v39 = vadd.f32 %v2355_v58, %v6811_v1  ;;  %v2357_v38 = vpop.f32.mrb[245].mxu0  ;;  %v2646_v4 = vpop.f32.mrb[245].mxu1  ;;  %v3046_v56 = vsel %vm2918_vm8, %v2723_v51, %v2982_v54  ;;  %v6816_v51 = vld [vmem:[#allocation27_spill] sm:$0xff] }
 0x30c   : > { %v2358_v14 = vpop.f32.mrb[246].mxu0  ;;  %v2647_v29 = vpop.f32.mrb[246].mxu1 }
 0x30d   : > { %v2645_v41 = vadd.f32 %v2644_v8, %v2356_v39  ;;  %v2359_v33 = vadd.f32 %v2358_v14, %v6812_v13  ;;  %v2360_v6 = vpop.f32.mrb[247].mxu0  ;;  %v3047_v60 = vsel %vm2919_vm9, %v2724_v59, %v2983_v62  ;;  %v2649_v0 = vpop.f32.mrb[247].mxu1  ;;  %v6607_v14 = vld [vmem:[%s6763_s5] ss:$0 sm:$0xff] }
 0x30e   : > { %v3082_v5 = vpack.c.bf16 %v3047_v60, %v3046_v56 }
 0x30f   : > { %v2725_v12 = vadd.f32 %v5030_v47, %v2645_v41  ;;  %v2648_v34 = vadd.f32 %v2647_v29, %v2359_v33 }
 0x310   : > { %5605 = vmatprep.mubr.bf16.mxu0 %v3082_v5  ;;  %5685 = vmatprep.mubr.bf16.mxu1 %v3082_v5 }
 0x311   : > { %v2984_v20 = vmul.f32 0.05, %v2725_v12  ;;  %v2726_v26 = vadd.f32 %v5031_v48, %v2648_v34  ;;  %vm2920_vm10 = vcmp.ge.f32.partialorder %v2725_v12, 0.0 }
 0x312   : > { %v2363_v57 = vpop.f32.mrb[248].mxu0  ;;  %v2652_v18 = vpop.f32.mrb[248].mxu1 }
 0x313   : > { %vm2921_vm11 = vcmp.ge.f32.partialorder %v2726_v26, 0.0  ;;  %v2985_v43 = vmul.f32 0.05, %v2726_v26  ;;  %v2364_v50 = vadd.f32 %v2363_v57, %v6813_v16  ;;  %v2365_v63 = vpop.f32.mrb[249].mxu0  ;;  %v2654_v28 = vpop.f32.mrb[249].mxu1  ;;  %v3048_v7 = vsel %vm2920_vm10, %v2725_v12, %v2984_v20 }
 0x314   : > { %v2366_v11 = vpop.f32.mrb[250].mxu0  ;;  %v2655_v27 = vpop.f32.mrb[250].mxu1 }
 0x315   : > { %v3049_v15 = vsel %vm2921_vm11, %v2726_v26, %v2985_v43  ;;  %v2653_v30 = vadd.f32 %v2652_v18, %v2364_v50  ;;  %v2367_v46 = vadd.f32 %v2366_v11, %v6814_v45  ;;  %v2368_v22 = vpop.f32.mrb[251].mxu0  ;;  %v2657_v25 = vpop.f32.mrb[251].mxu1 }
 0x316   : > { %v3083_v17 = vpack.c.bf16 %v3049_v15, %v3048_v7 }
 0x317   : > { %v2727_v42 = vadd.f32 %v5034_v10, %v2653_v30  ;;  %v2656_v61 = vadd.f32 %v2655_v27, %v2367_v46 }
 0x318   : > { %5606 = vmatmul.mubr.bf16.gmra.mrb[56].mxu0 %v3083_v17  ;;  %5686 = vmatmul.mubr.bf16.gmra.mrb[56].mxu1 %v3083_v17 }
 0x319   : > { %v2986_v52 = vmul.f32 0.05, %v2727_v42  ;;  %v2728_v31 = vadd.f32 %v5035_v2, %v2656_v61  ;;  %vm2922_vm12 = vcmp.ge.f32.partialorder %v2727_v42, 0.0 }
 0x31a   : > { %v2371_v19 = vpop.f32.mrb[252].mxu0  ;;  %v2660_v53 = vpop.f32.mrb[252].mxu1 }
 0x31b   : > { %vm2923_vm13 = vcmp.ge.f32.partialorder %v2728_v31, 0.0  ;;  %v2987_v24 = vmul.f32 0.05, %v2728_v31  ;;  %v2372_v55 = vadd.f32 %v2371_v19, %v6815_v21  ;;  %v2373_v49 = vpop.f32.mrb[253].mxu0  ;;  %v2662_v36 = vpop.f32.mrb[253].mxu1  ;;  %v3050_v59 = vsel %vm2922_vm12, %v2727_v42, %v2986_v52 }
 0x31c   : > { %v2374_v40 = vpop.f32.mrb[254].mxu0  ;;  %v2663_v32 = vpop.f32.mrb[254].mxu1 }
 0x31d   : > { %v2661_v9 = vadd.f32 %v2660_v53, %v2372_v55  ;;  %v2375_v3 = vadd.f32 %v2374_v40, %v6816_v51  ;;  %v2376_v54 = vpop.f32.mrb[255].mxu0  ;;  %v3051_v58 = vsel %vm2923_vm13, %v2728_v31, %v2987_v24  ;;  %v2665_v62 = vpop.f32.mrb[255].mxu1 }
 0x31e   : > { %v3084_v1 = vpack.c.bf16 %v3051_v58, %v3050_v59 }
 0x31f   : > { %v2729_v39 = vadd.f32 %v5038_v44, %v2661_v9  ;;  %v2664_v47 = vadd.f32 %v2663_v32, %v2375_v3 }
 0x320   : > { %5609 = vmatprep.mubr.bf16.mxu0 %v3084_v1  ;;  %5689 = vmatprep.mubr.bf16.mxu1 %v3084_v1 }
 0x321   : > { %v2988_v8 = vmul.f32 0.05, %v2729_v39  ;;  %v2730_v38 = vadd.f32 %v5039_v23, %v2664_v47  ;;  %vm2924_vm14 = vcmp.ge.f32.partialorder %v2729_v39, 0.0 }
 0x322   : > { %v5551_v4 = vpop.f32.mrb[0].mxu0  ;;  %v5631_v41 = vpop.f32.mrb[0].mxu1 }
 0x323   : > { %vm2925_vm15 = vcmp.ge.f32.partialorder %v2730_v38, 0.0  ;;  %v2989_v48 = vmul.f32 0.05, %v2730_v38  ;;  %v3184_v13 = vpop.f32.mrb[1].mxu0  ;;  %v3864_v33 = vpop.f32.mrb[1].mxu1  ;;  %v3052_v6 = vsel %vm2924_vm14, %v2729_v39, %v2988_v8  ;;  %v3873_v34 = vadd.f32 %v5631_v41, %v6607_v14 }
 0x324   : > { %v5552_v29 = vpop.f32.mrb[2].mxu0  ;;  %v5632_v0 = vpop.f32.mrb[2].mxu1  ;;  %v3865_v57 = vadd.f32 %v6607_v14, %v3864_v33 }
 0x325   : > { %v3053_v56 = vsel %vm2925_vm15, %v2730_v38, %v2989_v48  ;;  %v5048_v60 = vpack.c.bf16 %v5552_v29, %v5551_v4  ;;  %v3187_v5 = vpop.f32.mrb[3].mxu0  ;;  %v3876_v37 = vadd.f32 %v5632_v0, %v6607_v14  ;;  %v3867_v26 = vpop.f32.mrb[3].mxu1 }
 0x326   : > { %v3085_v12 = vpack.c.bf16 %v3053_v56, %v3052_v6  ;;  %v5043_v20 = vpack.c.bf16 %v3187_v5, %v3184_v13  ;;  %v3868_v43 = vadd.f32 %v6607_v14, %v3867_v26 }
 0x327   : > { %5391 = vst [vmem:[%s6613_s14 + $0x8] sm:$0xff] %v5048_v60   ;;  %v5208_v16 = vpack.c.bf16 %v3876_v37, %v3873_v34 }
 0x328   : > { %5044 = vst [vmem:[%s6613_s14] sm:$0xff] %v5043_v20   ;;  %5610 = vmatmul.mubr.bf16.gmra.mrb[60].mxu0 %v3085_v12  ;;  %5690 = vmatmul.mubr.bf16.gmra.mrb[60].mxu1 %v3085_v12  ;;  %v5203_v50 = vpack.c.bf16 %v3868_v43, %v3865_v57 }
 0x329   : > { %5422 = vst [vmem:[%s6623_s17 + $0x8] sm:$0xff] %v5208_v16  }
 0x32a   : > { %v5555_v10 = vpop.f32.mrb[4].mxu0  ;;  %5204 = vst [vmem:[%s6623_s17] sm:$0xff] %v5203_v50   ;;  %v5635_v18 = vpop.f32.mrb[4].mxu1 }
 0x32b   : > { %v3200_v63 = vpop.f32.mrb[5].mxu0  ;;  %v3880_v28 = vpop.f32.mrb[5].mxu1  ;;  %v3889_v30 = vadd.f32 %v5635_v18, %v6607_v14 }
 0x32c   : > { %v5556_v11 = vpop.f32.mrb[6].mxu0  ;;  %v5636_v7 = vpop.f32.mrb[6].mxu1  ;;  %v3881_v22 = vadd.f32 %v6607_v14, %v3880_v28 }
 0x32d   : > { %v5058_v2 = vpack.c.bf16 %v5556_v11, %v5555_v10  ;;  %v3203_v15 = vpop.f32.mrb[7].mxu0  ;;  %v3892_v45 = vadd.f32 %v5636_v7, %v6607_v14  ;;  %v3883_v27 = vpop.f32.mrb[7].mxu1 }
 0x32e   : > { %v5053_v46 = vpack.c.bf16 %v3203_v15, %v3200_v63  ;;  %v3884_v17 = vadd.f32 %v6607_v14, %v3883_v27 }
 0x32f   : > { %5393 = vst [vmem:[%s6613_s14 + $0x18] sm:$0xff] %v5058_v2   ;;  %v5218_v25 = vpack.c.bf16 %v3892_v45, %v3889_v30 }
 0x330   : > { %5392 = vst [vmem:[%s6613_s14 + $0x10] sm:$0xff] %v5053_v46   ;;  %v5213_v42 = vpack.c.bf16 %v3884_v17, %v3881_v22 }
 0x331   : > { %5424 = vst [vmem:[%s6623_s17 + $0x18] sm:$0xff] %v5218_v25  }
 0x332   : > { %v5559_v61 = vpop.f32.mrb[8].mxu0  ;;  %5423 = vst [vmem:[%s6623_s17 + $0x10] sm:$0xff] %v5213_v42   ;;  %v5639_v35 = vpop.f32.mrb[8].mxu1 }
 0x333   : > { %v3216_v52 = vpop.f32.mrb[9].mxu0  ;;  %v3896_v31 = vpop.f32.mrb[9].mxu1  ;;  %v3905_v44 = vadd.f32 %v5639_v35, %v6607_v14 }
 0x334   : > { %v5560_v19 = vpop.f32.mrb[10].mxu0  ;;  %v5640_v21 = vpop.f32.mrb[10].mxu1  ;;  %v3897_v40 = vadd.f32 %v6607_v14, %v3896_v31 }
 0x335   : > { %v5068_v24 = vpack.c.bf16 %v5560_v19, %v5559_v61  ;;  %v3219_v55 = vpop.f32.mrb[11].mxu0  ;;  %v3908_v53 = vadd.f32 %v5640_v21, %v6607_v14  ;;  %v3899_v36 = vpop.f32.mrb[11].mxu1 }
 0x336   : > { %v5063_v49 = vpack.c.bf16 %v3219_v55, %v3216_v52  ;;  %v3900_v23 = vadd.f32 %v6607_v14, %v3899_v36 }
 0x337   : > { %5395 = vst [vmem:[%s6613_s14 + $0x28] sm:$0xff] %v5068_v24   ;;  %v5228_v9 = vpack.c.bf16 %v3908_v53, %v3905_v44 }
 0x338   : > { %5394 = vst [vmem:[%s6613_s14 + $0x20] sm:$0xff] %v5063_v49   ;;  %v5223_v51 = vpack.c.bf16 %v3900_v23, %v3897_v40 }
 0x339   : > { %5426 = vst [vmem:[%s6623_s17 + $0x28] sm:$0xff] %v5228_v9  }
 0x33a   : > { %5425 = vst [vmem:[%s6623_s17 + $0x20] sm:$0xff] %v5223_v51  }
 0x33b   : > { %v5563_v3 = vpop.f32.mrb[12].mxu0  ;;  %v5643_v32 = vpop.f32.mrb[12].mxu1 }
 0x33c   : > { %v3232_v54 = vpop.f32.mrb[13].mxu0  ;;  %v3912_v59 = vpop.f32.mrb[13].mxu1  ;;  %v3921_v1 = vadd.f32 %v5643_v32, %v6607_v14 }
 0x33d   : > { %v5564_v58 = vpop.f32.mrb[14].mxu0  ;;  %v5644_v62 = vpop.f32.mrb[14].mxu1  ;;  %v3913_v4 = vadd.f32 %v6607_v14, %v3912_v59 }
 0x33e   : > { %v5078_v39 = vpack.c.bf16 %v5564_v58, %v5563_v3  ;;  %v3924_v47 = vadd.f32 %v5644_v62, %v6607_v14  ;;  %v3235_v8 = vpop.f32.mrb[15].mxu0  ;;  %v3915_v38 = vpop.f32.mrb[15].mxu1 }
 0x33f   : > { %v5073_v48 = vpack.c.bf16 %v3235_v8, %v3232_v54  ;;  %v3916_v41 = vadd.f32 %v6607_v14, %v3915_v38 }
 0x340   : > { %5397 = vst [vmem:[%s6613_s14 + $0x38] sm:$0xff] %v5078_v39   ;;  %v5238_v13 = vpack.c.bf16 %v3924_v47, %v3921_v1 }
 0x341   : > { %5396 = vst [vmem:[%s6613_s14 + $0x30] sm:$0xff] %v5073_v48   ;;  %v5233_v33 = vpack.c.bf16 %v3916_v41, %v3913_v4 }
 0x342   : > { %5428 = vst [vmem:[%s6623_s17 + $0x38] sm:$0xff] %v5238_v13  }
 0x343   : > { %5427 = vst [vmem:[%s6623_s17 + $0x30] sm:$0xff] %v5233_v33  }
 0x34b   : > { %v5567_v29 = vpop.f32.mrb[16].mxu0  ;;  %v5647_v6 = vpop.f32.mrb[16].mxu1 }
 0x34c   : > { %v3248_v56 = vpop.f32.mrb[17].mxu0  ;;  %v3928_v60 = vpop.f32.mrb[17].mxu1  ;;  %v3937_v12 = vadd.f32 %v5647_v6, %v6607_v14 }
 0x34d   : > { %v5568_v0 = vpop.f32.mrb[18].mxu0  ;;  %v5648_v5 = vpop.f32.mrb[18].mxu1  ;;  %v3929_v57 = vadd.f32 %v6607_v14, %v3928_v60 }
 0x34e   : > { %v5088_v34 = vpack.c.bf16 %v5568_v0, %v5567_v29  ;;  %v3940_v37 = vadd.f32 %v5648_v5, %v6607_v14  ;;  %v3251_v20 = vpop.f32.mrb[19].mxu0  ;;  %v3931_v26 = vpop.f32.mrb[19].mxu1 }
 0x34f   : > { %v5083_v43 = vpack.c.bf16 %v3251_v20, %v3248_v56  ;;  %v3932_v16 = vadd.f32 %v6607_v14, %v3931_v26 }
 0x350   : > { %5399 = vst [vmem:[%s6613_s14 + $0x48] sm:$0xff] %v5088_v34   ;;  %v5248_v50 = vpack.c.bf16 %v3940_v37, %v3937_v12 }
 0x351   : > { %5398 = vst [vmem:[%s6613_s14 + $0x40] sm:$0xff] %v5083_v43   ;;  %v5243_v10 = vpack.c.bf16 %v3932_v16, %v3929_v57 }
 0x352   : > { %5430 = vst [vmem:[%s6623_s17 + $0x48] sm:$0xff] %v5248_v50  }
 0x353   : > { %5429 = vst [vmem:[%s6623_s17 + $0x40] sm:$0xff] %v5243_v10  }
 0x35b   : > { %v5571_v18 = vpop.f32.mrb[20].mxu0  ;;  %v5651_v63 = vpop.f32.mrb[20].mxu1 }
 0x35c   : > { %v3264_v28 = vpop.f32.mrb[21].mxu0  ;;  %v3944_v11 = vpop.f32.mrb[21].mxu1  ;;  %v3953_v15 = vadd.f32 %v5651_v63, %v6607_v14 }
 0x35d   : > { %v5572_v2 = vpop.f32.mrb[22].mxu0  ;;  %v5652_v7 = vpop.f32.mrb[22].mxu1  ;;  %v3945_v22 = vadd.f32 %v6607_v14, %v3944_v11 }
 0x35e   : > { %v5098_v30 = vpack.c.bf16 %v5572_v2, %v5571_v18  ;;  %v3956_v45 = vadd.f32 %v5652_v7, %v6607_v14  ;;  %v3267_v46 = vpop.f32.mrb[23].mxu0  ;;  %v3947_v27 = vpop.f32.mrb[23].mxu1 }
 0x35f   : > { %v5093_v17 = vpack.c.bf16 %v3267_v46, %v3264_v28  ;;  %v3948_v25 = vadd.f32 %v6607_v14, %v3947_v27 }
 0x360   : > { %5401 = vst [vmem:[%s6613_s14 + $0x58] sm:$0xff] %v5098_v30   ;;  %v5258_v42 = vpack.c.bf16 %v3956_v45, %v3953_v15 }
 0x361   : > { %5400 = vst [vmem:[%s6613_s14 + $0x50] sm:$0xff] %v5093_v17   ;;  %v5253_v61 = vpack.c.bf16 %v3948_v25, %v3945_v22 }
 0x362   : > { %5432 = vst [vmem:[%s6623_s17 + $0x58] sm:$0xff] %v5258_v42  }
 0x363   : > { %5431 = vst [vmem:[%s6623_s17 + $0x50] sm:$0xff] %v5253_v61  }
 0x36b   : > { %v5575_v35 = vpop.f32.mrb[24].mxu0  ;;  %v5655_v52 = vpop.f32.mrb[24].mxu1 }
 0x36c   : > { %v3280_v31 = vpop.f32.mrb[25].mxu0  ;;  %v3960_v19 = vpop.f32.mrb[25].mxu1  ;;  %v3969_v55 = vadd.f32 %v5655_v52, %v6607_v14 }
 0x36d   : > { %v5576_v24 = vpop.f32.mrb[26].mxu0  ;;  %v5656_v21 = vpop.f32.mrb[26].mxu1  ;;  %v3961_v40 = vadd.f32 %v6607_v14, %v3960_v19 }
 0x36e   : > { %v5108_v44 = vpack.c.bf16 %v5576_v24, %v5575_v35  ;;  %v3972_v53 = vadd.f32 %v5656_v21, %v6607_v14  ;;  %v3283_v49 = vpop.f32.mrb[27].mxu0  ;;  %v3963_v36 = vpop.f32.mrb[27].mxu1 }
 0x36f   : > { %v5103_v23 = vpack.c.bf16 %v3283_v49, %v3280_v31  ;;  %v3964_v9 = vadd.f32 %v6607_v14, %v3963_v36 }
 0x370   : > { %5403 = vst [vmem:[%s6613_s14 + $0x68] sm:$0xff] %v5108_v44   ;;  %v5268_v51 = vpack.c.bf16 %v3972_v53, %v3969_v55 }
 0x371   : > { %5402 = vst [vmem:[%s6613_s14 + $0x60] sm:$0xff] %v5103_v23   ;;  %v5263_v3 = vpack.c.bf16 %v3964_v9, %v3961_v40 }
 0x372   : > { %5434 = vst [vmem:[%s6623_s17 + $0x68] sm:$0xff] %v5268_v51  }
 0x373   : > { %5433 = vst [vmem:[%s6623_s17 + $0x60] sm:$0xff] %v5263_v3  }
 0x37b   : > { %v5579_v32 = vpop.f32.mrb[28].mxu0  ;;  %v5659_v54 = vpop.f32.mrb[28].mxu1 }
 0x37c   : > { %v3296_v59 = vpop.f32.mrb[29].mxu0  ;;  %v3976_v58 = vpop.f32.mrb[29].mxu1  ;;  %v3985_v39 = vadd.f32 %v5659_v54, %v6607_v14 }
 0x37d   : > { %v5580_v62 = vpop.f32.mrb[30].mxu0  ;;  %v5660_v1 = vpop.f32.mrb[30].mxu1  ;;  %v3977_v48 = vadd.f32 %v6607_v14, %v3976_v58 }
 0x37e   : > { %v5118_v47 = vpack.c.bf16 %v5580_v62, %v5579_v32  ;;  %v3988_v8 = vadd.f32 %v5660_v1, %v6607_v14  ;;  %v3299_v38 = vpop.f32.mrb[31].mxu0  ;;  %v3979_v4 = vpop.f32.mrb[31].mxu1 }
 0x37f   : > { %v5113_v41 = vpack.c.bf16 %v3299_v38, %v3296_v59  ;;  %v3980_v13 = vadd.f32 %v6607_v14, %v3979_v4 }
 0x380   : > { %5405 = vst [vmem:[%s6613_s14 + $0x78] sm:$0xff] %v5118_v47   ;;  %v5278_v33 = vpack.c.bf16 %v3988_v8, %v3985_v39 }
 0x381   : > { %5404 = vst [vmem:[%s6613_s14 + $0x70] sm:$0xff] %v5113_v41   ;;  %v5273_v29 = vpack.c.bf16 %v3980_v13, %v3977_v48 }
 0x382   : > { %5436 = vst [vmem:[%s6623_s17 + $0x78] sm:$0xff] %v5278_v33  }
 0x383   : > { %5435 = vst [vmem:[%s6623_s17 + $0x70] sm:$0xff] %v5273_v29  }
 0x38b   : > { %v5583_v6 = vpop.f32.mrb[32].mxu0  ;;  %v5663_v56 = vpop.f32.mrb[32].mxu1 }
 0x38c   : > { %v3312_v60 = vpop.f32.mrb[33].mxu0  ;;  %v3992_v0 = vpop.f32.mrb[33].mxu1  ;;  %v4001_v34 = vadd.f32 %v5663_v56, %v6607_v14 }
 0x38d   : > { %v5584_v5 = vpop.f32.mrb[34].mxu0  ;;  %v5664_v12 = vpop.f32.mrb[34].mxu1  ;;  %v3993_v43 = vadd.f32 %v6607_v14, %v3992_v0 }
 0x38e   : > { %v5128_v37 = vpack.c.bf16 %v5584_v5, %v5583_v6  ;;  %v4004_v20 = vadd.f32 %v5664_v12, %v6607_v14  ;;  %v3315_v26 = vpop.f32.mrb[35].mxu0  ;;  %v3995_v57 = vpop.f32.mrb[35].mxu1 }
 0x38f   : > { %v5123_v16 = vpack.c.bf16 %v3315_v26, %v3312_v60  ;;  %v3996_v50 = vadd.f32 %v6607_v14, %v3995_v57 }
 0x390   : > { %5407 = vst [vmem:[%s6613_s14 + $0x88] sm:$0xff] %v5128_v37   ;;  %v5288_v10 = vpack.c.bf16 %v4004_v20, %v4001_v34 }
 0x391   : > { %5406 = vst [vmem:[%s6613_s14 + $0x80] sm:$0xff] %v5123_v16   ;;  %v5283_v18 = vpack.c.bf16 %v3996_v50, %v3993_v43 }
 0x392   : > { %5438 = vst [vmem:[%s6623_s17 + $0x88] sm:$0xff] %v5288_v10  }
 0x393   : > { %5437 = vst [vmem:[%s6623_s17 + $0x80] sm:$0xff] %v5283_v18  }
 0x39b   : > { %v5587_v63 = vpop.f32.mrb[36].mxu0  ;;  %v5667_v28 = vpop.f32.mrb[36].mxu1 }
 0x39c   : > { %v3328_v11 = vpop.f32.mrb[37].mxu0  ;;  %v4008_v2 = vpop.f32.mrb[37].mxu1  ;;  %v4017_v30 = vadd.f32 %v5667_v28, %v6607_v14 }
 0x39d   : > { %v5588_v7 = vpop.f32.mrb[38].mxu0  ;;  %v5668_v15 = vpop.f32.mrb[38].mxu1  ;;  %v4009_v17 = vadd.f32 %v6607_v14, %v4008_v2 }
 0x39e   : > { %v5138_v45 = vpack.c.bf16 %v5588_v7, %v5587_v63  ;;  %v4020_v46 = vadd.f32 %v5668_v15, %v6607_v14  ;;  %v3331_v27 = vpop.f32.mrb[39].mxu0  ;;  %v4011_v22 = vpop.f32.mrb[39].mxu1 }
 0x39f   : > { %v5133_v25 = vpack.c.bf16 %v3331_v27, %v3328_v11  ;;  %v4012_v42 = vadd.f32 %v6607_v14, %v4011_v22 }
 0x3a0   : > { %5409 = vst [vmem:[%s6613_s14 + $0x98] sm:$0xff] %v5138_v45   ;;  %v5298_v61 = vpack.c.bf16 %v4020_v46, %v4017_v30 }
 0x3a1   : > { %5408 = vst [vmem:[%s6613_s14 + $0x90] sm:$0xff] %v5133_v25   ;;  %v5293_v35 = vpack.c.bf16 %v4012_v42, %v4009_v17 }
 0x3a2   : > { %5440 = vst [vmem:[%s6623_s17 + $0x98] sm:$0xff] %v5298_v61  }
 0x3a3   : > { %5439 = vst [vmem:[%s6623_s17 + $0x90] sm:$0xff] %v5293_v35  }
 0x3ab   : > { %v5591_v52 = vpop.f32.mrb[40].mxu0  ;;  %v5671_v31 = vpop.f32.mrb[40].mxu1 }
 0x3ac   : > { %v3344_v19 = vpop.f32.mrb[41].mxu0  ;;  %v4024_v24 = vpop.f32.mrb[41].mxu1  ;;  %v4033_v44 = vadd.f32 %v5671_v31, %v6607_v14 }
 0x3ad   : > { %v5592_v21 = vpop.f32.mrb[42].mxu0  ;;  %v5672_v55 = vpop.f32.mrb[42].mxu1  ;;  %v4025_v23 = vadd.f32 %v6607_v14, %v4024_v24 }
 0x3ae   : > { %v5148_v53 = vpack.c.bf16 %v5592_v21, %v5591_v52  ;;  %v4036_v49 = vadd.f32 %v5672_v55, %v6607_v14  ;;  %v3347_v36 = vpop.f32.mrb[43].mxu0  ;;  %v4027_v40 = vpop.f32.mrb[43].mxu1 }
 0x3af   : > { %v5143_v9 = vpack.c.bf16 %v3347_v36, %v3344_v19  ;;  %v4028_v51 = vadd.f32 %v6607_v14, %v4027_v40 }
 0x3b0   : > { %5411 = vst [vmem:[%s6613_s14 + $0xa8] sm:$0xff] %v5148_v53   ;;  %v5308_v3 = vpack.c.bf16 %v4036_v49, %v4033_v44 }
 0x3b1   : > { %5410 = vst [vmem:[%s6613_s14 + $0xa0] sm:$0xff] %v5143_v9   ;;  %v5303_v32 = vpack.c.bf16 %v4028_v51, %v4025_v23 }
 0x3b2   : > { %5442 = vst [vmem:[%s6623_s17 + $0xa8] sm:$0xff] %v5308_v3  }
 0x3b3   : > { %5441 = vst [vmem:[%s6623_s17 + $0xa0] sm:$0xff] %v5303_v32  }
 0x3bb   : > { %v5595_v54 = vpop.f32.mrb[44].mxu0  ;;  %v5675_v59 = vpop.f32.mrb[44].mxu1 }
 0x3bc   : > { %v3360_v58 = vpop.f32.mrb[45].mxu0  ;;  %v4040_v62 = vpop.f32.mrb[45].mxu1  ;;  %v4049_v47 = vadd.f32 %v5675_v59, %v6607_v14 }
 0x3bd   : > { %v5596_v1 = vpop.f32.mrb[46].mxu0  ;;  %v5676_v39 = vpop.f32.mrb[46].mxu1  ;;  %v4041_v41 = vadd.f32 %v6607_v14, %v4040_v62 }
 0x3be   : > { %v5158_v8 = vpack.c.bf16 %v5596_v1, %v5595_v54  ;;  %v4052_v38 = vadd.f32 %v5676_v39, %v6607_v14  ;;  %v3363_v4 = vpop.f32.mrb[47].mxu0  ;;  %v4043_v48 = vpop.f32.mrb[47].mxu1 }
 0x3bf   : > { %v5153_v13 = vpack.c.bf16 %v3363_v4, %v3360_v58  ;;  %v4044_v33 = vadd.f32 %v6607_v14, %v4043_v48 }
 0x3c0   : > { %5413 = vst [vmem:[%s6613_s14 + $0xb8] sm:$0xff] %v5158_v8   ;;  %v5318_v29 = vpack.c.bf16 %v4052_v38, %v4049_v47 }
 0x3c1   : > { %5412 = vst [vmem:[%s6613_s14 + $0xb0] sm:$0xff] %v5153_v13   ;;  %v5313_v6 = vpack.c.bf16 %v4044_v33, %v4041_v41 }
 0x3c2   : > { %5444 = vst [vmem:[%s6623_s17 + $0xb8] sm:$0xff] %v5318_v29  }
 0x3c3   : > { %5443 = vst [vmem:[%s6623_s17 + $0xb0] sm:$0xff] %v5313_v6  }
 0x3cb   : > { %v5599_v56 = vpop.f32.mrb[48].mxu0  ;;  %v5679_v60 = vpop.f32.mrb[48].mxu1 }
 0x3cc   : > { %v3376_v0 = vpop.f32.mrb[49].mxu0  ;;  %v4056_v5 = vpop.f32.mrb[49].mxu1  ;;  %v4065_v37 = vadd.f32 %v5679_v60, %v6607_v14 }
 0x3cd   : > { %v5600_v12 = vpop.f32.mrb[50].mxu0  ;;  %v5680_v34 = vpop.f32.mrb[50].mxu1  ;;  %v4057_v16 = vadd.f32 %v6607_v14, %v4056_v5 }
 0x3ce   : > { %v5168_v20 = vpack.c.bf16 %v5600_v12, %v5599_v56  ;;  %v4068_v26 = vadd.f32 %v5680_v34, %v6607_v14  ;;  %v3379_v57 = vpop.f32.mrb[51].mxu0  ;;  %v4059_v43 = vpop.f32.mrb[51].mxu1 }
 0x3cf   : > { %v5163_v50 = vpack.c.bf16 %v3379_v57, %v3376_v0  ;;  %v4060_v10 = vadd.f32 %v6607_v14, %v4059_v43 }
 0x3d0   : > { %5415 = vst [vmem:[%s6613_s14 + $0xc8] sm:$0xff] %v5168_v20   ;;  %v5328_v18 = vpack.c.bf16 %v4068_v26, %v4065_v37 }
 0x3d1   : > { %5414 = vst [vmem:[%s6613_s14 + $0xc0] sm:$0xff] %v5163_v50   ;;  %v5323_v63 = vpack.c.bf16 %v4060_v10, %v4057_v16 }
 0x3d2   : > { %5446 = vst [vmem:[%s6623_s17 + $0xc8] sm:$0xff] %v5328_v18  }
 0x3d3   : > { %5445 = vst [vmem:[%s6623_s17 + $0xc0] sm:$0xff] %v5323_v63  }
 0x3db   : > { %v5603_v28 = vpop.f32.mrb[52].mxu0  ;;  %v5683_v11 = vpop.f32.mrb[52].mxu1 }
 0x3dc   : > { %v3392_v2 = vpop.f32.mrb[53].mxu0  ;;  %v4072_v7 = vpop.f32.mrb[53].mxu1  ;;  %v4081_v45 = vadd.f32 %v5683_v11, %v6607_v14 }
 0x3dd   : > { %v5604_v15 = vpop.f32.mrb[54].mxu0  ;;  %v5684_v30 = vpop.f32.mrb[54].mxu1  ;;  %v4073_v25 = vadd.f32 %v6607_v14, %v4072_v7 }
 0x3de   : > { %v5178_v46 = vpack.c.bf16 %v5604_v15, %v5603_v28  ;;  %v4084_v27 = vadd.f32 %v5684_v30, %v6607_v14  ;;  %v3395_v22 = vpop.f32.mrb[55].mxu0  ;;  %v4075_v17 = vpop.f32.mrb[55].mxu1 }
 0x3df   : > { %v5173_v42 = vpack.c.bf16 %v3395_v22, %v3392_v2  ;;  %v4076_v61 = vadd.f32 %v6607_v14, %v4075_v17 }
 0x3e0   : > { %5417 = vst [vmem:[%s6613_s14 + $0xd8] sm:$0xff] %v5178_v46   ;;  %v5338_v35 = vpack.c.bf16 %v4084_v27, %v4081_v45 }
 0x3e1   : > { %5416 = vst [vmem:[%s6613_s14 + $0xd0] sm:$0xff] %v5173_v42   ;;  %v5333_v52 = vpack.c.bf16 %v4076_v61, %v4073_v25 }
 0x3e2   : > { %5448 = vst [vmem:[%s6623_s17 + $0xd8] sm:$0xff] %v5338_v35  }
 0x3e3   : > { %5447 = vst [vmem:[%s6623_s17 + $0xd0] sm:$0xff] %v5333_v52  }
 0x3eb   : > { %v5607_v31 = vpop.f32.mrb[56].mxu0  ;;  %v5687_v19 = vpop.f32.mrb[56].mxu1 }
 0x3ec   : > { %v3408_v24 = vpop.f32.mrb[57].mxu0  ;;  %v4088_v21 = vpop.f32.mrb[57].mxu1  ;;  %v4097_v53 = vadd.f32 %v5687_v19, %v6607_v14 }
 0x3ed   : > { %v5608_v55 = vpop.f32.mrb[58].mxu0  ;;  %v5688_v44 = vpop.f32.mrb[58].mxu1  ;;  %v4089_v9 = vadd.f32 %v6607_v14, %v4088_v21 }
 0x3ee   : > { %v5188_v49 = vpack.c.bf16 %v5608_v55, %v5607_v31  ;;  %v4100_v36 = vadd.f32 %v5688_v44, %v6607_v14  ;;  %v3411_v40 = vpop.f32.mrb[59].mxu0  ;;  %v4091_v23 = vpop.f32.mrb[59].mxu1 }
 0x3ef   : > { %v5183_v51 = vpack.c.bf16 %v3411_v40, %v3408_v24  ;;  %v4092_v3 = vadd.f32 %v6607_v14, %v4091_v23 }
 0x3f0   : > { %5419 = vst [vmem:[%s6613_s14 + $0xe8] sm:$0xff] %v5188_v49   ;;  %v5348_v32 = vpack.c.bf16 %v4100_v36, %v4097_v53 }
 0x3f1   : > { %5418 = vst [vmem:[%s6613_s14 + $0xe0] sm:$0xff] %v5183_v51   ;;  %v5343_v54 = vpack.c.bf16 %v4092_v3, %v4089_v9 }
 0x3f2   : > { %5450 = vst [vmem:[%s6623_s17 + $0xe8] sm:$0xff] %v5348_v32  }
 0x3f3   : > { %5449 = vst [vmem:[%s6623_s17 + $0xe0] sm:$0xff] %v5343_v54  }
 0x3fb   : > { %v5611_v59 = vpop.f32.mrb[60].mxu0  ;;  %v5691_v58 = vpop.f32.mrb[60].mxu1 }
 0x3fc   : > { %v3424_v62 = vpop.f32.mrb[61].mxu0  ;;  %v4104_v1 = vpop.f32.mrb[61].mxu1  ;;  %v4113_v8 = vadd.f32 %v5691_v58, %v6607_v14 }
 0x3fd   : > { %v5612_v39 = vpop.f32.mrb[62].mxu0  ;;  %v5692_v47 = vpop.f32.mrb[62].mxu1  ;;  %v4105_v13 = vadd.f32 %v6607_v14, %v4104_v1 }
 0x3fe   : > { %v5198_v38 = vpack.c.bf16 %v5612_v39, %v5611_v59  ;;  %v4116_v4 = vadd.f32 %v5692_v47, %v6607_v14  ;;  %v3427_v48 = vpop.f32.mrb[63].mxu0  ;;  %v4107_v41 = vpop.f32.mrb[63].mxu1 }
 0x3ff   : > { %v5193_v33 = vpack.c.bf16 %v3427_v48, %v3424_v62  ;;  %v4108_v29 = vadd.f32 %v6607_v14, %v4107_v41 }
 0x400   : > { %5421 = vst [vmem:[%s6613_s14 + $0xf8] sm:$0xff] %v5198_v38   ;;  %v5358_v6 = vpack.c.bf16 %v4116_v4, %v4113_v8 }
 0x401   : > { %5420 = vst [vmem:[%s6613_s14 + $0xf0] sm:$0xff] %v5193_v33   ;;  %v5353_v56 = vpack.c.bf16 %v4108_v29, %v4105_v13 }
 0x402   : > { %5452 = vst [vmem:[%s6623_s17 + $0xf8] sm:$0xff] %v5358_v6  }
 0x403   : > { %5451 = vst [vmem:[%s6623_s17 + $0xf0] sm:$0xff] %v5353_v56  }
 0x404 PF: > { %s18_s26 = sadd.s32 1, %s5820_s26   ;;  %s6817_s24 = smov %s5816_s25 }
 0x405   : > { %p15_p6 = scmp.ge.s32.totalorder %s18_s26, 4   ;;  %s6818_s25 = smov %s6820_s27 }
 0x407   :  { %17 = sbr.rel (!%p15_p6) target bundleno = 2 (0x2), region = 98 }

// kernel: rg_discriminator.7
= control target key start
LH: loop header
LB: loop body
LE: loop exit
PB: predicated region body
PF: predicated region fallthrough
CT: control target
= control target key end

     0   :  { %s4342_s23 = smov 0   ;;  %s5844_s0 = inlined_call_operand.vmem [shape: bf16[1024,128], index: 0, kind: input, shape index: {}]   ;;  %s5845_s1 = inlined_call_operand.vmem [shape: f32[1024,4], index: 1, kind: input, shape index: {}]   ;;  %s5846_s2 = inlined_call_operand.vmem [shape: bf16[2,1024], index: 2, kind: input, shape index: {}]   ;;  %s5847_s3 = inlined_call_operand.vmem [shape: bf16[128,256], index: 3, kind: input, shape index: {}]   ;;  %s5848_s4 = inlined_call_operand.vmem [shape: f32[4,256], index: 4, kind: input, shape index: {}]   ;;  %s5849_s5 = inlined_call_operand.vmem [shape: f32[1,256], index: 5, kind: input, shape index: {}]   ;;  %s5850_s6 = inlined_call_operand.vmem [shape: f32[128,128], index: 6, kind: input, shape index: {}]   ;;  %s5851_s7 = inlined_call_operand.vmem [shape: f32[1,128], index: 7, kind: input, shape index: {}]   ;;  %s5852_s8 = inlined_call_operand.vmem [shape: f32[128,384], index: 8, kind: input, shape index: {}]   ;;  %s5853_s9 = inlined_call_operand.vmem [shape: f32[1,384], index: 9, kind: input, shape index: {}]   ;;  %s5854_s10 = inlined_call_operand.vmem [shape: f32[384,1], index: 10, kind: input, shape index: {}]   ;;  %s5855_s11 = inlined_call_operand.<no memory space> [shape: f32[1,1], index: 11, kind: input, shape index: {}]   ;;  %s5856_s12 = inlined_call_operand.vmem [shape: f32[2,1], index: 12, kind: output, shape index: {}]  }
   0x1   :  { %v17_v0 = vstv %s5855_s11 }
   0x2   :  { %18 = vst [vmem:[#allocation3] sm:$0x1] %v17_v0 }
   0x3 LB: > { %s4348_s24 = sadd.s32 4294967295, %s4265_s23   ;;  %p3237_p0 = scmp.ge.s32.totalorder %s4265_s23, 1  ;;  %s4265_s23 = sphi %s4342_s23, %s24_s23  }
   0x4   : > { %p381_p1 = scmp.lt.s32.totalorder %s4265_s23, 3 }
   0x6   : > { %p382_p2 = pnand %p3237_p0, %p381_p1 }
   0x7   : > { %s3238_s11 = sshll.u32 (!%p382_p2), %s4348_s24, 6  ;;  %s3242_s25 = sshll.u32 (!%p382_p2), %s4348_s24, 2 }
   0x8   : > { %385 = sbr.rel (%p382_p2) target bundleno = 1471 (0x5bf), region = 68  ;;  %p428_p3 = scmp.lt.s32.totalorder (!%p382_p2), %s3238_s11, 127 }
   0x9   : > { %p440_p4 = scmp.lt.s32.totalorder (!%p382_p2), %s3242_s25, 7  ;;  %p3243_p5 = scmp.ne.s32.totalorder (!%p382_p2), %s4348_s24, 0 }
   0xf   : > { %s5858_s11 = smov (!%p428_p3, %s3238_s11), 127  ;;  %s5860_s25 = smov (!%p440_p4, %s3242_s25), 7 }
  0x10   : > { %s3239_s26 = sshll.u32 %s5858_s11, 2  ;;  %s3241_s27 = sshll.u32 %s5858_s11, 3  ;;  %v4267_v1 = vmov (!%p3243_p5), 0.0  }
  0x11   : > { %s4359_s30 = scalar_lea.vmem %s5844_s0, %s3239_s26  ;;  %s4364_s15 = scalar_lea.vmem %s5845_s1, %s3241_s27  ;;  %449 = vst [vmem:[#allocation2] sm:$0x3] (!%p3243_p5), %v4267_v1 }
  0x12   : > { %s442_s18 = scalar_lea.vmem %s5846_s2, %s5860_s25  ;;  %448 = sbr.rel (%p3243_p5) target bundleno = 25 (0x19), region = 72 }
  0x19 PF: > { %v3814_v2 = vld [vmem:[%s5847_s3 + $0x4] ss:$8 sps:$4 sm:$0xff]   ;;  %v3816_v3 = vld [vmem:[%s5847_s3] ss:$8 sps:$4 sm:$0xff]   ;;  %v4268_v4 = vmov 0.0   ;;  %v4269_v6 = vmov 0  }
  0x1a   : > { %859 = vmatprep.mubr.f32.mxu0 %v4268_v4  ;;  %1516 = vmatprep.subr.bf16.mxu1 %v3814_v2  ;;  %v3817_v5 = vld [vmem:[%s5847_s3 + $0x14] ss:$8 sps:$4 sm:$0xff]   ;;  %v3819_v7 = vld [vmem:[%s5847_s3 + $0x10] ss:$8 sps:$4 sm:$0xff]   ;;  %v3820_v8 = vld [vmem:[%s5847_s3 + $0x24] ss:$8 sps:$4 sm:$0xff]  }
  0x1b   : > { %1548 = vmatprep.mubr.bf16.mxu1 %v4269_v6  ;;  %1517 = vmatpush1.bf16.msra.mxu1 %v3816_v3  ;;  %v3822_v9 = vld [vmem:[%s5847_s3 + $0x20] ss:$8 sps:$4 sm:$0xff]   ;;  %v3823_v10 = vld [vmem:[%s5847_s3 + $0x34] ss:$8 sps:$4 sm:$0xff]   ;;  %vm790_vm0 = vcmask 1043456   ;;  %vm597_vm1 = vcmask 31744  }
  0x1c   : > { %1518 = vmatprep.subr.bf16.mxu1 %v3817_v5  ;;  %v594_v11 = vld [vmem:[%s5848_s4] sm:$0xff]  ;;  %v3825_v12 = vld [vmem:[%s5847_s3 + $0x30] ss:$8 sps:$4 sm:$0xff]   ;;  %v531_v17 = vld [vmem:[%s4364_s15 + $0x8] sm:$0xff]  ;;  %p3423_p6 = scmp.ne.s32.totalorder %s4348_s24, 1 }
  0x1d   : > { %v596_v13 = vcombine.high %v594_v11, %v594_v11  ;;  %v530_v14 = vld [vmem:[%s4364_s15] sm:$0xff]  ;;  %v3829_v18 = vld [vmem:[%s5847_s3 + $0x54] ss:$8 sps:$4 sm:$0xff]   ;;  %v3831_v19 = vld [vmem:[%s5847_s3 + $0x50] ss:$8 sps:$4 sm:$0xff]   ;;  %vm4272_vm2 = vmmov (!%p3423_p6), 0  }
  0x1e   : > { %v3826_v15 = vld [vmem:[%s5847_s3 + $0x44] ss:$8 sps:$4 sm:$0xff]   ;;  %v3828_v16 = vld [vmem:[%s5847_s3 + $0x40] ss:$8 sps:$4 sm:$0xff]   ;;  %v532_v20 = vld [vmem:[%s4364_s15 + $0x10] sm:$0xff]  ;;  %vm3183_vm7 = vcmask (!%p3423_p6), 1024  }
  0x1f   : > { %1519 = vmatpush1.bf16.msra.mxu1 %v3819_v7  ;;  %3244 = vmatprep.subr.msk.mxu0 %vm790_vm0, %v596_v13  ;;  %v3832_v21 = vld [vmem:[%s5847_s3 + $0x64] ss:$8 sps:$4 sm:$0xff]   ;;  %v3834_v22 = vld [vmem:[%s5847_s3 + $0x60] ss:$8 sps:$4 sm:$0xff]   ;;  %v533_v23 = vld [vmem:[%s4364_s15 + $0x18] sm:$0xff] }
  0x20   : > { %1520 = vmatprep.subr.bf16.mxu1 %v3820_v8  ;;  %3245 = vmatpush1.msk.msra.mxu0 %vm790_vm0, %v594_v11  ;;  %v3836_v24 = vld [vmem:[%s5847_s3 + $0x74] ss:$8 sps:$4 sm:$0xff]   ;;  %v3838_v25 = vld [vmem:[%s5847_s3 + $0x70] ss:$8 sps:$4 sm:$0xff]   ;;  %v534_v26 = vld [vmem:[%s4364_s15 + $0x20] sm:$0xff] }
  0x21   : > { %3246 = vmatmul.mubr.msk.f32.vlgmr.msra.gmra.mrb[0].mxu0 %vm597_vm1, %v530_v14  ;;  %v3839_v27 = vld [vmem:[%s4359_s30] sm:$0xff]   ;;  %v535_v28 = vld [vmem:[%s4364_s15 + $0x28] sm:$0xff]  ;;  %v536_v29 = vld [vmem:[%s4364_s15 + $0x30] sm:$0xff] }
  0x22   : > { %865 = vmatprep.mubr.f32.mxu0 %v4268_v4  ;;  %v3840_v30 = vld [vmem:[%s4359_s30 + $0x8] sm:$0xff]   ;;  %v537_v31 = vld [vmem:[%s4364_s15 + $0x38] sm:$0xff]  ;;  %v538_v32 = vld [vmem:[%s4364_s15 + $0x40] sm:$0xff] }
  0x23   : > { %1521 = vmatpush1.bf16.msra.mxu1 %v3822_v9  ;;  %v3841_v33 = vld [vmem:[%s4359_s30 + $0x10] sm:$0xff]   ;;  %v539_v34 = vld [vmem:[%s4364_s15 + $0x48] sm:$0xff]  ;;  %v3842_v36 = vld [vmem:[%s4359_s30 + $0x18] sm:$0xff]  }
  0x24   : > { %1522 = vmatprep.subr.bf16.mxu1 %v3823_v10  ;;  %v540_v35 = vld [vmem:[%s4364_s15 + $0x50] sm:$0xff]  ;;  %v541_v37 = vld [vmem:[%s4364_s15 + $0x58] sm:$0xff]  ;;  %v542_v38 = vld [vmem:[%s4364_s15 + $0x60] sm:$0xff] }
  0x25   : > { %3247 = vmatmul.mubr.msk.f32.gmra.mrb[2].mxu0 %vm597_vm1, %v531_v17  ;;  %v3843_v39 = vld [vmem:[%s4359_s30 + $0x20] sm:$0xff]   ;;  %v543_v40 = vld [vmem:[%s4364_s15 + $0x68] sm:$0xff]  ;;  %v544_v41 = vld [vmem:[%s4364_s15 + $0x70] sm:$0xff] }
  0x26   : > { %871 = vmatprep.mubr.f32.mxu0 %v4268_v4  ;;  %v3844_v42 = vld [vmem:[%s4359_s30 + $0x28] sm:$0xff]   ;;  %v545_v43 = vld [vmem:[%s4364_s15 + $0x78] sm:$0xff]  ;;  %v546_v44 = vld [vmem:[%s4364_s15 + $0x80] sm:$0xff] }
  0x27   : > { %1523 = vmatpush1.bf16.msra.mxu1 %v3825_v12  ;;  %v3845_v45 = vld [vmem:[%s4359_s30 + $0x30] sm:$0xff]   ;;  %v547_v46 = vld [vmem:[%s4364_s15 + $0x88] sm:$0xff]  ;;  %v3846_v48 = vld [vmem:[%s4359_s30 + $0x38] sm:$0xff]  }
  0x28   : > { %1524 = vmatprep.subr.bf16.mxu1 %v3826_v15  ;;  %v548_v47 = vld [vmem:[%s4364_s15 + $0x90] sm:$0xff]  ;;  %v549_v49 = vld [vmem:[%s4364_s15 + $0x98] sm:$0xff]  ;;  %v550_v50 = vld [vmem:[%s4364_s15 + $0xa0] sm:$0xff] }
  0x29   : > { %3248 = vmatmul.mubr.msk.f32.gmra.mrb[4].mxu0 %vm597_vm1, %v532_v20  ;;  %v3847_v51 = vld [vmem:[%s4359_s30 + $0x40] sm:$0xff]   ;;  %v551_v52 = vld [vmem:[%s4364_s15 + $0xa8] sm:$0xff]  ;;  %v552_v53 = vld [vmem:[%s4364_s15 + $0xb0] sm:$0xff] }
  0x2a   : > { %877 = vmatprep.mubr.f32.mxu0 %v4268_v4  ;;  %v3848_v54 = vld [vmem:[%s4359_s30 + $0x48] sm:$0xff]   ;;  %v553_v55 = vld [vmem:[%s4364_s15 + $0xb8] sm:$0xff]  ;;  %v554_v56 = vld [vmem:[%s4364_s15 + $0xc0] sm:$0xff] }
  0x2b   : > { %1525 = vmatpush1.bf16.msra.mxu1 %v3828_v16  ;;  %v3849_v57 = vld [vmem:[%s4359_s30 + $0x50] sm:$0xff]   ;;  %v555_v58 = vld [vmem:[%s4364_s15 + $0xc8] sm:$0xff]  ;;  %v3850_v60 = vld [vmem:[%s4359_s30 + $0x58] sm:$0xff]  }
  0x2c   : > { %1526 = vmatprep.subr.bf16.mxu1 %v3829_v18  ;;  %v556_v59 = vld [vmem:[%s4364_s15 + $0xd0] sm:$0xff]  ;;  %v557_v61 = vld [vmem:[%s4364_s15 + $0xd8] sm:$0xff]  ;;  %v558_v62 = vld [vmem:[%s4364_s15 + $0xe0] sm:$0xff] }
  0x2d   : > { %3249 = vmatmul.mubr.msk.f32.gmra.mrb[6].mxu0 %vm597_vm1, %v533_v23  ;;  %v3851_v63 = vld [vmem:[%s4359_s30 + $0x60] sm:$0xff]   ;;  %v559_v0 = vld [vmem:[%s4364_s15 + $0xe8] sm:$0xff]  ;;  %v560_v1 = vld [vmem:[%s4364_s15 + $0xf0] sm:$0xff] }
  0x2e   : > { %883 = vmatprep.mubr.f32.mxu0 %v4268_v4  ;;  %v3852_v2 = vld [vmem:[%s4359_s30 + $0x68] sm:$0xff]   ;;  %v561_v3 = vld [vmem:[%s4364_s15 + $0xf8] sm:$0xff]  ;;  %v562_v5 = vld [vmem:[%s4364_s15 + $0x100] sm:$0xff] }
  0x2f   : > { %1527 = vmatpush1.bf16.msra.mxu1 %v3831_v19  ;;  %v3853_v7 = vld [vmem:[%s4359_s30 + $0x70] sm:$0xff]   ;;  %v563_v8 = vld [vmem:[%s4364_s15 + $0x108] sm:$0xff]  ;;  %v3854_v10 = vld [vmem:[%s4359_s30 + $0x78] sm:$0xff]  }
  0x30   : > { %1528 = vmatprep.subr.bf16.mxu1 %v3832_v21  ;;  %v564_v9 = vld [vmem:[%s4364_s15 + $0x110] sm:$0xff]  ;;  %v565_v11 = vld [vmem:[%s4364_s15 + $0x118] sm:$0xff]  ;;  %v566_v12 = vld [vmem:[%s4364_s15 + $0x120] sm:$0xff] }
  0x31   : > { %3250 = vmatmul.mubr.msk.f32.gmra.mrb[8].mxu0 %vm597_vm1, %v534_v26  ;;  %v3855_v13 = vld [vmem:[%s4359_s30 + $0x80] sm:$0xff]   ;;  %v567_v14 = vld [vmem:[%s4364_s15 + $0x128] sm:$0xff]  ;;  %v568_v15 = vld [vmem:[%s4364_s15 + $0x130] sm:$0xff] }
  0x32   : > { %889 = vmatprep.mubr.f32.mxu0 %v4268_v4  ;;  %v3856_v16 = vld [vmem:[%s4359_s30 + $0x88] sm:$0xff]   ;;  %v569_v17 = vld [vmem:[%s4364_s15 + $0x138] sm:$0xff]  ;;  %v570_v18 = vld [vmem:[%s4364_s15 + $0x140] sm:$0xff] }
  0x33   : > { %1529 = vmatpush1.bf16.msra.mxu1 %v3834_v22  ;;  %v3857_v19 = vld [vmem:[%s4359_s30 + $0x90] sm:$0xff]   ;;  %v571_v20 = vld [vmem:[%s4364_s15 + $0x148] sm:$0xff]  ;;  %v3858_v22 = vld [vmem:[%s4359_s30 + $0x98] sm:$0xff]  }
  0x34   : > { %1530 = vmatprep.subr.bf16.mxu1 %v3836_v24  ;;  %v572_v21 = vld [vmem:[%s4364_s15 + $0x150] sm:$0xff]  ;;  %v573_v23 = vld [vmem:[%s4364_s15 + $0x158] sm:$0xff]  ;;  %v574_v24 = vld [vmem:[%s4364_s15 + $0x160] sm:$0xff] }
  0x35   : > { %3251 = vmatmul.mubr.msk.f32.gmra.mrb[10].mxu0 %vm597_vm1, %v535_v28  ;;  %v575_v26 = vld [vmem:[%s4364_s15 + $0x168] sm:$0xff] }
  0x36   : > { %895 = vmatprep.mubr.f32.mxu0 %v4268_v4  ;;  %v3860_v28 = vld [vmem:[%s4359_s30 + $0xa8] sm:$0xff]  }
  0x37   : > { %1531 = vmatpush1.bf16.msra.mxu1 %v3838_v25  ;;  %v3859_v25 = vld [vmem:[%s4359_s30 + $0xa0] sm:$0xff]  }
  0x39   : > { %3252 = vmatmul.mubr.msk.f32.gmra.mrb[12].mxu0 %vm597_vm1, %v536_v29  ;;  %v577_v29 = vld [vmem:[%s4364_s15 + $0x178] sm:$0xff] }
  0x3a   : > { %1549 = vmatmul.mubr.bf16.vlgmr.msra.gmra.mrb[0].mxu1 %v3839_v27  ;;  %901 = vmatprep.mubr.f32.mxu0 %v4268_v4  ;;  %v576_v27 = vld [vmem:[%s4364_s15 + $0x170] sm:$0xff] }
  0x3b   : > { %1558 = vmatprep.mubr.bf16.mxu1 %v4269_v6 }
  0x3d   : > { %3253 = vmatmul.mubr.msk.f32.gmra.mrb[14].mxu0 %vm597_vm1, %v537_v31  ;;  %v3861_v31 = vld [vmem:[%s4359_s30 + $0xb0] sm:$0xff]  }
  0x3e   : > { %907 = vmatprep.mubr.f32.mxu0 %v4268_v4 }
  0x41   : > { %3254 = vmatmul.mubr.msk.f32.gmra.mrb[16].mxu0 %vm597_vm1, %v538_v32  ;;  %v579_v32 = vld [vmem:[%s4364_s15 + $0x188] sm:$0xff] }
  0x42   : > { %1559 = vmatmul.mubr.bf16.gmra.mrb[4].mxu1 %v3840_v30  ;;  %913 = vmatprep.mubr.f32.mxu0 %v4268_v4  ;;  %v578_v30 = vld [vmem:[%s4364_s15 + $0x180] sm:$0xff] }
  0x43   : > { %1568 = vmatprep.mubr.bf16.mxu1 %v4269_v6 }
  0x45   : > { %3255 = vmatmul.mubr.msk.f32.gmra.mrb[18].mxu0 %vm597_vm1, %v539_v34  ;;  %v3862_v34 = vld [vmem:[%s4359_s30 + $0xb8] sm:$0xff]  }
  0x46   : > { %919 = vmatprep.mubr.f32.mxu0 %v4268_v4 }
  0x49   : > { %3256 = vmatmul.mubr.msk.f32.gmra.mrb[20].mxu0 %vm597_vm1, %v540_v35  ;;  %v581_v35 = vld [vmem:[%s4364_s15 + $0x198] sm:$0xff] }
  0x4a   : > { %1569 = vmatmul.mubr.bf16.gmra.mrb[8].mxu1 %v3841_v33  ;;  %925 = vmatprep.mubr.f32.mxu0 %v4268_v4  ;;  %v580_v33 = vld [vmem:[%s4364_s15 + $0x190] sm:$0xff] }
  0x4b   : > { %1578 = vmatprep.mubr.bf16.mxu1 %v4269_v6 }
  0x4d   : > { %3257 = vmatmul.mubr.msk.f32.gmra.mrb[22].mxu0 %vm597_vm1, %v541_v37  ;;  %v3863_v37 = vld [vmem:[%s4359_s30 + $0xc0] sm:$0xff]  }
  0x4e   : > { %931 = vmatprep.mubr.f32.mxu0 %v4268_v4 }
  0x51   : > { %3258 = vmatmul.mubr.msk.f32.gmra.mrb[24].mxu0 %vm597_vm1, %v542_v38  ;;  %v583_v38 = vld [vmem:[%s4364_s15 + $0x1a8] sm:$0xff] }
  0x52   : > { %1579 = vmatmul.mubr.bf16.gmra.mrb[12].mxu1 %v3842_v36  ;;  %937 = vmatprep.mubr.f32.mxu0 %v4268_v4  ;;  %v582_v36 = vld [vmem:[%s4364_s15 + $0x1a0] sm:$0xff] }
  0x53   : > { %1588 = vmatprep.mubr.bf16.mxu1 %v4269_v6 }
  0x55   : > { %3259 = vmatmul.mubr.msk.f32.gmra.mrb[26].mxu0 %vm597_vm1, %v543_v40 }
  0x56   : > { %943 = vmatprep.mubr.f32.mxu0 %v4268_v4 }
  0x59   : > { %3260 = vmatmul.mubr.msk.f32.gmra.mrb[28].mxu0 %vm597_vm1, %v544_v41  ;;  %v584_v41 = vld [vmem:[%s4364_s15 + $0x1b0] sm:$0xff] }
  0x5a   : > { %1589 = vmatmul.mubr.bf16.gmra.mrb[16].mxu1 %v3843_v39  ;;  %949 = vmatprep.mubr.f32.mxu0 %v4268_v4 }
  0x5b   : > { %1598 = vmatprep.mubr.bf16.mxu1 %v4269_v6 }
  0x5d   : > { %3261 = vmatmul.mubr.msk.f32.gmra.mrb[30].mxu0 %vm597_vm1, %v545_v43  ;;  %v3864_v43 = vld [vmem:[%s4359_s30 + $0xc8] sm:$0xff]  }
  0x5e   : > { %955 = vmatprep.mubr.f32.mxu0 %v4268_v4 }
  0x61   : > { %3262 = vmatmul.mubr.msk.f32.gmra.mrb[32].mxu0 %vm597_vm1, %v546_v44 }
  0x62   : > { %1599 = vmatmul.mubr.bf16.gmra.mrb[20].mxu1 %v3844_v42  ;;  %961 = vmatprep.mubr.f32.mxu0 %v4268_v4 }
  0x63   : > { %1608 = vmatprep.mubr.bf16.mxu1 %v4269_v6 }
  0x65   : > { %3263 = vmatmul.mubr.msk.f32.gmra.mrb[34].mxu0 %vm597_vm1, %v547_v46  ;;  %v1871_v46 = vlaneseq }
  0x66   : > { %967 = vmatprep.mubr.f32.mxu0 %v4268_v4 }
  0x69   : > { %3264 = vmatmul.mubr.msk.f32.gmra.mrb[36].mxu0 %vm597_vm1, %v548_v47 }
  0x6a   : > { %1609 = vmatmul.mubr.bf16.gmra.mrb[24].mxu1 %v3845_v45  ;;  %973 = vmatprep.mubr.f32.mxu0 %v4268_v4  ;;  %v585_v45 = vld [vmem:[%s4364_s15 + $0x1b8] sm:$0xff] }
  0x6b   : > { %1618 = vmatprep.mubr.bf16.mxu1 %v4269_v6 }
  0x6d   : > { %3265 = vmatmul.mubr.msk.f32.gmra.mrb[38].mxu0 %vm597_vm1, %v549_v49  ;;  %v586_v49 = vld [vmem:[%s4364_s15 + $0x1c0] sm:$0xff] }
  0x6e   : > { %979 = vmatprep.mubr.f32.mxu0 %v4268_v4 }
  0x71   : > { %3266 = vmatmul.mubr.msk.f32.gmra.mrb[40].mxu0 %vm597_vm1, %v550_v50  ;;  %v4645_v50 = vshrl.u32 %v1871_v46, 7 }
  0x72   : > { %1619 = vmatmul.mubr.bf16.gmra.mrb[28].mxu1 %v3846_v48  ;;  %985 = vmatprep.mubr.f32.mxu0 %v4268_v4 }
  0x73   : > { %1628 = vmatprep.mubr.bf16.mxu1 %v4269_v6 }
  0x75   : > { %3267 = vmatmul.mubr.msk.f32.gmra.mrb[42].mxu0 %vm597_vm1, %v551_v52  ;;  %v3865_v52 = vld [vmem:[%s4359_s30 + $0xd0] sm:$0xff]  }
  0x76   : > { %991 = vmatprep.mubr.f32.mxu0 %v4268_v4 }
  0x79   : > { %3268 = vmatmul.mubr.msk.f32.gmra.mrb[44].mxu0 %vm597_vm1, %v552_v53 }
  0x7a   : > { %1629 = vmatmul.mubr.bf16.gmra.mrb[32].mxu1 %v3847_v51  ;;  %997 = vmatprep.mubr.f32.mxu0 %v4268_v4 }
  0x7b   : > { %1638 = vmatprep.mubr.bf16.mxu1 %v4269_v6 }
  0x7d   : > { %3269 = vmatmul.mubr.msk.f32.gmra.mrb[46].mxu0 %vm597_vm1, %v553_v55  ;;  %v1873_v55 = vsub.s32 0, %v4645_v50 }
  0x7e   : > { %1003 = vmatprep.mubr.f32.mxu0 %v4268_v4 }
  0x81   : > { %3270 = vmatmul.mubr.msk.f32.gmra.mrb[48].mxu0 %vm597_vm1, %v554_v56  ;;  %v1869_v56 = vld [vmem:[%s5849_s5] sm:$0x3] }
  0x82   : > { %1639 = vmatmul.mubr.bf16.gmra.mrb[36].mxu1 %v3848_v54  ;;  %1009 = vmatprep.mubr.f32.mxu0 %v4268_v4  ;;  %v587_v54 = vld [vmem:[%s4364_s15 + $0x1c8] sm:$0xff] }
  0x83   : > { %1648 = vmatprep.mubr.bf16.mxu1 %v4269_v6 }
  0x85   : > { %3271 = vmatmul.mubr.msk.f32.gmra.mrb[50].mxu0 %vm597_vm1, %v555_v58 }
  0x86   : > { %1015 = vmatprep.mubr.f32.mxu0 %v4268_v4 }
  0x89   : > { %3272 = vmatmul.mubr.msk.f32.gmra.mrb[52].mxu0 %vm597_vm1, %v556_v59  ;;  %v588_v59 = vld [vmem:[%s4364_s15 + $0x1d0] sm:$0xff] }
  0x8a   : > { %1649 = vmatmul.mubr.bf16.gmra.mrb[40].mxu1 %v3849_v57  ;;  %1021 = vmatprep.mubr.f32.mxu0 %v4268_v4 }
  0x8b   : > { %1658 = vmatprep.mubr.bf16.mxu1 %v4269_v6 }
  0x8d   : > { %3273 = vmatmul.mubr.msk.f32.gmra.mrb[54].mxu0 %vm597_vm1, %v557_v61 }
  0x8e   : > { %1027 = vmatprep.mubr.f32.mxu0 %v4268_v4 }
  0x91   : > { %3274 = vmatmul.mubr.msk.f32.gmra.mrb[56].mxu0 %vm597_vm1, %v558_v62 }
  0x92   : > { %1659 = vmatmul.mubr.bf16.gmra.mrb[44].mxu1 %v3850_v60  ;;  %1033 = vmatprep.mubr.f32.mxu0 %v4268_v4  ;;  %v4665_v60 = vrot.slane %v1869_v56, %v1873_v55 }
  0x93   : > { %1668 = vmatprep.mubr.bf16.mxu1 %v4269_v6 }
  0x95   : > { %3275 = vmatmul.mubr.msk.f32.gmra.mrb[58].mxu0 %vm597_vm1, %v559_v0 }
  0x96   : > { %1039 = vmatprep.mubr.f32.mxu0 %v4268_v4 }
  0x99   : > { %3276 = vmatmul.mubr.msk.f32.gmra.mrb[60].mxu0 %vm597_vm1, %v560_v1  ;;  %v3866_v1 = vld [vmem:[%s4359_s30 + $0xd8] sm:$0xff]  }
  0x9a   : > { %1669 = vmatmul.mubr.bf16.gmra.mrb[48].mxu1 %v3851_v63  ;;  %1045 = vmatprep.mubr.f32.mxu0 %v4268_v4 }
  0x9b   : > { %1678 = vmatprep.mubr.bf16.mxu1 %v4269_v6 }
  0x9d   : > { %3277 = vmatmul.mubr.msk.f32.gmra.mrb[62].mxu0 %vm597_vm1, %v561_v3 }
  0x9e   : > { %1051 = vmatprep.mubr.f32.mxu0 %v4268_v4 }
  0xa1   : > { %3278 = vmatmul.mubr.msk.f32.gmra.mrb[64].mxu0 %vm597_vm1, %v562_v5 }
  0xa2   : > { %1679 = vmatmul.mubr.bf16.gmra.mrb[52].mxu1 %v3852_v2  ;;  %1057 = vmatprep.mubr.f32.mxu0 %v4268_v4 }
  0xa3   : > { %1688 = vmatprep.mubr.bf16.mxu1 %v4269_v6 }
  0xa5   : > { %3279 = vmatmul.mubr.msk.f32.gmra.mrb[66].mxu0 %vm597_vm1, %v563_v8 }
  0xa6   : > { %1063 = vmatprep.mubr.f32.mxu0 %v4268_v4 }
  0xa9   : > { %3280 = vmatmul.mubr.msk.f32.gmra.mrb[68].mxu0 %vm597_vm1, %v564_v9 }
  0xaa   : > { %1689 = vmatmul.mubr.bf16.gmra.mrb[56].mxu1 %v3853_v7  ;;  %1069 = vmatprep.mubr.f32.mxu0 %v4268_v4  ;;  %v589_v7 = vld [vmem:[%s4364_s15 + $0x1d8] sm:$0xff] }
  0xab   : > { %1698 = vmatprep.mubr.bf16.mxu1 %v4269_v6 }
  0xad   : > { %3281 = vmatmul.mubr.msk.f32.gmra.mrb[70].mxu0 %vm597_vm1, %v565_v11 }
  0xae   : > { %1075 = vmatprep.mubr.f32.mxu0 %v4268_v4 }
  0xb1   : > { %3282 = vmatmul.mubr.msk.f32.gmra.mrb[72].mxu0 %vm597_vm1, %v566_v12 }
  0xb2   : > { %1699 = vmatmul.mubr.bf16.gmra.mrb[60].mxu1 %v3854_v10  ;;  %1081 = vmatprep.mubr.f32.mxu0 %v4268_v4 }
  0xb3   : > { %1708 = vmatprep.mubr.bf16.mxu1 %v4269_v6 }
  0xb5   : > { %3283 = vmatmul.mubr.msk.f32.gmra.mrb[74].mxu0 %vm597_vm1, %v567_v14 }
  0xb6   : > { %1087 = vmatprep.mubr.f32.mxu0 %v4268_v4 }
  0xb9   : > { %3284 = vmatmul.mubr.msk.f32.gmra.mrb[76].mxu0 %vm597_vm1, %v568_v15 }
  0xba   : > { %1709 = vmatmul.mubr.bf16.gmra.mrb[64].mxu1 %v3855_v13  ;;  %1093 = vmatprep.mubr.f32.mxu0 %v4268_v4 }
  0xbb   : > { %1718 = vmatprep.mubr.bf16.mxu1 %v4269_v6 }
  0xbd   : > { %3285 = vmatmul.mubr.msk.f32.gmra.mrb[78].mxu0 %vm597_vm1, %v569_v17 }
  0xbe   : > { %1099 = vmatprep.mubr.f32.mxu0 %v4268_v4 }
  0xc1   : > { %3286 = vmatmul.mubr.msk.f32.gmra.mrb[80].mxu0 %vm597_vm1, %v570_v18 }
  0xc2   : > { %1719 = vmatmul.mubr.bf16.gmra.mrb[68].mxu1 %v3856_v16  ;;  %1105 = vmatprep.mubr.f32.mxu0 %v4268_v4  ;;  %v590_v16 = vld [vmem:[%s4364_s15 + $0x1e0] sm:$0xff] }
  0xc3   : > { %1728 = vmatprep.mubr.bf16.mxu1 %v4269_v6 }
  0xc5   : > { %3287 = vmatmul.mubr.msk.f32.gmra.mrb[82].mxu0 %vm597_vm1, %v571_v20 }
  0xc6   : > { %1111 = vmatprep.mubr.f32.mxu0 %v4268_v4 }
  0xc9   : > { %3288 = vmatmul.mubr.msk.f32.gmra.mrb[84].mxu0 %vm597_vm1, %v572_v21  ;;  %v1877_v21 = vsub.s32 1, %v4645_v50 }
  0xca   : > { %1729 = vmatmul.mubr.bf16.gmra.mrb[72].mxu1 %v3857_v19  ;;  %1117 = vmatprep.mubr.f32.mxu0 %v4268_v4 }
  0xcb   : > { %1738 = vmatprep.mubr.bf16.mxu1 %v4269_v6 }
  0xcd   : > { %3289 = vmatmul.mubr.msk.f32.gmra.mrb[86].mxu0 %vm597_vm1, %v573_v23 }
  0xce   : > { %1123 = vmatprep.mubr.f32.mxu0 %v4268_v4 }
  0xd1   : > { %3290 = vmatmul.mubr.msk.f32.gmra.mrb[88].mxu0 %vm597_vm1, %v574_v24 }
  0xd2   : > { %1739 = vmatmul.mubr.bf16.gmra.mrb[76].mxu1 %v3858_v22  ;;  %1129 = vmatprep.mubr.f32.mxu0 %v4268_v4 }
  0xd3   : > { %1748 = vmatprep.mubr.bf16.mxu1 %v4269_v6 }
  0xd5   : > { %3291 = vmatmul.mubr.msk.f32.gmra.mrb[90].mxu0 %vm597_vm1, %v575_v26 }
  0xd6   : > { %1135 = vmatprep.mubr.f32.mxu0 %v4268_v4 }
  0xd9   : > { %3292 = vmatmul.mubr.msk.f32.gmra.mrb[92].mxu0 %vm597_vm1, %v576_v27 }
  0xda   : > { %1749 = vmatmul.mubr.bf16.gmra.mrb[80].mxu1 %v3859_v25  ;;  %1141 = vmatprep.mubr.f32.mxu0 %v4268_v4  ;;  %v3867_v25 = vld [vmem:[%s4359_s30 + $0xe0] sm:$0xff]  }
  0xdb   : > { %1758 = vmatprep.mubr.bf16.mxu1 %v4269_v6 }
  0xdd   : > { %3293 = vmatmul.mubr.msk.f32.gmra.mrb[94].mxu0 %vm597_vm1, %v577_v29  ;;  %v591_v29 = vld [vmem:[%s4364_s15 + $0x1e8] sm:$0xff] }
  0xde   : > { %1147 = vmatprep.mubr.f32.mxu0 %v4268_v4 }
  0xe1   : > { %3294 = vmatmul.mubr.msk.f32.gmra.mrb[96].mxu0 %vm597_vm1, %v578_v30 }
  0xe2   : > { %1759 = vmatmul.mubr.bf16.gmra.mrb[84].mxu1 %v3860_v28  ;;  %1153 = vmatprep.mubr.f32.mxu0 %v4268_v4 }
  0xe3   : > { %1768 = vmatprep.mubr.bf16.mxu1 %v4269_v6 }
  0xe5   : > { %3295 = vmatmul.mubr.msk.f32.gmra.mrb[98].mxu0 %vm597_vm1, %v579_v32 }
  0xe6   : > { %1159 = vmatprep.mubr.f32.mxu0 %v4268_v4 }
  0xe9   : > { %3296 = vmatmul.mubr.msk.f32.gmra.mrb[100].mxu0 %vm597_vm1, %v580_v33 }
  0xea   : > { %1769 = vmatmul.mubr.bf16.gmra.mrb[88].mxu1 %v3861_v31  ;;  %1165 = vmatprep.mubr.f32.mxu0 %v4268_v4 }
  0xeb   : > { %1778 = vmatprep.mubr.bf16.mxu1 %v4269_v6 }
  0xed   : > { %3297 = vmatmul.mubr.msk.f32.gmra.mrb[102].mxu0 %vm597_vm1, %v581_v35  ;;  %v4699_v35 = vrot.slane %v1869_v56, %v1877_v21 }
  0xee   : > { %1171 = vmatprep.mubr.f32.mxu0 %v4268_v4 }
  0xf1   : > { %3298 = vmatmul.mubr.msk.f32.gmra.mrb[104].mxu0 %vm597_vm1, %v582_v36 }
  0xf2   : > { %1779 = vmatmul.mubr.bf16.gmra.mrb[92].mxu1 %v3862_v34  ;;  %1177 = vmatprep.mubr.f32.mxu0 %v4268_v4 }
  0xf3   : > { %1788 = vmatprep.mubr.bf16.mxu1 %v4269_v6 }
  0xf4   : > { %v861_v39 = vpop.f32.mrb[0].mxu0 }
  0xf5   : > { %v863_v40 = vpop.f32.mrb[1].mxu0  ;;  %3299 = vmatmul.mubr.msk.f32.gmra.mrb[106].mxu0 %vm597_vm1, %v583_v38 }
  0xf6   : > { %1183 = vmatprep.mubr.f32.mxu0 %v4268_v4 }
  0xf8   : > { %v867_v42 = vpop.f32.mrb[2].mxu0 }
  0xf9   : > { %v869_v44 = vpop.f32.mrb[3].mxu0  ;;  %3300 = vmatmul.mubr.msk.f32.gmra.mrb[108].mxu0 %vm597_vm1, %v584_v41 }
  0xfa   : > { %1789 = vmatmul.mubr.bf16.gmra.mrb[96].mxu1 %v3863_v37  ;;  %1189 = vmatprep.mubr.f32.mxu0 %v4268_v4 }
  0xfb   : > { %1798 = vmatprep.mubr.bf16.mxu1 %v4269_v6 }
  0xfc   : > { %v873_v47 = vpop.f32.mrb[4].mxu0 }
  0xfd   : > { %v875_v48 = vpop.f32.mrb[5].mxu0  ;;  %3301 = vmatmul.mubr.msk.f32.gmra.mrb[110].mxu0 %vm597_vm1, %v585_v45 }
  0xfe   : > { %1195 = vmatprep.mubr.f32.mxu0 %v4268_v4 }
 0x100   : > { %v879_v51 = vpop.f32.mrb[6].mxu0 }
 0x101   : > { %v881_v53 = vpop.f32.mrb[7].mxu0  ;;  %3302 = vmatmul.mubr.msk.f32.gmra.mrb[112].mxu0 %vm597_vm1, %v586_v49 }
 0x102   : > { %1799 = vmatmul.mubr.bf16.gmra.mrb[100].mxu1 %v3864_v43  ;;  %1201 = vmatprep.mubr.f32.mxu0 %v4268_v4 }
 0x103   : > { %1808 = vmatprep.mubr.bf16.mxu1 %v4269_v6 }
 0x104   : > { %v4655_v57 = vpop.f32.mrb[8].mxu0 }
 0x105   : > { %v4657_v58 = vpop.f32.mrb[9].mxu0  ;;  %3303 = vmatmul.mubr.msk.f32.gmra.mrb[114].mxu0 %vm597_vm1, %v587_v54 }
 0x106   : > { %1207 = vmatprep.mubr.f32.mxu0 %v4268_v4 }
 0x108   : > { %v4667_v62 = vpop.f32.mrb[10].mxu0 }
 0x109   : > { %v4670_v2 = vpop.f32.mrb[11].mxu0  ;;  %3304 = vmatmul.mubr.msk.f32.gmra.mrb[116].mxu0 %vm597_vm1, %v588_v59 }
 0x10a   : > { %1809 = vmatmul.mubr.bf16.gmra.mrb[104].mxu1 %v3865_v52  ;;  %1213 = vmatprep.mubr.f32.mxu0 %v4268_v4 }
 0x10b   : > { %1818 = vmatprep.mubr.bf16.mxu1 %v4269_v6 }
 0x10c   : > { %v4676_v12 = vpop.f32.mrb[12].mxu0 }
 0x10d   : > { %v1550_v61 = vpop.f32.mrb[0].mxu1  ;;  %v4679_v15 = vpop.f32.mrb[13].mxu0  ;;  %3305 = vmatmul.mubr.msk.f32.gmra.mrb[118].mxu0 %vm597_vm1, %v589_v7 }
 0x10e   : > { %v1551_v63 = vadd.f32 %v1550_v61, %v861_v39  ;;  %v1552_v0 = vpop.f32.mrb[1].mxu1  ;;  %1219 = vmatprep.mubr.f32.mxu0 %v4268_v4  ;;  %v592_v39 = vld [vmem:[%s4364_s15 + $0x1f0] sm:$0xff] }
 0x10f   : > { %v1553_v3 = vadd.f32 %v1552_v0, %v863_v40  ;;  %v1554_v5 = vpop.f32.mrb[2].mxu1 }
 0x110   : > { %v1881_v8 = vadd.f32 %v4665_v60, %v1551_v63  ;;  %v1555_v9 = vadd.f32 %v1554_v5, %v867_v42  ;;  %v1556_v10 = vpop.f32.mrb[3].mxu1  ;;  %v4685_v20 = vpop.f32.mrb[14].mxu0 }
 0x111   : > { %v1557_v11 = vadd.f32 %v1556_v10, %v869_v44  ;;  %v4689_v26 = vpop.f32.mrb[15].mxu0  ;;  %3306 = vmatmul.mubr.msk.f32.gmra.mrb[120].mxu0 %vm597_vm1, %v590_v16  ;;  %v1882_v44 = vadd.f32 %v4699_v35, %v1553_v3  ;;  %v3869_v16 = vld [vmem:[%s4359_s30 + $0xf0] sm:$0xff]  }
 0x112   : > { %v3358_v13 = vclamps-f32 %v1881_v8, 30.0  ;;  %v1883_v14 = vadd.f32 %v4665_v60, %v1555_v9  ;;  %1819 = vmatmul.mubr.bf16.gmra.mrb[108].mxu1 %v3866_v1  ;;  %1225 = vmatprep.mubr.f32.mxu0 %v4268_v4 }
 0x113   : > { %1828 = vmatprep.mubr.bf16.mxu1 %v4269_v6  ;;  %v1884_v56 = vadd.f32 %v4699_v35, %v1557_v11 }
 0x114   : > { %v2201_v17 = vmul.f32 1.442695, %v3358_v13  ;;  %v3359_v18 = vclamps-f32 %v1883_v14, 30.0  ;;  %v4695_v34 = vpop.f32.mrb[16].mxu0 }
 0x115   : > { %v1560_v19 = vpop.f32.mrb[4].mxu1  ;;  %v4702_v38 = vpop.f32.mrb[17].mxu0  ;;  %3307 = vmatmul.mubr.msk.f32.gmra.mrb[122].mxu0 %vm597_vm1, %v591_v29 }
 0x116   : > { %3871 = vpow2.f32 %v2201_v17  ;;  %v2203_v22 = vmul.f32 1.442695, %v3359_v18  ;;  %v1561_v23 = vadd.f32 %v1560_v19, %v873_v47  ;;  %v1562_v24 = vpop.f32.mrb[5].mxu1  ;;  %1231 = vmatprep.mubr.f32.mxu0 %v4268_v4 }
 0x117   : > { %v1563_v27 = vadd.f32 %v1562_v24, %v875_v48  ;;  %v1564_v28 = vpop.f32.mrb[6].mxu1  ;;  %v3868_v48 = vld [vmem:[%s4359_s30 + $0xe8] sm:$0xff]  }
 0x118   : > { %3873 = vpow2.f32 %v2203_v22  ;;  %v1885_v30 = vadd.f32 %v4665_v60, %v1561_v23  ;;  %v1565_v31 = vadd.f32 %v1564_v28, %v879_v51  ;;  %v1566_v32 = vpop.f32.mrb[7].mxu1  ;;  %v4708_v43 = vpop.f32.mrb[18].mxu0 }
 0x119   : > { %v1567_v33 = vadd.f32 %v1566_v32, %v881_v53  ;;  %v4713_v49 = vpop.f32.mrb[19].mxu0  ;;  %3308 = vmatmul.mubr.msk.f32.gmra.mrb[124].mxu0 %vm597_vm1, %v592_v39  ;;  %v593_v53 = vld [vmem:[%s4364_s15 + $0x1f8] sm:$0xff]  ;;  %v1886_v10 = vadd.f32 %v4699_v35, %v1563_v27 }
 0x11a   : > { %v3360_v36 = vclamps-f32 %v1885_v30, 30.0  ;;  %v1887_v37 = vadd.f32 %v4665_v60, %v1565_v31  ;;  %1829 = vmatmul.mubr.bf16.gmra.mrb[112].mxu1 %v3867_v25  ;;  %1237 = vmatprep.mubr.f32.mxu0 %v4268_v4 }
 0x11b   : > { %1838 = vmatprep.mubr.bf16.mxu1 %v4269_v6  ;;  %v1888_v23 = vadd.f32 %v4699_v35, %v1567_v33 }
 0x11c   : > { %v2205_v40 = vmul.f32 1.442695, %v3360_v36  ;;  %v3361_v41 = vclamps-f32 %v1887_v37, 30.0  ;;  %v4725_v1 = vpop.f32.mrb[20].mxu0 }
 0x11d   : > { %v1570_v42 = vpop.f32.mrb[8].mxu1  ;;  %v4728_v5 = vpop.f32.mrb[21].mxu0  ;;  %3309 = vmatmul.mubr.msk.f32.gmra.mrb[126].mxu0 %vm597_vm1, %v593_v53 }
 0x11e   : > { %3875 = vpow2.f32 %v2205_v40  ;;  %v2207_v45 = vmul.f32 1.442695, %v3361_v41  ;;  %v1571_v46 = vadd.f32 %v1570_v42, %v4655_v57  ;;  %v1572_v47 = vpop.f32.mrb[9].mxu1 }
 0x11f   : > { %v1573_v51 = vadd.f32 %v1572_v47, %v4657_v58  ;;  %v1574_v52 = vpop.f32.mrb[10].mxu1  ;;  %v3870_v47 = vld [vmem:[%s4359_s30 + $0xf8] sm:$0xff]  }
 0x120   : > { %v3872_v54 = vpop.eup %3871  ;;  %3877 = vpow2.f32 %v2207_v45  ;;  %v1889_v59 = vadd.f32 %v4665_v60, %v1571_v46  ;;  %v1575_v57 = vadd.f32 %v1574_v52, %v4667_v62  ;;  %v1576_v61 = vpop.f32.mrb[11].mxu1 }
 0x121   : > { %v2329_v63 = vadd.f32 1.0, %v3872_v54  ;;  %v4723_v0 = vadd.f32 %v1576_v61, %v4670_v2  ;;  %3879 = vtanh.f32 %v1882_v44  ;;  %v4732_v9 = vpop.f32.mrb[22].mxu0  ;;  %v1890_v39 = vadd.f32 %v4699_v35, %v1573_v51 }
 0x122   : > { %v3874_v58 = vpop.eup %3873  ;;  %v3362_v3 = vclamps-f32 %v1889_v59, 30.0  ;;  %v1891_v4 = vadd.f32 %v4665_v60, %v1575_v57  ;;  %1839 = vmatmul.mubr.bf16.gmra.mrb[116].mxu1 %v3868_v48  ;;  %v4737_v17 = vpop.f32.mrb[23].mxu0 }
 0x123   : > { %3881 = vrcp.f32 %v2329_v63  ;;  %v2330_v62 = vadd.f32 1.0, %v3874_v58  ;;  %1848 = vmatprep.mubr.bf16.mxu1 %v4269_v6  ;;  %v1892_v53 = vadd.f32 %v4699_v35, %v4723_v0 }
 0x124   : > { %3883 = vtanh.f32 %v1884_v56  ;;  %v2209_v2 = vmul.f32 1.442695, %v3362_v3  ;;  %v3363_v7 = vclamps-f32 %v1891_v4, 30.0  ;;  %v4748_v29 = vpop.f32.mrb[24].mxu0 }
 0x125   : > { %3885 = vrcp.f32 %v2330_v62  ;;  %v1580_v8 = vpop.f32.mrb[12].mxu1  ;;  %v4751_v32 = vpop.f32.mrb[25].mxu0 }
 0x126   : > { %3887 = vpow2.f32 %v2209_v2  ;;  %v2211_v11 = vmul.f32 1.442695, %v3363_v7  ;;  %v1581_v13 = vadd.f32 %v1580_v8, %v4676_v12  ;;  %v1582_v14 = vpop.f32.mrb[13].mxu1 }
 0x127   : > { %v4740_v18 = vadd.f32 %v1582_v14, %v4679_v15  ;;  %v1584_v19 = vpop.f32.mrb[14].mxu1 }
 0x128   : > { %v3876_v22 = vpop.eup %3875  ;;  %3889 = vpow2.f32 %v2211_v11  ;;  %v1893_v24 = vadd.f32 %v4665_v60, %v1581_v13  ;;  %v1585_v25 = vadd.f32 %v1584_v19, %v4685_v20  ;;  %v1586_v27 = vpop.f32.mrb[15].mxu1 }
 0x129   : > { %v2331_v28 = vadd.f32 1.0, %v3876_v22  ;;  %v4746_v12 = vadd.f32 %v1586_v27, %v4689_v26  ;;  %3891 = vtanh.f32 %v1886_v10  ;;  %v4755_v41 = vpop.f32.mrb[26].mxu0  ;;  %v1894_v11 = vadd.f32 %v4699_v35, %v4740_v18 }
 0x12a   : > { %v3878_v30 = vpop.eup %3877  ;;  %v3364_v15 = vclamps-f32 %v1893_v24, 30.0  ;;  %v1895_v31 = vadd.f32 %v4665_v60, %v1585_v25  ;;  %1849 = vmatmul.mubr.bf16.gmra.mrb[120].mxu1 %v3869_v16  ;;  %v4759_v48 = vpop.f32.mrb[27].mxu0 }
 0x12b   : > { %3893 = vrcp.f32 %v2331_v28  ;;  %v2332_v33 = vadd.f32 1.0, %v3878_v30  ;;  %1858 = vmatprep.mubr.bf16.mxu1 %v4269_v6  ;;  %v3880_v20 = vpop.eup %3879  ;;  %v1896_v28 = vadd.f32 %v4699_v35, %v4746_v12 }
 0x12c   : > { %3895 = vtanh.f32 %v1888_v23  ;;  %v2213_v36 = vmul.f32 1.442695, %v3364_v15  ;;  %v3365_v26 = vclamps-f32 %v1895_v31, 30.0  ;;  %v4775_v3 = vpop.f32.mrb[28].mxu0 }
 0x12d   : > { %v3882_v37 = vpop.eup %3881  ;;  %3897 = vrcp.f32 %v2332_v33  ;;  %v1590_v40 = vpop.f32.mrb[16].mxu1 }
 0x12e   : > { %v3884_v42 = vpop.eup %3883  ;;  %3899 = vpow2.f32 %v2213_v36  ;;  %v2215_v44 = vmul.f32 1.442695, %v3365_v26  ;;  %v1591_v45 = vadd.f32 %v1590_v40, %v4695_v34  ;;  %v1592_v46 = vpop.f32.mrb[17].mxu1  ;;  %v4761_v6 = vmul.f32 %v3882_v37, %v3880_v20 }
 0x12f   : > { %v3886_v52 = vpop.eup %3885  ;;  %v4766_v51 = vadd.f32 %v1592_v46, %v4702_v38  ;;  %v1594_v54 = vpop.f32.mrb[18].mxu1 }
 0x130   : > { %v3888_v56 = vpop.eup %3887  ;;  %3901 = vpow2.f32 %v2215_v44  ;;  %v1897_v59 = vadd.f32 %v4665_v60, %v1591_v45  ;;  %v1595_v34 = vadd.f32 %v1594_v54, %v4708_v43  ;;  %v1596_v57 = vpop.f32.mrb[19].mxu1  ;;  %v4770_v61 = vmul.f32 %v3886_v52, %v3884_v42 }
 0x131   : > { %v2333_v63 = vadd.f32 1.0, %v3888_v56  ;;  %v4773_v58 = vadd.f32 %v1596_v57, %v4713_v49  ;;  %3903 = vtanh.f32 %v1890_v39  ;;  %v4778_v62 = vpop.f32.mrb[29].mxu0 }
 0x132   : > { %v3890_v0 = vpop.eup %3889  ;;  %v3366_v38 = vclamps-f32 %v1897_v59, 30.0  ;;  %v1899_v4 = vadd.f32 %v4665_v60, %v1595_v34  ;;  %1859 = vmatmul.mubr.bf16.gmra.mrb[124].mxu1 %v3870_v47  ;;  %v2521_v43 = vpack.c.bf16 %v4770_v61, %v4761_v6  ;;  %v4784_v14 = vpop.f32.mrb[30].mxu0  ;;  %v1898_v47 = vadd.f32 %v4699_v35, %v4766_v51 }
 0x133   : > { %3905 = vrcp.f32 %v2333_v63  ;;  %v2334_v2 = vadd.f32 1.0, %v3890_v0  ;;  %v3892_v7 = vpop.eup %3891  ;;  %v4787_v24 = vpop.f32.mrb[31].mxu0 }
 0x134   : > { %3907 = vtanh.f32 %v1892_v53  ;;  %v2217_v8 = vmul.f32 1.442695, %v3366_v38  ;;  %v3367_v49 = vclamps-f32 %v1899_v4, 30.0  ;;  %v4801_v37 = vpop.f32.mrb[32].mxu0  ;;  %v1900_v38 = vadd.f32 %v4699_v35, %v4773_v58 }
 0x135   : > { %v3894_v10 = vpop.eup %3893  ;;  %3909 = vrcp.f32 %v2334_v2  ;;  %v1600_v13 = vpop.f32.mrb[20].mxu1 }
 0x136   : > { %v3896_v16 = vpop.eup %3895  ;;  %3911 = vpow2.f32 %v2217_v8  ;;  %v2219_v19 = vmul.f32 1.442695, %v3367_v49  ;;  %v1601_v22 = vadd.f32 %v1600_v13, %v4725_v1  ;;  %v1602_v23 = vpop.f32.mrb[21].mxu1  ;;  %v4789_v25 = vmul.f32 %v3894_v10, %v3892_v7 }
 0x137   : > { %v3898_v27 = vpop.eup %3897  ;;  %v1603_v30 = vadd.f32 %v1602_v23, %v4728_v5  ;;  %v1604_v18 = vpop.f32.mrb[22].mxu1 }
 0x138   : > { %v3900_v15 = vpop.eup %3899  ;;  %3913 = vpow2.f32 %v2219_v19  ;;  %v1901_v31 = vadd.f32 %v4665_v60, %v1601_v22  ;;  %v1605_v33 = vadd.f32 %v1604_v18, %v4732_v9  ;;  %v1606_v20 = vpop.f32.mrb[23].mxu1  ;;  %v4796_v1 = vmul.f32 %v3898_v27, %v3896_v16 }
 0x139   : > { %v2335_v36 = vadd.f32 1.0, %v3900_v15  ;;  %v4799_v26 = vadd.f32 %v1606_v20, %v4737_v17  ;;  %3915 = vtanh.f32 %v1894_v11  ;;  %v4804_v40 = vpop.f32.mrb[33].mxu0  ;;  %v1902_v18 = vadd.f32 %v4699_v35, %v1603_v30 }
 0x13a   : > { %v3902_v39 = vpop.eup %3901  ;;  %v3368_v12 = vclamps-f32 %v1901_v31, 30.0  ;;  %v1903_v5 = vadd.f32 %v4665_v60, %v1605_v33  ;;  %v2522_v42 = vpack.c.bf16 %v4796_v1, %v4789_v25  ;;  %v4810_v53 = vpop.f32.mrb[34].mxu0 }
 0x13b   : > { %3917 = vrcp.f32 %v2335_v36  ;;  %v2336_v9 = vadd.f32 1.0, %v3902_v39  ;;  %v3904_v44 = vpop.eup %3903  ;;  %v4813_v57 = vpop.f32.mrb[35].mxu0 }
 0x13c   : > { %3919 = vtanh.f32 %v1896_v28  ;;  %v2221_v45 = vmul.f32 1.442695, %v3368_v12  ;;  %v3369_v46 = vclamps-f32 %v1903_v5, 30.0  ;;  %v4827_v13 = vpop.f32.mrb[36].mxu0 }
 0x13d   : > { %v3906_v17 = vpop.eup %3905  ;;  %3921 = vrcp.f32 %v2336_v9  ;;  %v1610_v52 = vpop.f32.mrb[24].mxu1 }
 0x13e   : > { %v3908_v54 = vpop.eup %3907  ;;  %3923 = vpow2.f32 %v2221_v45  ;;  %v2223_v56 = vmul.f32 1.442695, %v3369_v46  ;;  %v1611_v59 = vadd.f32 %v1610_v52, %v4748_v29  ;;  %v1612_v34 = vpop.f32.mrb[25].mxu1  ;;  %v4815_v63 = vmul.f32 %v3906_v17, %v3904_v44 }
 0x13f   : > { %v3910_v0 = vpop.eup %3909  ;;  %v1613_v4 = vadd.f32 %v1612_v34, %v4751_v32  ;;  %v1614_v51 = vpop.f32.mrb[26].mxu1  ;;  %v1904_v44 = vadd.f32 %v4699_v35, %v4799_v26 }
 0x140   : > { %v3912_v2 = vpop.eup %3911  ;;  %3925 = vpow2.f32 %v2223_v56  ;;  %v1905_v7 = vadd.f32 %v4665_v60, %v1611_v59  ;;  %v1615_v8 = vadd.f32 %v1614_v51, %v4755_v41  ;;  %v1616_v49 = vpop.f32.mrb[27].mxu1  ;;  %v4822_v29 = vmul.f32 %v3910_v0, %v3908_v54 }
 0x141   : > { %v2337_v10 = vadd.f32 1.0, %v3912_v2  ;;  %v4825_v11 = vadd.f32 %v1616_v49, %v4759_v48  ;;  %3927 = vtanh.f32 %v1898_v47  ;;  %v4830_v19 = vpop.f32.mrb[37].mxu0 }
 0x142   : > { %v3914_v16 = vpop.eup %3913  ;;  %v3370_v58 = vclamps-f32 %v1905_v7, 30.0  ;;  %v1907_v32 = vadd.f32 %v4665_v60, %v1615_v8  ;;  %v2523_v22 = vpack.c.bf16 %v4822_v29, %v4815_v63  ;;  %v4835_v31 = vpop.f32.mrb[38].mxu0  ;;  %v1906_v8 = vadd.f32 %v4699_v35, %v1613_v4 }
 0x143   : > { %3929 = vrcp.f32 %v2337_v10  ;;  %v2338_v41 = vadd.f32 1.0, %v3914_v16  ;;  %v3916_v23 = vpop.eup %3915  ;;  %v4838_v12 = vpop.f32.mrb[39].mxu0 }
 0x144   : > { %3931 = vtanh.f32 %v1900_v38  ;;  %v2225_v27 = vmul.f32 1.442695, %v3370_v58  ;;  %v3371_v28 = vclamps-f32 %v1907_v32, 30.0  ;;  %v4852_v59 = vpop.f32.mrb[40].mxu0 }
 0x145   : > { %v3918_v48 = vpop.eup %3917  ;;  %3933 = vrcp.f32 %v2338_v41  ;;  %v1620_v15 = vpop.f32.mrb[28].mxu1 }
 0x146   : > { %v3920_v33 = vpop.eup %3919  ;;  %3935 = vpow2.f32 %v2225_v27  ;;  %v2227_v20 = vmul.f32 1.442695, %v3371_v28  ;;  %v1621_v36 = vadd.f32 %v1620_v15, %v4775_v3  ;;  %v1622_v39 = vpop.f32.mrb[29].mxu1  ;;  %v4840_v5 = vmul.f32 %v3918_v48, %v3916_v23 }
 0x147   : > { %v3922_v9 = vpop.eup %3921  ;;  %v1623_v45 = vadd.f32 %v1622_v39, %v4778_v62  ;;  %v1624_v30 = vpop.f32.mrb[30].mxu1  ;;  %v1908_v48 = vadd.f32 %v4699_v35, %v4825_v11 }
 0x148   : > { %v3924_v46 = vpop.eup %3923  ;;  %3937 = vpow2.f32 %v2227_v20  ;;  %v1909_v17 = vadd.f32 %v4665_v60, %v1621_v36  ;;  %v1625_v47 = vadd.f32 %v1624_v30, %v4784_v14  ;;  %v1626_v52 = vpop.f32.mrb[31].mxu1  ;;  %v4847_v3 = vmul.f32 %v3922_v9, %v3920_v33 }
 0x149   : > { %v2339_v54 = vadd.f32 1.0, %v3924_v46  ;;  %v4850_v56 = vadd.f32 %v1626_v52, %v4787_v24  ;;  %3939 = vtanh.f32 %v1902_v18  ;;  %v4855_v0 = vpop.f32.mrb[41].mxu0 }
 0x14a   : > { %v3926_v34 = vpop.eup %3925  ;;  %v3372_v26 = vclamps-f32 %v1909_v17, 30.0  ;;  %v1911_v62 = vadd.f32 %v4665_v60, %v1625_v47  ;;  %v2524_v38 = vpack.c.bf16 %v4847_v3, %v4840_v5  ;;  %v4860_v10 = vpop.f32.mrb[42].mxu0 }
 0x14b   : > { %3941 = vrcp.f32 %v2339_v54  ;;  %v2340_v14 = vadd.f32 1.0, %v3926_v34  ;;  %v3928_v51 = vpop.eup %3927  ;;  %v4863_v23 = vpop.f32.mrb[43].mxu0  ;;  %v1910_v34 = vadd.f32 %v4699_v35, %v1623_v45 }
 0x14c   : > { %3943 = vtanh.f32 %v1904_v44  ;;  %v2229_v2 = vmul.f32 1.442695, %v3372_v26  ;;  %v3373_v7 = vclamps-f32 %v1911_v62, 30.0  ;;  %v4877_v44 = vpop.f32.mrb[44].mxu0 }
 0x14d   : > { %v3930_v24 = vpop.eup %3929  ;;  %3945 = vrcp.f32 %v2340_v14  ;;  %v1630_v49 = vpop.f32.mrb[32].mxu1 }
 0x14e   : > { %v3932_v16 = vpop.eup %3931  ;;  %3947 = vpow2.f32 %v2229_v2  ;;  %v2231_v58 = vmul.f32 1.442695, %v3373_v7  ;;  %v1631_v32 = vadd.f32 %v1630_v49, %v4801_v37  ;;  %v1632_v41 = vpop.f32.mrb[33].mxu1  ;;  %v4865_v27 = vmul.f32 %v3930_v24, %v3928_v51 }
 0x14f   : > { %v3934_v28 = vpop.eup %3933  ;;  %v1633_v18 = vadd.f32 %v1632_v41, %v4804_v40  ;;  %v1634_v4 = vpop.f32.mrb[34].mxu1 }
 0x150   : > { %v3936_v15 = vpop.eup %3935  ;;  %3949 = vpow2.f32 %v2231_v58  ;;  %v1913_v33 = vadd.f32 %v4665_v60, %v1631_v32  ;;  %v1635_v20 = vadd.f32 %v1634_v4, %v4810_v53  ;;  %v1636_v36 = vpop.f32.mrb[35].mxu1  ;;  %v4872_v37 = vmul.f32 %v3934_v28, %v3932_v16 }
 0x151   : > { %v2341_v39 = vadd.f32 1.0, %v3936_v15  ;;  %v4875_v9 = vadd.f32 %v1636_v36, %v4813_v57  ;;  %3951 = vtanh.f32 %v1906_v8  ;;  %v4880_v46 = vpop.f32.mrb[45].mxu0  ;;  %v1912_v16 = vadd.f32 %v4699_v35, %v4850_v56 }
 0x152   : > { %v3938_v30 = vpop.eup %3937  ;;  %v3374_v11 = vclamps-f32 %v1913_v33, 30.0  ;;  %v1915_v40 = vadd.f32 %v4665_v60, %v1635_v20  ;;  %v2525_v17 = vpack.c.bf16 %v4872_v37, %v4865_v27  ;;  %v4885_v62 = vpop.f32.mrb[46].mxu0 }
 0x153   : > { %3953 = vrcp.f32 %v2341_v39  ;;  %v2342_v53 = vadd.f32 1.0, %v3938_v30  ;;  %v3940_v47 = vpop.eup %3939  ;;  %v4888_v24 = vpop.f32.mrb[47].mxu0 }
 0x154   : > { %3955 = vtanh.f32 %v1908_v48  ;;  %v2233_v52 = vmul.f32 1.442695, %v3374_v11  ;;  %v3375_v54 = vclamps-f32 %v1915_v40, 30.0  ;;  %v4902_v33 = vpop.f32.mrb[48].mxu0 }
 0x155   : > { %v3942_v57 = vpop.eup %3941  ;;  %3957 = vrcp.f32 %v2342_v53  ;;  %v1640_v26 = vpop.f32.mrb[36].mxu1  ;;  %v1914_v53 = vadd.f32 %v4699_v35, %v1633_v18 }
 0x156   : > { %v3944_v14 = vpop.eup %3943  ;;  %3959 = vpow2.f32 %v2233_v52  ;;  %v2235_v51 = vmul.f32 1.442695, %v3375_v54  ;;  %v1641_v2 = vadd.f32 %v1640_v26, %v4827_v13  ;;  %v1642_v7 = vpop.f32.mrb[37].mxu1  ;;  %v4890_v8 = vmul.f32 %v3942_v57, %v3940_v47 }
 0x157   : > { %v3946_v49 = vpop.eup %3945  ;;  %v1643_v58 = vadd.f32 %v1642_v7, %v4830_v19  ;;  %v1644_v45 = vpop.f32.mrb[38].mxu1  ;;  %v1916_v7 = vadd.f32 %v4699_v35, %v4875_v9 }
 0x158   : > { %v3948_v32 = vpop.eup %3947  ;;  %3961 = vpow2.f32 %v2235_v51  ;;  %v1917_v41 = vadd.f32 %v4665_v60, %v1641_v2  ;;  %v1645_v28 = vadd.f32 %v1644_v45, %v4835_v31  ;;  %v1646_v48 = vpop.f32.mrb[39].mxu1  ;;  %v4897_v13 = vmul.f32 %v3946_v49, %v3944_v14 }
 0x159   : > { %v2343_v4 = vadd.f32 1.0, %v3948_v32  ;;  %v4900_v15 = vadd.f32 %v1646_v48, %v4838_v12  ;;  %3963 = vtanh.f32 %v1910_v34  ;;  %v4905_v36 = vpop.f32.mrb[49].mxu0 }
 0x15a   : > { %v3950_v20 = vpop.eup %3949  ;;  %v3376_v56 = vclamps-f32 %v1917_v41, 30.0  ;;  %v1919_v19 = vadd.f32 %v4665_v60, %v1645_v28  ;;  %v2526_v39 = vpack.c.bf16 %v4897_v13, %v4890_v8  ;;  %v4910_v52 = vpop.f32.mrb[50].mxu0 }
 0x15b   : > { %3965 = vrcp.f32 %v2343_v4  ;;  %v2344_v31 = vadd.f32 1.0, %v3950_v20  ;;  %v3952_v30 = vpop.eup %3951  ;;  %v4913_v14 = vpop.f32.mrb[51].mxu0 }
 0x15c   : > { %3967 = vtanh.f32 %v1912_v16  ;;  %v2237_v11 = vmul.f32 1.442695, %v3376_v56  ;;  %v3377_v40 = vclamps-f32 %v1919_v19, 30.0  ;;  %v4927_v4 = vpop.f32.mrb[52].mxu0 }
 0x15d   : > { %v3954_v12 = vpop.eup %3953  ;;  %3969 = vrcp.f32 %v2344_v31  ;;  %v1650_v47 = vpop.f32.mrb[40].mxu1 }
 0x15e   : > { %v3956_v54 = vpop.eup %3955  ;;  %3971 = vpow2.f32 %v2237_v11  ;;  %v2239_v57 = vmul.f32 1.442695, %v3377_v40  ;;  %v1651_v34 = vadd.f32 %v1650_v47, %v4852_v59  ;;  %v1652_v26 = vpop.f32.mrb[41].mxu1  ;;  %v4915_v51 = vmul.f32 %v3954_v12, %v3952_v30 }
 0x15f   : > { %v3958_v2 = vpop.eup %3957  ;;  %v1653_v49 = vadd.f32 %v1652_v26, %v4855_v0  ;;  %v1654_v18 = vpop.f32.mrb[42].mxu1  ;;  %v1918_v40 = vadd.f32 %v4699_v35, %v1643_v58 }
 0x160   : > { %v3960_v16 = vpop.eup %3959  ;;  %3973 = vpow2.f32 %v2239_v57  ;;  %v1921_v45 = vadd.f32 %v4665_v60, %v1651_v34  ;;  %v1655_v32 = vadd.f32 %v1654_v18, %v4860_v10  ;;  %v1656_v41 = vpop.f32.mrb[43].mxu1  ;;  %v4922_v59 = vmul.f32 %v3958_v2, %v3956_v54 }
 0x161   : > { %v2345_v28 = vadd.f32 1.0, %v3960_v16  ;;  %v4925_v48 = vadd.f32 %v1656_v41, %v4863_v23  ;;  %3975 = vtanh.f32 %v1914_v53  ;;  %v4930_v56 = vpop.f32.mrb[53].mxu0  ;;  %v1920_v18 = vadd.f32 %v4699_v35, %v4900_v15 }
 0x162   : > { %v3962_v20 = vpop.eup %3961  ;;  %v3378_v9 = vclamps-f32 %v1921_v45, 30.0  ;;  %v1923_v0 = vadd.f32 %v4665_v60, %v1655_v32  ;;  %v2527_v19 = vpack.c.bf16 %v4922_v59, %v4915_v51  ;;  %v4935_v53 = vpop.f32.mrb[54].mxu0  ;;  %v4270_v59 = vmov 1966171168  }
 0x163   : > { %3977 = vrcp.f32 %v2345_v28  ;;  %v2346_v10 = vadd.f32 1.0, %v3962_v20  ;;  %v3964_v31 = vpop.eup %3963  ;;  %v4938_v26 = vpop.f32.mrb[55].mxu0 }
 0x164   : > { %3979 = vtanh.f32 %v1916_v7  ;;  %v2241_v30 = vmul.f32 1.442695, %v3378_v9  ;;  %v3379_v11 = vclamps-f32 %v1923_v0, 30.0  ;;  %v4954_v0 = vpop.f32.mrb[56].mxu0 }
 0x165   : > { %v3966_v23 = vpop.eup %3965  ;;  %3981 = vrcp.f32 %v2346_v10  ;;  %v1660_v12 = vpop.f32.mrb[44].mxu1 }
 0x166   : > { %v3968_v47 = vpop.eup %3967  ;;  %3983 = vpow2.f32 %v2241_v30  ;;  %v2243_v54 = vmul.f32 1.442695, %v3379_v11  ;;  %v1661_v57 = vadd.f32 %v1660_v12, %v4877_v44  ;;  %v1662_v34 = vpop.f32.mrb[45].mxu1  ;;  %v4940_v2 = vmul.f32 %v3966_v23, %v3964_v31 }
 0x167   : > { %v3970_v7 = vpop.eup %3969  ;;  %v4945_v16 = vadd.f32 %v1662_v34, %v4880_v46  ;;  %v1664_v58 = vpop.f32.mrb[46].mxu1 }
 0x168   : > { %v3972_v45 = vpop.eup %3971  ;;  %3985 = vpow2.f32 %v2243_v54  ;;  %v1925_v32 = vadd.f32 %v4665_v60, %v1661_v57  ;;  %v1665_v41 = vadd.f32 %v1664_v58, %v4885_v62  ;;  %v1666_v44 = vpop.f32.mrb[47].mxu1  ;;  %v4949_v28 = vmul.f32 %v3970_v7, %v3968_v47 }
 0x169   : > { %v2347_v20 = vadd.f32 1.0, %v3972_v45  ;;  %v4952_v9 = vadd.f32 %v1666_v44, %v4888_v24  ;;  %3987 = vtanh.f32 %v1918_v40  ;;  %v4957_v31 = vpop.f32.mrb[57].mxu0  ;;  %v1922_v47 = vadd.f32 %v4699_v35, %v1653_v49 }
 0x16a   : > { %v3974_v15 = vpop.eup %3973  ;;  %v3380_v46 = vclamps-f32 %v1925_v32, 30.0  ;;  %v1927_v10 = vadd.f32 %v4665_v60, %v1665_v41  ;;  %v2528_v30 = vpack.c.bf16 %v4949_v28, %v4940_v2  ;;  %v4962_v40 = vpop.f32.mrb[58].mxu0 }
 0x16b   : > { %3989 = vrcp.f32 %v2347_v20  ;;  %v2348_v62 = vadd.f32 1.0, %v3974_v15  ;;  %v3976_v11 = vpop.eup %3975  ;;  %v4965_v32 = vpop.f32.mrb[59].mxu0 }
 0x16c   : > { %3991 = vtanh.f32 %v1920_v18  ;;  %v2245_v23 = vmul.f32 1.442695, %v3380_v46  ;;  %v3381_v12 = vclamps-f32 %v1927_v10, 30.0  ;;  %v1924_v18 = vadd.f32 %v4699_v35, %v4925_v48 }
 0x16d   : > { %v3978_v24 = vpop.eup %3977  ;;  %3993 = vrcp.f32 %v2348_v62  ;;  %v1670_v54 = vpop.f32.mrb[48].mxu1 }
 0x16e   : > { %v3980_v57 = vpop.eup %3979  ;;  %3995 = vpow2.f32 %v2245_v23  ;;  %v2247_v34 = vmul.f32 1.442695, %v3381_v12  ;;  %v1671_v7 = vadd.f32 %v1670_v54, %v4902_v33  ;;  %v1672_v58 = vpop.f32.mrb[49].mxu1  ;;  %v2473_v45 = vmul.f32 %v3978_v24, %v3976_v11 }
 0x16f   : > { %v3982_v41 = vpop.eup %3981  ;;  %v4970_v44 = vadd.f32 %v1672_v58, %v4905_v36  ;;  %v1674_v49 = vpop.f32.mrb[50].mxu1 }
 0x170   : > { %v3984_v20 = vpop.eup %3983  ;;  %3997 = vpow2.f32 %v2247_v34  ;;  %v1929_v15 = vadd.f32 %v4665_v60, %v1671_v7  ;;  %v1675_v46 = vadd.f32 %v1674_v49, %v4910_v52  ;;  %v1676_v10 = vpop.f32.mrb[51].mxu1  ;;  %v2474_v33 = vmul.f32 %v3982_v41, %v3980_v57 }
 0x171   : > { %v2349_v62 = vadd.f32 1.0, %v3984_v20  ;;  %v4975_v11 = vadd.f32 %v1676_v10, %v4913_v14  ;;  %v4977_v23 = vpop.f32.mrb[60].mxu0  ;;  %3999 = vtanh.f32 %v1922_v47  ;;  %v1926_v14 = vadd.f32 %v4699_v35, %v4945_v16 }
 0x172   : > { %v3986_v12 = vpop.eup %3985  ;;  %v3382_v48 = vclamps-f32 %v1929_v15, 30.0  ;;  %v1931_v36 = vadd.f32 %v4665_v60, %v1675_v46  ;;  %v2529_v24 = vpack.c.bf16 %v2474_v33, %v2473_v45  ;;  %v4980_v54 = vpop.f32.mrb[61].mxu0  ;;  %v1928_v16 = vadd.f32 %v4699_v35, %v4952_v9 }
 0x173   : > { %4001 = vrcp.f32 %v2349_v62  ;;  %v2350_v34 = vadd.f32 1.0, %v3986_v12  ;;  %v3988_v7 = vpop.eup %3987  ;;  %v4987_v47 = vpop.f32.mrb[62].mxu0 }
 0x174   : > { %4003 = vtanh.f32 %v1924_v18  ;;  %v2249_v52 = vmul.f32 1.442695, %v3382_v48  ;;  %v3383_v57 = vclamps-f32 %v1931_v36, 30.0  ;;  %3428 = vmatprep.subr.bf16.mxu0 %v2529_v24  ;;  %v4990_v46 = vpop.f32.mrb[63].mxu0 }
 0x175   : > { %v3990_v58 = vpop.eup %3989  ;;  %4005 = vrcp.f32 %v2350_v34  ;;  %v1680_v41 = vpop.f32.mrb[52].mxu1  ;;  %3429 = vmatpush3.bf16.msra.mxu0 %v2521_v43 }
 0x176   : > { %v3992_v45 = vpop.eup %3991  ;;  %4007 = vpow2.f32 %v2249_v52  ;;  %v2251_v49 = vmul.f32 1.442695, %v3383_v57  ;;  %v1681_v18 = vadd.f32 %v1680_v41, %v4927_v4  ;;  %v1682_v20 = vpop.f32.mrb[53].mxu1  ;;  %v2475_v15 = vmul.f32 %v3990_v58, %v3988_v7 }
 0x177   : > { %v3994_v10 = vpop.eup %3993  ;;  %v4995_v33 = vadd.f32 %v1682_v20, %v4930_v56  ;;  %v1684_v6 = vpop.f32.mrb[54].mxu1 }
 0x178   : > { %v3996_v61 = vpop.eup %3995  ;;  %4009 = vpow2.f32 %v2251_v49  ;;  %v1933_v43 = vadd.f32 %v4665_v60, %v1681_v18  ;;  %v1685_v62 = vadd.f32 %v1684_v6, %v4935_v53  ;;  %v1686_v12 = vpop.f32.mrb[55].mxu1  ;;  %v2476_v4 = vmul.f32 %v3994_v10, %v3992_v45 }
 0x179   : > { %v2351_v48 = vadd.f32 1.0, %v3996_v61  ;;  %v5000_v36 = vadd.f32 %v1686_v12, %v4938_v26  ;;  %v5002_v24 = vpop.f32.mrb[64].mxu0  ;;  %4011 = vtanh.f32 %v1926_v14  ;;  %v1930_v26 = vadd.f32 %v4699_v35, %v4970_v44 }
 0x17a   : > { %v3998_v34 = vpop.eup %3997  ;;  %v3384_v9 = vclamps-f32 %v1933_v43, 30.0  ;;  %v1935_v56 = vadd.f32 %v4665_v60, %v1685_v62  ;;  %v2530_v7 = vpack.c.bf16 %v2476_v4, %v2475_v15  ;;  %v5005_v52 = vpop.f32.mrb[65].mxu0  ;;  %v1932_v44 = vadd.f32 %v4699_v35, %v4975_v11 }
 0x17b   : > { %4013 = vrcp.f32 %v2351_v48  ;;  %v2352_v57 = vadd.f32 1.0, %v3998_v34  ;;  %v4000_v58 = vpop.eup %3999  ;;  %v5012_v14 = vpop.f32.mrb[66].mxu0 }
 0x17c   : > { %4015 = vtanh.f32 %v1928_v16  ;;  %v2253_v53 = vmul.f32 1.442695, %v3384_v9  ;;  %v3385_v41 = vclamps-f32 %v1935_v56, 30.0  ;;  %3430 = vmatprep.subr.bf16.mxu0 %v2530_v7  ;;  %v5015_v6 = vpop.f32.mrb[67].mxu0 }
 0x17d   : > { %v4002_v45 = vpop.eup %4001  ;;  %4017 = vrcp.f32 %v2352_v57  ;;  %v1690_v49 = vpop.f32.mrb[56].mxu1  ;;  %3431 = vmatpush3.bf16.msra.mxu0 %v2522_v42 }
 0x17e   : > { %v4004_v18 = vpop.eup %4003  ;;  %4019 = vpow2.f32 %v2253_v53  ;;  %v2255_v20 = vmul.f32 1.442695, %v3385_v41  ;;  %v1691_v15 = vadd.f32 %v1690_v49, %v4954_v0  ;;  %v1692_v10 = vpop.f32.mrb[57].mxu1  ;;  %v2477_v16 = vmul.f32 %v4002_v45, %v4000_v58 }
 0x17f   : > { %v4006_v61 = vpop.eup %4005  ;;  %v5020_v43 = vadd.f32 %v1692_v10, %v4957_v31  ;;  %v1694_v25 = vpop.f32.mrb[58].mxu1 }
 0x180   : > { %v4008_v1 = vpop.eup %4007  ;;  %4021 = vpow2.f32 %v2255_v20  ;;  %v1937_v42 = vadd.f32 %v4665_v60, %v1691_v15  ;;  %v1695_v62 = vadd.f32 %v1694_v25, %v4962_v40  ;;  %v1696_v12 = vpop.f32.mrb[59].mxu1  ;;  %v2478_v0 = vmul.f32 %v4006_v61, %v4004_v18 }
 0x181   : > { %v2353_v4 = vadd.f32 1.0, %v4008_v1  ;;  %v5025_v48 = vadd.f32 %v1696_v12, %v4965_v32  ;;  %v5027_v34 = vpop.f32.mrb[68].mxu0  ;;  %4023 = vtanh.f32 %v1930_v26  ;;  %v1934_v32 = vadd.f32 %v4699_v35, %v4995_v33 }
 0x182   : > { %v4010_v9 = vpop.eup %4009  ;;  %v3386_v11 = vclamps-f32 %v1937_v42, 30.0  ;;  %v1939_v31 = vadd.f32 %v4665_v60, %v1695_v62  ;;  %v2531_v56 = vpack.c.bf16 %v2478_v0, %v2477_v16  ;;  %v5030_v7 = vpop.f32.mrb[69].mxu0  ;;  %v1936_v33 = vadd.f32 %v4699_v35, %v5000_v36 }
 0x183   : > { %4025 = vrcp.f32 %v2353_v4  ;;  %v2354_v57 = vadd.f32 1.0, %v4010_v9  ;;  %v4012_v58 = vpop.eup %4011  ;;  %v5037_v26 = vpop.f32.mrb[70].mxu0 }
 0x184   : > { %4027 = vtanh.f32 %v1932_v44  ;;  %v2257_v40 = vmul.f32 1.442695, %v3386_v11  ;;  %v3387_v53 = vclamps-f32 %v1939_v31, 30.0  ;;  %3432 = vmatprep.subr.bf16.mxu0 %v2531_v56  ;;  %v5040_v16 = vpop.f32.mrb[71].mxu0 }
 0x185   : > { %v4014_v41 = vpop.eup %4013  ;;  %4029 = vrcp.f32 %v2354_v57  ;;  %v1700_v45 = vpop.f32.mrb[60].mxu1  ;;  %3433 = vmatpush3.bf16.msra.mxu0 %v2523_v22 }
 0x186   : > { %v4016_v49 = vpop.eup %4015  ;;  %4031 = vpow2.f32 %v2257_v40  ;;  %v2259_v18 = vmul.f32 1.442695, %v3387_v53  ;;  %v1701_v20 = vadd.f32 %v1700_v45, %v4977_v23  ;;  %v1702_v15 = vpop.f32.mrb[61].mxu1  ;;  %v2479_v10 = vmul.f32 %v4014_v41, %v4012_v58 }
 0x187   : > { %v4018_v61 = vpop.eup %4017  ;;  %v5045_v44 = vadd.f32 %v1702_v15, %v4980_v54  ;;  %v1704_v63 = vpop.f32.mrb[62].mxu1 }
 0x188   : > { %v4020_v29 = vpop.eup %4019  ;;  %4033 = vpow2.f32 %v2259_v18  ;;  %v1941_v22 = vadd.f32 %v4665_v60, %v1701_v20  ;;  %v1705_v25 = vadd.f32 %v1704_v63, %v4987_v47  ;;  %v1706_v1 = vpop.f32.mrb[63].mxu1  ;;  %v2480_v23 = vmul.f32 %v4018_v61, %v4016_v49 }
 0x189   : > { %v2355_v42 = vadd.f32 1.0, %v4020_v29  ;;  %v5050_v62 = vadd.f32 %v1706_v1, %v4990_v46  ;;  %v5052_v12 = vpop.f32.mrb[72].mxu0  ;;  %4035 = vtanh.f32 %v1934_v32  ;;  %v1938_v46 = vadd.f32 %v4699_v35, %v5020_v43 }
 0x18a   : > { %v4022_v0 = vpop.eup %4021  ;;  %v3388_v36 = vclamps-f32 %v1941_v22, 30.0  ;;  %v1943_v54 = vadd.f32 %v4665_v60, %v1705_v25  ;;  %v2532_v4 = vpack.c.bf16 %v2480_v23, %v2479_v10  ;;  %v5055_v9 = vpop.f32.mrb[73].mxu0  ;;  %v1940_v43 = vadd.f32 %v4699_v35, %v5025_v48 }
 0x18b   : > { %4037 = vrcp.f32 %v2355_v42  ;;  %v2356_v11 = vadd.f32 1.0, %v4022_v0  ;;  %v4024_v31 = vpop.eup %4023  ;;  %v5062_v40 = vpop.f32.mrb[74].mxu0 }
 0x18c   : > { %4039 = vtanh.f32 %v1936_v33  ;;  %v2261_v47 = vmul.f32 1.442695, %v3388_v36  ;;  %v3389_v56 = vclamps-f32 %v1943_v54, 30.0  ;;  %3434 = vmatprep.subr.bf16.mxu0 %v2532_v4  ;;  %v5065_v18 = vpop.f32.mrb[75].mxu0 }
 0x18d   : > { %v4026_v57 = vpop.eup %4025  ;;  %4041 = vrcp.f32 %v2356_v11  ;;  %v1710_v58 = vpop.f32.mrb[64].mxu1  ;;  %3435 = vmatpush3.bf16.msra.mxu0 %v2524_v38 }
 0x18e   : > { %v4028_v53 = vpop.eup %4027  ;;  %4043 = vpow2.f32 %v2261_v47  ;;  %v2263_v41 = vmul.f32 1.442695, %v3389_v56  ;;  %v1711_v32 = vadd.f32 %v1710_v58, %v5002_v24  ;;  %v1712_v45 = vpop.f32.mrb[65].mxu1  ;;  %v2481_v49 = vmul.f32 %v4026_v57, %v4024_v31 }
 0x18f   : > { %v4030_v20 = vpop.eup %4029  ;;  %v5070_v15 = vadd.f32 %v1712_v45, %v5005_v52  ;;  %v1714_v5 = vpop.f32.mrb[66].mxu1 }
 0x190   : > { %v4032_v3 = vpop.eup %4031  ;;  %4045 = vpow2.f32 %v2263_v41  ;;  %v1945_v38 = vadd.f32 %v4665_v60, %v1711_v32  ;;  %v1715_v10 = vadd.f32 %v1714_v5, %v5012_v14  ;;  %v1716_v61 = vpop.f32.mrb[67].mxu1  ;;  %v2482_v24 = vmul.f32 %v4030_v20, %v4028_v53 }
 0x191   : > { %v2357_v33 = vadd.f32 1.0, %v4032_v3  ;;  %v5075_v63 = vadd.f32 %v1716_v61, %v5015_v6  ;;  %v5077_v29 = vpop.f32.mrb[76].mxu0  ;;  %4047 = vtanh.f32 %v1938_v46  ;;  %v1942_v6 = vadd.f32 %v4699_v35, %v5045_v44 }
 0x192   : > { %v4034_v22 = vpop.eup %4033  ;;  %v3390_v48 = vclamps-f32 %v1945_v38, 30.0  ;;  %v1947_v52 = vadd.f32 %v4665_v60, %v1715_v10  ;;  %v2533_v25 = vpack.c.bf16 %v2482_v24, %v2481_v49  ;;  %v5080_v1 = vpop.f32.mrb[77].mxu0  ;;  %v1944_v44 = vadd.f32 %v4699_v35, %v5050_v62 }
 0x193   : > { %4049 = vrcp.f32 %v2357_v33  ;;  %v2358_v23 = vadd.f32 1.0, %v4034_v22  ;;  %v4036_v42 = vpop.eup %4035  ;;  %v5087_v4 = vpop.f32.mrb[78].mxu0 }
 0x194   : > { %4051 = vtanh.f32 %v1940_v43  ;;  %v2265_v14 = vmul.f32 1.442695, %v3390_v48  ;;  %v3391_v0 = vclamps-f32 %v1947_v52, 30.0  ;;  %3436 = vmatprep.subr.bf16.mxu0 %v2533_v25  ;;  %v5090_v46 = vpop.f32.mrb[79].mxu0 }
 0x195   : > { %v4038_v36 = vpop.eup %4037  ;;  %4053 = vrcp.f32 %v2358_v23  ;;  %v1720_v54 = vpop.f32.mrb[68].mxu1  ;;  %3437 = vmatpush3.bf16.msra.mxu0 %v2525_v17 }
 0x196   : > { %v4040_v11 = vpop.eup %4039  ;;  %4055 = vpow2.f32 %v2265_v14  ;;  %v2267_v31 = vmul.f32 1.442695, %v3391_v0  ;;  %v1721_v47 = vadd.f32 %v1720_v54, %v5027_v34  ;;  %v1722_v56 = vpop.f32.mrb[69].mxu1  ;;  %v2483_v57 = vmul.f32 %v4038_v36, %v4036_v42 }
 0x197   : > { %v4042_v58 = vpop.eup %4041  ;;  %v5095_v53 = vadd.f32 %v1722_v56, %v5030_v7  ;;  %v1724_v27 = vpop.f32.mrb[70].mxu1 }
 0x198   : > { %v4044_v37 = vpop.eup %4043  ;;  %4057 = vpow2.f32 %v2267_v31  ;;  %v1949_v17 = vadd.f32 %v4665_v60, %v1721_v47  ;;  %v1725_v41 = vadd.f32 %v1724_v27, %v5037_v26  ;;  %v1726_v32 = vpop.f32.mrb[71].mxu1  ;;  %v2484_v34 = vmul.f32 %v4042_v58, %v4040_v11 }
 0x199   : > { %v2359_v45 = vadd.f32 1.0, %v4044_v37  ;;  %v5100_v49 = vadd.f32 %v1726_v32, %v5040_v16  ;;  %v5102_v20 = vpop.f32.mrb[80].mxu0  ;;  %4059 = vtanh.f32 %v1942_v6  ;;  %v1946_v16 = vadd.f32 %v4699_v35, %v5070_v15 }
 0x19a   : > { %v4046_v43 = vpop.eup %4045  ;;  %v3392_v62 = vclamps-f32 %v1949_v17, 30.0  ;;  %v1951_v7 = vadd.f32 %v4665_v60, %v1725_v41  ;;  %v2534_v5 = vpack.c.bf16 %v2484_v34, %v2483_v57  ;;  %v5105_v3 = vpop.f32.mrb[81].mxu0  ;;  %v1948_v15 = vadd.f32 %v4699_v35, %v5075_v63 }
 0x19b   : > { %4061 = vrcp.f32 %v2359_v45  ;;  %v2360_v38 = vadd.f32 1.0, %v4046_v43  ;;  %v4048_v10 = vpop.eup %4047  ;;  %v5112_v22 = vpop.f32.mrb[82].mxu0 }
 0x19c   : > { %4063 = vtanh.f32 %v1944_v44  ;;  %v2269_v26 = vmul.f32 1.442695, %v3392_v62  ;;  %v3393_v61 = vclamps-f32 %v1951_v7, 30.0  ;;  %3438 = vmatprep.subr.bf16.mxu0 %v2534_v5  ;;  %v5115_v14 = vpop.f32.mrb[83].mxu0 }
 0x19d   : > { %v4050_v24 = vpop.eup %4049  ;;  %4065 = vrcp.f32 %v2360_v38  ;;  %v1730_v33 = vpop.f32.mrb[72].mxu1  ;;  %3439 = vmatpush3.bf16.msra.mxu0 %v2526_v39 }
 0x19e   : > { %v4052_v48 = vpop.eup %4051  ;;  %4067 = vpow2.f32 %v2269_v26  ;;  %v2271_v52 = vmul.f32 1.442695, %v3393_v61  ;;  %v1731_v25 = vadd.f32 %v1730_v33, %v5052_v12  ;;  %v1732_v23 = vpop.f32.mrb[73].mxu1  ;;  %v2485_v42 = vmul.f32 %v4050_v24, %v4048_v10 }
 0x19f   : > { %v4054_v0 = vpop.eup %4053  ;;  %v5120_v36 = vadd.f32 %v1732_v23, %v5055_v9  ;;  %v1734_v8 = vpop.f32.mrb[74].mxu1 }
 0x1a0   : > { %v4056_v13 = vpop.eup %4055  ;;  %4069 = vpow2.f32 %v2271_v52  ;;  %v1953_v39 = vadd.f32 %v4665_v60, %v1731_v25  ;;  %v1735_v6 = vadd.f32 %v1734_v8, %v5062_v40  ;;  %v1736_v54 = vpop.f32.mrb[75].mxu1  ;;  %v2486_v12 = vmul.f32 %v4054_v0, %v4052_v48 }
 0x1a1   : > { %v2361_v11 = vadd.f32 1.0, %v4056_v13  ;;  %v5125_v31 = vadd.f32 %v1736_v54, %v5065_v18  ;;  %v5127_v47 = vpop.f32.mrb[84].mxu0  ;;  %4071 = vtanh.f32 %v1946_v16  ;;  %v1950_v18 = vadd.f32 %v4699_v35, %v5095_v53 }
 0x1a2   : > { %v4058_v56 = vpop.eup %4057  ;;  %v3394_v63 = vclamps-f32 %v1953_v39, 30.0  ;;  %v1955_v9 = vadd.f32 %v4665_v60, %v1735_v6  ;;  %v2535_v57 = vpack.c.bf16 %v2486_v12, %v2485_v42  ;;  %v5130_v58 = vpop.f32.mrb[85].mxu0  ;;  %v1952_v53 = vadd.f32 %v4699_v35, %v5100_v49 }
 0x1a3   : > { %4073 = vrcp.f32 %v2361_v11  ;;  %v2362_v44 = vadd.f32 1.0, %v4058_v56  ;;  %v4060_v27 = vpop.eup %4059  ;;  %v5137_v32 = vpop.f32.mrb[86].mxu0  ;;  %v1954_v12 = vadd.f32 %v4699_v35, %v5120_v36  ;;  %v1956_v2 = vadd.f32 %v4699_v35, %v5125_v31 }
 0x1a4   : > { %4075 = vtanh.f32 %v1948_v15  ;;  %v2273_v40 = vmul.f32 1.442695, %v3394_v63  ;;  %v3395_v37 = vclamps-f32 %v1955_v9, 30.0  ;;  %3440 = vmatprep.subr.bf16.mxu0 %v2535_v57  ;;  %v5140_v5 = vpop.f32.mrb[87].mxu0 }
 0x1a5   : > { %v4062_v17 = vpop.eup %4061  ;;  %4077 = vrcp.f32 %v2362_v44  ;;  %v1740_v41 = vpop.f32.mrb[76].mxu1  ;;  %3441 = vmatpush3.bf16.msra.mxu0 %v2527_v19  ;;  %v2565_v19 = vunpack.c.l.s4 %v4270_v59 }
 0x1a6   : > { %v4064_v34 = vpop.eup %4063  ;;  %4079 = vpow2.f32 %v2273_v40  ;;  %v2275_v45 = vmul.f32 1.442695, %v3395_v37  ;;  %v1741_v43 = vadd.f32 %v1740_v41, %v5077_v29  ;;  %v1742_v62 = vpop.f32.mrb[77].mxu1  ;;  %v2487_v7 = vmul.f32 %v4062_v17, %v4060_v27 }
 0x1a7   : > { %v4066_v38 = vpop.eup %4065  ;;  %v5145_v10 = vadd.f32 %v1742_v62, %v5080_v1  ;;  %v1744_v51 = vpop.f32.mrb[78].mxu1  ;;  %v3422_v1 = vld.sshfl [vmem:[%s442_s18] sm:$0x33 pattern:$0x75316420]  ;;  %v2566_v52 = vunpack.c.0.s8 %v2565_v19 }
 0x1a8   : > { %v4068_v26 = vpop.eup %4067  ;;  %4081 = vpow2.f32 %v2275_v45  ;;  %v1957_v61 = vadd.f32 %v4665_v60, %v1741_v43  ;;  %v1745_v29 = vadd.f32 %v1744_v51, %v5087_v4  ;;  %v1746_v24 = vpop.f32.mrb[79].mxu1  ;;  %v2488_v16 = vmul.f32 %v4066_v38, %v4064_v34 }
 0x1a9   : > { %v2363_v33 = vadd.f32 1.0, %v4068_v26  ;;  %4083 = vtanh.f32 %v1950_v18  ;;  %v5150_v48 = vadd.f32 %v1746_v24, %v5090_v46  ;;  %v5152_v49 = vpop.f32.mrb[88].mxu0  ;;  %v2563_v15 = vcombine.high %v3422_v1, %v3422_v1 }
 0x1aa   : > { %v4070_v25 = vpop.eup %4069  ;;  %v3396_v23 = vclamps-f32 %v1957_v61, 30.0  ;;  %v1959_v42 = vadd.f32 %v4665_v60, %v1745_v29  ;;  %v2536_v4 = vpack.c.bf16 %v2488_v16, %v2487_v7  ;;  %v5160_v0 = vpop.f32.mrb[89].mxu0  ;;  %v2569_v46 = vsub.s32 %v2566_v52, %v4645_v50 }
 0x1ab   : > { %4085 = vrcp.f32 %v2363_v33  ;;  %v2364_v8 = vadd.f32 1.0, %v4070_v25  ;;  %v4072_v13 = vpop.eup %4071  ;;  %v5168_v56 = vpop.f32.mrb[90].mxu0  ;;  %v1958_v29 = vadd.f32 %v4699_v35, %v5145_v10 }
 0x1ac   : > { %4087 = vtanh.f32 %v1952_v53  ;;  %v2277_v39 = vmul.f32 1.442695, %v3396_v23  ;;  %v3397_v6 = vclamps-f32 %v1959_v42, 30.0  ;;  %3442 = vmatprep.subr.bf16.mxu0 %v2536_v4  ;;  %v5170_v63 = vrot.slane %v3422_v1, %v2569_v46  ;;  %v5173_v37 = vpop.f32.mrb[91].mxu0 }
 0x1ad   : > { %v4074_v54 = vpop.eup %4073  ;;  %4089 = vrcp.f32 %v2364_v8  ;;  %v1750_v11 = vpop.f32.mrb[80].mxu1  ;;  %3443 = vmatpush3.bf16.msra.mxu0 %v2528_v30  ;;  %v2577_v9 = vrot.slane %v2563_v15, %v2569_v46  ;;  %v1960_v15 = vadd.f32 %v4699_v35, %v5150_v48 }
 0x1ae   : > { %v4076_v57 = vpop.eup %4075  ;;  %4091 = vpow2.f32 %v2277_v39  ;;  %v2279_v44 = vmul.f32 1.442695, %v3397_v6  ;;  %v1751_v27 = vadd.f32 %v1750_v11, %v5102_v20  ;;  %v1752_v40 = vpop.f32.mrb[81].mxu1  ;;  %v5175_v17 = vmul.f32 %v4074_v54, %v4072_v13 }
 0x1af   : > { %v4078_v36 = vpop.eup %4077  ;;  %v5180_v28 = vadd.f32 %v1752_v40, %v5105_v3  ;;  %v1754_v30 = vpop.f32.mrb[82].mxu1  ;;  %2616 = vmatprep.mubr.bf16.mxu0 %v2577_v9  ;;  %v2579_v18 = vcombine.high %v2577_v9, %v2577_v9 }
 0x1b0   : > { %v4080_v41 = vpop.eup %4079  ;;  %4093 = vpow2.f32 %v2279_v44  ;;  %v1961_v34 = vadd.f32 %v4665_v60, %v1751_v27  ;;  %v1755_v20 = vadd.f32 %v1754_v30, %v5112_v22  ;;  %v1756_v45 = vpop.f32.mrb[83].mxu1  ;;  %v5184_v43 = vmul.f32 %v4078_v36, %v4076_v57  ;;  %2617 = vmatmul.mubr.bf16.vlgmr.msra.gmra.mrb[128].mxu0 %v5170_v63 }
 0x1b1   : > { %v2365_v62 = vadd.f32 1.0, %v4080_v41  ;;  %v5188_v31 = vadd.f32 %v1756_v45, %v5115_v14  ;;  %v5190_v3 = vpop.f32.mrb[92].mxu0  ;;  %2656 = vmatprep.mubr.bf16.mxu1 %v2579_v18  ;;  %4095 = vtanh.f32 %v1954_v12 }
 0x1b2   : > { %v4082_v7 = vpop.eup %4081  ;;  %v3398_v38 = vclamps-f32 %v1961_v34, 30.0  ;;  %v1963_v53 = vadd.f32 %v4665_v60, %v1755_v20  ;;  %v5193_v51 = vpop.f32.mrb[93].mxu0  ;;  %v2537_v22 = vpack.c.bf16 %v5184_v43, %v5175_v17 }
 0x1b3   : > { %v4084_v59 = vpop.eup %4083  ;;  %4097 = vrcp.f32 %v2365_v62  ;;  %v2366_v19 = vadd.f32 1.0, %v4082_v7  ;;  %v5199_v16 = vpop.f32.mrb[94].mxu0 }
 0x1b4   : > { %4099 = vtanh.f32 %v1956_v2  ;;  %v2281_v26 = vmul.f32 1.442695, %v3398_v38  ;;  %v3399_v14 = vclamps-f32 %v1963_v53, 30.0  ;;  %v5202_v23 = vpop.f32.mrb[95].mxu0  ;;  %v1962_v2 = vadd.f32 %v4699_v35, %v5180_v28 }
 0x1b5   : > { %v4086_v61 = vpop.eup %4085  ;;  %4101 = vrcp.f32 %v2366_v19  ;;  %v1760_v24 = vpop.f32.mrb[84].mxu1  ;;  %v1964_v53 = vadd.f32 %v4699_v35, %v5188_v31 }
 0x1b6   : > { %v4088_v33 = vpop.eup %4087  ;;  %4103 = vpow2.f32 %v2281_v26  ;;  %v2283_v1 = vmul.f32 1.442695, %v3399_v14  ;;  %v1761_v52 = vadd.f32 %v1760_v24, %v5127_v47  ;;  %v1762_v25 = vpop.f32.mrb[85].mxu1  ;;  %v5204_v42 = vmul.f32 %v4086_v61, %v4084_v59 }
 0x1b7   : > { %v4090_v4 = vpop.eup %4089  ;;  %v1763_v8 = vadd.f32 %v1762_v25, %v5130_v58  ;;  %v1764_v10 = vpop.f32.mrb[86].mxu1 }
 0x1b8   : > { %v4092_v46 = vpop.eup %4091  ;;  %4105 = vpow2.f32 %v2283_v1  ;;  %v1965_v13 = vadd.f32 %v4665_v60, %v1761_v52  ;;  %v1765_v39 = vadd.f32 %v1764_v10, %v5137_v32  ;;  %v1766_v6 = vpop.f32.mrb[87].mxu1  ;;  %v5211_v47 = vmul.f32 %v4090_v4, %v4088_v33 }
 0x1b9   : > { %v2367_v54 = vadd.f32 1.0, %v4092_v46  ;;  %v5214_v12 = vadd.f32 %v1766_v6, %v5140_v5  ;;  %v5216_v11 = vpop.f32.mrb[96].mxu0  ;;  %4107 = vtanh.f32 %v1958_v29  ;;  %v1966_v46 = vadd.f32 %v4699_v35, %v1763_v8 }
 0x1ba   : > { %v4094_v9 = vpop.eup %4093  ;;  %v3400_v48 = vclamps-f32 %v1965_v13, 30.0  ;;  %v1967_v58 = vadd.f32 %v4665_v60, %v1765_v39  ;;  %v5219_v57 = vpop.f32.mrb[97].mxu0  ;;  %v2538_v44 = vpack.c.bf16 %v5211_v47, %v5204_v42 }
 0x1bb   : > { %4109 = vrcp.f32 %v2367_v54  ;;  %v2368_v32 = vadd.f32 1.0, %v4094_v9  ;;  %v4096_v27 = vpop.eup %4095  ;;  %v5225_v18 = vpop.f32.mrb[98].mxu0 }
 0x1bc   : > { %4111 = vtanh.f32 %v1960_v15  ;;  %v2285_v40 = vmul.f32 1.442695, %v3400_v48  ;;  %v3401_v36 = vclamps-f32 %v1967_v58, 30.0  ;;  %v5228_v62 = vpop.f32.mrb[99].mxu0 }
 0x1bd   : > { %v4098_v5 = vpop.eup %4097  ;;  %4113 = vrcp.f32 %v2368_v32  ;;  %v1770_v30 = vpop.f32.mrb[88].mxu1 }
 0x1be   : > { %v4100_v41 = vpop.eup %4099  ;;  %4115 = vpow2.f32 %v2285_v40  ;;  %v2287_v34 = vmul.f32 1.442695, %v3401_v36  ;;  %v1771_v20 = vadd.f32 %v1770_v30, %v5152_v49  ;;  %v1772_v45 = vpop.f32.mrb[89].mxu1  ;;  %v5230_v7 = vmul.f32 %v4098_v5, %v4096_v27 }
 0x1bf   : > { %v4102_v38 = vpop.eup %4101  ;;  %v1773_v59 = vadd.f32 %v1772_v45, %v5160_v0  ;;  %v1774_v28 = vpop.f32.mrb[90].mxu1  ;;  %v1968_v40 = vadd.f32 %v4699_v35, %v5214_v12 }
 0x1c0   : > { %v4104_v19 = vpop.eup %4103  ;;  %4117 = vpow2.f32 %v2287_v34  ;;  %v1969_v26 = vadd.f32 %v4665_v60, %v1771_v20  ;;  %v1775_v14 = vadd.f32 %v1774_v28, %v5168_v56  ;;  %v1776_v61 = vpop.f32.mrb[91].mxu1  ;;  %v5237_v49 = vmul.f32 %v4102_v38, %v4100_v41 }
 0x1c1   : > { %v2369_v29 = vadd.f32 1.0, %v4104_v19  ;;  %v5240_v24 = vadd.f32 %v1776_v61, %v5173_v37  ;;  %v5242_v33 = vpop.f32.mrb[100].mxu0  ;;  %4119 = vtanh.f32 %v1962_v2  ;;  %v1970_v61 = vadd.f32 %v4699_v35, %v1773_v59 }
 0x1c2   : > { %v4106_v1 = vpop.eup %4105  ;;  %v3402_v31 = vclamps-f32 %v1969_v26, 30.0  ;;  %v1971_v0 = vadd.f32 %v4665_v60, %v1775_v14  ;;  %v5245_v52 = vpop.f32.mrb[101].mxu0  ;;  %v2539_v25 = vpack.c.bf16 %v5237_v49, %v5230_v7 }
 0x1c3   : > { %4121 = vrcp.f32 %v2369_v29  ;;  %v2370_v56 = vadd.f32 1.0, %v4106_v1  ;;  %v4108_v4 = vpop.eup %4107  ;;  %v5250_v39 = vpop.f32.mrb[102].mxu0 }
 0x1c4   : > { %4123 = vtanh.f32 %v1964_v53  ;;  %v2289_v15 = vmul.f32 1.442695, %v3402_v31  ;;  %v3403_v10 = vclamps-f32 %v1971_v0, 30.0  ;;  %v5253_v58 = vpop.f32.mrb[103].mxu0 }
 0x1c5   : > { %v4110_v37 = vpop.eup %4109  ;;  %4125 = vrcp.f32 %v2370_v56  ;;  %v1780_v13 = vpop.f32.mrb[92].mxu1 }
 0x1c6   : > { %v4112_v6 = vpop.eup %4111  ;;  %4127 = vpow2.f32 %v2289_v15  ;;  %v2291_v54 = vmul.f32 1.442695, %v3403_v10  ;;  %v1781_v9 = vadd.f32 %v1780_v13, %v5190_v3  ;;  %v1782_v48 = vpop.f32.mrb[93].mxu1  ;;  %v5255_v32 = vmul.f32 %v4110_v37, %v4108_v4 }
 0x1c7   : > { %v4114_v27 = vpop.eup %4113  ;;  %v1783_v36 = vadd.f32 %v1782_v48, %v5193_v51  ;;  %v1784_v8 = vpop.f32.mrb[94].mxu1 }
 0x1c8   : > { %v4116_v5 = vpop.eup %4115  ;;  %4129 = vpow2.f32 %v2291_v54  ;;  %v1973_v2 = vadd.f32 %v4665_v60, %v1781_v9  ;;  %v1785_v30 = vadd.f32 %v1784_v8, %v5199_v16  ;;  %v1786_v41 = vpop.f32.mrb[95].mxu1  ;;  %v5262_v3 = vmul.f32 %v4114_v27, %v4112_v6 }
 0x1c9   : > { %v2371_v34 = vadd.f32 1.0, %v4116_v5  ;;  %v5265_v20 = vadd.f32 %v1786_v41, %v5202_v23  ;;  %v5267_v45 = vpop.f32.mrb[104].mxu0  ;;  %4131 = vtanh.f32 %v1966_v46  ;;  %v1972_v46 = vadd.f32 %v4699_v35, %v5240_v24 }
 0x1ca   : > { %v4118_v38 = vpop.eup %4117  ;;  %v3404_v12 = vclamps-f32 %v1973_v2, 30.0  ;;  %v1975_v51 = vadd.f32 %v4665_v60, %v1785_v30  ;;  %v5270_v53 = vpop.f32.mrb[105].mxu0  ;;  %v2540_v28 = vpack.c.bf16 %v5262_v3, %v5255_v32 }
 0x1cb   : > { %4133 = vrcp.f32 %v2371_v34  ;;  %v2372_v16 = vadd.f32 1.0, %v4118_v38  ;;  %v4120_v19 = vpop.eup %4119  ;;  %v5275_v1 = vpop.f32.mrb[106].mxu0 }
 0x1cc   : > { %4135 = vtanh.f32 %v1968_v40  ;;  %v2293_v26 = vmul.f32 1.442695, %v3404_v12  ;;  %v3405_v14 = vclamps-f32 %v1975_v51, 30.0  ;;  %v5278_v15 = vpop.f32.mrb[107].mxu0  ;;  %v1974_v12 = vadd.f32 %v4699_v35, %v1783_v36 }
 0x1cd   : > { %v4122_v23 = vpop.eup %4121  ;;  %4137 = vrcp.f32 %v2372_v16  ;;  %v1790_v29 = vpop.f32.mrb[96].mxu1 }
 0x1ce   : > { %v4124_v31 = vpop.eup %4123  ;;  %4139 = vpow2.f32 %v2293_v26  ;;  %v2295_v0 = vmul.f32 1.442695, %v3405_v14  ;;  %v1791_v56 = vadd.f32 %v1790_v29, %v5216_v11  ;;  %v1792_v4 = vpop.f32.mrb[97].mxu1  ;;  %v5280_v10 = vmul.f32 %v4122_v23, %v4120_v19 }
 0x1cf   : > { %v4126_v37 = vpop.eup %4125  ;;  %v1793_v13 = vadd.f32 %v1792_v4, %v5219_v57  ;;  %v1794_v59 = vpop.f32.mrb[98].mxu1 }
 0x1d0   : > { %v4128_v6 = vpop.eup %4127  ;;  %4141 = vpow2.f32 %v2295_v0  ;;  %v1977_v54 = vadd.f32 %v4665_v60, %v1791_v56  ;;  %v1795_v9 = vadd.f32 %v1794_v59, %v5225_v18  ;;  %v1796_v48 = vpop.f32.mrb[99].mxu1  ;;  %v5287_v11 = vmul.f32 %v4126_v37, %v4124_v31 }
 0x1d1   : > { %v2373_v27 = vadd.f32 1.0, %v4128_v6  ;;  %v5290_v40 = vadd.f32 %v1796_v48, %v5228_v62  ;;  %v5292_v8 = vpop.f32.mrb[108].mxu0  ;;  %4143 = vtanh.f32 %v1970_v61  ;;  %v1976_v0 = vadd.f32 %v4699_v35, %v5265_v20 }
 0x1d2   : > { %v4130_v5 = vpop.eup %4129  ;;  %v3406_v24 = vclamps-f32 %v1977_v54, 30.0  ;;  %v1979_v57 = vadd.f32 %v4665_v60, %v1795_v9  ;;  %v5295_v2 = vpop.f32.mrb[109].mxu0  ;;  %v2541_v30 = vpack.c.bf16 %v5287_v11, %v5280_v10 }
 0x1d3   : > { %4145 = vrcp.f32 %v2373_v27  ;;  %v2374_v18 = vadd.f32 1.0, %v4130_v5  ;;  %v4132_v41 = vpop.eup %4131  ;;  %v5300_v16 = vpop.f32.mrb[110].mxu0 }
 0x1d4   : > { %4147 = vtanh.f32 %v1972_v46  ;;  %v2297_v34 = vmul.f32 1.442695, %v3406_v24  ;;  %v3407_v38 = vclamps-f32 %v1979_v57, 30.0  ;;  %v5303_v61 = vpop.f32.mrb[111].mxu0 }
 0x1d5   : > { %v4134_v62 = vpop.eup %4133  ;;  %4149 = vrcp.f32 %v2374_v18  ;;  %v1800_v51 = vpop.f32.mrb[100].mxu1 }
 0x1d6   : > { %v4136_v19 = vpop.eup %4135  ;;  %4151 = vpow2.f32 %v2297_v34  ;;  %v2299_v26 = vmul.f32 1.442695, %v3407_v38  ;;  %v1801_v14 = vadd.f32 %v1800_v51, %v5242_v33  ;;  %v1802_v23 = vpop.f32.mrb[101].mxu1  ;;  %v5305_v29 = vmul.f32 %v4134_v62, %v4132_v41 }
 0x1d7   : > { %v4138_v31 = vpop.eup %4137  ;;  %v1803_v56 = vadd.f32 %v1802_v23, %v5245_v52  ;;  %v1804_v36 = vpop.f32.mrb[102].mxu1  ;;  %v1978_v41 = vadd.f32 %v4699_v35, %v1793_v13 }
 0x1d8   : > { %v4140_v4 = vpop.eup %4139  ;;  %4153 = vpow2.f32 %v2299_v26  ;;  %v1981_v37 = vadd.f32 %v4665_v60, %v1801_v14  ;;  %v1805_v46 = vadd.f32 %v1804_v36, %v5250_v39  ;;  %v1806_v59 = vpop.f32.mrb[103].mxu1  ;;  %v5312_v33 = vmul.f32 %v4138_v31, %v4136_v19 }
 0x1d9   : > { %v2375_v6 = vadd.f32 1.0, %v4140_v4  ;;  %v5315_v54 = vadd.f32 %v1806_v59, %v5253_v58  ;;  %v5317_v9 = vpop.f32.mrb[112].mxu0  ;;  %4155 = vtanh.f32 %v1974_v12  ;;  %v1980_v31 = vadd.f32 %v4699_v35, %v5290_v40 }
 0x1da   : > { %v4142_v48 = vpop.eup %4141  ;;  %v3408_v20 = vclamps-f32 %v1981_v37, 30.0  ;;  %v1983_v52 = vadd.f32 %v4665_v60, %v1805_v46  ;;  %v5320_v27 = vpop.f32.mrb[113].mxu0  ;;  %v2542_v5 = vpack.c.bf16 %v5312_v33, %v5305_v29  ;;  %v2578_v29 = vcombine.high %v5170_v63, %v5170_v63  ;;  %v2671_v63 = vld [vmem:[%s5850_s6] sm:$0xff] (!%p3423_p6) }
 0x1db   : > { %4157 = vrcp.f32 %v2375_v6  ;;  %v2376_v39 = vadd.f32 1.0, %v4142_v48  ;;  %v4144_v24 = vpop.eup %4143  ;;  %v5325_v38 = vpop.f32.mrb[114].mxu0 }
 0x1dc   : > { %4159 = vtanh.f32 %v1976_v0  ;;  %v2301_v57 = vmul.f32 1.442695, %v3408_v20  ;;  %v3409_v18 = vclamps-f32 %v1983_v52, 30.0  ;;  %v5328_v26 = vpop.f32.mrb[115].mxu0 }
 0x1dd   : > { %v4146_v58 = vpop.eup %4145  ;;  %4161 = vrcp.f32 %v2376_v39  ;;  %v1810_v34 = vpop.f32.mrb[104].mxu1 }
 0x1de   : > { %v4148_v62 = vpop.eup %4147  ;;  %4163 = vpow2.f32 %v2301_v57  ;;  %v2303_v12 = vmul.f32 1.442695, %v3409_v18  ;;  %v1811_v51 = vadd.f32 %v1810_v34, %v5267_v45  ;;  %v1812_v19 = vpop.f32.mrb[105].mxu1  ;;  %v5330_v14 = vmul.f32 %v4146_v58, %v4144_v24 }
 0x1df   : > { %v4150_v23 = vpop.eup %4149  ;;  %v1813_v0 = vadd.f32 %v1812_v19, %v5270_v53  ;;  %v1814_v13 = vpop.f32.mrb[106].mxu1  ;;  %v1982_v58 = vadd.f32 %v4699_v35, %v1803_v56 }
 0x1e0   : > { %v4152_v36 = vpop.eup %4151  ;;  %4165 = vpow2.f32 %v2303_v12  ;;  %v1985_v4 = vadd.f32 %v4665_v60, %v1811_v51  ;;  %v1815_v37 = vadd.f32 %v1814_v13, %v5275_v1  ;;  %v1816_v46 = vpop.f32.mrb[107].mxu1  ;;  %v5337_v45 = vmul.f32 %v4150_v23, %v4148_v62 }
 0x1e1   : > { %v2377_v59 = vadd.f32 1.0, %v4152_v36  ;;  %v5340_v6 = vadd.f32 %v1816_v46, %v5278_v15  ;;  %v5342_v48 = vpop.f32.mrb[116].mxu0  ;;  %4167 = vtanh.f32 %v1978_v41  ;;  %v1984_v36 = vadd.f32 %v4699_v35, %v5315_v54 }
 0x1e2   : > { %v4154_v20 = vpop.eup %4153  ;;  %v3410_v40 = vclamps-f32 %v1985_v4, 30.0  ;;  %v1987_v53 = vadd.f32 %v4665_v60, %v1815_v37  ;;  %v5345_v52 = vpop.f32.mrb[117].mxu0  ;;  %v2543_v39 = vpack.c.bf16 %v5337_v45, %v5330_v14 }
 0x1e3   : > { %4169 = vrcp.f32 %v2377_v59  ;;  %v2378_v1 = vadd.f32 1.0, %v4154_v20  ;;  %v4156_v24 = vpop.eup %4155  ;;  %v5350_v41 = vpop.f32.mrb[118].mxu0 }
 0x1e4   : > { %4171 = vtanh.f32 %v1980_v31  ;;  %v2305_v57 = vmul.f32 1.442695, %v3410_v40  ;;  %v3411_v18 = vclamps-f32 %v1987_v53, 30.0  ;;  %v5353_v23 = vpop.f32.mrb[119].mxu0 }
 0x1e5   : > { %v4158_v15 = vpop.eup %4157  ;;  %4173 = vrcp.f32 %v2378_v1  ;;  %v1820_v34 = vpop.f32.mrb[108].mxu1 }
 0x1e6   : > { %v4160_v62 = vpop.eup %4159  ;;  %4175 = vpow2.f32 %v2305_v57  ;;  %v2307_v12 = vmul.f32 1.442695, %v3411_v18  ;;  %v1821_v51 = vadd.f32 %v1820_v34, %v5292_v8  ;;  %v1822_v19 = vpop.f32.mrb[109].mxu1  ;;  %v5355_v13 = vmul.f32 %v4158_v15, %v4156_v24 }
 0x1e7   : > { %v4162_v31 = vpop.eup %4161  ;;  %v5360_v4 = vadd.f32 %v1822_v19, %v5295_v2  ;;  %v1824_v56 = vpop.f32.mrb[110].mxu1 }
 0x1e8   : > { %v4164_v37 = vpop.eup %4163  ;;  %4177 = vpow2.f32 %v2307_v12  ;;  %v1989_v46 = vadd.f32 %v4665_v60, %v1821_v51  ;;  %v1825_v59 = vadd.f32 %v1824_v56, %v5300_v16  ;;  %v1826_v8 = vpop.f32.mrb[111].mxu1  ;;  %v5364_v20 = vmul.f32 %v4162_v31, %v4160_v62 }
 0x1e9   : > { %v2379_v40 = vadd.f32 1.0, %v4164_v37  ;;  %v5367_v53 = vadd.f32 %v1826_v8, %v5303_v61  ;;  %v5369_v1 = vpop.f32.mrb[120].mxu0  ;;  %4179 = vtanh.f32 %v1982_v58  ;;  %v1986_v12 = vadd.f32 %v4699_v35, %v1813_v0 }
 0x1ea   : > { %v4166_v54 = vpop.eup %4165  ;;  %v3412_v2 = vclamps-f32 %v1989_v46, 30.0  ;;  %v1991_v24 = vadd.f32 %v4665_v60, %v1825_v59  ;;  %v5372_v57 = vpop.f32.mrb[121].mxu0  ;;  %v2544_v18 = vpack.c.bf16 %v5364_v20, %v5355_v13  ;;  %v2672_v13 = vld [vmem:[%s5850_s6 + $0x8] sm:$0xff] (!%p3423_p6)  ;;  %v2673_v20 = vld [vmem:[%s5850_s6 + $0x10] sm:$0xff] (!%p3423_p6) }
 0x1eb   : > { %4181 = vrcp.f32 %v2379_v40  ;;  %v2380_v16 = vadd.f32 1.0, %v4166_v54  ;;  %v4168_v15 = vpop.eup %4167  ;;  %v5377_v58 = vpop.f32.mrb[122].mxu0 }
 0x1ec   : > { %4183 = vtanh.f32 %v1984_v36  ;;  %v2309_v34 = vmul.f32 1.442695, %v3412_v2  ;;  %v3413_v62 = vclamps-f32 %v1991_v24, 30.0  ;;  %v5380_v59 = vpop.f32.mrb[123].mxu0  ;;  %v1988_v36 = vadd.f32 %v4699_v35, %v5340_v6 }
 0x1ed   : > { %v4170_v61 = vpop.eup %4169  ;;  %4185 = vrcp.f32 %v2380_v16  ;;  %v1830_v51 = vpop.f32.mrb[112].mxu1 }
 0x1ee   : > { %v4172_v19 = vpop.eup %4171  ;;  %4187 = vpow2.f32 %v2309_v34  ;;  %v2311_v31 = vmul.f32 1.442695, %v3413_v62  ;;  %v1831_v56 = vadd.f32 %v1830_v51, %v5317_v9  ;;  %v1832_v37 = vpop.f32.mrb[113].mxu1  ;;  %v2505_v46 = vmul.f32 %v4170_v61, %v4168_v15 }
 0x1ef   : > { %v4174_v8 = vpop.eup %4173  ;;  %v5385_v40 = vadd.f32 %v1832_v37, %v5320_v27  ;;  %v1834_v0 = vpop.f32.mrb[114].mxu1 }
 0x1f0   : > { %v4176_v54 = vpop.eup %4175  ;;  %4189 = vpow2.f32 %v2311_v31  ;;  %v1993_v2 = vadd.f32 %v4665_v60, %v1831_v56  ;;  %v1835_v24 = vadd.f32 %v1834_v0, %v5325_v38  ;;  %v1836_v16 = vpop.f32.mrb[115].mxu1  ;;  %v2506_v9 = vmul.f32 %v4174_v8, %v4172_v19 }
 0x1f1   : > { %v2381_v34 = vadd.f32 1.0, %v4176_v54  ;;  %v5390_v15 = vadd.f32 %v1836_v16, %v5328_v26  ;;  %v5392_v62 = vpop.f32.mrb[124].mxu0  ;;  %4191 = vtanh.f32 %v1986_v12  ;;  %v1990_v26 = vadd.f32 %v4699_v35, %v5360_v4 }
 0x1f2   : > { %v4178_v61 = vpop.eup %4177  ;;  %v3414_v6 = vclamps-f32 %v1993_v2, 30.0  ;;  %v1995_v27 = vadd.f32 %v4665_v60, %v1835_v24  ;;  %v2545_v51 = vpack.c.bf16 %v2506_v9, %v2505_v46  ;;  %v5395_v37 = vpop.f32.mrb[125].mxu0  ;;  %v1992_v4 = vadd.f32 %v4699_v35, %v5367_v53 }
 0x1f3   : > { %4193 = vrcp.f32 %v2381_v34  ;;  %v2382_v31 = vadd.f32 1.0, %v4178_v61  ;;  %v4180_v56 = vpop.eup %4179  ;;  %v5402_v12 = vpop.f32.mrb[126].mxu0 }
 0x1f4   : > { %4195 = vtanh.f32 %v1988_v36  ;;  %v2313_v38 = vmul.f32 1.442695, %v3414_v6  ;;  %v3415_v19 = vclamps-f32 %v1995_v27, 30.0  ;;  %3450 = vmatprep.subr.bf16.mxu1 %v2545_v51  ;;  %v5405_v16 = vpop.f32.mrb[127].mxu0 }
 0x1f5   : > { %v4182_v8 = vpop.eup %4181  ;;  %4197 = vrcp.f32 %v2382_v31  ;;  %v1840_v0 = vpop.f32.mrb[116].mxu1  ;;  %3451 = vmatpush3.bf16.msra.mxu1 %v2537_v22 }
 0x1f6   : > { %v4184_v46 = vpop.eup %4183  ;;  %4199 = vpow2.f32 %v2313_v38  ;;  %v2315_v54 = vmul.f32 1.442695, %v3415_v19  ;;  %v1841_v36 = vadd.f32 %v1840_v0, %v5342_v48  ;;  %v1842_v2 = vpop.f32.mrb[117].mxu1  ;;  %v2507_v24 = vmul.f32 %v4182_v8, %v4180_v56 }
 0x1f7   : > { %v4186_v9 = vpop.eup %4185  ;;  %v1843_v34 = vadd.f32 %v1842_v2, %v5345_v52  ;;  %v1844_v61 = vpop.f32.mrb[118].mxu1 }
 0x1f8   : > { %v4188_v17 = vpop.eup %4187  ;;  %4201 = vpow2.f32 %v2315_v54  ;;  %v1997_v43 = vadd.f32 %v4665_v60, %v1841_v36  ;;  %v1845_v22 = vadd.f32 %v1844_v61, %v5350_v41  ;;  %v1846_v6 = vpop.f32.mrb[119].mxu1  ;;  %v2508_v27 = vmul.f32 %v4186_v9, %v4184_v46 }
 0x1f9   : > { %v2383_v48 = vadd.f32 1.0, %v4188_v17  ;;  %v1847_v51 = vadd.f32 %v1846_v6, %v5353_v23  ;;  %4203 = vtanh.f32 %v1990_v26  ;;  %v1994_v41 = vadd.f32 %v4699_v35, %v5385_v40 }
 0x1fa   : > { %v4190_v31 = vpop.eup %4189  ;;  %v3416_v56 = vclamps-f32 %v1997_v43, 30.0  ;;  %v1999_v38 = vadd.f32 %v4665_v60, %v1845_v22  ;;  %v2546_v53 = vpack.c.bf16 %v2508_v27, %v2507_v24 }
 0x1fb   : > { %4205 = vrcp.f32 %v2383_v48  ;;  %v2384_v52 = vadd.f32 1.0, %v4190_v31  ;;  %v4192_v19 = vpop.eup %4191 }
 0x1fc   : > { %4207 = vtanh.f32 %v1992_v4  ;;  %v2317_v8 = vmul.f32 1.442695, %v3416_v56  ;;  %v3417_v0 = vclamps-f32 %v1999_v38, 30.0  ;;  %3452 = vmatprep.subr.bf16.mxu1 %v2546_v53  ;;  %v1996_v4 = vadd.f32 %v4699_v35, %v5390_v15 }
 0x1fd   : > { %v4194_v54 = vpop.eup %4193  ;;  %4209 = vrcp.f32 %v2384_v52  ;;  %v1850_v46 = vpop.f32.mrb[120].mxu1  ;;  %3453 = vmatpush3.bf16.msra.mxu1 %v2538_v44 }
 0x1fe   : > { %v4196_v23 = vpop.eup %4195  ;;  %4211 = vpow2.f32 %v2317_v8  ;;  %v2319_v26 = vmul.f32 1.442695, %v3417_v0  ;;  %v1851_v36 = vadd.f32 %v1850_v46, %v5369_v1  ;;  %v1852_v2 = vpop.f32.mrb[121].mxu1  ;;  %v2509_v24 = vmul.f32 %v4194_v54, %v4192_v19 }
 0x1ff   : > { %v4198_v9 = vpop.eup %4197  ;;  %v1853_v61 = vadd.f32 %v1852_v2, %v5372_v57  ;;  %v1854_v17 = vpop.f32.mrb[122].mxu1  ;;  %v2000_v46 = vadd.f32 %v4699_v35, %v1847_v51 }
 0x200   : > { %v4200_v40 = vpop.eup %4199  ;;  %4213 = vpow2.f32 %v2319_v26  ;;  %v2001_v43 = vadd.f32 %v4665_v60, %v1851_v36  ;;  %v1855_v42 = vadd.f32 %v1854_v17, %v5377_v58  ;;  %v1856_v47 = vpop.f32.mrb[123].mxu1  ;;  %v2510_v44 = vmul.f32 %v4198_v9, %v4196_v23 }
 0x201   : > { %v2385_v22 = vadd.f32 1.0, %v4200_v40  ;;  %v1857_v1 = vadd.f32 %v1856_v47, %v5380_v59  ;;  %4215 = vtanh.f32 %v1994_v41  ;;  %v1998_v58 = vadd.f32 %v4699_v35, %v1843_v34 }
 0x202   : > { %v4202_v6 = vpop.eup %4201  ;;  %v3418_v27 = vclamps-f32 %v2001_v43, 30.0  ;;  %v2003_v48 = vadd.f32 %v4665_v60, %v1855_v42  ;;  %v2547_v15 = vpack.c.bf16 %v2510_v44, %v2509_v24 }
 0x203   : > { %4217 = vrcp.f32 %v2385_v22  ;;  %v2386_v57 = vadd.f32 1.0, %v4202_v6  ;;  %v4204_v31 = vpop.eup %4203  ;;  %v2004_v6 = vadd.f32 %v4699_v35, %v1857_v1 }
 0x204   : > { %4219 = vtanh.f32 %v1996_v4  ;;  %v2321_v56 = vmul.f32 1.442695, %v3418_v27  ;;  %v3419_v38 = vclamps-f32 %v2003_v48, 30.0  ;;  %3454 = vmatprep.subr.bf16.mxu1 %v2547_v15 }
 0x205   : > { %v4206_v53 = vpop.eup %4205  ;;  %4221 = vrcp.f32 %v2386_v57  ;;  %v1860_v52 = vpop.f32.mrb[124].mxu1  ;;  %3455 = vmatpush3.bf16.msra.mxu1 %v2539_v25 }
 0x206   : > { %v4208_v59 = vpop.eup %4207  ;;  %4223 = vpow2.f32 %v2321_v56  ;;  %v2323_v19 = vmul.f32 1.442695, %v3419_v38  ;;  %v1861_v8 = vadd.f32 %v1860_v52, %v5392_v62  ;;  %v1862_v0 = vpop.f32.mrb[125].mxu1  ;;  %v2511_v54 = vmul.f32 %v4206_v53, %v4204_v31 }
 0x207   : > { %v4210_v41 = vpop.eup %4209  ;;  %v1863_v23 = vadd.f32 %v1862_v0, %v5395_v37  ;;  %v1864_v26 = vpop.f32.mrb[126].mxu1 }
 0x208   : > { %v4212_v36 = vpop.eup %4211  ;;  %4225 = vpow2.f32 %v2323_v19  ;;  %v2005_v34 = vadd.f32 %v4665_v60, %v1861_v8  ;;  %v1865_v7 = vadd.f32 %v1864_v26, %v5402_v12  ;;  %v2512_v49 = vmul.f32 %v4210_v41, %v4208_v59  ;;  %v1866_v25 = vpop.f32.mrb[127].mxu1 }
 0x209   : > { %v2387_v2 = vadd.f32 1.0, %v4212_v36  ;;  %v1867_v24 = vadd.f32 %v1866_v25, %v5405_v16  ;;  %4227 = vtanh.f32 %v1998_v58  ;;  %v2002_v16 = vadd.f32 %v4699_v35, %v1853_v61 }
 0x20a   : > { %v4214_v62 = vpop.eup %4213  ;;  %v3420_v9 = vclamps-f32 %v2005_v34, 30.0  ;;  %v2007_v4 = vadd.f32 %v4665_v60, %v1865_v7  ;;  %v2548_v51 = vpack.c.bf16 %v2512_v49, %v2511_v54  ;;  %v2006_v61 = vadd.f32 %v4699_v35, %v1863_v23 }
 0x20b   : > { %4229 = vrcp.f32 %v2387_v2  ;;  %v2388_v37 = vadd.f32 1.0, %v4214_v62  ;;  %v4216_v17 = vpop.eup %4215  ;;  %v2008_v53 = vadd.f32 %v4699_v35, %v1867_v24 }
 0x20c   : > { %4231 = vtanh.f32 %v2000_v46  ;;  %v2325_v40 = vmul.f32 1.442695, %v3420_v9  ;;  %v3421_v43 = vclamps-f32 %v2007_v4, 30.0  ;;  %3456 = vmatprep.subr.bf16.mxu1 %v2548_v51  ;;  %v2553_v9 = vld [vmem:[#allocation2] sm:$0x3] }
 0x20d   : > { %v4218_v42 = vpop.eup %4217  ;;  %4233 = vrcp.f32 %v2388_v37  ;;  %3457 = vmatpush3.bf16.msra.mxu1 %v2540_v28 }
 0x20e   : > { %v4220_v12 = vpop.eup %4219  ;;  %4235 = vpow2.f32 %v2325_v40  ;;  %v2327_v47 = vmul.f32 1.442695, %v3421_v43  ;;  %v2513_v60 = vmul.f32 %v4218_v42, %v4216_v17  ;;  %v3664_v17 = vpack.c.bf16 (!%p3423_p6), %v2672_v13, %v2671_v63  ;;  %v2674_v40 = vld [vmem:[%s5850_s6 + $0x18] sm:$0xff] (!%p3423_p6)  ;;  %v2807_v63 = vld [vmem:[%s5852_s8 + $0x140] sm:$0xff] (!%p3423_p6) }
 0x20f   : > { %v4222_v44 = vpop.eup %4221  ;;  %v4273_v43 = vmov (!%p3423_p6), 0.0   ;;  %v3667_v42 = vpack.c.bf16 (!%p3423_p6), %v2674_v40, %v2673_v20  ;;  %v2803_v40 = vld [vmem:[%s5852_s8 + $0x120] sm:$0xff] (!%p3423_p6) }
 0x210   : > { %v4224_v22 = vpop.eup %4223  ;;  %4237 = vpow2.f32 %v2327_v47  ;;  %v2514_v27 = vmul.f32 %v4222_v44, %v4220_v12  ;;  %3590 = vmatprep.mubr.msk.f32.mxu0 (!%p3423_p6), %vm4272_vm2, %v4273_v43  ;;  %v2675_v12 = vld [vmem:[%s5850_s6 + $0x20] sm:$0xff] (!%p3423_p6)  ;;  %v2768_v47 = vld [vmem:[%s5852_s8 + $0x8] sm:$0xff] (!%p3423_p6) }
 0x211   : > { %v2389_v48 = vadd.f32 1.0, %v4224_v22  ;;  %4239 = vtanh.f32 %v2002_v16  ;;  %v2676_v16 = vld [vmem:[%s5850_s6 + $0x28] sm:$0xff] (!%p3423_p6)  ;;  %v2767_v44 = vld [vmem:[%s5852_s8] sm:$0xff] (!%p3423_p6)  ;;  %v2770_v22 = vld [vmem:[%s5852_s8 + $0x18] sm:$0xff] (!%p3423_p6) }
 0x212   : > { %v4226_v15 = vpop.eup %4225  ;;  %v2549_v57 = vpack.c.bf16 %v2514_v27, %v2513_v60  ;;  %v2771_v60 = vld [vmem:[%s5852_s8 + $0x20] sm:$0xff] (!%p3423_p6)  ;;  %v2677_v27 = vld [vmem:[%s5850_s6 + $0x30] sm:$0xff] (!%p3423_p6) }
 0x213   : > { %4241 = vrcp.f32 %v2389_v48  ;;  %v2390_v31 = vadd.f32 1.0, %v4226_v15  ;;  %v4228_v32 = vpop.eup %4227  ;;  %v2678_v48 = vld [vmem:[%s5850_s6 + $0x38] sm:$0xff] (!%p3423_p6)  ;;  %v3687_v15 = vpack.c.bf16 (!%p3423_p6), %v2771_v60, %v2768_v47 }
 0x214   : > { %4243 = vtanh.f32 %v2004_v6  ;;  %3458 = vmatprep.subr.bf16.mxu1 %v2549_v57  ;;  %v3670_v6 = vpack.c.bf16 (!%p3423_p6), %v2676_v16, %v2675_v12  ;;  %v3689_v57 = vpack.c.bf16 (!%p3423_p6), %v2770_v22, %v2767_v44  ;;  %v2769_v12 = vld [vmem:[%s5852_s8 + $0x10] sm:$0xff] (!%p3423_p6)  ;;  %v2772_v16 = vld [vmem:[%s5852_s8 + $0x28] sm:$0xff] (!%p3423_p6)  ;;  %v2775_v22 = vld [vmem:[%s5852_s8 + $0x40] sm:$0xff] (!%p3423_p6) }
 0x215   : > { %v4230_v3 = vpop.eup %4229  ;;  %4245 = vrcp.f32 %v2390_v31  ;;  %3459 = vmatpush3.bf16.msra.mxu1 %v2541_v30  ;;  %v2774_v31 = vld [vmem:[%s5852_s8 + $0x38] sm:$0xff] (!%p3423_p6)  ;;  %v3720_v44 = vpack.c.bf16 (!%p3423_p6), %v2772_v16, %v2769_v12  ;;  %v3019_v12 = vld [vmem:[%s5854_s10 + $0x128] sm:$0xff] (!%p3423_p6) }
 0x216   : > { %v4232_v28 = vpop.eup %4231  ;;  %v2515_v1 = vmul.f32 %v4230_v3, %v4228_v32  ;;  %4247 = vtanh.f32 %v2006_v61  ;;  %v2777_v32 = vld [vmem:[%s5852_s8 + $0x50] sm:$0xff] (!%p3423_p6) }
 0x217   : > { %v4234_v56 = vpop.eup %4233  ;;  %v2773_v3 = vld [vmem:[%s5852_s8 + $0x30] sm:$0xff] (!%p3423_p6)  ;;  %v3691_v61 = vpack.c.bf16 (!%p3423_p6), %v2777_v32, %v2774_v31  ;;  %v2787_v31 = vld [vmem:[%s5852_s8 + $0xa0] sm:$0xff] (!%p3423_p6)  ;;  %v2790_v32 = vld [vmem:[%s5852_s8 + $0xb8] sm:$0xff] (!%p3423_p6) }
 0x218   : > { %v4236_v38 = vpop.eup %4235  ;;  %v2516_v58 = vmul.f32 %v4234_v56, %v4232_v28  ;;  %v2776_v28 = vld [vmem:[%s5852_s8 + $0x48] sm:$0xff] (!%p3423_p6) }
 0x219   : > { %v2391_v52 = vadd.f32 1.0, %v4236_v38  ;;  %v3693_v56 = vpack.c.bf16 (!%p3423_p6), %v2776_v28, %v2773_v3  ;;  %v2783_v38 = vld [vmem:[%s5852_s8 + $0x80] sm:$0xff] (!%p3423_p6)  ;;  %v3729_v3 = vpack.c.bf16 (!%p3423_p6), %v2790_v32, %v2787_v31  ;;  %v2793_v28 = vld [vmem:[%s5852_s8 + $0xd0] sm:$0xff] (!%p3423_p6)  ;;  %v2989_v31 = vld [vmem:[%s5854_s10 + $0x38] sm:$0xff] (!%p3423_p6) }
 0x21a   : > { %v4238_v59 = vpop.eup %4237  ;;  %v2550_v19 = vpack.c.bf16 %v2516_v58, %v2515_v1  ;;  %v2780_v1 = vld [vmem:[%s5852_s8 + $0x68] sm:$0xff] (!%p3423_p6)  ;;  %v2679_v58 = vld [vmem:[%s5850_s6 + $0x40] sm:$0xff] (!%p3423_p6) }
 0x21b   : > { %4249 = vrcp.f32 %v2391_v52  ;;  %v2392_v8 = vadd.f32 1.0, %v4238_v59  ;;  %v4240_v0 = vpop.eup %4239  ;;  %v3695_v52 = vpack.c.bf16 (!%p3423_p6), %v2783_v38, %v2780_v1  ;;  %v2779_v59 = vld [vmem:[%s5852_s8 + $0x60] sm:$0xff] (!%p3423_p6)  ;;  %v2802_v38 = vld [vmem:[%s5852_s8 + $0x118] sm:$0xff] (!%p3423_p6) }
 0x21c   : > { %4251 = vtanh.f32 %v2008_v53  ;;  %3460 = vmatprep.subr.bf16.mxu1 %v2550_v19  ;;  %v3673_v53 = vpack.c.bf16 (!%p3423_p6), %v2678_v48, %v2677_v27  ;;  %v2782_v19 = vld [vmem:[%s5852_s8 + $0x78] sm:$0xff] (!%p3423_p6)  ;;  %v2781_v48 = vld [vmem:[%s5852_s8 + $0x70] sm:$0xff] (!%p3423_p6)  ;;  %v3006_v32 = vld [vmem:[%s5854_s10 + $0xc0] sm:$0xff] (!%p3423_p6) }
 0x21d   : > { %v4242_v10 = vpop.eup %4241  ;;  %4253 = vrcp.f32 %v2392_v8  ;;  %3461 = vmatpush3.bf16.msra.mxu1 %v2542_v5  ;;  %v2680_v8 = vld [vmem:[%s5850_s6 + $0x48] sm:$0xff] (!%p3423_p6) }
 0x21e   : > { %v4244_v11 = vpop.eup %4243  ;;  %v2517_v30 = vmul.f32 %v4242_v10, %v4240_v0  ;;  %v2786_v0 = vld [vmem:[%s5852_s8 + $0x98] sm:$0xff] (!%p3423_p6)  ;;  %v2789_v10 = vld [vmem:[%s5852_s8 + $0xb0] sm:$0xff] (!%p3423_p6) }
 0x21f   : > { %v4246_v54 = vpop.eup %4245 }
 0x220   : > { %v2518_v35 = vmul.f32 %v4246_v54, %v4244_v11  ;;  %v4248_v46 = vpop.eup %4247  ;;  %v3697_v11 = vpack.c.bf16 (!%p3423_p6), %v2782_v19, %v2779_v59  ;;  %v2681_v54 = vld [vmem:[%s5850_s6 + $0x50] sm:$0xff] (!%p3423_p6)  ;;  %v2810_v19 = vld [vmem:[%s5852_s8 + $0x158] sm:$0xff] (!%p3423_p6) }
 0x222   : > { %v2551_v41 = vpack.c.bf16 %v2518_v35, %v2517_v30  ;;  %v3676_v30 = vpack.c.bf16 (!%p3423_p6), %v2680_v8, %v2679_v58  ;;  %v3699_v35 = vpack.c.bf16 (!%p3423_p6), %v2789_v10, %v2786_v0  ;;  %v2805_v58 = vld [vmem:[%s5852_s8 + $0x130] sm:$0xff] (!%p3423_p6) }
 0x223   : > { %v2813_v8 = vld [vmem:[%s5852_s8 + $0x170] sm:$0xff] (!%p3423_p6) }
 0x224   : > { %3462 = vmatprep.subr.bf16.mxu1 %v2551_v41  ;;  %v2785_v41 = vld [vmem:[%s5852_s8 + $0x90] sm:$0xff] (!%p3423_p6)  ;;  %v3715_v0 = vpack.c.bf16 (!%p3423_p6), %v2813_v8, %v2810_v19 }
 0x225   : > { %v4250_v23 = vpop.eup %4249  ;;  %3463 = vmatpush3.bf16.msra.mxu1 %v2543_v39  ;;  %v2809_v10 = vld [vmem:[%s5852_s8 + $0x150] sm:$0xff] (!%p3423_p6) }
 0x226   : > { %v4252_v26 = vpop.eup %4251  ;;  %v2519_v36 = vmul.f32 %v4250_v23, %v4248_v46  ;;  %v2788_v46 = vld [vmem:[%s5852_s8 + $0xa8] sm:$0xff] (!%p3423_p6)  ;;  %v2682_v23 = vld [vmem:[%s5850_s6 + $0x58] sm:$0xff] (!%p3423_p6) }
 0x227   : > { %v4254_v34 = vpop.eup %4253 }
 0x228   : > { %v2520_v7 = vmul.f32 %v4254_v34, %v4252_v26  ;;  %v2792_v26 = vld [vmem:[%s5852_s8 + $0xc8] sm:$0xff] (!%p3423_p6)  ;;  %v3701_v34 = vpack.c.bf16 (!%p3423_p6), %v2788_v46, %v2785_v41  ;;  %v2998_v46 = vld [vmem:[%s5854_s10 + $0x80] sm:$0xff] (!%p3423_p6) }
 0x22a   : > { %v2552_v49 = vpack.c.bf16 %v2520_v7, %v2519_v36  ;;  %v2795_v36 = vld [vmem:[%s5852_s8 + $0xe0] sm:$0xff] (!%p3423_p6)  ;;  %v3679_v7 = vpack.c.bf16 (!%p3423_p6), %v2682_v23, %v2681_v54  ;;  %v2999_v23 = vld [vmem:[%s5854_s10 + $0x88] sm:$0xff] (!%p3423_p6) }
 0x22c   : > { %3464 = vmatprep.subr.bf16.mxu1 %v2552_v49  ;;  %v2683_v49 = vld [vmem:[%s5850_s6 + $0x60] sm:$0xff] (!%p3423_p6) }
 0x22d   : > { %3465 = vmatpush3.bf16.msra.mxu1 %v2544_v18  ;;  %v4271_v18 = vmov (!%p3423_p6), 0.0|0.0  }
 0x22e   : > { %3663 = vmatprep.subr.bf16.mxu0 (!%p3423_p6), %v4271_v18  ;;  %3688 = vmatprep.subr.bf16.mxu1 (!%p3423_p6), %v3687_v15  ;;  %v2784_v15 = vld [vmem:[%s5852_s8 + $0x88] sm:$0xff] (!%p3423_p6) }
 0x22f   : > { %3665 = vmatpush3.bf16.msra.mxu0 (!%p3423_p6), %v3664_v17 }
 0x230   : > { %2657 = vmatmul.mubr.bf16.vlgmr.msra.gmra.mrb[128].mxu1 %v2578_v29  ;;  %3666 = vmatprep.subr.bf16.mxu0 (!%p3423_p6), %v4271_v18  ;;  %v3703_v29 = vpack.c.bf16 (!%p3423_p6), %v2795_v36, %v2792_v26  ;;  %v3743_v26 = vpack.c.bf16 (!%p3423_p6), %v2999_v23, %v2998_v46  ;;  %v3424_v36 = vld [vmem:[%s5851_s7] ss:$0 sm:$0xff] (!%p3423_p6)  ;;  %v3027_v23 = vld [vmem:[%s5854_s10 + $0x168] sm:$0xff] (!%p3423_p6) }
 0x231   : > { %2896 = vmatprep.mubr.f32.mxu1 (!%p3423_p6), %v4273_v43  ;;  %3690 = vmatpush1.bf16.msra.mxu1 (!%p3423_p6), %v3689_v57  ;;  %v3726_v57 = vpack.c.bf16 (!%p3423_p6), %v2784_v15, %v2781_v48  ;;  %v3020_v48 = vld [vmem:[%s5854_s10 + $0x130] sm:$0xff] (!%p3423_p6)  ;;  %v3021_v15 = vld [vmem:[%s5854_s10 + $0x138] sm:$0xff] (!%p3423_p6)  ;;  %v3026_v46 = vld [vmem:[%s5854_s10 + $0x160] sm:$0xff] (!%p3423_p6) }
 0x232   : > { %3692 = vmatprep.subr.bf16.mxu1 (!%p3423_p6), %v3691_v61  ;;  %v2796_v61 = vld [vmem:[%s5852_s8 + $0xe8] sm:$0xff] (!%p3423_p6) }
 0x233   : > { %3668 = vmatpush3.bf16.msra.mxu0 (!%p3423_p6), %v3667_v42  ;;  %v2806_v42 = vld [vmem:[%s5852_s8 + $0x138] sm:$0xff] (!%p3423_p6)  ;;  %v3732_v1 = vpack.c.bf16 (!%p3423_p6), %v2796_v61, %v2793_v28  ;;  %v3785_v28 = vpack.c.bf16 (!%p3423_p6), %v3021_v15, %v3020_v48  ;;  %v3425_v48 = vld [vmem:[#allocation3] ss:$0 sm:$0xff] (!%p3423_p6) }
 0x234   : > { %3669 = vmatprep.subr.bf16.mxu0 (!%p3423_p6), %v4271_v18  ;;  %v3713_v47 = vpack.c.bf16 (!%p3423_p6), %v2806_v42, %v2803_v40  ;;  %v3018_v42 = vld [vmem:[%s5854_s10 + $0x120] sm:$0xff] (!%p3423_p6) }
 0x235   : > { %3694 = vmatpush1.bf16.msra.mxu1 (!%p3423_p6), %v3693_v56  ;;  %v2799_v56 = vld [vmem:[%s5852_s8 + $0x100] sm:$0xff] (!%p3423_p6) }
 0x236   : > { %3696 = vmatprep.subr.bf16.mxu1 (!%p3423_p6), %v3695_v52  ;;  %v2808_v52 = vld [vmem:[%s5852_s8 + $0x148] sm:$0xff] (!%p3423_p6) }
 0x237   : > { %3671 = vmatpush3.bf16.msra.mxu0 (!%p3423_p6), %v3670_v6  ;;  %v2778_v6 = vld [vmem:[%s5852_s8 + $0x58] sm:$0xff] (!%p3423_p6)  ;;  %v3738_v59 = vpack.c.bf16 (!%p3423_p6), %v2808_v52, %v2805_v58  ;;  %v2991_v58 = vld [vmem:[%s5854_s10 + $0x48] sm:$0xff] (!%p3423_p6)  ;;  %v3008_v52 = vld [vmem:[%s5854_s10 + $0xd0] sm:$0xff] (!%p3423_p6) }
 0x238   : > { %3672 = vmatprep.subr.bf16.mxu0 (!%p3423_p6), %v4271_v18  ;;  %v3723_v27 = vpack.c.bf16 (!%p3423_p6), %v2778_v6, %v2775_v22  ;;  %v3005_v22 = vld [vmem:[%s5854_s10 + $0xb8] sm:$0xff] (!%p3423_p6)  ;;  %v3782_v6 = vpack.c.bf16 (!%p3423_p6), %v3019_v12, %v3018_v42 }
 0x239   : > { %3698 = vmatpush1.bf16.msra.mxu1 (!%p3423_p6), %v3697_v11  ;;  %v2812_v11 = vld [vmem:[%s5852_s8 + $0x168] sm:$0xff] (!%p3423_p6) }
 0x23a   : > { %3700 = vmatprep.subr.bf16.mxu1 (!%p3423_p6), %v3699_v35  ;;  %v3717_v54 = vpack.c.bf16 (!%p3423_p6), %v2812_v11, %v2809_v10  ;;  %v2814_v35 = vld [vmem:[%s5852_s8 + $0x178] sm:$0xff] (!%p3423_p6) }
 0x23b   : > { %3674 = vmatpush3.bf16.msra.mxu0 (!%p3423_p6), %v3673_v53  ;;  %v3735_v53 = vpack.c.bf16 (!%p3423_p6), %v2802_v38, %v2799_v56  ;;  %v3023_v56 = vld [vmem:[%s5854_s10 + $0x148] sm:$0xff] (!%p3423_p6)  ;;  %v3025_v10 = vld [vmem:[%s5854_s10 + $0x158] sm:$0xff] (!%p3423_p6) }
 0x23c   : > { %3675 = vmatprep.subr.bf16.mxu0 (!%p3423_p6), %v4271_v18 }
 0x23d   : > { %3702 = vmatpush1.bf16.msra.mxu1 (!%p3423_p6), %v3701_v34  ;;  %v3014_v34 = vld [vmem:[%s5854_s10 + $0x100] sm:$0xff] (!%p3423_p6) }
 0x23e   : > { %3704 = vmatprep.subr.bf16.mxu1 (!%p3423_p6), %v3703_v29  ;;  %v2982_v29 = vld [vmem:[%s5854_s10] sm:$0xff] (!%p3423_p6) }
 0x23f   : > { %3677 = vmatpush3.bf16.msra.mxu0 (!%p3423_p6), %v3676_v30  ;;  %v2811_v30 = vld [vmem:[%s5852_s8 + $0x160] sm:$0xff] (!%p3423_p6) }
 0x240   : > { %3678 = vmatprep.subr.bf16.mxu0 (!%p3423_p6), %v4271_v18  ;;  %v3741_v41 = vpack.c.bf16 (!%p3423_p6), %v2814_v35, %v2811_v30  ;;  %v2992_v30 = vld [vmem:[%s5854_s10 + $0x50] sm:$0xff] (!%p3423_p6) }
 0x243   : > { %3680 = vmatpush3.bf16.msra.mxu0 (!%p3423_p6), %v3679_v7 }
 0x244   : > { %3681 = vmatprep.subr.bf16.mxu0 (!%p3423_p6), %v4271_v18 }
 0x283   : > { %v3444_v33 = vpop.f32.mrb[128].mxu0 }
 0x284   : > { %v3445_v5 = vpop.f32.mrb[129].mxu0 }
 0x285   : > { %v3446_v25 = vadd.f32 %v3445_v5, %v3444_v33  ;;  %v3447_v2 = vpop.f32.mrb[130].mxu0  ;;  %v2791_v33 = vld [vmem:[%s5852_s8 + $0xc0] sm:$0xff] (!%p3423_p6)  ;;  %v2794_v5 = vld [vmem:[%s5852_s8 + $0xd8] sm:$0xff] (!%p3423_p6) }
 0x286   : > { %v3448_v14 = vpop.f32.mrb[131].mxu0  ;;  %v2798_v2 = vld [vmem:[%s5852_s8 + $0xf8] sm:$0xff] (!%p3423_p6) }
 0x287   : > { %v2801_v14 = vld [vmem:[%s5852_s8 + $0x110] sm:$0xff] (!%p3423_p6) }
 0x303   : > { %v3466_v45 = vpop.f32.mrb[128].mxu1 }
 0x304   : > { %v3467_v39 = vpop.f32.mrb[129].mxu1 }
 0x305   : > { %v3468_v24 = vadd.f32 %v3467_v39, %v3466_v45  ;;  %v3469_v62 = vpop.f32.mrb[130].mxu1  ;;  %2669 = sbr.rel (%p3423_p6) target bundleno = 1471 (0x5bf), region = 76  ;;  %v3705_v45 = vpack.c.bf16 (!%p3423_p6), %v2794_v5, %v2791_v33  ;;  %v2983_v33 = vld [vmem:[%s5854_s10 + $0x8] sm:$0xff] (!%p3423_p6) }
 0x306   : > { %v3470_v4 = vpop.f32.mrb[131].mxu1  ;;  %v3707_v62 = vpack.c.bf16 (!%p3423_p6), %v2801_v14, %v2798_v2  ;;  %v3000_v2 = vld [vmem:[%s5854_s10 + $0x90] sm:$0xff] (!%p3423_p6)  ;;  %v3001_v14 = vld [vmem:[%s5854_s10 + $0x98] sm:$0xff] (!%p3423_p6) }
 0x307   : > { %v2659_v51 = vadd.f32 %v3468_v24, %v3446_v25  ;;  %v2684_v25 = vld [vmem:[%s5850_s6 + $0x68] sm:$0xff] (!%p3423_p6)  ;;  %v2685_v24 = vld [vmem:[%s5850_s6 + $0x70] sm:$0xff] (!%p3423_p6)  ;;  %3706 = vmatpush1.bf16.msra.mxu1 (!%p3423_p6), %v3705_v45 }
 0x308   : > { %v3682_v39 = vpack.c.bf16 (!%p3423_p6), %v2684_v25, %v2683_v49  ;;  %v2800_v4 = vld [vmem:[%s5852_s8 + $0x108] sm:$0xff] (!%p3423_p6)  ;;  %3708 = vmatprep.subr.bf16.mxu1 (!%p3423_p6), %v3707_v62  ;;  %v3016_v62 = vld [vmem:[%s5854_s10 + $0x110] sm:$0xff] (!%p3423_p6) }
 0x309   : > { %v2664_v37 = vadd.f32 %v2659_v51, %v2553_v9  ;;  %v2797_v9 = vld [vmem:[%s5852_s8 + $0xf0] sm:$0xff] (!%p3423_p6)  ;;  %v2686_v51 = vld [vmem:[%s5850_s6 + $0x78] sm:$0xff] (!%p3423_p6)  ;;  %v3015_v49 = vld [vmem:[%s5854_s10 + $0x108] sm:$0xff] (!%p3423_p6) }
 0x30a   : > { %v3709_v13 = vpack.c.bf16 (!%p3423_p6), %v2800_v4, %v2797_v9  ;;  %3683 = vmatpush3.bf16.msra.mxu0 (!%p3423_p6), %v3682_v39  ;;  %v3685_v20 = vpack.c.bf16 (!%p3423_p6), %v2686_v51, %v2685_v24  ;;  %v3776_v39 = vpack.c.bf16 (!%p3423_p6), %v3015_v49, %v3014_v34  ;;  %v3745_v24 = vpack.c.bf16 (!%p3423_p6), %v2983_v33, %v2982_v29  ;;  %v3017_v9 = vld [vmem:[%s5854_s10 + $0x118] sm:$0xff] (!%p3423_p6)  ;;  %v2984_v51 = vld [vmem:[%s5854_s10 + $0x10] sm:$0xff] (!%p3423_p6)  ;;  %v3011_v34 = vld [vmem:[%s5854_s10 + $0xe8] sm:$0xff] (!%p3423_p6) }
 0x30b   : > { %2665 = vst [vmem:[#allocation2] sm:$0x3] %v2664_v37  ;;  %v2804_v37 = vld [vmem:[%s5852_s8 + $0x128] sm:$0xff] (!%p3423_p6)  ;;  %3684 = vmatprep.subr.bf16.mxu0 (!%p3423_p6), %v4271_v18  ;;  %v3747_v4 = vpack.c.bf16 (!%p3423_p6), %v3001_v14, %v3000_v2  ;;  %v2994_v49 = vld [vmem:[%s5854_s10 + $0x60] sm:$0xff] (!%p3423_p6)  ;;  %v3012_v2 = vld [vmem:[%s5854_s10 + $0xf0] sm:$0xff] (!%p3423_p6) }
 0x30c   : > { %v3711_v17 = vpack.c.bf16 %v2807_v63, %v2804_v37  ;;  %3710 = vmatpush1.bf16.msra.mxu1 %v3709_v13  ;;  %v2985_v37 = vld [vmem:[%s5854_s10 + $0x18] sm:$0xff]  ;;  %v3002_v13 = vld [vmem:[%s5854_s10 + $0xa0] sm:$0xff]  ;;  %v2995_v29 = vld [vmem:[%s5854_s10 + $0x68] sm:$0xff] }
 0x30d   : > { %v3749_v40 = vpack.c.bf16 %v2985_v37, %v2984_v51  ;;  %v3769_v33 = vpack.c.bf16 %v2995_v29, %v2994_v49  ;;  %v3013_v14 = vld [vmem:[%s5854_s10 + $0xf8] sm:$0xff] }
 0x30e   : > { %3686 = vmatpush3.bf16.msra.mxu0 %v3685_v20  ;;  %3712 = vmatprep.subr.bf16.mxu1 %v3711_v17  ;;  %v3003_v20 = vld [vmem:[%s5854_s10 + $0xa8] sm:$0xff]  ;;  %v3779_v17 = vpack.c.bf16 %v3017_v9, %v3016_v62  ;;  %v2827_v9 = vsub.s32 2, %v4645_v50 }
 0x30f   : > { %3719 = vmatprep.subr.bf16.mxu0 %v4271_v18  ;;  %v3751_v16 = vpack.c.bf16 %v3003_v20, %v3002_v13 }
 0x310   : > { %3714 = vmatpush1.bf16.msra.mxu1 %v3713_v47  ;;  %v2986_v47 = vld [vmem:[%s5854_s10 + $0x20] sm:$0xff] }
 0x311   : > { %3716 = vmatprep.subr.bf16.mxu1 %v3715_v0  ;;  %v3024_v0 = vld [vmem:[%s5854_s10 + $0x150] sm:$0xff] }
 0x312   : > { %v2670_v60 = vld [vmem:[#allocation2] sm:$0x3]  ;;  %v3791_v35 = vpack.c.bf16 %v3025_v10, %v3024_v0 }
 0x313   : > { %3591 = vmatmul.mubr.f32.vlgmr.msra.gmra.mrb[0].mxu0 %v2670_v60  ;;  %v2987_v60 = vld [vmem:[%s5854_s10 + $0x28] sm:$0xff] }
 0x314   : > { %3721 = vmatpush3.bf16.msra.mxu0 %v3720_v44  ;;  %3625 = vmatprep.mubr.msk.f32.mxu0 %vm4272_vm2, %v4273_v43  ;;  %v3004_v44 = vld [vmem:[%s5854_s10 + $0xb0] sm:$0xff] }
 0x315   : > { %3722 = vmatprep.subr.bf16.mxu0 %v4271_v18  ;;  %3718 = vmatpush1.bf16.msra.mxu1 %v3717_v54  ;;  %v2993_v54 = vld [vmem:[%s5854_s10 + $0x58] sm:$0xff] }
 0x316   : > { %3744 = vmatprep.subr.bf16.mxu1 %v3743_v26  ;;  %v3794_v26 = vpack.c.bf16 %v3027_v23, %v3026_v46 }
 0x318   : > { %3724 = vmatpush3.bf16.msra.mxu0 %v3723_v27  ;;  %v3753_v27 = vpack.c.bf16 %v2987_v60, %v2986_v47 }
 0x319   : > { %3725 = vmatprep.subr.bf16.mxu0 %v4271_v18 }
 0x31c   : > { %3727 = vmatpush3.bf16.msra.mxu0 %v3726_v57  ;;  %v3755_v57 = vpack.c.bf16 %v3005_v22, %v3004_v44 }
 0x31d   : > { %3728 = vmatprep.subr.bf16.mxu0 %v4271_v18 }
 0x320   : > { %3730 = vmatpush3.bf16.msra.mxu0 %v3729_v3  ;;  %v3007_v3 = vld [vmem:[%s5854_s10 + $0xc8] sm:$0xff] }
 0x321   : > { %3731 = vmatprep.subr.bf16.mxu0 %v4271_v18  ;;  %v3759_v38 = vpack.c.bf16 %v3007_v3, %v3006_v32 }
 0x324   : > { %3733 = vmatpush3.bf16.msra.mxu0 %v3732_v1  ;;  %v3022_v1 = vld [vmem:[%s5854_s10 + $0x140] sm:$0xff] }
 0x325   : > { %3734 = vmatprep.subr.bf16.mxu0 %v4271_v18  ;;  %v3788_v19 = vpack.c.bf16 %v3023_v56, %v3022_v1 }
 0x328   : > { %3736 = vmatpush3.bf16.msra.mxu0 %v3735_v53  ;;  %v2990_v53 = vld [vmem:[%s5854_s10 + $0x40] sm:$0xff] }
 0x329   : > { %3737 = vmatprep.subr.bf16.mxu0 %v4271_v18  ;;  %v3761_v8 = vpack.c.bf16 %v2991_v58, %v2990_v53 }
 0x32c   : > { %3739 = vmatpush3.bf16.msra.mxu0 %v3738_v59  ;;  %v3009_v59 = vld [vmem:[%s5854_s10 + $0xd8] sm:$0xff] }
 0x32d   : > { %3740 = vmatprep.subr.bf16.mxu0 %v4271_v18  ;;  %v3763_v11 = vpack.c.bf16 %v3009_v59, %v3008_v52 }
 0x330   : > { %3742 = vmatpush3.bf16.msra.mxu0 %v3741_v41  ;;  %v3765_v41 = vpack.c.bf16 %v2993_v54, %v2992_v30 }
 0x331   : > { %3775 = vmatprep.subr.bf16.mxu0 %v4271_v18 }
 0x3e6   : > { %v2760_v7 = vpop.f32.mrb[0].mxu0 }
 0x3e7   : > { %v2761_v5 = vadd.f32 %v3424_v36, %v2760_v7  ;;  %v3592_v25 = vpop.f32.mrb[1].mxu0  ;;  %v3010_v36 = vld [vmem:[%s5854_s10 + $0xe0] sm:$0xff] }
 0x3e8   : > { %v3767_v7 = vpack.c.bf16 %v3011_v34, %v3010_v36 }
 0x3e9   : > { %v2765_v45 = vmul.f32 0.05, %v2761_v5  ;;  %vm2764_vm3 = vcmp.ge.f32.partialorder %v2761_v5, 0.0 }
 0x3eb   : > { %v2766_v63 = vsel %vm2764_vm3, %v2761_v5, %v2765_v45  ;;  %v3029_v5 = vld [vmem:[%s5854_s10 + $0x178] sm:$0xff]  ;;  %v3771_v45 = vpack.c.bf16 %v3013_v14, %v3012_v2 }
 0x3ec   : > { %2897 = vmatmul.mubr.f32.vlgmr.msra.gmra.mrb[0].mxu1 %v2766_v63  ;;  %3626 = vmatmul.mubr.f32.vlgmr.msra.gmra.mrb[2].mxu0 %v2766_v63 }
 0x3ed   : > { %3777 = vmatpush3.bf16.msra.mxu0 %v3776_v39  ;;  %3746 = vmatpush3.bf16.msra.mxu1 %v3745_v24  ;;  %v2996_v39 = vld [vmem:[%s5854_s10 + $0x70] sm:$0xff]  ;;  %v2997_v24 = vld [vmem:[%s5854_s10 + $0x78] sm:$0xff] }
 0x3ee   : > { %3778 = vmatprep.subr.bf16.mxu0 %v4271_v18  ;;  %3748 = vmatprep.subr.bf16.mxu1 %v3747_v4  ;;  %v3773_v62 = vpack.c.bf16 %v2997_v24, %v2996_v39  ;;  %v2815_v4 = vld [vmem:[%s5853_s9] sm:$0x7] }
 0x3ef   : > { %3660 = vmatprep.mubr.msk.f32.mxu0 %vm4272_vm2, %v4273_v43  ;;  %v2988_v43 = vld [vmem:[%s5854_s10 + $0x30] sm:$0xff]  ;;  %v2820_v51 = vrot.slane %v2815_v4, %v1873_v55  ;;  %v2828_v37 = vrot.slane %v2815_v4, %v2827_v9  ;;  %v2824_v63 = vrot.slane %v2815_v4, %v1877_v21 }
 0x3f0   : > { %v3757_v61 = vpack.c.bf16 %v2989_v31, %v2988_v43 }
 0x3f1   : > { %3780 = vmatpush3.bf16.msra.mxu0 %v3779_v17  ;;  %3750 = vmatpush3.bf16.msra.mxu1 %v3749_v40 }
 0x3f2   : > { %3781 = vmatprep.subr.bf16.mxu0 %v4271_v18  ;;  %3752 = vmatprep.subr.bf16.mxu1 %v3751_v16 }
 0x3f5   : > { %3783 = vmatpush3.bf16.msra.mxu0 %v3782_v6  ;;  %3754 = vmatpush3.bf16.msra.mxu1 %v3753_v27 }
 0x3f6   : > { %3784 = vmatprep.subr.bf16.mxu0 %v4271_v18  ;;  %3756 = vmatprep.subr.bf16.mxu1 %v3755_v57 }
 0x3f9   : > { %3786 = vmatpush3.bf16.msra.mxu0 %v3785_v28  ;;  %3758 = vmatpush3.bf16.msra.mxu1 %v3757_v61 }
 0x3fa   : > { %3787 = vmatprep.subr.bf16.mxu0 %v4271_v18  ;;  %3760 = vmatprep.subr.bf16.mxu1 %v3759_v38 }
 0x3fd   : > { %3789 = vmatpush3.bf16.msra.mxu0 %v3788_v19  ;;  %3762 = vmatpush3.bf16.msra.mxu1 %v3761_v8 }
 0x3fe   : > { %3790 = vmatprep.subr.bf16.mxu0 %v4271_v18  ;;  %3764 = vmatprep.subr.bf16.mxu1 %v3763_v11 }
 0x401   : > { %3792 = vmatpush3.bf16.msra.mxu0 %v3791_v35  ;;  %3766 = vmatpush3.bf16.msra.mxu1 %v3765_v41 }
 0x402   : > { %3793 = vmatprep.subr.bf16.mxu0 %v4271_v18  ;;  %3768 = vmatprep.subr.bf16.mxu1 %v3767_v7 }
 0x405   : > { %3795 = vmatpush3.bf16.msra.mxu0 %v3794_v26  ;;  %3770 = vmatpush3.bf16.msra.mxu1 %v3769_v33 }
 0x406   : > { %3796 = vmatprep.subr.bf16.mxu0 %v4271_v18  ;;  %v3028_v18 = vld [vmem:[%s5854_s10 + $0x170] sm:$0xff]  ;;  %3772 = vmatprep.subr.bf16.mxu1 %v3771_v45 }
 0x407   : > { %v3797_v25 = vpack.c.bf16 %v3029_v5, %v3028_v18 }
 0x409   : > { %3798 = vmatpush3.bf16.msra.mxu0 %v3797_v25  ;;  %3774 = vmatpush3.bf16.msra.mxu1 %v3773_v62 }
 0x4bf   : > { %v2898_v13 = vpop.f32.mrb[0].mxu1  ;;  %v2969_v20 = vpop.f32.mrb[2].mxu0 }
 0x4c0   : > { %v2899_v17 = vadd.f32 %v2898_v13, %v2820_v51  ;;  %v2970_v40 = vadd.f32 %v2969_v20, %v2828_v37  ;;  %v2900_v42 = vpop.f32.mrb[1].mxu1  ;;  %v3627_v12 = vpop.f32.mrb[3].mxu0 }
 0x4c1   : > { %v2901_v16 = vadd.f32 %v2900_v42, %v2824_v63 }
 0x4c2   : > { %v2976_v47 = vmul.f32 0.05, %v2899_v17  ;;  %vm2975_vm4 = vcmp.ge.f32.partialorder %v2970_v40, 0.0  ;;  %v2978_v60 = vmul.f32 0.05, %v2970_v40  ;;  %vm2973_vm5 = vcmp.ge.f32.partialorder %v2899_v17, 0.0 }
 0x4c3   : > { %v2977_v44 = vmul.f32 0.05, %v2901_v16  ;;  %vm2974_vm6 = vcmp.ge.f32.partialorder %v2901_v16, 0.0 }
 0x4c4   : > { %v2981_v22 = vsel %vm2975_vm4, %v2970_v40, %v2978_v60  ;;  %v2979_v6 = vsel %vm2973_vm5, %v2899_v17, %v2976_v47 }
 0x4c5   : > { %3661 = vmatmul.mubr.f32.vlgmr.msra.gmra.mrb[4].mxu0 %v2981_v22  ;;  %v2980_v55 = vsel %vm2974_vm6, %v2901_v16, %v2977_v44 }
 0x4c6   : > { %3101 = vmatprep.mubr.f32.mxu1 %v2980_v55 }
 0x4c7   : > { %3102 = vmatmul.mubr.f32.vlgmr.msra.gmra.mrb[2].mxu1 %v2979_v6 }
 0x598   : > { %v3173_v50 = vpop.f32.mrb[4].mxu0 }
 0x599   : > { %v3662_v21 = vpop.f32.mrb[5].mxu0 }
 0x59a   : > { %v3538_v27 = vpop.f32.mrb[2].mxu1 }
 0x59b   : > { %v3539_v15 = vpop.f32.mrb[3].mxu1 }
 0x59c   : > { %v3540_v57 = vadd.f32 %v3539_v15, %v3538_v27 }
 0x59e   : > { %v3104_v43 = vadd.f32 %v3540_v57, %v3425_v48 }
 0x5a0   : > { %v3174_v31 = vadd.f32 %v3173_v50, %v3104_v43 }
 0x5a2   : > { %v3177_v32 = vsub.f32 0.0, %v3174_v31 }
 0x5a4   : > { %v3178_v3 = vmul.f32 1.442695, %v3177_v32 }
 0x5a6   : > { %4255 = vpow2.f32 %v3178_v3 }
 0x5b0   : > { %v4256_v28 = vpop.eup %4255 }
 0x5b1   : > { %v3180_v61 = vadd.f32 1.0, %v4256_v28 }
 0x5b3   : > { %4257 = vrcp.f32 %v3180_v61 }
 0x5bd   : > { %v4258_v1 = vpop.eup %4257 }
 0x5be   : > { %3184 = vst.msk [vmem:[%s5856_s12] sm:$0x3] %vm3183_vm7, %v4258_v1 }
 0x5bf PF: > { %s24_s23 = sadd.s32 1, %s4265_s23  }
 0x5c0   : > { %p21_p7 = scmp.ge.s32.totalorder %s24_s23, 4  }
 0x5c2   :  { %23 = sbr.rel (!%p21_p7) target bundleno = 3 (0x3), region = 108 }

</bundles_post_ra>
